<compile_context>
chip_gen: v7x
topology: tpu7x:2x2x1
jax: 0.10.0
libtpu: 0.0.40
codegen_flags: <defaults>
</compile_context>

<pallas_src>
import jax
import jax.numpy as jnp
import numpy as np
from jax.experimental import pallas as pl
from jax.experimental.pallas import tpu as pltpu

LEAK = 0.2  # nn.LeakyReLU(negative_slope=0.2)


def _lrelu(x):
    return jnp.where(x >= 0, x, LEAK * x)


def _avg_pool_2x2(v):
    """2x2 average pool of an NHWC value via layout-friendly reshapes + adds."""
    B, H, W, C = v.shape
    v = v.reshape(B * (H // 2), 2, W, C).sum(axis=1)        # pool rows (leading split)
    v = v.reshape(B * (H // 2), W // 2, 2, C).sum(axis=2)   # pool cols (sublane split)
    return v.reshape(B, H // 2, W // 2, C) * 0.25


def residual_block_dis_kernel(x_ref, w1_ref, w2_ref, w3_ref, o_ref,
                              xpad, ypad, imc1, imc2):
    """One batch block per grid step.

    x_ref : (Bb, H, W, Cin)          bf16 input block (NHWC)
    w1_ref: (9*Cin, Cout)            bf16 conv1 3x3 weights, row (kh*3+kw)*Cin+ci
    w2_ref: (9*Cout, Cout)           bf16 conv2 3x3 weights
    w3_ref: (Cin, Cout)              bf16 conv3 1x1 weights
    o_ref : (Bb, H/2, W/2, Cout)     f32 output block
    xpad  : VMEM (Bb, H+2, W+2, Cin)  f32 zero-padded activations
    ypad  : VMEM (Bb, H+2, W+2, Cout) f32 zero-padded activations
    imc1  : VMEM (Bb*H*W, 9*Cin)      f32 im2col buffer for conv1
    imc2  : VMEM (Bb*H*W, 9*Cout)     f32 im2col buffer for conv2
    """
    Bb, H, W, Cin = x_ref.shape
    Cout = w3_ref.shape[1]
    H2, W2 = H // 2, W // 2

    # Zero only the 1-pixel border of the padded scratches; the interior is
    # fully overwritten every step.  Per-step (cheap) so it is correct even
    # when the "parallel" batch axis is split across TensorCores, each of
    # which gets a private scratch copy.
    xpad[:, 0:1, :, :] = jnp.zeros((Bb, 1, W + 2, Cin), jnp.float32)
    xpad[:, H + 1:H + 2, :, :] = jnp.zeros((Bb, 1, W + 2, Cin), jnp.float32)
    xpad[:, :, 0:1, :] = jnp.zeros((Bb, H + 2, 1, Cin), jnp.float32)
    xpad[:, :, W + 1:W + 2, :] = jnp.zeros((Bb, H + 2, 1, Cin), jnp.float32)
    ypad[:, 0:1, :, :] = jnp.zeros((Bb, 1, W + 2, Cout), jnp.float32)
    ypad[:, H + 1:H + 2, :, :] = jnp.zeros((Bb, 1, W + 2, Cout), jnp.float32)
    ypad[:, :, 0:1, :] = jnp.zeros((Bb, H + 2, 1, Cout), jnp.float32)
    ypad[:, :, W + 1:W + 2, :] = jnp.zeros((Bb, H + 2, 1, Cout), jnp.float32)

    x = x_ref[...].astype(jnp.float32)                      # (Bb, H, W, Cin)

    # ---- residual branch: pool FIRST (avg-pool commutes with a 1x1 conv),
    #      then one small MXU matmul on the pooled activations.
    xp = _avg_pool_2x2(x)                                   # (Bb, H2, W2, Cin)
    res = jnp.dot(xp.reshape(Bb * H2 * W2, Cin).astype(jnp.bfloat16),
                  w3_ref[...], preferred_element_type=jnp.float32)
    res = res.reshape(Bb, H2, W2, Cout)

    # ---- main branch
    xpad[:, 1:H + 1, 1:W + 1, :] = _lrelu(x)

    # conv1 (3x3, SAME) as ONE im2col matmul: (Bb*H*W, 9*Cin) @ (9*Cin, Cout)
    for kh in range(3):
        for kw in range(3):
            k = kh * 3 + kw
            imc1[:, k * Cin:(k + 1) * Cin] = (
                xpad[:, kh:kh + H, kw:kw + W, :].reshape(Bb * H * W, Cin))
    acc1 = jnp.dot(imc1[...].astype(jnp.bfloat16), w1_ref[...],
                   preferred_element_type=jnp.float32)       # (Bb*H*W, Cout)

    ypad[:, 1:H + 1, 1:W + 1, :] = _lrelu(acc1).reshape(Bb, H, W, Cout)

    # conv2 (3x3, SAME) as ONE im2col matmul: (Bb*H*W, 9*Cout) @ (9*Cout, Cout)
    for kh in range(3):
        for kw in range(3):
            k = kh * 3 + kw
            imc2[:, k * Cout:(k + 1) * Cout] = (
                ypad[:, kh:kh + H, kw:kw + W, :].reshape(Bb * H * W, Cout))
    acc2 = jnp.dot(imc2[...].astype(jnp.bfloat16), w2_ref[...],
                   preferred_element_type=jnp.float32)       # (Bb*H*W, Cout)

    out = _avg_pool_2x2(acc2.reshape(Bb, H, W, Cout))        # (Bb, H2, W2, Cout)
    o_ref[...] = (out + res).astype(o_ref.dtype)


def _pick_block_b(B, H, W, Cin, Cout, budget_bytes=8 << 20):
    """Largest batch block fitting a modest VMEM budget; keep >=2 grid steps
    when B >= 2 so the 'parallel' batch axis can be split across TensorCores
    (v7x megacore)."""
    per_image = (H * W * Cin * 2                                # bf16 input block
                 + (H + 2) * (W + 2) * (Cin + Cout) * 4          # padded scratches
                 + H * W * 9 * (Cin + Cout) * 4                  # im2col scratches
                 + (H // 2) * (W // 2) * Cout * 4)               # output block
    divisors = [d for d in range(1, B + 1) if B % d == 0]
    fitting = [d for d in divisors if 2 * d * per_image <= budget_bytes]
    bb = max(fitting) if fitting else 1
    while B // bb < 2 and bb > 1:
        bb = max(d for d in divisors if d < bb)
    return bb


def residual_block_dis(x_nchw, w1_hwio, w2_hwio, w3_hwio, *, block_b=None):
    """Wrapper: NCHW in, NCHW out (spatially halved by the 2x2 avg-pool)."""
    B, Cin, H, W = x_nchw.shape
    Cout = w1_hwio.shape[-1]
    assert H % 2 == 0 and W % 2 == 0, "2x2 avg-pool requires even H, W"
    H2, W2 = H // 2, W // 2

    if block_b is None:
        block_b = _pick_block_b(B, H, W, Cin, Cout)
    assert B % block_b == 0

    # bf16 at the HBM boundary (halves HBM->VMEM traffic, native MXU path);
    # all elementwise math / accumulation stay f32 inside the kernel.
    x = jnp.transpose(x_nchw, (0, 2, 3, 1)).astype(jnp.bfloat16)        # NHWC
    w1 = w1_hwio.reshape(9 * Cin, Cout).astype(jnp.bfloat16)
    w2 = w2_hwio.reshape(9 * Cout, Cout).astype(jnp.bfloat16)
    w3 = w3_hwio.reshape(Cin, Cout).astype(jnp.bfloat16)

    out = pl.pallas_call(
        residual_block_dis_kernel,
        out_shape=jax.ShapeDtypeStruct((B, H2, W2, Cout), jnp.float32),
        grid_spec=pltpu.PrefetchScalarGridSpec(
            num_scalar_prefetch=0,
            grid=(B // block_b,),
            in_specs=[
                pl.BlockSpec((block_b, H, W, Cin), lambda b: (b, 0, 0, 0)),
                pl.BlockSpec((9 * Cin, Cout), lambda b: (0, 0)),
                pl.BlockSpec((9 * Cout, Cout), lambda b: (0, 0)),
                pl.BlockSpec((Cin, Cout), lambda b: (0, 0)),
            ],
            out_specs=pl.BlockSpec((block_b, H2, W2, Cout),
                                   lambda b: (b, 0, 0, 0)),
            scratch_shapes=[
                pltpu.VMEM((block_b, H + 2, W + 2, Cin), jnp.float32),
                pltpu.VMEM((block_b, H + 2, W + 2, Cout), jnp.float32),
                pltpu.VMEM((block_b * H * W, 9 * Cin), jnp.float32),
                pltpu.VMEM((block_b * H * W, 9 * Cout), jnp.float32),
            ],
        ),
        compiler_params=pltpu.CompilerParams(
            dimension_semantics=("parallel",)),     # batch blocks independent
    )(x, w1, w2, w3)

    return jnp.transpose(out, (0, 3, 1, 2))                             # NCHW


def _xavier_normal(key, shape_hwio):
    kh, kw, cin, cout = shape_hwio
    std = float(np.sqrt(2.0 / (cin * kh * kw + cout * kh * kw)))
    return jax.random.normal(key, shape_hwio, jnp.float32) * std


def _reference(x_nchw, w1, w2, w3):
    """Plain-JAX f32 reference of the PyTorch forward (NCHW in/out)."""
    x = jnp.transpose(x_nchw, (0, 2, 3, 1))

    def conv(v, w, pad):
        return jax.lax.conv_general_dilated(
            v, w, (1, 1), pad, dimension_numbers=("NHWC", "HWIO", "NHWC"))

    def pool(v):
        B, H, W, C = v.shape
        return v.reshape(B, H // 2, 2, W // 2, 2, C).mean(axis=(2, 4))

    res = pool(conv(x, w3, "VALID"))
    o = _lrelu(x)
    o = conv(o, w1, "SAME")
    o = _lrelu(o)
    o = pool(conv(o, w2, "SAME"))
    return jnp.transpose(o + res, (0, 3, 1, 2))


if __name__ == "__main__":
    B, Cin, Cout, H, W = 2, 4, 8, 16, 16

    key = jax.random.PRNGKey(0)
    kx, k1, k2, k3 = jax.random.split(key, 4)
    x = jax.random.normal(kx, (B, Cin, H, W), jnp.float32)
    w1 = _xavier_normal(k1, (3, 3, Cin, Cout))   # conv1: 3x3, in->out
    w2 = _xavier_normal(k2, (3, 3, Cout, Cout))  # conv2: 3x3, out->out
    w3 = _xavier_normal(k3, (1, 1, Cin, Cout))   # conv3: 1x1, in->out

    out = residual_block_dis(x, w1, w2, w3)
    out = jax.block_until_ready(out)
    assert out.shape == (B, Cout, H // 2, W // 2)

    ref = _reference(x, w1, w2, w3)
    # Kernel feeds bf16 operands to the MXU (f32 accumulation); loosen
    # tolerance accordingly vs. the pure-f32 reference.
    np.testing.assert_allclose(np.asarray(out), np.asarray(ref),
                               rtol=5e-2, atol=5e-2)
    print("KERNEL_OK")
</pallas_src>

<mosaic_0001>
module attributes {stable_mosaic.version = 11 : i64} {
  func.func @residual_block_dis_kernel(%arg0: i32, %arg1: memref<1x16x16x4xbf16, #tpu.memory_space<vmem>>, %arg2: memref<36x8xbf16, #tpu.memory_space<vmem>>, %arg3: memref<72x8xbf16, #tpu.memory_space<vmem>>, %arg4: memref<4x8xbf16, #tpu.memory_space<vmem>>, %arg5: memref<1x8x8x8xf32, #tpu.memory_space<vmem>>, %arg6: memref<1x18x18x4xf32, #tpu.memory_space<vmem>>, %arg7: memref<1x18x18x8xf32, #tpu.memory_space<vmem>>, %arg8: memref<256x36xf32, #tpu.memory_space<vmem>>, %arg9: memref<256x72xf32, #tpu.memory_space<vmem>>) attributes {dimension_semantics = [#tpu.dimension_semantics<parallel>], iteration_bounds = array<i64: 2>, scalar_prefetch = 0 : i64, scratch_operands = 4 : i64, tpu.core_type = #tpu.core_type<tc>, window_params = [{transform_indices = @transform_0, window_bounds = array<i64: 1, 16, 16, 4>}, {pipeline_mode = #tpu.pipeline_mode<synchronous>, transform_indices = @transform_1, window_bounds = array<i64: 36, 8>}, {pipeline_mode = #tpu.pipeline_mode<synchronous>, transform_indices = @transform_2, window_bounds = array<i64: 72, 8>}, {pipeline_mode = #tpu.pipeline_mode<synchronous>, transform_indices = @transform_3, window_bounds = array<i64: 4, 8>}, {transform_indices = @transform_4, window_bounds = array<i64: 1, 8, 8, 8>}]} {
    %cst = arith.constant 0.000000e+00 : f32
    %0 = vector.broadcast %cst : f32 to vector<1x1x18x4xf32>
    %c0 = arith.constant 0 : index
    %c0_0 = arith.constant 0 : index
    %c0_1 = arith.constant 0 : index
    %c0_2 = arith.constant 0 : index
    %1 = vector.load %arg6[%c0, %c0_0, %c0_1, %c0_2] : memref<1x18x18x4xf32, #tpu.memory_space<vmem>>, vector<1x1x18x4xf32>
    tpu.vector_store %arg6[%c0, %c0_0, %c0_1, %c0_2], %0 {strides = array<i32>} : memref<1x18x18x4xf32, #tpu.memory_space<vmem>>, vector<1x1x18x4xf32>,
    %cst_3 = arith.constant 0.000000e+00 : f32
    %2 = vector.broadcast %cst_3 : f32 to vector<1x1x18x4xf32>
    %c0_4 = arith.constant 0 : index
    %c17 = arith.constant 17 : index
    %c0_5 = arith.constant 0 : index
    %c0_6 = arith.constant 0 : index
    %3 = vector.load %arg6[%c0_4, %c17, %c0_5, %c0_6] : memref<1x18x18x4xf32, #tpu.memory_space<vmem>>, vector<1x1x18x4xf32>
    tpu.vector_store %arg6[%c0_4, %c17, %c0_5, %c0_6], %2 {strides = array<i32>} : memref<1x18x18x4xf32, #tpu.memory_space<vmem>>, vector<1x1x18x4xf32>,
    %cst_7 = arith.constant 0.000000e+00 : f32
    %4 = vector.broadcast %cst_7 : f32 to vector<1x18x1x4xf32>
    %c0_8 = arith.constant 0 : index
    %c0_9 = arith.constant 0 : index
    %c0_10 = arith.constant 0 : index
    %c0_11 = arith.constant 0 : index
    %5 = vector.load %arg6[%c0_8, %c0_9, %c0_10, %c0_11] : memref<1x18x18x4xf32, #tpu.memory_space<vmem>>, vector<1x18x1x4xf32>
    tpu.vector_store %arg6[%c0_8, %c0_9, %c0_10, %c0_11], %4 {strides = array<i32>} : memref<1x18x18x4xf32, #tpu.memory_space<vmem>>, vector<1x18x1x4xf32>,
    %cst_12 = arith.constant 0.000000e+00 : f32
    %6 = vector.broadcast %cst_12 : f32 to vector<1x18x1x4xf32>
    %c0_13 = arith.constant 0 : index
    %c0_14 = arith.constant 0 : index
    %c17_15 = arith.constant 17 : index
    %c0_16 = arith.constant 0 : index
    %7 = vector.load %arg6[%c0_13, %c0_14, %c17_15, %c0_16] : memref<1x18x18x4xf32, #tpu.memory_space<vmem>>, vector<1x18x1x4xf32>
    tpu.vector_store %arg6[%c0_13, %c0_14, %c17_15, %c0_16], %6 {strides = array<i32>} : memref<1x18x18x4xf32, #tpu.memory_space<vmem>>, vector<1x18x1x4xf32>,
    %cst_17 = arith.constant 0.000000e+00 : f32
    %8 = vector.broadcast %cst_17 : f32 to vector<1x1x18x8xf32>
    %c0_18 = arith.constant 0 : index
    %c0_19 = arith.constant 0 : index
    %c0_20 = arith.constant 0 : index
    %c0_21 = arith.constant 0 : index
    %9 = vector.load %arg7[%c0_18, %c0_19, %c0_20, %c0_21] : memref<1x18x18x8xf32, #tpu.memory_space<vmem>>, vector<1x1x18x8xf32>
    tpu.vector_store %arg7[%c0_18, %c0_19, %c0_20, %c0_21], %8 {strides = array<i32>} : memref<1x18x18x8xf32, #tpu.memory_space<vmem>>, vector<1x1x18x8xf32>,
    %cst_22 = arith.constant 0.000000e+00 : f32
    %10 = vector.broadcast %cst_22 : f32 to vector<1x1x18x8xf32>
    %c0_23 = arith.constant 0 : index
    %c17_24 = arith.constant 17 : index
    %c0_25 = arith.constant 0 : index
    %c0_26 = arith.constant 0 : index
    %11 = vector.load %arg7[%c0_23, %c17_24, %c0_25, %c0_26] : memref<1x18x18x8xf32, #tpu.memory_space<vmem>>, vector<1x1x18x8xf32>
    tpu.vector_store %arg7[%c0_23, %c17_24, %c0_25, %c0_26], %10 {strides = array<i32>} : memref<1x18x18x8xf32, #tpu.memory_space<vmem>>, vector<1x1x18x8xf32>,
    %cst_27 = arith.constant 0.000000e+00 : f32
    %12 = vector.broadcast %cst_27 : f32 to vector<1x18x1x8xf32>
    %c0_28 = arith.constant 0 : index
    %c0_29 = arith.constant 0 : index
    %c0_30 = arith.constant 0 : index
    %c0_31 = arith.constant 0 : index
    %13 = vector.load %arg7[%c0_28, %c0_29, %c0_30, %c0_31] : memref<1x18x18x8xf32, #tpu.memory_space<vmem>>, vector<1x18x1x8xf32>
    tpu.vector_store %arg7[%c0_28, %c0_29, %c0_30, %c0_31], %12 {strides = array<i32>} : memref<1x18x18x8xf32, #tpu.memory_space<vmem>>, vector<1x18x1x8xf32>,
    %cst_32 = arith.constant 0.000000e+00 : f32
    %14 = vector.broadcast %cst_32 : f32 to vector<1x18x1x8xf32>
    %c0_33 = arith.constant 0 : index
    %c0_34 = arith.constant 0 : index
    %c17_35 = arith.constant 17 : index
    %c0_36 = arith.constant 0 : index
    %15 = vector.load %arg7[%c0_33, %c0_34, %c17_35, %c0_36] : memref<1x18x18x8xf32, #tpu.memory_space<vmem>>, vector<1x18x1x8xf32>
    tpu.vector_store %arg7[%c0_33, %c0_34, %c17_35, %c0_36], %14 {strides = array<i32>} : memref<1x18x18x8xf32, #tpu.memory_space<vmem>>, vector<1x18x1x8xf32>,
    %c0_37 = arith.constant 0 : index
    %c0_38 = arith.constant 0 : index
    %c0_39 = arith.constant 0 : index
    %c0_40 = arith.constant 0 : index
    %16 = vector.load %arg1[%c0_37, %c0_38, %c0_39, %c0_40] : memref<1x16x16x4xbf16, #tpu.memory_space<vmem>>, vector<1x16x16x4xbf16>
    %17 = arith.extf %16 : vector<1x16x16x4xbf16> to vector<1x16x16x4xf32>
    %18 = vector.shape_cast %17 : vector<1x16x16x4xf32> to vector<8x2x16x4xf32>
    %cst_41 = arith.constant dense<0.000000e+00> : vector<8x16x4xf32>
    %19 = vector.multi_reduction <add>, %18, %cst_41 [1] : vector<8x2x16x4xf32> to vector<8x16x4xf32>
    %20 = vector.shape_cast %19 : vector<8x16x4xf32> to vector<8x8x2x4xf32>
    %cst_42 = arith.constant dense<0.000000e+00> : vector<8x8x4xf32>
    %21 = vector.multi_reduction <add>, %20, %cst_42 [2] : vector<8x8x2x4xf32> to vector<8x8x4xf32>
    %22 = vector.shape_cast %21 : vector<8x8x4xf32> to vector<1x8x8x4xf32>
    %cst_43 = arith.constant 2.500000e-01 : f32
    %23 = vector.broadcast %cst_43 : f32 to vector<1x8x8x4xf32>
    %24 = arith.mulf %22, %23 : vector<1x8x8x4xf32>
    %25 = vector.shape_cast %24 : vector<1x8x8x4xf32> to vector<64x4xf32>
    %26 = arith.truncf %25 : vector<64x4xf32> to vector<64x4xbf16>
    %c0_44 = arith.constant 0 : index
    %c0_45 = arith.constant 0 : index
    %27 = vector.load %arg4[%c0_44, %c0_45] : memref<4x8xbf16, #tpu.memory_space<vmem>>, vector<4x8xbf16>
    %cst_46 = arith.constant dense<0.000000e+00> : vector<64x8xf32>
    %28 = tpu.matmul %26, %27, %cst_46 {dimension_numbers = #tpu.dot_dimension_numbers<[1], [0], [0], [1], [0, 0, 1, 1], [], []>} : vector<64x4xbf16>, vector<4x8xbf16>, vector<64x8xf32> -> vector<64x8xf32>
    %29 = vector.shape_cast %28 : vector<64x8xf32> to vector<1x8x8x8xf32>
    %cst_47 = arith.constant 0.000000e+00 : f32
    %30 = vector.broadcast %cst_47 : f32 to vector<1x16x16x4xf32>
    %31 = arith.cmpf oge, %17, %30 : vector<1x16x16x4xf32>
    %cst_48 = arith.constant 2.000000e-01 : f32
    %32 = vector.broadcast %cst_48 : f32 to vector<1x16x16x4xf32>
    %33 = arith.mulf %32, %17 : vector<1x16x16x4xf32>
    %34 = arith.select %31, %17, %33 : vector<1x16x16x4xi1>, vector<1x16x16x4xf32>
    %c0_49 = arith.constant 0 : index
    %c1 = arith.constant 1 : index
    %c1_50 = arith.constant 1 : index
    %c0_51 = arith.constant 0 : index
    %35 = vector.load %arg6[%c0_49, %c1, %c1_50, %c0_51] : memref<1x18x18x4xf32, #tpu.memory_space<vmem>>, vector<1x16x16x4xf32>
    tpu.vector_store %arg6[%c0_49, %c1, %c1_50, %c0_51], %34 {strides = array<i32>} : memref<1x18x18x4xf32, #tpu.memory_space<vmem>>, vector<1x16x16x4xf32>,
    %c0_52 = arith.constant 0 : index
    %c0_53 = arith.constant 0 : index
    %c0_54 = arith.constant 0 : index
    %c0_55 = arith.constant 0 : index
    %36 = vector.load %arg6[%c0_52, %c0_53, %c0_54, %c0_55] : memref<1x18x18x4xf32, #tpu.memory_space<vmem>>, vector<1x16x16x4xf32>
    %37 = vector.shape_cast %36 : vector<1x16x16x4xf32> to vector<256x4xf32>
    %c0_56 = arith.constant 0 : index
    %c0_57 = arith.constant 0 : index
    %38 = vector.load %arg8[%c0_56, %c0_57] : memref<256x36xf32, #tpu.memory_space<vmem>>, vector<256x4xf32>
    tpu.vector_store %arg8[%c0_56, %c0_57], %37 {strides = array<i32>} : memref<256x36xf32, #tpu.memory_space<vmem>>, vector<256x4xf32>,
    %c0_58 = arith.constant 0 : index
    %c0_59 = arith.constant 0 : index
    %c1_60 = arith.constant 1 : index
    %c0_61 = arith.constant 0 : index
    %39 = vector.load %arg6[%c0_58, %c0_59, %c1_60, %c0_61] : memref<1x18x18x4xf32, #tpu.memory_space<vmem>>, vector<1x16x16x4xf32>
    %40 = vector.shape_cast %39 : vector<1x16x16x4xf32> to vector<256x4xf32>
    %c0_62 = arith.constant 0 : index
    %c4 = arith.constant 4 : index
    %41 = vector.load %arg8[%c0_62, %c4] : memref<256x36xf32, #tpu.memory_space<vmem>>, vector<256x4xf32>
    tpu.vector_store %arg8[%c0_62, %c4], %40 {strides = array<i32>} : memref<256x36xf32, #tpu.memory_space<vmem>>, vector<256x4xf32>,
    %c0_63 = arith.constant 0 : index
    %c0_64 = arith.constant 0 : index
    %c2 = arith.constant 2 : index
    %c0_65 = arith.constant 0 : index
    %42 = vector.load %arg6[%c0_63, %c0_64, %c2, %c0_65] : memref<1x18x18x4xf32, #tpu.memory_space<vmem>>, vector<1x16x16x4xf32>
    %43 = vector.shape_cast %42 : vector<1x16x16x4xf32> to vector<256x4xf32>
    %c0_66 = arith.constant 0 : index
    %c8 = arith.constant 8 : index
    %44 = vector.load %arg8[%c0_66, %c8] : memref<256x36xf32, #tpu.memory_space<vmem>>, vector<256x4xf32>
    tpu.vector_store %arg8[%c0_66, %c8], %43 {strides = array<i32>} : memref<256x36xf32, #tpu.memory_space<vmem>>, vector<256x4xf32>,
    %c0_67 = arith.constant 0 : index
    %c1_68 = arith.constant 1 : index
    %c0_69 = arith.constant 0 : index
    %c0_70 = arith.constant 0 : index
    %45 = vector.load %arg6[%c0_67, %c1_68, %c0_69, %c0_70] : memref<1x18x18x4xf32, #tpu.memory_space<vmem>>, vector<1x16x16x4xf32>
    %46 = vector.shape_cast %45 : vector<1x16x16x4xf32> to vector<256x4xf32>
    %c0_71 = arith.constant 0 : index
    %c12 = arith.constant 12 : index
    %47 = vector.load %arg8[%c0_71, %c12] : memref<256x36xf32, #tpu.memory_space<vmem>>, vector<256x4xf32>
    tpu.vector_store %arg8[%c0_71, %c12], %46 {strides = array<i32>} : memref<256x36xf32, #tpu.memory_space<vmem>>, vector<256x4xf32>,
    %c0_72 = arith.constant 0 : index
    %c1_73 = arith.constant 1 : index
    %c1_74 = arith.constant 1 : index
    %c0_75 = arith.constant 0 : index
    %48 = vector.load %arg6[%c0_72, %c1_73, %c1_74, %c0_75] : memref<1x18x18x4xf32, #tpu.memory_space<vmem>>, vector<1x16x16x4xf32>
    %49 = vector.shape_cast %48 : vector<1x16x16x4xf32> to vector<256x4xf32>
    %c0_76 = arith.constant 0 : index
    %c16 = arith.constant 16 : index
    %50 = vector.load %arg8[%c0_76, %c16] : memref<256x36xf32, #tpu.memory_space<vmem>>, vector<256x4xf32>
    tpu.vector_store %arg8[%c0_76, %c16], %49 {strides = array<i32>} : memref<256x36xf32, #tpu.memory_space<vmem>>, vector<256x4xf32>,
    %c0_77 = arith.constant 0 : index
    %c1_78 = arith.constant 1 : index
    %c2_79 = arith.constant 2 : index
    %c0_80 = arith.constant 0 : index
    %51 = vector.load %arg6[%c0_77, %c1_78, %c2_79, %c0_80] : memref<1x18x18x4xf32, #tpu.memory_space<vmem>>, vector<1x16x16x4xf32>
    %52 = vector.shape_cast %51 : vector<1x16x16x4xf32> to vector<256x4xf32>
    %c0_81 = arith.constant 0 : index
    %c20 = arith.constant 20 : index
    %53 = vector.load %arg8[%c0_81, %c20] : memref<256x36xf32, #tpu.memory_space<vmem>>, vector<256x4xf32>
    tpu.vector_store %arg8[%c0_81, %c20], %52 {strides = array<i32>} : memref<256x36xf32, #tpu.memory_space<vmem>>, vector<256x4xf32>,
    %c0_82 = arith.constant 0 : index
    %c2_83 = arith.constant 2 : index
    %c0_84 = arith.constant 0 : index
    %c0_85 = arith.constant 0 : index
    %54 = vector.load %arg6[%c0_82, %c2_83, %c0_84, %c0_85] : memref<1x18x18x4xf32, #tpu.memory_space<vmem>>, vector<1x16x16x4xf32>
    %55 = vector.shape_cast %54 : vector<1x16x16x4xf32> to vector<256x4xf32>
    %c0_86 = arith.constant 0 : index
    %c24 = arith.constant 24 : index
    %56 = vector.load %arg8[%c0_86, %c24] : memref<256x36xf32, #tpu.memory_space<vmem>>, vector<256x4xf32>
    tpu.vector_store %arg8[%c0_86, %c24], %55 {strides = array<i32>} : memref<256x36xf32, #tpu.memory_space<vmem>>, vector<256x4xf32>,
    %c0_87 = arith.constant 0 : index
    %c2_88 = arith.constant 2 : index
    %c1_89 = arith.constant 1 : index
    %c0_90 = arith.constant 0 : index
    %57 = vector.load %arg6[%c0_87, %c2_88, %c1_89, %c0_90] : memref<1x18x18x4xf32, #tpu.memory_space<vmem>>, vector<1x16x16x4xf32>
    %58 = vector.shape_cast %57 : vector<1x16x16x4xf32> to vector<256x4xf32>
    %c0_91 = arith.constant 0 : index
    %c28 = arith.constant 28 : index
    %59 = vector.load %arg8[%c0_91, %c28] : memref<256x36xf32, #tpu.memory_space<vmem>>, vector<256x4xf32>
    tpu.vector_store %arg8[%c0_91, %c28], %58 {strides = array<i32>} : memref<256x36xf32, #tpu.memory_space<vmem>>, vector<256x4xf32>,
    %c0_92 = arith.constant 0 : index
    %c2_93 = arith.constant 2 : index
    %c2_94 = arith.constant 2 : index
    %c0_95 = arith.constant 0 : index
    %60 = vector.load %arg6[%c0_92, %c2_93, %c2_94, %c0_95] : memref<1x18x18x4xf32, #tpu.memory_space<vmem>>, vector<1x16x16x4xf32>
    %61 = vector.shape_cast %60 : vector<1x16x16x4xf32> to vector<256x4xf32>
    %c0_96 = arith.constant 0 : index
    %c32 = arith.constant 32 : index
    %62 = vector.load %arg8[%c0_96, %c32] : memref<256x36xf32, #tpu.memory_space<vmem>>, vector<256x4xf32>
    tpu.vector_store %arg8[%c0_96, %c32], %61 {strides = array<i32>} : memref<256x36xf32, #tpu.memory_space<vmem>>, vector<256x4xf32>,
    %c0_97 = arith.constant 0 : index
    %c0_98 = arith.constant 0 : index
    %63 = vector.load %arg8[%c0_97, %c0_98] : memref<256x36xf32, #tpu.memory_space<vmem>>, vector<256x36xf32>
    %64 = arith.truncf %63 : vector<256x36xf32> to vector<256x36xbf16>
    %c0_99 = arith.constant 0 : index
    %c0_100 = arith.constant 0 : index
    %65 = vector.load %arg2[%c0_99, %c0_100] : memref<36x8xbf16, #tpu.memory_space<vmem>>, vector<36x8xbf16>
    %cst_101 = arith.constant dense<0.000000e+00> : vector<256x8xf32>
    %66 = tpu.matmul %64, %65, %cst_101 {dimension_numbers = #tpu.dot_dimension_numbers<[1], [0], [0], [1], [0, 0, 1, 1], [], []>} : vector<256x36xbf16>, vector<36x8xbf16>, vector<256x8xf32> -> vector<256x8xf32>
    %cst_102 = arith.constant 0.000000e+00 : f32
    %67 = vector.broadcast %cst_102 : f32 to vector<256x8xf32>
    %68 = arith.cmpf oge, %66, %67 : vector<256x8xf32>
    %cst_103 = arith.constant 2.000000e-01 : f32
    %69 = vector.broadcast %cst_103 : f32 to vector<256x8xf32>
    %70 = arith.mulf %69, %66 : vector<256x8xf32>
    %71 = arith.select %68, %66, %70 : vector<256x8xi1>, vector<256x8xf32>
    %72 = vector.shape_cast %71 : vector<256x8xf32> to vector<1x16x16x8xf32>
    %c0_104 = arith.constant 0 : index
    %c1_105 = arith.constant 1 : index
    %c1_106 = arith.constant 1 : index
    %c0_107 = arith.constant 0 : index
    %73 = vector.load %arg7[%c0_104, %c1_105, %c1_106, %c0_107] : memref<1x18x18x8xf32, #tpu.memory_space<vmem>>, vector<1x16x16x8xf32>
    tpu.vector_store %arg7[%c0_104, %c1_105, %c1_106, %c0_107], %72 {strides = array<i32>} : memref<1x18x18x8xf32, #tpu.memory_space<vmem>>, vector<1x16x16x8xf32>,
    %c0_108 = arith.constant 0 : index
    %c0_109 = arith.constant 0 : index
    %c0_110 = arith.constant 0 : index
    %c0_111 = arith.constant 0 : index
    %74 = vector.load %arg7[%c0_108, %c0_109, %c0_110, %c0_111] : memref<1x18x18x8xf32, #tpu.memory_space<vmem>>, vector<1x16x16x8xf32>
    %75 = vector.shape_cast %74 : vector<1x16x16x8xf32> to vector<256x8xf32>
    %c0_112 = arith.constant 0 : index
    %c0_113 = arith.constant 0 : index
    %76 = vector.load %arg9[%c0_112, %c0_113] : memref<256x72xf32, #tpu.memory_space<vmem>>, vector<256x8xf32>
    tpu.vector_store %arg9[%c0_112, %c0_113], %75 {strides = array<i32>} : memref<256x72xf32, #tpu.memory_space<vmem>>, vector<256x8xf32>,
    %c0_114 = arith.constant 0 : index
    %c0_115 = arith.constant 0 : index
    %c1_116 = arith.constant 1 : index
    %c0_117 = arith.constant 0 : index
    %77 = vector.load %arg7[%c0_114, %c0_115, %c1_116, %c0_117] : memref<1x18x18x8xf32, #tpu.memory_space<vmem>>, vector<1x16x16x8xf32>
    %78 = vector.shape_cast %77 : vector<1x16x16x8xf32> to vector<256x8xf32>
    %c0_118 = arith.constant 0 : index
    %c8_119 = arith.constant 8 : index
    %79 = vector.load %arg9[%c0_118, %c8_119] : memref<256x72xf32, #tpu.memory_space<vmem>>, vector<256x8xf32>
    tpu.vector_store %arg9[%c0_118, %c8_119], %78 {strides = array<i32>} : memref<256x72xf32, #tpu.memory_space<vmem>>, vector<256x8xf32>,
    %c0_120 = arith.constant 0 : index
    %c0_121 = arith.constant 0 : index
    %c2_122 = arith.constant 2 : index
    %c0_123 = arith.constant 0 : index
    %80 = vector.load %arg7[%c0_120, %c0_121, %c2_122, %c0_123] : memref<1x18x18x8xf32, #tpu.memory_space<vmem>>, vector<1x16x16x8xf32>
    %81 = vector.shape_cast %80 : vector<1x16x16x8xf32> to vector<256x8xf32>
    %c0_124 = arith.constant 0 : index
    %c16_125 = arith.constant 16 : index
    %82 = vector.load %arg9[%c0_124, %c16_125] : memref<256x72xf32, #tpu.memory_space<vmem>>, vector<256x8xf32>
    tpu.vector_store %arg9[%c0_124, %c16_125], %81 {strides = array<i32>} : memref<256x72xf32, #tpu.memory_space<vmem>>, vector<256x8xf32>,
    %c0_126 = arith.constant 0 : index
    %c1_127 = arith.constant 1 : index
    %c0_128 = arith.constant 0 : index
    %c0_129 = arith.constant 0 : index
    %83 = vector.load %arg7[%c0_126, %c1_127, %c0_128, %c0_129] : memref<1x18x18x8xf32, #tpu.memory_space<vmem>>, vector<1x16x16x8xf32>
    %84 = vector.shape_cast %83 : vector<1x16x16x8xf32> to vector<256x8xf32>
    %c0_130 = arith.constant 0 : index
    %c24_131 = arith.constant 24 : index
    %85 = vector.load %arg9[%c0_130, %c24_131] : memref<256x72xf32, #tpu.memory_space<vmem>>, vector<256x8xf32>
    tpu.vector_store %arg9[%c0_130, %c24_131], %84 {strides = array<i32>} : memref<256x72xf32, #tpu.memory_space<vmem>>, vector<256x8xf32>,
    %c0_132 = arith.constant 0 : index
    %c1_133 = arith.constant 1 : index
    %c1_134 = arith.constant 1 : index
    %c0_135 = arith.constant 0 : index
    %86 = vector.load %arg7[%c0_132, %c1_133, %c1_134, %c0_135] : memref<1x18x18x8xf32, #tpu.memory_space<vmem>>, vector<1x16x16x8xf32>
    %87 = vector.shape_cast %86 : vector<1x16x16x8xf32> to vector<256x8xf32>
    %c0_136 = arith.constant 0 : index
    %c32_137 = arith.constant 32 : index
    %88 = vector.load %arg9[%c0_136, %c32_137] : memref<256x72xf32, #tpu.memory_space<vmem>>, vector<256x8xf32>
    tpu.vector_store %arg9[%c0_136, %c32_137], %87 {strides = array<i32>} : memref<256x72xf32, #tpu.memory_space<vmem>>, vector<256x8xf32>,
    %c0_138 = arith.constant 0 : index
    %c1_139 = arith.constant 1 : index
    %c2_140 = arith.constant 2 : index
    %c0_141 = arith.constant 0 : index
    %89 = vector.load %arg7[%c0_138, %c1_139, %c2_140, %c0_141] : memref<1x18x18x8xf32, #tpu.memory_space<vmem>>, vector<1x16x16x8xf32>
    %90 = vector.shape_cast %89 : vector<1x16x16x8xf32> to vector<256x8xf32>
    %c0_142 = arith.constant 0 : index
    %c40 = arith.constant 40 : index
    %91 = vector.load %arg9[%c0_142, %c40] : memref<256x72xf32, #tpu.memory_space<vmem>>, vector<256x8xf32>
    tpu.vector_store %arg9[%c0_142, %c40], %90 {strides = array<i32>} : memref<256x72xf32, #tpu.memory_space<vmem>>, vector<256x8xf32>,
    %c0_143 = arith.constant 0 : index
    %c2_144 = arith.constant 2 : index
    %c0_145 = arith.constant 0 : index
    %c0_146 = arith.constant 0 : index
    %92 = vector.load %arg7[%c0_143, %c2_144, %c0_145, %c0_146] : memref<1x18x18x8xf32, #tpu.memory_space<vmem>>, vector<1x16x16x8xf32>
    %93 = vector.shape_cast %92 : vector<1x16x16x8xf32> to vector<256x8xf32>
    %c0_147 = arith.constant 0 : index
    %c48 = arith.constant 48 : index
    %94 = vector.load %arg9[%c0_147, %c48] : memref<256x72xf32, #tpu.memory_space<vmem>>, vector<256x8xf32>
    tpu.vector_store %arg9[%c0_147, %c48], %93 {strides = array<i32>} : memref<256x72xf32, #tpu.memory_space<vmem>>, vector<256x8xf32>,
    %c0_148 = arith.constant 0 : index
    %c2_149 = arith.constant 2 : index
    %c1_150 = arith.constant 1 : index
    %c0_151 = arith.constant 0 : index
    %95 = vector.load %arg7[%c0_148, %c2_149, %c1_150, %c0_151] : memref<1x18x18x8xf32, #tpu.memory_space<vmem>>, vector<1x16x16x8xf32>
    %96 = vector.shape_cast %95 : vector<1x16x16x8xf32> to vector<256x8xf32>
    %c0_152 = arith.constant 0 : index
    %c56 = arith.constant 56 : index
    %97 = vector.load %arg9[%c0_152, %c56] : memref<256x72xf32, #tpu.memory_space<vmem>>, vector<256x8xf32>
    tpu.vector_store %arg9[%c0_152, %c56], %96 {strides = array<i32>} : memref<256x72xf32, #tpu.memory_space<vmem>>, vector<256x8xf32>,
    %c0_153 = arith.constant 0 : index
    %c2_154 = arith.constant 2 : index
    %c2_155 = arith.constant 2 : index
    %c0_156 = arith.constant 0 : index
    %98 = vector.load %arg7[%c0_153, %c2_154, %c2_155, %c0_156] : memref<1x18x18x8xf32, #tpu.memory_space<vmem>>, vector<1x16x16x8xf32>
    %99 = vector.shape_cast %98 : vector<1x16x16x8xf32> to vector<256x8xf32>
    %c0_157 = arith.constant 0 : index
    %c64 = arith.constant 64 : index
    %100 = vector.load %arg9[%c0_157, %c64] : memref<256x72xf32, #tpu.memory_space<vmem>>, vector<256x8xf32>
    tpu.vector_store %arg9[%c0_157, %c64], %99 {strides = array<i32>} : memref<256x72xf32, #tpu.memory_space<vmem>>, vector<256x8xf32>,
    %c0_158 = arith.constant 0 : index
    %c0_159 = arith.constant 0 : index
    %101 = vector.load %arg9[%c0_158, %c0_159] : memref<256x72xf32, #tpu.memory_space<vmem>>, vector<256x72xf32>
    %102 = arith.truncf %101 : vector<256x72xf32> to vector<256x72xbf16>
    %c0_160 = arith.constant 0 : index
    %c0_161 = arith.constant 0 : index
    %103 = vector.load %arg3[%c0_160, %c0_161] : memref<72x8xbf16, #tpu.memory_space<vmem>>, vector<72x8xbf16>
    %cst_162 = arith.constant dense<0.000000e+00> : vector<256x8xf32>
    %104 = tpu.matmul %102, %103, %cst_162 {dimension_numbers = #tpu.dot_dimension_numbers<[1], [0], [0], [1], [0, 0, 1, 1], [], []>} : vector<256x72xbf16>, vector<72x8xbf16>, vector<256x8xf32> -> vector<256x8xf32>
    %105 = vector.shape_cast %104 : vector<256x8xf32> to vector<1x16x16x8xf32>
    %106 = vector.shape_cast %105 : vector<1x16x16x8xf32> to vector<8x2x16x8xf32>
    %cst_163 = arith.constant dense<0.000000e+00> : vector<8x16x8xf32>
    %107 = vector.multi_reduction <add>, %106, %cst_163 [1] : vector<8x2x16x8xf32> to vector<8x16x8xf32>
    %108 = vector.shape_cast %107 : vector<8x16x8xf32> to vector<8x8x2x8xf32>
    %cst_164 = arith.constant dense<0.000000e+00> : vector<8x8x8xf32>
    %109 = vector.multi_reduction <add>, %108, %cst_164 [2] : vector<8x8x2x8xf32> to vector<8x8x8xf32>
    %110 = vector.shape_cast %109 : vector<8x8x8xf32> to vector<1x8x8x8xf32>
    %cst_165 = arith.constant 2.500000e-01 : f32
    %111 = vector.broadcast %cst_165 : f32 to vector<1x8x8x8xf32>
    %112 = arith.mulf %110, %111 : vector<1x8x8x8xf32>
    %113 = arith.addf %112, %29 : vector<1x8x8x8xf32>
    %c0_166 = arith.constant 0 : index
    %c0_167 = arith.constant 0 : index
    %c0_168 = arith.constant 0 : index
    %c0_169 = arith.constant 0 : index
    %114 = vector.load %arg5[%c0_166, %c0_167, %c0_168, %c0_169] : memref<1x8x8x8xf32, #tpu.memory_space<vmem>>, vector<1x8x8x8xf32>
    tpu.vector_store %arg5[%c0_166, %c0_167, %c0_168, %c0_169], %113 {strides = array<i32>} : memref<1x8x8x8xf32, #tpu.memory_space<vmem>>, vector<1x8x8x8xf32>,
    return
  }
  func.func @transform_0(%arg0: i32) -> (i32, i32, i32, i32) {
    %c0_i32 = arith.constant 0 : i32
    %c0_i32_0 = arith.constant 0 : i32
    %c0_i32_1 = arith.constant 0 : i32
    %c0_i32_2 = arith.constant 0 : i32
    return %arg0, %c0_i32, %c0_i32_0, %c0_i32_1 : i32, i32, i32, i32
  }
  func.func @transform_1(%arg0: i32) -> (i32, i32) {
    %c0_i32 = arith.constant 0 : i32
    %c0_i32_0 = arith.constant 0 : i32
    %c0_i32_1 = arith.constant 0 : i32
    return %c0_i32, %c0_i32_0 : i32, i32
  }
  func.func @transform_2(%arg0: i32) -> (i32, i32) {
    %c0_i32 = arith.constant 0 : i32
    %c0_i32_0 = arith.constant 0 : i32
    %c0_i32_1 = arith.constant 0 : i32
    return %c0_i32, %c0_i32_0 : i32, i32
  }
  func.func @transform_3(%arg0: i32) -> (i32, i32) {
    %c0_i32 = arith.constant 0 : i32
    %c0_i32_0 = arith.constant 0 : i32
    %c0_i32_1 = arith.constant 0 : i32
    return %c0_i32, %c0_i32_0 : i32, i32
  }
  func.func @transform_4(%arg0: i32) -> (i32, i32, i32, i32) {
    %c0_i32 = arith.constant 0 : i32
    %c0_i32_0 = arith.constant 0 : i32
    %c0_i32_1 = arith.constant 0 : i32
    %c0_i32_2 = arith.constant 0 : i32
    return %arg0, %c0_i32, %c0_i32_0, %c0_i32_1 : i32, i32, i32, i32
  }
}

</mosaic_0001>

<bundles_post_ra>
// kernel: tpu_custom_call.1
= control target key start
LH: loop header
LB: loop body
LE: loop exit
PB: predicated region body
PF: predicated region fallthrough
CT: control target
= control target key end

     0   :  { %9 = vsyncpa [#allocation7], 0  ;;  %s10617_s0 = inlined_call_operand.vmem [shape: bf16[2,16,16,4], index: 0, kind: input, shape index: {}]   ;;  %s10618_s1 = inlined_call_operand.vmem [shape: bf16[36,8], index: 1, kind: input, shape index: {}]   ;;  %s10619_s2 = inlined_call_operand.vmem [shape: bf16[72,8], index: 2, kind: input, shape index: {}]   ;;  %s10620_s3 = inlined_call_operand.vmem [shape: bf16[4,8], index: 3, kind: input, shape index: {}]   ;;  %s10621_s4 = inlined_call_operand.hbm [shape: f32[2,8,8,8], index: 4, kind: output, shape index: {}]  }
   0x1   :  { %11 = vsyncpa [#allocation7 + $0x1], 0  ;;  %s7476_s15 = smov 0   ;;  %s7478_s16 = smov 0  }
   0x2   :  { %s7480_s17 = smov 0   ;;  %s7482_s18 = smov 0  }
   0x3 LB: > { %s7497_s19 = sadd.s32 4294967295, %s7433_s18   ;;  %s7033_s20 = sadd.s32 4294967294, %s7433_s18   ;;  %s7433_s18 = sphi %s7482_s18, %s10828_s18   ;;  %s7429_s17 = sphi %s7480_s17, %s10827_s17   ;;  %s7425_s16 = sphi %s7478_s16, %s10826_s16   ;;  %s7421_s15 = sphi %s7476_s15, %s10825_s15  }
   0x4   : > { %s7501_s21 = sadd.s32 1, %s7433_s18   ;;  %s113_s22 = sadd.s32 1, %s7429_s17 }
   0x5   : > { %s110_s23 = ssub.s32 %s7433_s18, %s7501_s21  ;;  %p123_p0 = scmp.ne.s32.totalorder %s7429_s17, %s7425_s16 }
   0x6   : > { %p111_p1 = scmp.eq.s32.totalorder %s110_s23, 0  ;;  %p124_p2 = scmp.eq.s32.totalorder %s7497_s19, 1 }
   0x7   : > { %p129_p3 = scmp.ne.s32.totalorder %s7425_s16, %s7421_s15  ;;  %p130_p4 = scmp.eq.s32.totalorder %s7033_s20, 1 }
   0x8   : > { %s7512_s24 = scalar_select %p111_p1, %s7429_s17, %s113_s22  }
   0x9   : > { %p7514_p5 = por %p124_p2, %p123_p0  ;;  %p7518_p6 = por %p130_p4, %p129_p3 }
   0xa   : > { %p7036_p7 = scmp.ge.s32.totalorder %s7433_s18, 1  ;;  %p165_p8 = scmp.lt.s32.totalorder %s7433_s18, 3 }
   0xc   : > { %p166_p9 = pnand %p7036_p7, %p165_p8 }
   0xe   : > { %169 = sbr.rel (%p166_p9) target bundleno = 1750 (0x6d6), region = 36 }
  0x15   : > { %vm197_vm0 = vcmask 31744   ;;  %vm206_vm1 = vcmask 24576   ;;  %p191_p10 = scmp.lt.s32.totalorder %s7497_s19, 1  ;;  %vm200_vm2 = vcmask 25600   ;;  %v10622_v0 = vmov 0.0   ;;  %s7436_s6 = smov 4  }
  0x16   : > { %198 = vst.msk [vmem:[#allocation2] sm:$0xff] %vm197_vm0, %v10622_v0  ;;  %199 = vst.msk [vmem:[#allocation2 + $0x8] sm:$0xff] %vm197_vm0, %v10622_v0  ;;  %s7437_s7 = smov 8   ;;  %s7438_s8 = smov 12  }
  0x17   : > { %203 = vst.msk [vmem:[#allocation2 + $0x198] sm:$0xff] %vm197_vm0, %v10622_v0  ;;  %204 = vst.msk [vmem:[#allocation2 + $0x1a0] sm:$0xff] %vm197_vm0, %v10622_v0  ;;  %s192_s27 = scalar_select %p191_p10, %s7497_s19, 1 }
  0x18   : > { %208 = vst.msk [vmem:[#allocation2 + $0x18] sm:$0x1] %vm206_vm1, %v10622_v0  ;;  %209 = vst.msk [vmem:[#allocation2 + $0x30] sm:$0x1] %vm206_vm1, %v10622_v0  ;;  %s7439_s9 = smov 16   ;;  %s7440_s10 = smov 20  }
  0x19   : > { %210 = vst.msk [vmem:[#allocation2 + $0x48] sm:$0x1] %vm206_vm1, %v10622_v0  ;;  %211 = vst.msk [vmem:[#allocation2 + $0x60] sm:$0x1] %vm206_vm1, %v10622_v0  ;;  %s7089_s28 = sshll.u32 %s192_s27, 7  ;;  %s7442_s11 = smov 24  }
  0x1a   : > { %212 = vst.msk [vmem:[#allocation2 + $0x78] sm:$0x1] %vm206_vm1, %v10622_v0  ;;  %213 = vst.msk [vmem:[#allocation2 + $0x90] sm:$0x1] %vm206_vm1, %v10622_v0  ;;  %s7615_s5 = scalar_lea.vmem %s10617_s0, %s7089_s28  ;;  %s7443_s14 = smov 28  }
  0x1b   : > { %214 = vst.msk [vmem:[#allocation2 + $0xa8] sm:$0x1] %vm206_vm1, %v10622_v0  ;;  %215 = vst.msk [vmem:[#allocation2 + $0xc0] sm:$0x1] %vm206_vm1, %v10622_v0  ;;  %v7092_v1 = vld [vmem:[%s7615_s5] sm:$0xff]   ;;  %v7155_v2 = vld [vmem:[%s7615_s5 + $0x8] sm:$0xff]  }
  0x1c   : > { %216 = vst.msk [vmem:[#allocation2 + $0xd8] sm:$0x1] %vm206_vm1, %v10622_v0  ;;  %217 = vst.msk [vmem:[#allocation2 + $0xf0] sm:$0x1] %vm206_vm1, %v10622_v0  ;;  %v7156_v3 = vld [vmem:[%s7615_s5 + $0x10] sm:$0xff]   ;;  %v7620_v4 = vunpack.c.l.bf16 %v7092_v1  ;;  %v7622_v5 = vunpack.c.h.bf16 %v7092_v1  ;;  %v7624_v6 = vunpack.c.l.bf16 %v7155_v2  ;;  %v7626_v7 = vunpack.c.h.bf16 %v7155_v2  ;;  %v7157_v8 = vld [vmem:[%s7615_s5 + $0x18] sm:$0xff]  }
  0x1d   : > { %218 = vst.msk [vmem:[#allocation2 + $0x108] sm:$0x1] %vm206_vm1, %v10622_v0  ;;  %219 = vst.msk [vmem:[#allocation2 + $0x120] sm:$0x1] %vm206_vm1, %v10622_v0  ;;  %v1799_v9 = vld [vmem:[#allocation2 + $0x1] sm:$0xff]  ;;  %v7629_v11 = vunpack.c.l.bf16 %v7156_v3  ;;  %v7631_v12 = vunpack.c.h.bf16 %v7156_v3  ;;  %v7633_v13 = vunpack.c.l.bf16 %v7157_v8  ;;  %v7635_v14 = vunpack.c.h.bf16 %v7157_v8  ;;  %v7160_v27 = vld [vmem:[%s7615_s5 + $0x30] sm:$0xff]  }
  0x1e   : > { %220 = vst.msk [vmem:[#allocation2 + $0x138] sm:$0x1] %vm206_vm1, %v10622_v0  ;;  %221 = vst.msk [vmem:[#allocation2 + $0x150] sm:$0x1] %vm206_vm1, %v10622_v0  ;;  %1863 = vrot.lane.b32.xlu0 %v1799_v9, %s7436_s6  ;;  %vm1606_vm3 = vcmp.ge.f32.partialorder %v7620_v4, 0.0  ;;  %vm1607_vm4 = vcmp.ge.f32.partialorder %v7622_v5, 0.0  ;;  %v7679_v38 = vunpack.c.l.bf16 %v7160_v27  ;;  %v7702_v52 = vunpack.c.h.bf16 %v7160_v27 }
  0x1f   : > { %222 = vst.msk [vmem:[#allocation2 + $0x168] sm:$0x1] %vm206_vm1, %v10622_v0  ;;  %223 = vst.msk [vmem:[#allocation2 + $0x180] sm:$0x1] %vm206_vm1, %v10622_v0  ;;  %v1638_v15 = vmul.f32 0.2, %v7620_v4 }
  0x20   : > { %226 = vst.msk [vmem:[#allocation2 + $0x29] sm:$0x1] %vm206_vm1, %v10622_v0  ;;  %227 = vst.msk [vmem:[#allocation2 + $0x41] sm:$0x1] %vm206_vm1, %v10622_v0  ;;  %v1639_v16 = vmul.f32 0.2, %v7622_v5 }
  0x21   : > { %228 = vst.msk [vmem:[#allocation2 + $0x59] sm:$0x1] %vm206_vm1, %v10622_v0  ;;  %229 = vst.msk [vmem:[#allocation2 + $0x71] sm:$0x1] %vm206_vm1, %v10622_v0  ;;  %vm1608_vm5 = vcmp.ge.f32.partialorder %v7624_v6, 0.0  ;;  %vm1609_vm6 = vcmp.ge.f32.partialorder %v7626_v7, 0.0  ;;  %v1670_v19 = vsel %vm1606_vm3, %v7620_v4, %v1638_v15 }
  0x22   : > { %230 = vst.msk [vmem:[#allocation2 + $0x89] sm:$0x1] %vm206_vm1, %v10622_v0  ;;  %231 = vst.msk [vmem:[#allocation2 + $0xa1] sm:$0x1] %vm206_vm1, %v10622_v0  ;;  %v1640_v17 = vmul.f32 0.2, %v7624_v6  ;;  %v1671_v20 = vsel %vm1607_vm4, %v7622_v5, %v1639_v16 }
  0x23   : > { %232 = vst.msk [vmem:[#allocation2 + $0xb9] sm:$0x1] %vm206_vm1, %v10622_v0  ;;  %233 = vst.msk [vmem:[#allocation2 + $0xd1] sm:$0x1] %vm206_vm1, %v10622_v0  ;;  %v1641_v18 = vmul.f32 0.2, %v7626_v7 }
  0x24   : > { %234 = vst.msk [vmem:[#allocation2 + $0xe9] sm:$0x1] %vm206_vm1, %v10622_v0  ;;  %235 = vst.msk [vmem:[#allocation2 + $0x101] sm:$0x1] %vm206_vm1, %v10622_v0  ;;  %vm1610_vm7 = vcmp.ge.f32.partialorder %v7629_v11, 0.0  ;;  %v7158_v22 = vld [vmem:[%s7615_s5 + $0x20] sm:$0xff]   ;;  %v1672_v23 = vsel %vm1608_vm5, %v7624_v6, %v1640_v17 }
  0x25   : > { %236 = vst.msk [vmem:[#allocation2 + $0x119] sm:$0x1] %vm206_vm1, %v10622_v0  ;;  %237 = vst.msk [vmem:[#allocation2 + $0x131] sm:$0x1] %vm206_vm1, %v10622_v0  ;;  %v1642_v21 = vmul.f32 0.2, %v7629_v11  ;;  %v1673_v24 = vsel %vm1609_vm6, %v7626_v7, %v1641_v18  ;;  %v7669_v32 = vunpack.c.l.bf16 %v7158_v22  ;;  %v7671_v33 = vunpack.c.h.bf16 %v7158_v22 }
  0x26   : > { %238 = vst.msk [vmem:[#allocation2 + $0x149] sm:$0x1] %vm206_vm1, %v10622_v0  ;;  %239 = vst.msk [vmem:[#allocation2 + $0x161] sm:$0x1] %vm206_vm1, %v10622_v0  ;;  %vm1611_vm8 = vcmp.ge.f32.partialorder %v7631_v12, 0.0  ;;  %v7159_v26 = vld [vmem:[%s7615_s5 + $0x28] sm:$0xff]  }
  0x27   : > { %240 = vst.msk [vmem:[#allocation2 + $0x179] sm:$0x1] %vm206_vm1, %v10622_v0  ;;  %241 = vst.msk [vmem:[#allocation2 + $0x191] sm:$0x1] %vm206_vm1, %v10622_v0  ;;  %v1643_v25 = vmul.f32 0.2, %v7631_v12  ;;  %v1674_v28 = vsel %vm1610_vm7, %v7629_v11, %v1642_v21  ;;  %v7675_v36 = vunpack.c.l.bf16 %v7159_v26  ;;  %v7677_v37 = vunpack.c.h.bf16 %v7159_v26 }
  0x28   : > { %201 = vst.msk [vmem:[#allocation2 + $0x10] sm:$0x3] %vm200_vm2, %v10622_v0  ;;  %205 = vst.msk [vmem:[#allocation2 + $0x1a8] sm:$0x3] %vm200_vm2, %v10622_v0  ;;  %vm1612_vm9 = vcmp.ge.f32.partialorder %v7633_v13, 0.0  ;;  %vm1613_vm10 = vcmp.ge.f32.partialorder %v7635_v14, 0.0 }
  0x29   : > { %207 = vst.msk [vmem:[#allocation2] sm:$0x1] %vm206_vm1, %v10622_v0  ;;  %224 = vst.msk [vmem:[#allocation2 + $0x198] sm:$0x1] %vm206_vm1, %v10622_v0  ;;  %v1644_v29 = vmul.f32 0.2, %v7633_v13  ;;  %v1675_v30 = vsel %vm1611_vm8, %v7631_v12, %v1643_v25 }
  0x2a   : > { %225 = vst.msk [vmem:[#allocation2 + $0x11] sm:$0x1] %vm206_vm1, %v10622_v0  ;;  %242 = vst.msk [vmem:[#allocation2 + $0x1a9] sm:$0x1] %vm206_vm1, %v10622_v0  ;;  %v1645_v31 = vmul.f32 0.2, %v7635_v14 }
  0x2b   : > { %10692 = vst [vmem:[#allocation9_spill] sm:$0xff] %v7620_v4  ;;  %10693 = vst [vmem:[#allocation10_spill] sm:$0xff] %v7622_v5  ;;  %v1676_v35 = vsel %vm1612_vm9, %v7633_v13, %v1644_v29  ;;  %v1736_v39 = vld [vmem:[#allocation2 + $0x8] sm:$0xff]  ;;  %vm1614_vm11 = vcmp.ge.f32.partialorder %v7669_v32, 0.0  ;;  %v1646_v41 = vmul.f32 0.2, %v7669_v32 }
  0x2c   : > { %10694 = vst [vmem:[#allocation11_spill] sm:$0xff] %v7624_v6  ;;  %10695 = vst [vmem:[#allocation12_spill] sm:$0xff] %v7626_v7  ;;  %v1677_v40 = vsel %vm1613_vm10, %v7635_v14, %v1645_v31  ;;  %vm1615_vm12 = vcmp.ge.f32.partialorder %v7671_v33, 0.0  ;;  %v7161_v42 = vld [vmem:[%s7615_s5 + $0x38] sm:$0xff]   ;;  %v7162_v43 = vld [vmem:[%s7615_s5 + $0x40] sm:$0xff]   ;;  %vm1616_vm13 = vcmp.ge.f32.partialorder %v7675_v36, 0.0 }
  0x2d   : > { %10696 = vst [vmem:[#allocation13_spill] sm:$0xff] %v7629_v11  ;;  %10697 = vst [vmem:[#allocation14_spill] sm:$0xff] %v7631_v12  ;;  %v1647_v44 = vmul.f32 0.2, %v7671_v33  ;;  %v1648_v45 = vmul.f32 0.2, %v7675_v36  ;;  %v1678_v46 = vsel %vm1614_vm11, %v7669_v32, %v1646_v41  ;;  %v7704_v53 = vunpack.c.l.bf16 %v7161_v42 }
  0x2e   : > { %10698 = vst [vmem:[#allocation15_spill] sm:$0xff] %v7633_v13  ;;  %10699 = vst [vmem:[#allocation16_spill] sm:$0xff] %v7635_v14  ;;  %vm1617_vm14 = vcmp.ge.f32.partialorder %v7677_v37, 0.0  ;;  %v1649_v47 = vmul.f32 0.2, %v7677_v37  ;;  %vm1618_vm15 = vcmp.ge.f32.partialorder %v7679_v38, 0.0  ;;  %v7716_v58 = vunpack.c.h.bf16 %v7161_v42 }
  0x2f   : > { %v1800_v10 = vld [vmem:[#allocation2 + $0x9] sm:$0xff]  ;;  %1703 = vst.msk [vmem:[#allocation2 + $0x19] sm:$0xff] %vm197_vm0, %v1670_v19  ;;  %1704 = vst.msk [vmem:[#allocation2 + $0x21] sm:$0xff] %vm197_vm0, %v1671_v20  ;;  %v1650_v48 = vmul.f32 0.2, %v7679_v38  ;;  %v1679_v50 = vsel %vm1615_vm12, %v7671_v33, %v1647_v44  ;;  %v1680_v51 = vsel %vm1616_vm13, %v7675_v36, %v1648_v45  ;;  %v7718_v59 = vunpack.c.l.bf16 %v7162_v43  ;;  %v7165_v15 = vld [vmem:[%s7615_s5 + $0x58] sm:$0xff]  }
  0x30   : > { %1865 = vrot.lane.b32.xlu0 %v1800_v10, %s7436_s6  ;;  %1705 = vst.msk [vmem:[#allocation2 + $0x31] sm:$0xff] %vm197_vm0, %v1672_v23  ;;  %1706 = vst.msk [vmem:[#allocation2 + $0x39] sm:$0xff] %vm197_vm0, %v1673_v24  ;;  %v1735_v34 = vld [vmem:[#allocation2] sm:$0xff]  ;;  %v7163_v54 = vld [vmem:[%s7615_s5 + $0x48] sm:$0xff]   ;;  %v1681_v56 = vsel %vm1617_vm14, %v7677_v37, %v1649_v47  ;;  %vm1619_vm1 = vcmp.ge.f32.partialorder %v7702_v52, 0.0  ;;  %vm1620_vm3 = vcmp.ge.f32.partialorder %v7704_v53, 0.0  ;;  %v7729_v62 = vunpack.c.h.bf16 %v7162_v43 }
  0x31   : > { %1707 = vst.msk [vmem:[#allocation2 + $0x49] sm:$0xff] %vm197_vm0, %v1674_v28  ;;  %10700 = vst [vmem:[#allocation17_spill] sm:$0xff] %v7669_v32  ;;  %v1682_v57 = vsel %vm1618_vm15, %v7679_v38, %v1650_v48  ;;  %v1651_v61 = vmul.f32 0.2, %v7702_v52  ;;  %v7164_v63 = vld [vmem:[%s7615_s5 + $0x50] sm:$0xff]   ;;  %vm1621_vm4 = vcmp.ge.f32.partialorder %v7716_v58, 0.0  ;;  %v7737_v8 = vunpack.c.l.bf16 %v7163_v54 }
  0x32   : > { %10701 = vst [vmem:[#allocation18_spill] sm:$0xff] %v7671_v33  ;;  %1708 = vst.msk [vmem:[#allocation2 + $0x51] sm:$0xff] %vm197_vm0, %v1675_v30  ;;  %v1652_v2 = vmul.f32 0.2, %v7704_v53  ;;  %v1653_v3 = vmul.f32 0.2, %v7716_v58  ;;  %v7759_v22 = vunpack.c.h.bf16 %v7163_v54  ;;  %v7761_v23 = vunpack.c.l.bf16 %v7164_v63 }
  0x33   : > { %10702 = vst [vmem:[#allocation19_spill] sm:$0xff] %v7675_v36  ;;  %10703 = vst [vmem:[#allocation20_spill] sm:$0xff] %v7677_v37  ;;  %v1683_v9 = vsel %vm1619_vm1, %v7702_v52, %v1651_v61  ;;  %vm1622_vm5 = vcmp.ge.f32.partialorder %v7718_v59, 0.0  ;;  %v1654_v10 = vmul.f32 0.2, %v7718_v59  ;;  %vm1623_vm6 = vcmp.ge.f32.partialorder %v7729_v62, 0.0 }
  0x34   : > { %10704 = vst [vmem:[#allocation21_spill] sm:$0xff] %v7679_v38  ;;  %1767 = vst.msk [vmem:[#allocation4] sm:$0xff] %vm197_vm0, %v1735_v34  ;;  %v1684_v16 = vsel %vm1620_vm3, %v7704_v53, %v1652_v2  ;;  %v1685_v17 = vsel %vm1621_vm4, %v7716_v58, %v1653_v3  ;;  %v1655_v18 = vmul.f32 0.2, %v7729_v62  ;;  %vm1624_vm7 = vcmp.ge.f32.partialorder %v7737_v8, 0.0  ;;  %v7166_v24 = vld [vmem:[%s7615_s5 + $0x60] sm:$0xff]  }
  0x35   : > { %1709 = vst.msk [vmem:[#allocation2 + $0x61] sm:$0xff] %vm197_vm0, %v1676_v35  ;;  %1768 = vst.msk [vmem:[#allocation4 + $0x8] sm:$0xff] %vm197_vm0, %v1736_v39  ;;  %v1686_v20 = vsel %vm1622_vm5, %v7718_v59, %v1654_v10  ;;  %v1656_v21 = vmul.f32 0.2, %v7737_v8  ;;  %v7772_v28 = vunpack.c.h.bf16 %v7164_v63  ;;  %v7774_v29 = vunpack.c.l.bf16 %v7165_v15  ;;  %v7167_v42 = vld [vmem:[%s7615_s5 + $0x68] sm:$0xff]   ;;  %v7168_v43 = vld [vmem:[%s7615_s5 + $0x70] sm:$0xff]  }
  0x36   : > { %1710 = vst.msk [vmem:[#allocation2 + $0x69] sm:$0xff] %vm197_vm0, %v1677_v40  ;;  %v1801_v49 = vld [vmem:[#allocation2 + $0x19] sm:$0xff]  ;;  %1711 = vst.msk [vmem:[#allocation2 + $0x79] sm:$0xff] %vm197_vm0, %v1678_v46  ;;  %v7720_v60 = vld [vmem:[#allocation2 + $0x21] sm:$0xff]  ;;  %v1687_v27 = vsel %vm1623_vm6, %v7729_v62, %v1655_v18  ;;  %v7776_v30 = vunpack.c.h.bf16 %v7165_v15  ;;  %vm1625_vm8 = vcmp.ge.f32.partialorder %v7759_v22, 0.0  ;;  %vm1626_vm9 = vcmp.ge.f32.partialorder %v7761_v23, 0.0 }
  0x37   : > { %10705 = vst [vmem:[#allocation22_spill] sm:$0xff] %v7702_v52  ;;  %10706 = vst [vmem:[#allocation23_spill] sm:$0xff] %v7704_v53  ;;  %1867 = vrot.lane.b32.xlu1 %v1801_v49, %s7436_s6  ;;  %v7708_v55 = vld [vmem:[#allocation2 + $0x31] sm:$0xff]  ;;  %v7751_v19 = vld [vmem:[#allocation2 + $0x39] sm:$0xff]  ;;  %v1688_v35 = vsel %vm1624_vm7, %v7737_v8, %v1656_v21  ;;  %v1657_v39 = vmul.f32 0.2, %v7759_v22  ;;  %v7801_v41 = vunpack.c.l.bf16 %v7166_v24  ;;  %v7831_v61 = vunpack.c.l.bf16 %v7167_v42 }
  0x38   : > { %1712 = vst.msk [vmem:[#allocation2 + $0x81] sm:$0xff] %vm197_vm0, %v1679_v50  ;;  %1713 = vst.msk [vmem:[#allocation2 + $0x91] sm:$0xff] %vm197_vm0, %v1680_v51  ;;  %1871 = vrot.lane.b32.xlu0 %v7708_v55, %s7436_s6  ;;  %v7732_v1 = vld [vmem:[#allocation2 + $0x49] sm:$0xff]  ;;  %v7764_v25 = vld [vmem:[#allocation2 + $0x18] sm:$0xff]  ;;  %v1658_v40 = vmul.f32 0.2, %v7761_v23  ;;  %v7839_v3 = vunpack.c.h.bf16 %v7167_v42 }
  0x39   : > { %10707 = vst [vmem:[#allocation24_spill] sm:$0xff] %v7716_v58  ;;  %10708 = vst [vmem:[#allocation25_spill] sm:$0xff] %v7718_v59  ;;  %v7780_v31 = vld [vmem:[#allocation2 + $0x20] sm:$0xff]  ;;  %v7782_v34 = vld [vmem:[#allocation2 + $0x30] sm:$0xff]  ;;  %vm1627_vm10 = vcmp.ge.f32.partialorder %v7772_v28, 0.0  ;;  %vm1628_vm11 = vcmp.ge.f32.partialorder %v7774_v29, 0.0  ;;  %v1689_v45 = vsel %vm1625_vm8, %v7759_v22, %v1657_v39 }
  0x3a   : > { %1714 = vst.msk [vmem:[#allocation2 + $0x99] sm:$0xff] %vm197_vm0, %v1681_v56  ;;  %1715 = vst.msk [vmem:[#allocation2 + $0xa9] sm:$0xff] %vm197_vm0, %v1682_v57  ;;  %v7805_v44 = vld [vmem:[#allocation2 + $0x51] sm:$0xff]  ;;  %v1659_v46 = vmul.f32 0.2, %v7772_v28  ;;  %vm1629_vm12 = vcmp.ge.f32.partialorder %v7776_v30, 0.0  ;;  %v1690_v49 = vsel %vm1626_vm9, %v7761_v23, %v1658_v40  ;;  %v7829_v57 = vunpack.c.h.bf16 %v7166_v24 }
  0x3b   : > { %10709 = vst [vmem:[#allocation26_spill] sm:$0xff] %v7729_v62  ;;  %10710 = vst [vmem:[#allocation27_spill] sm:$0xff] %v7737_v8  ;;  %1869 = vrot.lane.b32.xlu1 %v7720_v60, %s7436_s6  ;;  %v1660_v47 = vmul.f32 0.2, %v7774_v29  ;;  %v1661_v50 = vmul.f32 0.2, %v7776_v30 }
  0x3c   : > { %1716 = vst.msk [vmem:[#allocation2 + $0xb1] sm:$0xff] %vm197_vm0, %v1683_v9  ;;  %1875 = vrot.lane.b32.xlu0 %v7732_v1, %s7436_s6  ;;  %1717 = vst.msk [vmem:[#allocation2 + $0xc1] sm:$0xff] %vm197_vm0, %v1684_v16  ;;  %v7766_v26 = vld [vmem:[#allocation2 + $0x61] sm:$0xff]  ;;  %vm1630_vm13 = vcmp.ge.f32.partialorder %v7801_v41, 0.0  ;;  %v1662_v51 = vmul.f32 0.2, %v7801_v41  ;;  %v1691_v54 = vsel %vm1627_vm10, %v7772_v28, %v1659_v46  ;;  %v7841_v9 = vunpack.c.l.bf16 %v7168_v43 }
  0x3d   : > { %1718 = vst.msk [vmem:[#allocation2 + $0xc9] sm:$0xff] %vm197_vm0, %v1685_v17  ;;  %10711 = vst [vmem:[#allocation28_spill] sm:$0xff] %v7759_v22  ;;  %v7813_v48 = vld [vmem:[#allocation2 + $0x79] sm:$0xff]  ;;  %v1692_v56 = vsel %vm1628_vm11, %v7774_v29, %v1660_v47  ;;  %v1693_v63 = vsel %vm1629_vm12, %v7776_v30, %v1661_v50  ;;  %v7843_v10 = vld [vmem:[#allocation2 + $0x69] sm:$0xff]  ;;  %vm1631_vm14 = vcmp.ge.f32.partialorder %v7829_v57, 0.0  ;;  %vm1632_vm15 = vcmp.ge.f32.partialorder %v7831_v61, 0.0 }
  0x3e   : > { %10712 = vst [vmem:[#allocation29_spill] sm:$0xff] %v7761_v23  ;;  %1719 = vst.msk [vmem:[#allocation2 + $0xd9] sm:$0xff] %vm197_vm0, %v1686_v20  ;;  %v1694_v2 = vsel %vm1630_vm13, %v7801_v41, %v1662_v51  ;;  %v1663_v15 = vmul.f32 0.2, %v7829_v57  ;;  %v7852_v16 = vunpack.c.h.bf16 %v7168_v43  ;;  %v1664_v18 = vmul.f32 0.2, %v7831_v61 }
  0x3f   : > { %10713 = vst [vmem:[#allocation30_spill] sm:$0xff] %v7772_v28  ;;  %10714 = vst [vmem:[#allocation31_spill] sm:$0xff] %v7774_v29  ;;  %1873 = vrot.lane.b32.xlu1 %v7751_v19, %s7436_s6  ;;  %v7854_v17 = vld [vmem:[#allocation2 + $0x91] sm:$0xff]  ;;  %vm1633_vm1 = vcmp.ge.f32.partialorder %v7839_v3, 0.0  ;;  %v1665_v20 = vmul.f32 0.2, %v7839_v3 }
  0x40   : > { %10715 = vst [vmem:[#allocation32_spill] sm:$0xff] %v7776_v30  ;;  %1769 = vst.msk [vmem:[#allocation4 + $0x10] sm:$0xff] %vm197_vm0, %v7764_v25  ;;  %1879 = vrot.lane.b32.xlu0 %v7766_v26, %s7436_s6  ;;  %v1695_v21 = vsel %vm1631_vm14, %v7829_v57, %v1663_v15  ;;  %vm1634_vm3 = vcmp.ge.f32.partialorder %v7841_v9, 0.0  ;;  %v1666_v24 = vmul.f32 0.2, %v7841_v9  ;;  %vm1635_vm4 = vcmp.ge.f32.partialorder %v7852_v16, 0.0 }
  0x41   : > { %1720 = vst.msk [vmem:[#allocation2 + $0xe1] sm:$0xff] %vm197_vm0, %v1687_v27  ;;  %1770 = vst.msk [vmem:[#allocation4 + $0x18] sm:$0xff] %vm197_vm0, %v7780_v31  ;;  %v1696_v27 = vsel %vm1632_vm15, %v7831_v61, %v1664_v18  ;;  %v1667_v39 = vmul.f32 0.2, %v7852_v16  ;;  %v7869_v40 = vld [vmem:[#allocation2 + $0x81] sm:$0xff]  ;;  %v7876_v43 = vld [vmem:[#allocation2 + $0xa9] sm:$0xff] }
  0x42   : > { %1771 = vst.msk [vmem:[#allocation4 + $0x20] sm:$0xff] %vm197_vm0, %v7782_v34  ;;  %1721 = vst.msk [vmem:[#allocation2 + $0xf1] sm:$0xff] %vm197_vm0, %v1688_v35  ;;  %v1697_v35 = vsel %vm1633_vm1, %v7839_v3, %v1665_v20  ;;  %v1698_v42 = vsel %vm1634_vm3, %v7841_v9, %v1666_v24  ;;  %v7880_v46 = vld [vmem:[#allocation2 + $0x38] sm:$0xff]  ;;  %v7882_v47 = vld [vmem:[#allocation2 + $0x48] sm:$0xff]  ;;  %vm1959_vm7 = vcmask 64544   ;;  %vm2152_vm8 = vcmask 97344  }
  0x43   : > { %10716 = vst [vmem:[#allocation33_spill] sm:$0xff] %v7801_v41  ;;  %1722 = vst.msk [vmem:[#allocation2 + $0xf9] sm:$0xff] %vm197_vm0, %v1689_v45  ;;  %1877 = vrot.lane.b32.xlu1 %v7805_v44, %s7436_s6  ;;  %v1699_v45 = vsel %vm1635_vm4, %v7852_v16, %v1667_v39  ;;  %v7895_v50 = vld [vmem:[#allocation2 + $0xc1] sm:$0xff]  ;;  %v7897_v51 = vld [vmem:[#allocation2 + $0x50] sm:$0xff]  ;;  %vm2345_vm9 = vcmask 130144   ;;  %vm2538_vm10 = vcmask 162944  }
  0x44   : > { %1723 = vst.msk [vmem:[#allocation2 + $0x109] sm:$0xff] %vm197_vm0, %v1690_v49  ;;  %10717 = vst [vmem:[#allocation34_spill] sm:$0xff] %v7829_v57  ;;  %1883 = vrot.lane.b32.xlu0 %v7813_v48, %s7436_s6  ;;  %v7891_v49 = vld [vmem:[#allocation2 + $0x99] sm:$0xff]  ;;  %v7925_v20 = vld [vmem:[#allocation2 + $0xc9] sm:$0xff]  ;;  %vm1537_vm11 = vcmask 1041408   ;;  %s7444_s23 = smov 32  }
  0x45   : > { %10718 = vst [vmem:[#allocation35_spill] sm:$0xff] %v7831_v61  ;;  %1724 = vst.msk [vmem:[#allocation2 + $0x111] sm:$0xff] %vm197_vm0, %v1691_v54  ;;  %v7901_v54 = vld [vmem:[#allocation2 + $0x60] sm:$0xff]  ;;  %v7929_v24 = vld [vmem:[#allocation2 + $0x98] sm:$0xff]  ;;  %vm2731_vm12 = vcmask 195744   ;;  %vm1458_vm13 = vcmask 1041409  }
  0x46   : > { %1725 = vst.msk [vmem:[#allocation2 + $0x121] sm:$0xff] %vm197_vm0, %v1692_v56  ;;  %10719 = vst [vmem:[#allocation36_spill] sm:$0xff] %v7839_v3  ;;  %v7903_v56 = vld [vmem:[#allocation2 + $0x68] sm:$0xff]  ;;  %v7919_v15 = vld [vmem:[#allocation2 + $0x80] sm:$0xff]  ;;  %vm1460_vm14 = vcmask 1042434   ;;  %vm1462_vm15 = vcmask 1043459  }
  0x47   : > { %10720 = vst [vmem:[#allocation37_spill] sm:$0xff] %v7841_v9  ;;  %1726 = vst.msk [vmem:[#allocation2 + $0x129] sm:$0xff] %vm197_vm0, %v1693_v63  ;;  %1881 = vrot.lane.b32.xlu1 %v7843_v10, %s7436_s6  ;;  %v7905_v63 = vld [vmem:[#allocation2 + $0x78] sm:$0xff]  ;;  %v7943_v39 = vld [vmem:[#allocation2 + $0xb0] sm:$0xff]  ;;  %vm1464_vm1 = vcmask 1044484   ;;  %vm1466_vm3 = vcmask 1045509  }
  0x48   : > { %1727 = vst.msk [vmem:[#allocation2 + $0x139] sm:$0xff] %vm197_vm0, %v1694_v2  ;;  %10721 = vst [vmem:[#allocation38_spill] sm:$0xff] %v7852_v16  ;;  %1887 = vrot.lane.b32.xlu0 %v7854_v17, %s7436_s6  ;;  %v7915_v2 = vld [vmem:[#allocation2 + $0xb1] sm:$0xff]  ;;  %v7921_v18 = vld [vmem:[#allocation2 + $0xd9] sm:$0xff]  ;;  %vm1468_vm4 = vcmask 1046534   ;;  %s7446_s12 = smov 48  }
  0x49   : > { %1728 = vst.msk [vmem:[#allocation2 + $0x141] sm:$0xff] %vm197_vm0, %v1695_v21  ;;  %1729 = vst.msk [vmem:[#allocation2 + $0x151] sm:$0xff] %vm197_vm0, %v1696_v27  ;;  %v7927_v21 = vld [vmem:[#allocation2 + $0x90] sm:$0xff]  ;;  %v7931_v27 = vld [vmem:[#allocation2 + $0xa8] sm:$0xff]  ;;  %s7447_s27 = smov 56   ;;  %s7449_s22 = smov [#allocation6]  }
  0x4a   : > { %1730 = vst.msk [vmem:[#allocation2 + $0x159] sm:$0xff] %vm197_vm0, %v1697_v35  ;;  %1731 = vst.msk [vmem:[#allocation2 + $0x169] sm:$0xff] %vm197_vm0, %v1698_v42  ;;  %v7935_v35 = vld [vmem:[#allocation2 + $0xf1] sm:$0xff]  ;;  %v7945_v42 = vld [vmem:[#allocation2 + $0xc0] sm:$0xff] }
  0x4b   : > { %1732 = vst.msk [vmem:[#allocation2 + $0x171] sm:$0xff] %vm197_vm0, %v1699_v45  ;;  %1772 = vst.msk [vmem:[#allocation4 + $0x28] sm:$0xff] %vm197_vm0, %v7880_v46  ;;  %1885 = vrot.lane.b32.xlu1 %v7869_v40, %s7436_s6  ;;  %v7947_v45 = vld [vmem:[#allocation2 + $0xc8] sm:$0xff]  ;;  %v7957_v0 = vld [vmem:[#allocation2 + $0xd8] sm:$0xff] }
  0x4c   : > { %1773 = vst.msk [vmem:[#allocation4 + $0x30] sm:$0xff] %vm197_vm0, %v7882_v47  ;;  %1891 = vrot.lane.b32.xlu0 %v7876_v43, %s7436_s6  ;;  %1774 = vst.msk [vmem:[#allocation4 + $0x38] sm:$0xff] %vm197_vm0, %v7897_v51  ;;  %v7959_v16 = vld [vmem:[#allocation2 + $0xe0] sm:$0xff]  ;;  %v7961_v9 = vld [vmem:[#allocation2 + $0xf0] sm:$0xff] }
  0x4d   : > { %1775 = vst.msk [vmem:[#allocation4 + $0x40] sm:$0xff] %vm197_vm0, %v7901_v54  ;;  %1776 = vst.msk [vmem:[#allocation4 + $0x48] sm:$0xff] %vm197_vm0, %v7903_v56  ;;  %v7969_v3 = vld [vmem:[#allocation2 + $0xf8] sm:$0xff]  ;;  %v7971_v57 = vld [vmem:[#allocation2 + $0x108] sm:$0xff] }
  0x4e   : > { %1777 = vst.msk [vmem:[#allocation4 + $0x50] sm:$0xff] %vm197_vm0, %v7905_v63  ;;  %1778 = vst.msk [vmem:[#allocation4 + $0x58] sm:$0xff] %vm197_vm0, %v7919_v15  ;;  %v7973_v61 = vld [vmem:[#allocation2 + $0x110] sm:$0xff]  ;;  %v7983_v41 = vld [vmem:[#allocation2 + $0x120] sm:$0xff] }
  0x4f   : > { %1889 = vrot.lane.b32.xlu1 %v7891_v49, %s7436_s6  ;;  %1779 = vst.msk [vmem:[#allocation4 + $0x60] sm:$0xff] %vm197_vm0, %v7927_v21  ;;  %1780 = vst.msk [vmem:[#allocation4 + $0x68] sm:$0xff] %vm197_vm0, %v7929_v24  ;;  %v7985_v30 = vld [vmem:[#allocation2 + $0x128] sm:$0xff]  ;;  %v7999_v23 = vld [vmem:[#allocation2 + $0x138] sm:$0xff] }
  0x50   : > { %1895 = vrot.lane.b32.xlu0 %v7895_v50, %s7436_s6  ;;  %1781 = vst.msk [vmem:[#allocation4 + $0x70] sm:$0xff] %vm197_vm0, %v7931_v27  ;;  %1782 = vst.msk [vmem:[#allocation4 + $0x78] sm:$0xff] %vm197_vm0, %v7943_v39  ;;  %v7987_v28 = vld [vmem:[#allocation2 + $0xe1] sm:$0xff]  ;;  %v7995_v29 = vld [vmem:[#allocation2 + $0x109] sm:$0xff] }
  0x51   : > { %1783 = vst.msk [vmem:[#allocation4 + $0x80] sm:$0xff] %vm197_vm0, %v7945_v42  ;;  %1784 = vst.msk [vmem:[#allocation4 + $0x88] sm:$0xff] %vm197_vm0, %v7947_v45  ;;  %v8001_v22 = vld [vmem:[#allocation2 + $0x140] sm:$0xff]  ;;  %v8015_v59 = vld [vmem:[#allocation2 + $0x150] sm:$0xff] }
  0x52   : > { %1785 = vst.msk [vmem:[#allocation4 + $0x90] sm:$0xff] %vm197_vm0, %v7957_v0  ;;  %1786 = vst.msk [vmem:[#allocation4 + $0x98] sm:$0xff] %vm197_vm0, %v7959_v16  ;;  %v8003_v62 = vld [vmem:[#allocation2 + $0xf9] sm:$0xff]  ;;  %v8011_v8 = vld [vmem:[#allocation2 + $0x121] sm:$0xff] }
  0x53   : > { %1893 = vrot.lane.b32.xlu1 %v7915_v2, %s7436_s6  ;;  %1787 = vst.msk [vmem:[#allocation4 + $0xa0] sm:$0xff] %vm197_vm0, %v7961_v9  ;;  %1788 = vst.msk [vmem:[#allocation4 + $0xa8] sm:$0xff] %vm197_vm0, %v7969_v3  ;;  %v8017_v58 = vld [vmem:[#allocation2 + $0x158] sm:$0xff]  ;;  %v8031_v33 = vld [vmem:[#allocation2 + $0x168] sm:$0xff] }
  0x54   : > { %1899 = vrot.lane.b32.xlu0 %v7921_v18, %s7436_s6  ;;  %1789 = vst.msk [vmem:[#allocation4 + $0xb0] sm:$0xff] %vm197_vm0, %v7971_v57  ;;  %1790 = vst.msk [vmem:[#allocation4 + $0xb8] sm:$0xff] %vm197_vm0, %v7973_v61  ;;  %v8019_v52 = vld [vmem:[#allocation2 + $0x111] sm:$0xff]  ;;  %v8027_v37 = vld [vmem:[#allocation2 + $0x139] sm:$0xff] }
  0x55   : > { %1791 = vst.msk [vmem:[#allocation4 + $0xc0] sm:$0xff] %vm197_vm0, %v7983_v41  ;;  %1792 = vst.msk [vmem:[#allocation4 + $0xc8] sm:$0xff] %vm197_vm0, %v7985_v30  ;;  %v8033_v53 = vld [vmem:[#allocation2 + $0x170] sm:$0xff]  ;;  %v7169_v7 = vld [vmem:[%s7615_s5 + $0x78] sm:$0xff]  }
  0x56   : > { %1793 = vst.msk [vmem:[#allocation4 + $0xd0] sm:$0xff] %vm197_vm0, %v7999_v23  ;;  %1794 = vst.msk [vmem:[#allocation4 + $0xd8] sm:$0xff] %vm197_vm0, %v8001_v22  ;;  %v8035_v14 = vld [vmem:[#allocation2 + $0x129] sm:$0xff]  ;;  %v8043_v12 = vld [vmem:[#allocation2 + $0x151] sm:$0xff]  ;;  %v8046_v5 = vunpack.c.l.bf16 %v7169_v7  ;;  %v8048_v38 = vunpack.c.h.bf16 %v7169_v7 }
  0x57   : > { %1897 = vrot.lane.b32.xlu1 %v7925_v20, %s7436_s6  ;;  %1795 = vst.msk [vmem:[#allocation4 + $0xe0] sm:$0xff] %vm197_vm0, %v8015_v59  ;;  %1796 = vst.msk [vmem:[#allocation4 + $0xe8] sm:$0xff] %vm197_vm0, %v8017_v58  ;;  %v8052_v36 = vld [vmem:[#allocation2 + $0x141] sm:$0xff]  ;;  %v8058_v11 = vld [vmem:[#allocation2 + $0x169] sm:$0xff] }
  0x58   : > { %1903 = vrot.lane.b32.xlu0 %v7935_v35, %s7436_s6  ;;  %10722 = vst [vmem:[#allocation39_spill] sm:$0xff] %v8035_v14  ;;  %1797 = vst.msk [vmem:[#allocation4 + $0xf0] sm:$0xff] %vm197_vm0, %v8031_v33  ;;  %v1668_v32 = vmul.f32 0.2, %v8046_v5  ;;  %v1669_v13 = vmul.f32 0.2, %v8048_v38 }
  0x59   : > { %1798 = vst.msk [vmem:[#allocation4 + $0xf8] sm:$0xff] %vm197_vm0, %v8033_v53  ;;  %10723 = vst [vmem:[#allocation40_spill] sm:$0xff] %v8043_v12  ;;  %vm1636_vm5 = vcmp.ge.f32.partialorder %v8046_v5, 0.0  ;;  %vm1637_vm6 = vcmp.ge.f32.partialorder %v8048_v38, 0.0  ;;  %v8068_v4 = vld [vmem:[#allocation2 + $0x159] sm:$0xff] }
  0x5a   : > { %10724 = vst [vmem:[#allocation41_spill] sm:$0xff] %v8046_v5  ;;  %10725 = vst [vmem:[#allocation42_spill] sm:$0xff] %v8048_v38  ;;  %v1700_v7 = vsel %vm1636_vm5, %v8046_v5, %v1668_v32  ;;  %v1701_v6 = vsel %vm1637_vm6, %v8048_v38, %v1669_v13  ;;  %v8077_v13 = vld [vmem:[#allocation2 + $0x1a] sm:$0xff]  ;;  %v8083_v32 = vld [vmem:[#allocation2 + $0x32] sm:$0xff]  ;;  %vm1470_vm5 = vcmask 1047559   ;;  %vm2925_vm6 = vcmask 228544  }
  0x5b   : > { %1901 = vrot.lane.b32.xlu1 %v7987_v28, %s7436_s6  ;;  %1733 = vst.msk [vmem:[#allocation2 + $0x181] sm:$0xff] %vm197_vm0, %v1700_v7  ;;  %1734 = vst.msk [vmem:[#allocation2 + $0x189] sm:$0xff] %vm197_vm0, %v1701_v6  ;;  %v1993_v6 = vld [vmem:[#allocation2 + $0xa] sm:$0xff]  ;;  %v8086_v7 = vld [vmem:[#allocation2 + $0x22] sm:$0xff] }
  0x5c   : > { %1907 = vrot.lane.b32.xlu0 %v7995_v29, %s7436_s6  ;;  %10727 = vst [vmem:[#allocation44_spill] sm:$0xff] %v8077_v13  ;;  %10728 = vst [vmem:[#allocation45_spill] sm:$0xff] %v8083_v32  ;;  %v8090_v38 = vld [vmem:[#allocation2 + $0x4a] sm:$0xff]  ;;  %v8098_v5 = vld [vmem:[#allocation2 + $0x62] sm:$0xff] }
  0x5d   : > { %10729 = vst [vmem:[#allocation46_spill] sm:$0xff] %v8086_v7  ;;  %10730 = vst [vmem:[#allocation47_spill] sm:$0xff] %v8090_v38 }
  0x5e   : > { %10732 = vst [vmem:[#allocation49_spill] sm:$0xff] %v8098_v5 }
  0x5f   : > { %1905 = vrot.lane.b32.xlu1 %v8003_v62, %s7436_s6 }
  0x60   : > { %1911 = vrot.lane.b32.xlu0 %v8011_v8, %s7436_s6 }
  0x63   : > { %1909 = vrot.lane.b32.xlu1 %v8019_v52, %s7436_s6 }
  0x64   : > { %1915 = vrot.lane.b32.xlu0 %v8027_v37, %s7436_s6 }
  0x67   : > { %1913 = vrot.lane.b32.xlu1 %v8035_v14, %s7436_s6  ;;  %v8074_v14 = vld [vmem:[#allocation2 + $0x171] sm:$0xff] }
  0x68   : > { %1919 = vrot.lane.b32.xlu0 %v8043_v12, %s7436_s6  ;;  %v1992_v12 = vld [vmem:[#allocation2 + $0x2] sm:$0xff]  ;;  %10726 = vst [vmem:[#allocation43_spill] sm:$0xff] %v8074_v14 }
  0x6b   : > { %1917 = vrot.lane.b32.xlu1 %v8052_v36, %s7436_s6 }
  0x6c   : > { %1923 = vrot.lane.b32.xlu0 %v8058_v11, %s7436_s6 }
  0x6f   : > { %1921 = vrot.lane.b32.xlu1 %v8068_v4, %s7436_s6 }
  0x70   : > { %2056 = vrot.lane.b32.xlu0 %v1992_v12, %s7437_s7  ;;  %v8094_v12 = vld [vmem:[#allocation2 + $0x3a] sm:$0xff] }
  0x71   : > { %10731 = vst [vmem:[#allocation48_spill] sm:$0xff] %v8094_v12 }
  0x73   : > { %1925 = vrot.lane.b32.xlu1 %v8074_v14, %s7436_s6  ;;  %v8188_v14 = vld [vmem:[#allocation2 + $0x16a] sm:$0xff]  ;;  %s7448_s6 = smov 64  }
  0x74   : > { %2060 = vrot.lane.b32.xlu0 %v8077_v13, %s7437_s7 }
  0x77   : > { %2058 = vrot.lane.b32.xlu1 %v1993_v6, %s7437_s7  ;;  %v8102_v6 = vld [vmem:[#allocation2 + $0x52] sm:$0xff] }
  0x78   : > { %2064 = vrot.lane.b32.xlu0 %v8083_v32, %s7437_s7  ;;  %10733 = vst [vmem:[#allocation50_spill] sm:$0xff] %v8102_v6  ;;  %v8106_v32 = vld [vmem:[#allocation2 + $0x7a] sm:$0xff] }
  0x79   : > { %10734 = vst [vmem:[#allocation51_spill] sm:$0xff] %v8106_v32 }
  0x7b   : > { %2062 = vrot.lane.b32.xlu1 %v8086_v7, %s7437_s7  ;;  %v8110_v7 = vld [vmem:[#allocation2 + $0x6a] sm:$0xff] }
  0x7c   : > { %2068 = vrot.lane.b32.xlu0 %v8090_v38, %s7437_s7  ;;  %10735 = vst [vmem:[#allocation52_spill] sm:$0xff] %v8110_v7  ;;  %v8114_v38 = vld [vmem:[#allocation2 + $0x92] sm:$0xff] }
  0x7d   : > { %10736 = vst [vmem:[#allocation53_spill] sm:$0xff] %v8114_v38 }
  0x7f   : > { %2066 = vrot.lane.b32.xlu1 %v8094_v12, %s7437_s7  ;;  %v8118_v12 = vld [vmem:[#allocation2 + $0x82] sm:$0xff] }
  0x80   : > { %2072 = vrot.lane.b32.xlu0 %v8098_v5, %s7437_s7  ;;  %10737 = vst [vmem:[#allocation54_spill] sm:$0xff] %v8118_v12  ;;  %v8122_v5 = vld [vmem:[#allocation2 + $0xaa] sm:$0xff] }
  0x81   : > { %10738 = vst [vmem:[#allocation55_spill] sm:$0xff] %v8122_v5 }
  0x83   : > { %2070 = vrot.lane.b32.xlu1 %v8102_v6, %s7437_s7  ;;  %v8126_v6 = vld [vmem:[#allocation2 + $0x9a] sm:$0xff] }
  0x84   : > { %2076 = vrot.lane.b32.xlu0 %v8106_v32, %s7437_s7  ;;  %10739 = vst [vmem:[#allocation56_spill] sm:$0xff] %v8126_v6  ;;  %v8130_v32 = vld [vmem:[#allocation2 + $0xc2] sm:$0xff] }
  0x85   : > { %10740 = vst [vmem:[#allocation57_spill] sm:$0xff] %v8130_v32 }
  0x87   : > { %2074 = vrot.lane.b32.xlu1 %v8110_v7, %s7437_s7  ;;  %v8134_v7 = vld [vmem:[#allocation2 + $0xb2] sm:$0xff] }
  0x88   : > { %2080 = vrot.lane.b32.xlu0 %v8114_v38, %s7437_s7  ;;  %10741 = vst [vmem:[#allocation58_spill] sm:$0xff] %v8134_v7  ;;  %v8138_v38 = vld [vmem:[#allocation2 + $0xda] sm:$0xff] }
  0x89   : > { %10742 = vst [vmem:[#allocation59_spill] sm:$0xff] %v8138_v38 }
  0x8b   : > { %2078 = vrot.lane.b32.xlu1 %v8118_v12, %s7437_s7  ;;  %v8142_v12 = vld [vmem:[#allocation2 + $0xca] sm:$0xff] }
  0x8c   : > { %2084 = vrot.lane.b32.xlu0 %v8122_v5, %s7437_s7  ;;  %10743 = vst [vmem:[#allocation60_spill] sm:$0xff] %v8142_v12  ;;  %v8146_v5 = vld [vmem:[#allocation2 + $0xf2] sm:$0xff] }
  0x8d   : > { %10744 = vst [vmem:[#allocation61_spill] sm:$0xff] %v8146_v5 }
  0x8f   : > { %2082 = vrot.lane.b32.xlu1 %v8126_v6, %s7437_s7  ;;  %v8150_v6 = vld [vmem:[#allocation2 + $0xe2] sm:$0xff] }
  0x90   : > { %2088 = vrot.lane.b32.xlu0 %v8130_v32, %s7437_s7  ;;  %10745 = vst [vmem:[#allocation62_spill] sm:$0xff] %v8150_v6  ;;  %v8154_v32 = vld [vmem:[#allocation2 + $0x10a] sm:$0xff]  ;;  %v1864_v13 = vpop.permute.xlu0 %1863 }
  0x91   : > { %10746 = vst [vmem:[#allocation63_spill] sm:$0xff] %v8154_v32  ;;  %1960 = vst.msk [vmem:[#allocation4] sm:$0xff] %vm1959_vm7, %v1864_v13  ;;  %v8184_v13 = vld [vmem:[#allocation2 + $0x142] sm:$0xff] }
  0x92   : > { %10752 = vst [vmem:[#allocation69_spill] sm:$0xff] %v8184_v13 }
  0x93   : > { %2086 = vrot.lane.b32.xlu1 %v8134_v7, %s7437_s7  ;;  %v8158_v7 = vld [vmem:[#allocation2 + $0xfa] sm:$0xff] }
  0x94   : > { %2092 = vrot.lane.b32.xlu0 %v8138_v38, %s7437_s7  ;;  %10747 = vst [vmem:[#allocation64_spill] sm:$0xff] %v8158_v7  ;;  %v8162_v38 = vld [vmem:[#allocation2 + $0x122] sm:$0xff] }
  0x95   : > { %10748 = vst [vmem:[#allocation65_spill] sm:$0xff] %v8162_v38 }
  0x97   : > { %2090 = vrot.lane.b32.xlu1 %v8142_v12, %s7437_s7 }
  0x98   : > { %2096 = vrot.lane.b32.xlu0 %v8146_v5, %s7437_s7  ;;  %v8167_v5 = vld [vmem:[#allocation2 + $0x112] sm:$0xff] }
  0x9b   : > { %2094 = vrot.lane.b32.xlu1 %v8150_v6, %s7437_s7  ;;  %v8171_v6 = vld [vmem:[#allocation2 + $0x13a] sm:$0xff] }
  0x9c   : > { %2100 = vrot.lane.b32.xlu0 %v8154_v32, %s7437_s7  ;;  %10749 = vst [vmem:[#allocation66_spill] sm:$0xff] %v8171_v6  ;;  %v8176_v32 = vld [vmem:[#allocation2 + $0x12a] sm:$0xff] }
  0x9d   : > { %10750 = vst [vmem:[#allocation67_spill] sm:$0xff] %v8176_v32 }
  0x9f   : > { %2098 = vrot.lane.b32.xlu1 %v8158_v7, %s7437_s7  ;;  %v8180_v7 = vld [vmem:[#allocation2 + $0x152] sm:$0xff] }
  0xa0   : > { %2104 = vrot.lane.b32.xlu0 %v8162_v38, %s7437_s7  ;;  %10751 = vst [vmem:[#allocation68_spill] sm:$0xff] %v8180_v7 }
  0xa2   : > { %v1866_v12 = vpop.permute.xlu0 %1865 }
  0xa3   : > { %2102 = vrot.lane.b32.xlu1 %v8167_v5, %s7437_s7  ;;  %1961 = vst.msk [vmem:[#allocation4 + $0x8] sm:$0xff] %vm1959_vm7, %v1866_v12 }
  0xa4   : > { %2108 = vrot.lane.b32.xlu0 %v8171_v6, %s7437_s7  ;;  %v8194_v6 = vld [vmem:[#allocation2 + $0x15a] sm:$0xff] }
  0xa7   : > { %2106 = vrot.lane.b32.xlu1 %v8176_v32, %s7437_s7 }
  0xa8   : > { %2112 = vrot.lane.b32.xlu0 %v8180_v7, %s7437_s7 }
  0xa9   : > { %v1868_v38 = vpop.permute.xlu1 %1867 }
  0xaa   : > { %1962 = vst.msk [vmem:[#allocation4 + $0x10] sm:$0xff] %vm1959_vm7, %v1868_v38  ;;  %v1872_v12 = vpop.permute.xlu0 %1871  ;;  %v8202_v38 = vld [vmem:[#allocation2 + $0x172] sm:$0xff] }
  0xab   : > { %2110 = vrot.lane.b32.xlu1 %v8184_v13, %s7437_s7  ;;  %1964 = vst.msk [vmem:[#allocation4 + $0x20] sm:$0xff] %vm1959_vm7, %v1872_v12 }
  0xac   : > { %2116 = vrot.lane.b32.xlu0 %v8188_v14, %s7437_s7 }
  0xad   : > { %v1870_v32 = vpop.permute.xlu1 %1869 }
  0xae   : > { %1963 = vst.msk [vmem:[#allocation4 + $0x18] sm:$0xff] %vm1959_vm7, %v1870_v32  ;;  %v1876_v7 = vpop.permute.xlu0 %1875 }
  0xaf   : > { %2114 = vrot.lane.b32.xlu1 %v8194_v6, %s7437_s7  ;;  %1966 = vst.msk [vmem:[#allocation4 + $0x30] sm:$0xff] %vm1959_vm7, %v1876_v7 }
  0xb0   : > { %2249 = vrot.lane.b32.xlu0 %v7764_v25, %s7438_s8 }
  0xb1   : > { %v1874_v12 = vpop.permute.xlu1 %1873 }
  0xb2   : > { %1965 = vst.msk [vmem:[#allocation4 + $0x28] sm:$0xff] %vm1959_vm7, %v1874_v12  ;;  %v1880_v13 = vpop.permute.xlu0 %1879 }
  0xb3   : > { %2118 = vrot.lane.b32.xlu1 %v8202_v38, %s7437_s7  ;;  %1968 = vst.msk [vmem:[#allocation4 + $0x40] sm:$0xff] %vm1959_vm7, %v1880_v13 }
  0xb4   : > { %2253 = vrot.lane.b32.xlu0 %v7782_v34, %s7438_s8 }
  0xb5   : > { %v1878_v32 = vpop.permute.xlu1 %1877 }
  0xb6   : > { %1967 = vst.msk [vmem:[#allocation4 + $0x38] sm:$0xff] %vm1959_vm7, %v1878_v32  ;;  %v1884_v7 = vpop.permute.xlu0 %1883 }
  0xb7   : > { %2251 = vrot.lane.b32.xlu1 %v7780_v31, %s7438_s8  ;;  %1970 = vst.msk [vmem:[#allocation4 + $0x50] sm:$0xff] %vm1959_vm7, %v1884_v7 }
  0xb8   : > { %2257 = vrot.lane.b32.xlu0 %v7882_v47, %s7438_s8 }
  0xb9   : > { %v1882_v25 = vpop.permute.xlu1 %1881 }
  0xba   : > { %1969 = vst.msk [vmem:[#allocation4 + $0x48] sm:$0xff] %vm1959_vm7, %v1882_v25  ;;  %v1888_v12 = vpop.permute.xlu0 %1887 }
  0xbb   : > { %2255 = vrot.lane.b32.xlu1 %v7880_v46, %s7438_s8  ;;  %1972 = vst.msk [vmem:[#allocation4 + $0x60] sm:$0xff] %vm1959_vm7, %v1888_v12 }
  0xbc   : > { %2261 = vrot.lane.b32.xlu0 %v7901_v54, %s7438_s8 }
  0xbd   : > { %v1886_v13 = vpop.permute.xlu1 %1885 }
  0xbe   : > { %1971 = vst.msk [vmem:[#allocation4 + $0x58] sm:$0xff] %vm1959_vm7, %v1886_v13  ;;  %v1892_v31 = vpop.permute.xlu0 %1891 }
  0xbf   : > { %2259 = vrot.lane.b32.xlu1 %v7897_v51, %s7438_s8  ;;  %1974 = vst.msk [vmem:[#allocation4 + $0x70] sm:$0xff] %vm1959_vm7, %v1892_v31 }
  0xc0   : > { %2265 = vrot.lane.b32.xlu0 %v7905_v63, %s7438_s8 }
  0xc1   : > { %v1890_v32 = vpop.permute.xlu1 %1889 }
  0xc2   : > { %1973 = vst.msk [vmem:[#allocation4 + $0x68] sm:$0xff] %vm1959_vm7, %v1890_v32  ;;  %v1896_v7 = vpop.permute.xlu0 %1895 }
  0xc3   : > { %2263 = vrot.lane.b32.xlu1 %v7903_v56, %s7438_s8  ;;  %1976 = vst.msk [vmem:[#allocation4 + $0x80] sm:$0xff] %vm1959_vm7, %v1896_v7 }
  0xc4   : > { %2269 = vrot.lane.b32.xlu0 %v7927_v21, %s7438_s8 }
  0xc5   : > { %v1894_v25 = vpop.permute.xlu1 %1893 }
  0xc6   : > { %1975 = vst.msk [vmem:[#allocation4 + $0x78] sm:$0xff] %vm1959_vm7, %v1894_v25  ;;  %v1900_v12 = vpop.permute.xlu0 %1899 }
  0xc7   : > { %2267 = vrot.lane.b32.xlu1 %v7919_v15, %s7438_s8  ;;  %1978 = vst.msk [vmem:[#allocation4 + $0x90] sm:$0xff] %vm1959_vm7, %v1900_v12 }
  0xc8   : > { %2273 = vrot.lane.b32.xlu0 %v7931_v27, %s7438_s8 }
  0xc9   : > { %v1898_v13 = vpop.permute.xlu1 %1897 }
  0xca   : > { %1977 = vst.msk [vmem:[#allocation4 + $0x88] sm:$0xff] %vm1959_vm7, %v1898_v13  ;;  %v1904_v31 = vpop.permute.xlu0 %1903 }
  0xcb   : > { %2271 = vrot.lane.b32.xlu1 %v7929_v24, %s7438_s8  ;;  %1980 = vst.msk [vmem:[#allocation4 + $0xa0] sm:$0xff] %vm1959_vm7, %v1904_v31 }
  0xcc   : > { %2277 = vrot.lane.b32.xlu0 %v7945_v42, %s7438_s8 }
  0xcd   : > { %v1902_v32 = vpop.permute.xlu1 %1901 }
  0xce   : > { %1979 = vst.msk [vmem:[#allocation4 + $0x98] sm:$0xff] %vm1959_vm7, %v1902_v32  ;;  %v1908_v7 = vpop.permute.xlu0 %1907 }
  0xcf   : > { %2275 = vrot.lane.b32.xlu1 %v7943_v39, %s7438_s8  ;;  %1982 = vst.msk [vmem:[#allocation4 + $0xb0] sm:$0xff] %vm1959_vm7, %v1908_v7  ;;  %v2215_v7 = vld [vmem:[#allocation2 + $0x180] sm:$0xff] }
  0xd0   : > { %2281 = vrot.lane.b32.xlu0 %v7957_v0, %s7438_s8 }
  0xd1   : > { %v1906_v25 = vpop.permute.xlu1 %1905 }
  0xd2   : > { %1981 = vst.msk [vmem:[#allocation4 + $0xa8] sm:$0xff] %vm1959_vm7, %v1906_v25  ;;  %v1912_v12 = vpop.permute.xlu0 %1911  ;;  %v2378_v25 = vld [vmem:[#allocation2 + $0x19] sm:$0xff] }
  0xd3   : > { %2279 = vrot.lane.b32.xlu1 %v7947_v45, %s7438_s8  ;;  %1984 = vst.msk [vmem:[#allocation4 + $0xc0] sm:$0xff] %vm1959_vm7, %v1912_v12 }
  0xd4   : > { %2285 = vrot.lane.b32.xlu0 %v7961_v9, %s7438_s8 }
  0xd5   : > { %v1910_v13 = vpop.permute.xlu1 %1909 }
  0xd6   : > { %1983 = vst.msk [vmem:[#allocation4 + $0xb8] sm:$0xff] %vm1959_vm7, %v1910_v13  ;;  %v1916_v31 = vpop.permute.xlu0 %1915 }
  0xd7   : > { %2283 = vrot.lane.b32.xlu1 %v7959_v16, %s7438_s8  ;;  %1986 = vst.msk [vmem:[#allocation4 + $0xd0] sm:$0xff] %vm1959_vm7, %v1916_v31 }
  0xd8   : > { %2289 = vrot.lane.b32.xlu0 %v7971_v57, %s7438_s8 }
  0xd9   : > { %v1914_v0 = vpop.permute.xlu1 %1913 }
  0xda   : > { %1985 = vst.msk [vmem:[#allocation4 + $0xc8] sm:$0xff] %vm1959_vm7, %v1914_v0  ;;  %v1920_v32 = vpop.permute.xlu0 %1919 }
  0xdb   : > { %2287 = vrot.lane.b32.xlu1 %v7969_v3, %s7438_s8  ;;  %1988 = vst.msk [vmem:[#allocation4 + $0xe0] sm:$0xff] %vm1959_vm7, %v1920_v32  ;;  %v10753_v32 = vld [vmem:[#allocation39_spill] sm:$0xff] }
  0xdc   : > { %2293 = vrot.lane.b32.xlu0 %v7983_v41, %s7438_s8 }
  0xdd   : > { %v1918_v9 = vpop.permute.xlu1 %1917 }
  0xde   : > { %1987 = vst.msk [vmem:[#allocation4 + $0xd8] sm:$0xff] %vm1959_vm7, %v1918_v9  ;;  %v1924_v16 = vpop.permute.xlu0 %1923 }
  0xdf   : > { %2291 = vrot.lane.b32.xlu1 %v7973_v61, %s7438_s8  ;;  %1990 = vst.msk [vmem:[#allocation4 + $0xf0] sm:$0xff] %vm1959_vm7, %v1924_v16  ;;  %v2408_v16 = vld [vmem:[#allocation2 + $0x181] sm:$0xff] }
  0xe0   : > { %2297 = vrot.lane.b32.xlu0 %v7999_v23, %s7438_s8 }
  0xe1   : > { %v1922_v57 = vpop.permute.xlu1 %1921 }
  0xe2   : > { %1989 = vst.msk [vmem:[#allocation4 + $0xe8] sm:$0xff] %vm1959_vm7, %v1922_v57  ;;  %v2057_v3 = vpop.permute.xlu0 %2056 }
  0xe3   : > { %2295 = vrot.lane.b32.xlu1 %v7985_v30, %s7438_s8  ;;  %2153 = vst.msk [vmem:[#allocation4] sm:$0xff] %vm2152_vm8, %v2057_v3 }
  0xe4   : > { %2301 = vrot.lane.b32.xlu0 %v8015_v59, %s7438_s8 }
  0xe5   : > { %v1926_v41 = vpop.permute.xlu1 %1925 }
  0xe6   : > { %1991 = vst.msk [vmem:[#allocation4 + $0xf8] sm:$0xff] %vm1959_vm7, %v1926_v41  ;;  %v2061_v61 = vpop.permute.xlu0 %2060  ;;  %v10755_v41 = vld [vmem:[#allocation43_spill] sm:$0xff]  ;;  %vm3118_vm7 = vcmask 261344  }
  0xe7   : > { %2299 = vrot.lane.b32.xlu1 %v8001_v22, %s7438_s8  ;;  %2155 = vst.msk [vmem:[#allocation4 + $0x10] sm:$0xff] %vm2152_vm8, %v2061_v61  ;;  %v10756_v61 = vld [vmem:[#allocation44_spill] sm:$0xff] }
  0xe8   : > { %2305 = vrot.lane.b32.xlu0 %v8031_v33, %s7438_s8  ;;  %v2216_v33 = vld [vmem:[#allocation2 + $0x188] sm:$0xff] }
  0xe9   : > { %v2059_v23 = vpop.permute.xlu1 %2058 }
  0xea   : > { %2154 = vst.msk [vmem:[#allocation4 + $0x8] sm:$0xff] %vm2152_vm8, %v2059_v23  ;;  %v2065_v30 = vpop.permute.xlu0 %2064 }
  0xeb   : > { %2303 = vrot.lane.b32.xlu1 %v8017_v58, %s7438_s8  ;;  %2157 = vst.msk [vmem:[#allocation4 + $0x20] sm:$0xff] %vm2152_vm8, %v2065_v30 }
  0xec   : > { %2309 = vrot.lane.b32.xlu0 %v2215_v7, %s7438_s8  ;;  %v10757_v7 = vld [vmem:[#allocation45_spill] sm:$0xff] }
  0xed   : > { %v2063_v59 = vpop.permute.xlu1 %2062 }
  0xee   : > { %2156 = vst.msk [vmem:[#allocation4 + $0x18] sm:$0xff] %vm2152_vm8, %v2063_v59  ;;  %v2069_v22 = vpop.permute.xlu0 %2068 }
  0xef   : > { %2307 = vrot.lane.b32.xlu1 %v8033_v53, %s7438_s8  ;;  %2159 = vst.msk [vmem:[#allocation4 + $0x30] sm:$0xff] %vm2152_vm8, %v2069_v22  ;;  %v10759_v22 = vld [vmem:[#allocation47_spill] sm:$0xff] }
  0xf0   : > { %2442 = vrot.lane.b32.xlu0 %v2378_v25, %s7439_s9  ;;  %v10758_v25 = vld [vmem:[#allocation46_spill] sm:$0xff] }
  0xf1   : > { %v2067_v12 = vpop.permute.xlu1 %2066 }
  0xf2   : > { %2158 = vst.msk [vmem:[#allocation4 + $0x28] sm:$0xff] %vm2152_vm8, %v2067_v12  ;;  %v2073_v58 = vpop.permute.xlu0 %2072 }
  0xf3   : > { %2311 = vrot.lane.b32.xlu1 %v2216_v33, %s7438_s8  ;;  %2161 = vst.msk [vmem:[#allocation4 + $0x40] sm:$0xff] %vm2152_vm8, %v2073_v58  ;;  %v10760_v58 = vld [vmem:[#allocation48_spill] sm:$0xff]  ;;  %s7445_s8 = smov 40  }
  0xf4   : > { %2446 = vrot.lane.b32.xlu0 %v7708_v55, %s7439_s9 }
  0xf5   : > { %v2071_v13 = vpop.permute.xlu1 %2070 }
  0xf6   : > { %2160 = vst.msk [vmem:[#allocation4 + $0x38] sm:$0xff] %vm2152_vm8, %v2071_v13  ;;  %v2077_v53 = vpop.permute.xlu0 %2076  ;;  %v10761_v13 = vld [vmem:[#allocation49_spill] sm:$0xff] }
  0xf7   : > { %2444 = vrot.lane.b32.xlu1 %v7720_v60, %s7439_s9  ;;  %2163 = vst.msk [vmem:[#allocation4 + $0x50] sm:$0xff] %vm2152_vm8, %v2077_v53 }
  0xf8   : > { %2450 = vrot.lane.b32.xlu0 %v7732_v1, %s7439_s9 }
  0xf9   : > { %v2075_v31 = vpop.permute.xlu1 %2074 }
  0xfa   : > { %2162 = vst.msk [vmem:[#allocation4 + $0x48] sm:$0xff] %vm2152_vm8, %v2075_v31  ;;  %v2081_v0 = vpop.permute.xlu0 %2080 }
  0xfb   : > { %2448 = vrot.lane.b32.xlu1 %v7751_v19, %s7439_s9  ;;  %2165 = vst.msk [vmem:[#allocation4 + $0x60] sm:$0xff] %vm2152_vm8, %v2081_v0  ;;  %v10762_v0 = vld [vmem:[#allocation50_spill] sm:$0xff] }
  0xfc   : > { %2454 = vrot.lane.b32.xlu0 %v7766_v26, %s7439_s9 }
  0xfd   : > { %v2079_v55 = vpop.permute.xlu1 %2078 }
  0xfe   : > { %2164 = vst.msk [vmem:[#allocation4 + $0x58] sm:$0xff] %vm2152_vm8, %v2079_v55  ;;  %v2085_v60 = vpop.permute.xlu0 %2084  ;;  %v10763_v55 = vld [vmem:[#allocation51_spill] sm:$0xff] }
  0xff   : > { %2452 = vrot.lane.b32.xlu1 %v7805_v44, %s7439_s9  ;;  %2167 = vst.msk [vmem:[#allocation4 + $0x70] sm:$0xff] %vm2152_vm8, %v2085_v60 }
 0x100   : > { %2458 = vrot.lane.b32.xlu0 %v7813_v48, %s7439_s9 }
 0x101   : > { %v2083_v1 = vpop.permute.xlu1 %2082 }
 0x102   : > { %2166 = vst.msk [vmem:[#allocation4 + $0x68] sm:$0xff] %vm2152_vm8, %v2083_v1  ;;  %v2089_v19 = vpop.permute.xlu0 %2088 }
 0x103   : > { %2456 = vrot.lane.b32.xlu1 %v7843_v10, %s7439_s9  ;;  %2169 = vst.msk [vmem:[#allocation4 + $0x80] sm:$0xff] %vm2152_vm8, %v2089_v19  ;;  %v10764_v19 = vld [vmem:[#allocation52_spill] sm:$0xff] }
 0x104   : > { %2462 = vrot.lane.b32.xlu0 %v7854_v17, %s7439_s9 }
 0x105   : > { %v2087_v26 = vpop.permute.xlu1 %2086 }
 0x106   : > { %2168 = vst.msk [vmem:[#allocation4 + $0x78] sm:$0xff] %vm2152_vm8, %v2087_v26  ;;  %v2093_v44 = vpop.permute.xlu0 %2092  ;;  %v10765_v26 = vld [vmem:[#allocation53_spill] sm:$0xff] }
 0x107   : > { %2460 = vrot.lane.b32.xlu1 %v7869_v40, %s7439_s9  ;;  %2171 = vst.msk [vmem:[#allocation4 + $0x90] sm:$0xff] %vm2152_vm8, %v2093_v44 }
 0x108   : > { %2466 = vrot.lane.b32.xlu0 %v7876_v43, %s7439_s9 }
 0x109   : > { %v2091_v48 = vpop.permute.xlu1 %2090 }
 0x10a   : > { %2170 = vst.msk [vmem:[#allocation4 + $0x88] sm:$0xff] %vm2152_vm8, %v2091_v48  ;;  %v2097_v10 = vpop.permute.xlu0 %2096 }
 0x10b   : > { %2464 = vrot.lane.b32.xlu1 %v7891_v49, %s7439_s9  ;;  %2173 = vst.msk [vmem:[#allocation4 + $0xa0] sm:$0xff] %vm2152_vm8, %v2097_v10  ;;  %v10766_v10 = vld [vmem:[#allocation54_spill] sm:$0xff] }
 0x10c   : > { %2470 = vrot.lane.b32.xlu0 %v7895_v50, %s7439_s9 }
 0x10d   : > { %v2095_v17 = vpop.permute.xlu1 %2094 }
 0x10e   : > { %2172 = vst.msk [vmem:[#allocation4 + $0x98] sm:$0xff] %vm2152_vm8, %v2095_v17  ;;  %v2101_v40 = vpop.permute.xlu0 %2100  ;;  %v10767_v17 = vld [vmem:[#allocation55_spill] sm:$0xff] }
 0x10f   : > { %2468 = vrot.lane.b32.xlu1 %v7915_v2, %s7439_s9  ;;  %2175 = vst.msk [vmem:[#allocation4 + $0xb0] sm:$0xff] %vm2152_vm8, %v2101_v40 }
 0x110   : > { %2474 = vrot.lane.b32.xlu0 %v7921_v18, %s7439_s9 }
 0x111   : > { %v2099_v43 = vpop.permute.xlu1 %2098 }
 0x112   : > { %2174 = vst.msk [vmem:[#allocation4 + $0xa8] sm:$0xff] %vm2152_vm8, %v2099_v43  ;;  %v2105_v49 = vpop.permute.xlu0 %2104 }
 0x113   : > { %2472 = vrot.lane.b32.xlu1 %v7925_v20, %s7439_s9  ;;  %2177 = vst.msk [vmem:[#allocation4 + $0xc0] sm:$0xff] %vm2152_vm8, %v2105_v49  ;;  %v10768_v49 = vld [vmem:[#allocation56_spill] sm:$0xff] }
 0x114   : > { %2478 = vrot.lane.b32.xlu0 %v7935_v35, %s7439_s9 }
 0x115   : > { %v2103_v50 = vpop.permute.xlu1 %2102 }
 0x116   : > { %2176 = vst.msk [vmem:[#allocation4 + $0xb8] sm:$0xff] %vm2152_vm8, %v2103_v50  ;;  %v2109_v2 = vpop.permute.xlu0 %2108  ;;  %v10769_v50 = vld [vmem:[#allocation57_spill] sm:$0xff] }
 0x117   : > { %2476 = vrot.lane.b32.xlu1 %v7987_v28, %s7439_s9  ;;  %2179 = vst.msk [vmem:[#allocation4 + $0xd0] sm:$0xff] %vm2152_vm8, %v2109_v2 }
 0x118   : > { %2482 = vrot.lane.b32.xlu0 %v7995_v29, %s7439_s9 }
 0x119   : > { %v2107_v18 = vpop.permute.xlu1 %2106 }
 0x11a   : > { %2178 = vst.msk [vmem:[#allocation4 + $0xc8] sm:$0xff] %vm2152_vm8, %v2107_v18  ;;  %v2113_v20 = vpop.permute.xlu0 %2112 }
 0x11b   : > { %2480 = vrot.lane.b32.xlu1 %v8003_v62, %s7439_s9  ;;  %2181 = vst.msk [vmem:[#allocation4 + $0xe0] sm:$0xff] %vm2152_vm8, %v2113_v20  ;;  %v10770_v20 = vld [vmem:[#allocation58_spill] sm:$0xff] }
 0x11c   : > { %2486 = vrot.lane.b32.xlu0 %v8011_v8, %s7439_s9  ;;  %v10754_v8 = vld [vmem:[#allocation40_spill] sm:$0xff] }
 0x11d   : > { %v2111_v35 = vpop.permute.xlu1 %2110 }
 0x11e   : > { %2180 = vst.msk [vmem:[#allocation4 + $0xd8] sm:$0xff] %vm2152_vm8, %v2111_v35  ;;  %v2117_v28 = vpop.permute.xlu0 %2116  ;;  %v10771_v35 = vld [vmem:[#allocation59_spill] sm:$0xff] }
 0x11f   : > { %2484 = vrot.lane.b32.xlu1 %v8019_v52, %s7439_s9  ;;  %2183 = vst.msk [vmem:[#allocation4 + $0xf0] sm:$0xff] %vm2152_vm8, %v2117_v28 }
 0x120   : > { %2490 = vrot.lane.b32.xlu0 %v8027_v37, %s7439_s9 }
 0x121   : > { %v2115_v29 = vpop.permute.xlu1 %2114 }
 0x122   : > { %2182 = vst.msk [vmem:[#allocation4 + $0xe8] sm:$0xff] %vm2152_vm8, %v2115_v29  ;;  %v2250_v62 = vpop.permute.xlu0 %2249 }
 0x123   : > { %2488 = vrot.lane.b32.xlu1 %v10753_v32, %s7439_s9  ;;  %2346 = vst.msk [vmem:[#allocation4] sm:$0xff] %vm2345_vm9, %v2250_v62  ;;  %v10772_v62 = vld [vmem:[#allocation60_spill] sm:$0xff]  ;;  %v10773_v32 = vld [vmem:[#allocation61_spill] sm:$0xff] }
 0x124   : > { %2494 = vrot.lane.b32.xlu0 %v10754_v8, %s7439_s9 }
 0x125   : > { %v2119_v9 = vpop.permute.xlu1 %2118 }
 0x126   : > { %2184 = vst.msk [vmem:[#allocation4 + $0xf8] sm:$0xff] %vm2152_vm8, %v2119_v9  ;;  %v2254_v52 = vpop.permute.xlu0 %2253  ;;  %vm3311_vm8 = vcmask 294144  }
 0x127   : > { %2492 = vrot.lane.b32.xlu1 %v8052_v36, %s7439_s9  ;;  %2348 = vst.msk [vmem:[#allocation4 + $0x10] sm:$0xff] %vm2345_vm9, %v2254_v52  ;;  %v10774_v52 = vld [vmem:[#allocation62_spill] sm:$0xff] }
 0x128   : > { %2498 = vrot.lane.b32.xlu0 %v8058_v11, %s7439_s9  ;;  %v2409_v11 = vld [vmem:[#allocation2 + $0x189] sm:$0xff] }
 0x129   : > { %v2252_v37 = vpop.permute.xlu1 %2251 }
 0x12a   : > { %2347 = vst.msk [vmem:[#allocation4 + $0x8] sm:$0xff] %vm2345_vm9, %v2252_v37  ;;  %v2258_v57 = vpop.permute.xlu0 %2257  ;;  %v10775_v37 = vld [vmem:[#allocation63_spill] sm:$0xff] }
 0x12b   : > { %2496 = vrot.lane.b32.xlu1 %v8068_v4, %s7439_s9  ;;  %2350 = vst.msk [vmem:[#allocation4 + $0x20] sm:$0xff] %vm2345_vm9, %v2258_v57 }
 0x12c   : > { %2502 = vrot.lane.b32.xlu0 %v2408_v16, %s7439_s9 }
 0x12d   : > { %v2256_v3 = vpop.permute.xlu1 %2255 }
 0x12e   : > { %2349 = vst.msk [vmem:[#allocation4 + $0x18] sm:$0xff] %vm2345_vm9, %v2256_v3  ;;  %v2262_v36 = vpop.permute.xlu0 %2261  ;;  %v10776_v3 = vld [vmem:[#allocation64_spill] sm:$0xff] }
 0x12f   : > { %2500 = vrot.lane.b32.xlu1 %v10755_v41, %s7439_s9  ;;  %2352 = vst.msk [vmem:[#allocation4 + $0x30] sm:$0xff] %vm2345_vm9, %v2262_v36  ;;  %v10777_v36 = vld [vmem:[#allocation65_spill] sm:$0xff] }
 0x130   : > { %2635 = vrot.lane.b32.xlu0 %v10756_v61, %s7440_s10  ;;  %v10778_v61 = vld [vmem:[#allocation66_spill] sm:$0xff] }
 0x131   : > { %v2260_v23 = vpop.permute.xlu1 %2259 }
 0x132   : > { %2351 = vst.msk [vmem:[#allocation4 + $0x28] sm:$0xff] %vm2345_vm9, %v2260_v23  ;;  %v2266_v4 = vpop.permute.xlu0 %2265 }
 0x133   : > { %2504 = vrot.lane.b32.xlu1 %v2409_v11, %s7439_s9  ;;  %2354 = vst.msk [vmem:[#allocation4 + $0x40] sm:$0xff] %vm2345_vm9, %v2266_v4 }
 0x134   : > { %2639 = vrot.lane.b32.xlu0 %v10757_v7, %s7440_s10  ;;  %v10779_v7 = vld [vmem:[#allocation67_spill] sm:$0xff] }
 0x135   : > { %v2264_v30 = vpop.permute.xlu1 %2263 }
 0x136   : > { %2353 = vst.msk [vmem:[#allocation4 + $0x38] sm:$0xff] %vm2345_vm9, %v2264_v30  ;;  %v2270_v59 = vpop.permute.xlu0 %2269  ;;  %v10780_v30 = vld [vmem:[#allocation68_spill] sm:$0xff] }
 0x137   : > { %2637 = vrot.lane.b32.xlu1 %v10758_v25, %s7440_s10  ;;  %2356 = vst.msk [vmem:[#allocation4 + $0x50] sm:$0xff] %vm2345_vm9, %v2270_v59 }
 0x138   : > { %2643 = vrot.lane.b32.xlu0 %v10759_v22, %s7440_s10  ;;  %v421_v22 = vlaneseq }
 0x139   : > { %v2268_v33 = vpop.permute.xlu1 %2267 }
 0x13a   : > { %2355 = vst.msk [vmem:[#allocation4 + $0x48] sm:$0xff] %vm2345_vm9, %v2268_v33  ;;  %v2274_v12 = vpop.permute.xlu0 %2273 }
 0x13b   : > { %2641 = vrot.lane.b32.xlu1 %v10760_v58, %s7440_s10  ;;  %2358 = vst.msk [vmem:[#allocation4 + $0x60] sm:$0xff] %vm2345_vm9, %v2274_v12  ;;  %v10781_v12 = vld [vmem:[#allocation69_spill] sm:$0xff] }
 0x13c   : > { %2647 = vrot.lane.b32.xlu0 %v10761_v13, %s7440_s10  ;;  %v422_v13 = vshrl.u32 %v421_v22, 7 }
 0x13d   : > { %v2272_v53 = vpop.permute.xlu1 %2271 }
 0x13e   : > { %2357 = vst.msk [vmem:[#allocation4 + $0x58] sm:$0xff] %vm2345_vm9, %v2272_v53  ;;  %v2278_v31 = vpop.permute.xlu0 %2277  ;;  %v10782_v53 = vld [vmem:[#allocation9_spill] sm:$0xff] }
 0x13f   : > { %2645 = vrot.lane.b32.xlu1 %v10762_v0, %s7440_s10  ;;  %2360 = vst.msk [vmem:[#allocation4 + $0x70] sm:$0xff] %vm2345_vm9, %v2278_v31  ;;  %v353_v31 = vsel %vm197_vm0, %v10782_v53, 0.0  ;;  %v10783_v0 = vld [vmem:[#allocation11_spill] sm:$0xff] }
 0x140   : > { %2651 = vrot.lane.b32.xlu0 %v10763_v55, %s7440_s10  ;;  %v354_v55 = vsel %vm197_vm0, %v10783_v0, 0.0 }
 0x141   : > { %v2276_v60 = vpop.permute.xlu1 %2275 }
 0x142   : > { %2359 = vst.msk [vmem:[#allocation4 + $0x68] sm:$0xff] %vm2345_vm9, %v2276_v60  ;;  %v2282_v1 = vpop.permute.xlu0 %2281  ;;  %v10784_v60 = vld [vmem:[#allocation13_spill] sm:$0xff] }
 0x143   : > { %2649 = vrot.lane.b32.xlu1 %v10764_v19, %s7440_s10  ;;  %2362 = vst.msk [vmem:[#allocation4 + $0x80] sm:$0xff] %vm2345_vm9, %v2282_v1  ;;  %v359_v1 = vsel %vm197_vm0, %v10784_v60, 0.0  ;;  %v10785_v19 = vld [vmem:[#allocation15_spill] sm:$0xff] }
 0x144   : > { %2655 = vrot.lane.b32.xlu0 %v10765_v26, %s7440_s10  ;;  %v360_v26 = vsel %vm197_vm0, %v10785_v19, 0.0 }
 0x145   : > { %v2280_v44 = vpop.permute.xlu1 %2279 }
 0x146   : > { %2361 = vst.msk [vmem:[#allocation4 + $0x78] sm:$0xff] %vm2345_vm9, %v2280_v44  ;;  %v2286_v48 = vpop.permute.xlu0 %2285 }
 0x147   : > { %2653 = vrot.lane.b32.xlu1 %v10766_v10, %s7440_s10  ;;  %2364 = vst.msk [vmem:[#allocation4 + $0x90] sm:$0xff] %vm2345_vm9, %v2286_v48  ;;  %v2601_v48 = vld [vmem:[#allocation2 + $0x182] sm:$0xff]  ;;  %v355_v10 = vadd.f32 %v354_v55, %v353_v31 }
 0x148   : > { %2659 = vrot.lane.b32.xlu0 %v10767_v17, %s7440_s10  ;;  %v361_v17 = vadd.f32 %v360_v26, %v359_v1 }
 0x149   : > { %v2284_v40 = vpop.permute.xlu1 %2283 }
 0x14a   : > { %2363 = vst.msk [vmem:[#allocation4 + $0x88] sm:$0xff] %vm2345_vm9, %v2284_v40  ;;  %v2290_v43 = vpop.permute.xlu0 %2289 }
 0x14b   : > { %2657 = vrot.lane.b32.xlu1 %v10768_v49, %s7440_s10  ;;  %2366 = vst.msk [vmem:[#allocation4 + $0xa0] sm:$0xff] %vm2345_vm9, %v2290_v43  ;;  %v10786_v43 = vld [vmem:[#allocation17_spill] sm:$0xff] }
 0x14c   : > { %2663 = vrot.lane.b32.xlu0 %v10769_v50, %s7440_s10  ;;  %v365_v49 = vsel %vm197_vm0, %v10786_v43, 0.0  ;;  %v10787_v50 = vld [vmem:[#allocation19_spill] sm:$0xff] }
 0x14d   : > { %v2288_v2 = vpop.permute.xlu1 %2287 }
 0x14e   : > { %2365 = vst.msk [vmem:[#allocation4 + $0x98] sm:$0xff] %vm2345_vm9, %v2288_v2  ;;  %v2294_v18 = vpop.permute.xlu0 %2293  ;;  %v366_v2 = vsel %vm197_vm0, %v10787_v50, 0.0 }
 0x14f   : > { %2661 = vrot.lane.b32.xlu1 %v10770_v20, %s7440_s10  ;;  %2368 = vst.msk [vmem:[#allocation4 + $0xb0] sm:$0xff] %vm2345_vm9, %v2294_v18  ;;  %v10788_v18 = vld [vmem:[#allocation21_spill] sm:$0xff] }
 0x150   : > { %2667 = vrot.lane.b32.xlu0 %v10771_v35, %s7440_s10  ;;  %v8494_v20 = vsel %vm197_vm0, %v10788_v18, 0.0  ;;  %v417_v35 = vcombine.high %v355_v10, %v355_v10 }
 0x151   : > { %v2292_v28 = vpop.permute.xlu1 %2291 }
 0x152   : > { %2367 = vst.msk [vmem:[#allocation4 + $0xa8] sm:$0xff] %vm2345_vm9, %v2292_v28  ;;  %v2298_v29 = vpop.permute.xlu0 %2297 }
 0x153   : > { %2665 = vrot.lane.b32.xlu1 %v10772_v62, %s7440_s10  ;;  %2370 = vst.msk [vmem:[#allocation4 + $0xc0] sm:$0xff] %vm2345_vm9, %v2298_v29  ;;  %v451_v29 = vcombine.high %v361_v17, %v361_v17 }
 0x154   : > { %2671 = vrot.lane.b32.xlu0 %v10773_v32, %s7440_s10  ;;  %v10789_v32 = vld [vmem:[#allocation10_spill] sm:$0xff] }
 0x155   : > { %v2296_v8 = vpop.permute.xlu1 %2295 }
 0x156   : > { %2369 = vst.msk [vmem:[#allocation4 + $0xb8] sm:$0xff] %vm2345_vm9, %v2296_v8  ;;  %v2302_v9 = vpop.permute.xlu0 %2301  ;;  %v356_v8 = vsel %vm197_vm0, %v10789_v32, 0.0 }
 0x157   : > { %2669 = vrot.lane.b32.xlu1 %v10774_v52, %s7440_s10  ;;  %2372 = vst.msk [vmem:[#allocation4 + $0xd0] sm:$0xff] %vm2345_vm9, %v2302_v9  ;;  %v10790_v9 = vld [vmem:[#allocation12_spill] sm:$0xff] }
 0x158   : > { %2675 = vrot.lane.b32.xlu0 %v10775_v37, %s7440_s10  ;;  %v357_v52 = vsel %vm197_vm0, %v10790_v9, 0.0  ;;  %v10791_v37 = vld [vmem:[#allocation14_spill] sm:$0xff] }
 0x159   : > { %v2300_v16 = vpop.permute.xlu1 %2299 }
 0x15a   : > { %2371 = vst.msk [vmem:[#allocation4 + $0xc8] sm:$0xff] %vm2345_vm9, %v2300_v16  ;;  %v2306_v57 = vpop.permute.xlu0 %2305  ;;  %v10792_v16 = vld [vmem:[#allocation16_spill] sm:$0xff] }
 0x15b   : > { %2673 = vrot.lane.b32.xlu1 %v10776_v3, %s7440_s10  ;;  %2374 = vst.msk [vmem:[#allocation4 + $0xe0] sm:$0xff] %vm2345_vm9, %v2306_v57  ;;  %v363_v57 = vsel %vm197_vm0, %v10792_v16, 0.0 }
 0x15c   : > { %2679 = vrot.lane.b32.xlu0 %v10777_v36, %s7440_s10  ;;  %v358_v36 = vadd.f32 %v357_v52, %v356_v8 }
 0x15d   : > { %v2304_v41 = vpop.permute.xlu1 %2303 }
 0x15e   : > { %2373 = vst.msk [vmem:[#allocation4 + $0xd8] sm:$0xff] %vm2345_vm9, %v2304_v41  ;;  %v2310_v11 = vpop.permute.xlu0 %2309  ;;  %v434_v22 = vcombine.high %v358_v36, %v358_v36 }
 0x15f   : > { %2677 = vrot.lane.b32.xlu1 %v8167_v5, %s7440_s10  ;;  %2376 = vst.msk [vmem:[#allocation4 + $0xf0] sm:$0xff] %vm2345_vm9, %v2310_v11  ;;  %v7441_v5 = vmov 1983009808  }
 0x160   : > { %2683 = vrot.lane.b32.xlu0 %v10778_v61, %s7440_s10  ;;  %v419_v25 = vunpack.c.l.s4 %v7441_v5 }
 0x161   : > { %v2308_v23 = vpop.permute.xlu1 %2307 }
 0x162   : > { %2375 = vst.msk [vmem:[#allocation4 + $0xe8] sm:$0xff] %vm2345_vm9, %v2308_v23  ;;  %v2443_v4 = vpop.permute.xlu0 %2442  ;;  %v420_v58 = vunpack.c.0.s8 %v419_v25 }
 0x163   : > { %2681 = vrot.lane.b32.xlu1 %v10779_v7, %s7440_s10  ;;  %2539 = vst.msk [vmem:[#allocation4] sm:$0xff] %vm2538_vm10, %v2443_v4 }
 0x164   : > { %2687 = vrot.lane.b32.xlu0 %v10780_v30, %s7440_s10  ;;  %v8485_v40 = vsub.s32 %v420_v58, %v422_v13  ;;  %v8519_v30 = vadd.f32 %v366_v2, %v365_v49  ;;  %v2602_v58 = vld [vmem:[#allocation2 + $0x18a] sm:$0xff] }
 0x165   : > { %v2312_v59 = vpop.permute.xlu1 %2311 }
 0x166   : > { %2377 = vst.msk [vmem:[#allocation4 + $0xf8] sm:$0xff] %vm2345_vm9, %v2312_v59  ;;  %v2447_v33 = vpop.permute.xlu0 %2446  ;;  %v424_v28 = vrot.slane %v355_v10, %v8485_v40  ;;  %v8501_v62 = vrot.slane %v361_v17, %v8485_v40  ;;  %v431_v11 = vrot.slane %v417_v35, %v8485_v40  ;;  %v8515_v4 = vrot.slane %v451_v29, %v8485_v40  ;;  %v10793_v59 = vld [vmem:[#allocation23_spill] sm:$0xff] }
 0x167   : > { %2685 = vrot.lane.b32.xlu1 %v10781_v12, %s7440_s10  ;;  %2541 = vst.msk [vmem:[#allocation4 + $0x10] sm:$0xff] %vm2538_vm10, %v2447_v33  ;;  %v8523_v5 = vsel %vm197_vm0, %v10793_v59, 0.0  ;;  %v441_v33 = vrot.slane %v358_v36, %v8485_v40  ;;  %v448_v60 = vrot.slane %v434_v22, %v8485_v40  ;;  %vm246_vm9 = vcmask 58368  }
 0x168   : > { %2691 = vrot.lane.b32.xlu0 %v8188_v14, %s7440_s10  ;;  %v432_v61 = vcombine.high %v424_v28, %v424_v28  ;;  %v466_v7 = vcombine.high %v8501_v62, %v8501_v62  ;;  %v433_v25 = vcombine.high %v431_v11, %v431_v11  ;;  %v753_v53 = vsel %vm200_vm2, %v424_v28, 0.0 }
 0x169   : > { %v2445_v44 = vpop.permute.xlu1 %2444  ;;  %v449_v1 = vcombine.high %v441_v33, %v441_v33  ;;  %v467_v19 = vcombine.high %v8515_v4, %v8515_v4  ;;  %v754_v26 = vrot.slane %v753_v53, 4  ;;  %v767_v10 = vsel %vm200_vm2, %v431_v11, 0.0 }
 0x16a   : > { %2540 = vst.msk [vmem:[#allocation4 + $0x8] sm:$0xff] %vm2538_vm10, %v2445_v44  ;;  %v2451_v14 = vpop.permute.xlu0 %2450  ;;  %v760_v31 = vsel %vm200_vm2, %v432_v61, 0.0  ;;  %v774_v17 = vsel %vm200_vm2, %v433_v25, 0.0  ;;  %v768_v50 = vrot.slane %v767_v10, 4  ;;  %v781_v35 = vsel %vm200_vm2, %v441_v33, 0.0 }
 0x16b   : > { %2689 = vrot.lane.b32.xlu1 %v8194_v6, %s7440_s10  ;;  %2543 = vst.msk [vmem:[#allocation4 + $0x20] sm:$0xff] %vm2538_vm10, %v2451_v14  ;;  %v362_v6 = vsel %vm197_vm0, %v10791_v37, 0.0  ;;  %v450_v14 = vcombine.high %v448_v60, %v448_v60  ;;  %v755_v49 = vadd.f32 %v754_v26, %v753_v53  ;;  %v775_v18 = vrot.slane %v774_v17, 4 }
 0x16c   : > { %2695 = vrot.lane.b32.xlu0 %v2601_v48, %s7440_s10  ;;  %v364_v41 = vadd.f32 %v363_v57, %v362_v6  ;;  %v761_v48 = vrot.slane %v760_v31, 4  ;;  %v788_v28 = vsel %vm200_vm2, %v449_v1, 0.0  ;;  %v769_v8 = vadd.f32 %v768_v50, %v767_v10 }
 0x16d   : > { %v2449_v3 = vpop.permute.xlu1 %2448  ;;  %v756_v32 = vrot.slane %v755_v49, 2  ;;  %v782_v9 = vrot.slane %v781_v35, 4  ;;  %v789_v52 = vrot.slane %v788_v28, 4  ;;  %v776_v16 = vadd.f32 %v775_v18, %v774_v17 }
 0x16e   : > { %2542 = vst.msk [vmem:[#allocation4 + $0x18] sm:$0xff] %vm2538_vm10, %v2449_v3  ;;  %v2455_v23 = vpop.permute.xlu0 %2454  ;;  %v468_v12 = vcombine.high %v364_v41, %v364_v41  ;;  %v8532_v13 = vrot.slane %v364_v41, %v8485_v40  ;;  %v762_v2 = vadd.f32 %v761_v48, %v760_v31  ;;  %v795_v57 = vsel %vm200_vm2, %v448_v60, 0.0 }
 0x16f   : > { %2693 = vrot.lane.b32.xlu1 %v8202_v38, %s7440_s10  ;;  %2545 = vst.msk [vmem:[#allocation4 + $0x30] sm:$0xff] %vm2538_vm10, %v2455_v23  ;;  %v10794_v38 = vld [vmem:[#allocation18_spill] sm:$0xff]  ;;  %v757_v3 = vadd.f32 %v756_v32, %v755_v49  ;;  %v770_v36 = vrot.slane %v769_v8, 2  ;;  %v783_v41 = vadd.f32 %v782_v9, %v781_v35  ;;  %v790_v11 = vadd.f32 %v789_v52, %v788_v28 }
 0x170   : > { %2829 = vrot.lane.b32.xlu0 %v7782_v34, %s7442_s11  ;;  %v8538_v0 = vsel %vm197_vm0, %v10794_v38, 0.0  ;;  %v8545_v44 = vrot.slane %v468_v12, %v8485_v40  ;;  %v483_v43 = vcombine.high %v8532_v13, %v8532_v13  ;;  %v763_v6 = vrot.slane %v762_v2, 2 }
 0x171   : > { %v2453_v55 = vpop.permute.xlu1 %2452  ;;  %v777_v23 = vrot.slane %v776_v16, 2  ;;  %v796_v59 = vrot.slane %v795_v57, 4  ;;  %v758_v33 = vrot.slane %v757_v3, 1  ;;  %v771_v12 = vadd.f32 %v770_v36, %v769_v8 }
 0x172   : > { %2544 = vst.msk [vmem:[#allocation4 + $0x28] sm:$0xff] %vm2538_vm10, %v2453_v55  ;;  %v2459_v34 = vpop.permute.xlu0 %2458  ;;  %v764_v61 = vadd.f32 %v763_v6, %v762_v2  ;;  %v791_v53 = vrot.slane %v790_v11, 2  ;;  %v809_v18 = vsel %vm200_vm2, %v8501_v62, 0.0  ;;  %v816_v52 = vsel %vm200_vm2, %v466_v7, 0.0 }
 0x173   : > { %2697 = vrot.lane.b32.xlu1 %v2602_v58, %s7440_s10  ;;  %2547 = vst.msk [vmem:[#allocation4 + $0x40] sm:$0xff] %vm2538_vm10, %v2459_v34  ;;  %v784_v58 = vrot.slane %v783_v41, 2  ;;  %v778_v38 = vadd.f32 %v777_v23, %v776_v16  ;;  %v797_v55 = vadd.f32 %v796_v59, %v795_v57  ;;  %v772_v1 = vrot.slane %v771_v12, 1 }
 0x174   : > { %2833 = vrot.lane.b32.xlu0 %v7882_v47, %s7442_s11  ;;  %v802_v47 = vsel %vm200_vm2, %v450_v14, 0.0  ;;  %v765_v31 = vrot.slane %v764_v61, 1  ;;  %v792_v34 = vadd.f32 %v791_v53, %v790_v11  ;;  %v8573_v48 = vadd.f32 %v758_v33, %v757_v3 }
 0x175   : > { %v2457_v29 = vpop.permute.xlu1 %2456  ;;  %v803_v25 = vrot.slane %v802_v47, 4  ;;  %v785_v26 = vadd.f32 %v784_v58, %v783_v41  ;;  %v779_v10 = vrot.slane %v778_v38, 1  ;;  %v798_v17 = vrot.slane %v797_v55, 2 }
 0x176   : > { %2546 = vst.msk [vmem:[#allocation4 + $0x38] sm:$0xff] %vm2538_vm10, %v2457_v29  ;;  %v2463_v37 = vpop.permute.xlu0 %2462  ;;  %v8575_v50 = vadd.f32 %v765_v31, %v764_v61  ;;  %v793_v28 = vrot.slane %v792_v34, 1  ;;  %v810_v32 = vrot.slane %v809_v18, 4  ;;  %v817_v57 = vrot.slane %v816_v52, 4 }
 0x177   : > { %2831 = vrot.lane.b32.xlu1 %v7880_v46, %s7442_s11  ;;  %2549 = vst.msk [vmem:[#allocation4 + $0x50] sm:$0xff] %vm2538_vm10, %v2463_v37  ;;  %v804_v60 = vadd.f32 %v803_v25, %v802_v47  ;;  %v786_v2 = vrot.slane %v785_v26, 1  ;;  %v799_v29 = vadd.f32 %v798_v17, %v797_v55  ;;  %v8585_v8 = vadd.f32 %v779_v10, %v778_v38 }
 0x178   : > { %2837 = vrot.lane.b32.xlu0 %v7901_v54, %s7442_s11  ;;  %v484_v54 = vcombine.high %v8545_v44, %v8545_v44  ;;  %v823_v37 = vsel %vm200_vm2, %v8515_v4, 0.0  ;;  %v830_v36 = vsel %vm200_vm2, %v467_v19, 0.0  ;;  %v837_v62 = vsel %vm200_vm2, %v8532_v13, 0.0 }
 0x179   : > { %v2461_v22 = vpop.permute.xlu1 %2460  ;;  %v805_v14 = vrot.slane %v804_v60, 2  ;;  %v8587_v9 = vadd.f32 %v786_v2, %v785_v26  ;;  %v800_v6 = vrot.slane %v799_v29, 1  ;;  %v824_v3 = vrot.slane %v823_v37, 4 }
 0x17a   : > { %2548 = vst.msk [vmem:[#allocation4 + $0x48] sm:$0xff] %vm2538_vm10, %v2461_v22  ;;  %v2467_v46 = vpop.permute.xlu0 %2466  ;;  %v844_v7 = vsel %vm200_vm2, %v483_v43, 0.0  ;;  %v8608_v41 = vadd.f32 %v793_v28, %v792_v34  ;;  %v818_v23 = vadd.f32 %v817_v57, %v816_v52  ;;  %v831_v13 = vrot.slane %v830_v36, 4 }
 0x17b   : > { %2835 = vrot.lane.b32.xlu1 %v7897_v51, %s7442_s11  ;;  %2551 = vst.msk [vmem:[#allocation4 + $0x60] sm:$0xff] %vm2538_vm10, %v2467_v46  ;;  %v8577_v51 = vadd.f32 %v772_v1, %v771_v12  ;;  %v8610_v11 = vadd.f32 %v800_v6, %v799_v29  ;;  %v825_v19 = vadd.f32 %v824_v3, %v823_v37  ;;  %v838_v59 = vrot.slane %v837_v62, 4  ;;  %v1329_v1 = vld [vmem:[%s10620_s3] sm:$0x3] }
 0x17c   : > { %2841 = vrot.lane.b32.xlu0 %v7905_v63, %s7442_s11  ;;  %v806_v63 = vadd.f32 %v805_v14, %v804_v60  ;;  %v819_v25 = vrot.slane %v818_v23, 2  ;;  %v845_v22 = vrot.slane %v844_v7, 4  ;;  %v851_v33 = vsel %vm200_vm2, %v8545_v44, 0.0  ;;  %7305 = vmatprep.subr.msk.bf16.mxu1 %vm1537_vm11, %v1329_v1 }
 0x17d   : > { %v2465_v49 = vpop.permute.xlu1 %2464  ;;  %v826_v58 = vrot.slane %v825_v19, 2  ;;  %v832_v53 = vadd.f32 %v831_v13, %v830_v36  ;;  %v852_v46 = vrot.slane %v851_v33, 4  ;;  %v1539_v44 = vsel %vm1537_vm11, %v1329_v1, 0 }
 0x17e   : > { %2550 = vst.msk [vmem:[#allocation4 + $0x58] sm:$0xff] %vm2538_vm10, %v2465_v49  ;;  %v2471_v35 = vpop.permute.xlu0 %2470  ;;  %v807_v16 = vrot.slane %v806_v63, 1  ;;  %v820_v55 = vadd.f32 %v819_v25, %v818_v23  ;;  %v846_v60 = vadd.f32 %v845_v22, %v844_v7  ;;  %v2958_v49 = vld [vmem:[#allocation2 + $0x31] sm:$0xff]  ;;  %7216 = vmatpush3.bf16.msra.mxu1 %v1539_v44  ;;  %v8638_v52 = vmul.f32 0.25, %v8573_v48 }
 0x17f   : > { %2839 = vrot.lane.b32.xlu1 %v7903_v56, %s7442_s11  ;;  %2553 = vst.msk [vmem:[#allocation4 + $0x70] sm:$0xff] %vm2538_vm10, %v2471_v35  ;;  %v811_v56 = vadd.f32 %v810_v32, %v809_v18  ;;  %v827_v26 = vadd.f32 %v826_v58, %v825_v19  ;;  %v833_v34 = vrot.slane %v832_v53, 2  ;;  %v853_v28 = vadd.f32 %v852_v46, %v851_v33  ;;  %v2959_v33 = vld [vmem:[#allocation2 + $0x39] sm:$0xff]  ;;  %v2961_v44 = vld [vmem:[#allocation2 + $0x51] sm:$0xff] }
 0x180   : > { %2845 = vrot.lane.b32.xlu0 %v7927_v21, %s7442_s11  ;;  %v8615_v4 = vadd.f32 %v807_v16, %v806_v63  ;;  %v821_v17 = vrot.slane %v820_v55, 1  ;;  %v8645_v3 = vmul.f32 0.25, %v8575_v50  ;;  %v8648_v48 = vmul.f32 0.25, %v8577_v51  ;;  %v8657_v51 = vld [vmem:[%s10618_s1] sm:$0xff]  }
 0x181   : > { %v2469_v47 = vpop.permute.xlu1 %2468  ;;  %v812_v61 = vrot.slane %v811_v56, 2  ;;  %v828_v2 = vrot.slane %v827_v26, 1  ;;  %v834_v18 = vadd.f32 %v833_v34, %v832_v53  ;;  %v1206_v50 = vmul.f32 0.25, %v8608_v41  ;;  %7225 = vmatprep.subr.bf16.mxu1 %v8657_v51 }
 0x182   : > { %2552 = vst.msk [vmem:[#allocation4 + $0x68] sm:$0xff] %vm2538_vm10, %v2469_v47  ;;  %v2475_v21 = vpop.permute.xlu0 %2474  ;;  %v822_v63 = vadd.f32 %v821_v17, %v820_v55  ;;  %v1208_v25 = vmul.f32 0.25, %v8615_v4  ;;  %v1266_v55 = vpack.c.bf16 %v8645_v3, %v8645_v3 }
 0x183   : > { %2843 = vrot.lane.b32.xlu1 %v7919_v15, %s7442_s11  ;;  %2555 = vst.msk [vmem:[#allocation4 + $0x80] sm:$0xff] %vm2538_vm10, %v2475_v21  ;;  %v813_v43 = vadd.f32 %v812_v61, %v811_v56  ;;  %v839_v15 = vadd.f32 %v838_v59, %v837_v62  ;;  %v829_v37 = vadd.f32 %v828_v2, %v827_v26  ;;  %v835_v6 = vrot.slane %v834_v18, 1  ;;  %v2960_v62 = vld [vmem:[#allocation2 + $0x49] sm:$0xff] }
 0x184   : > { %2849 = vrot.lane.b32.xlu0 %v7931_v27, %s7442_s11  ;;  %v858_v27 = vsel %vm200_vm2, %v484_v54, 0.0  ;;  %v854_v56 = vrot.slane %v853_v28, 2  ;;  %v1204_v61 = vmul.f32 0.25, %v8585_v8  ;;  %v1205_v59 = vmul.f32 0.25, %v8587_v9  ;;  %v3153_v2 = vld [vmem:[#allocation2 + $0x4a] sm:$0xff] }
 0x185   : > { %v2473_v12 = vpop.permute.xlu1 %2472  ;;  %v814_v38 = vrot.slane %v813_v43, 1  ;;  %v840_v10 = vrot.slane %v839_v15, 2  ;;  %v1210_v41 = vmul.f32 0.25, %v822_v63  ;;  %v1270_v34 = vpack.c.bf16 %v1206_v50, %v1206_v50 }
 0x186   : > { %2554 = vst.msk [vmem:[#allocation4 + $0x78] sm:$0xff] %vm2538_vm10, %v2473_v12  ;;  %v2479_v31 = vpop.permute.xlu0 %2478  ;;  %v855_v21 = vadd.f32 %v854_v56, %v853_v28  ;;  %v1211_v12 = vmul.f32 0.25, %v829_v37  ;;  %v1269_v26 = vpack.c.bf16 %v1205_v59, %v1205_v59  ;;  %v1272_v17 = vpack.c.bf16 %v1208_v25, %v1208_v25  ;;  %v3154_v25 = vld [vmem:[#allocation2 + $0x52] sm:$0xff] }
 0x187   : > { %2847 = vrot.lane.b32.xlu1 %v7929_v24, %s7442_s11  ;;  %2557 = vst.msk [vmem:[#allocation4 + $0x90] sm:$0xff] %vm2538_vm10, %v2479_v31  ;;  %v815_v54 = vadd.f32 %v814_v38, %v813_v43  ;;  %v847_v24 = vrot.slane %v846_v60, 2  ;;  %v841_v35 = vadd.f32 %v840_v10, %v839_v15  ;;  %v1207_v43 = vmul.f32 0.25, %v8610_v11  ;;  %v3151_v15 = vld [vmem:[#allocation2 + $0x32] sm:$0xff] }
 0x188   : > { %2853 = vrot.lane.b32.xlu0 %v7945_v42, %s7442_s11  ;;  %v859_v42 = vrot.slane %v858_v27, 4  ;;  %v856_v8 = vrot.slane %v855_v21, 1  ;;  %v1265_v11 = vpack.c.bf16 %v8638_v52, %v8638_v52  ;;  %v1395_v37 = vunpack.c.l.b16 %v1266_v55 }
 0x189   : > { %v2477_v14 = vpop.permute.xlu1 %2476  ;;  %v848_v32 = vadd.f32 %v847_v24, %v846_v60  ;;  %v842_v16 = vrot.slane %v841_v35, 1  ;;  %v1209_v22 = vmul.f32 0.25, %v815_v54  ;;  %v1267_v60 = vpack.c.bf16 %v8648_v48, %v8648_v48 }
 0x18a   : > { %2556 = vst.msk [vmem:[#allocation4 + $0x88] sm:$0xff] %vm2538_vm10, %v2477_v14  ;;  %v2483_v29 = vpop.permute.xlu0 %2482  ;;  %v860_v47 = vadd.f32 %v859_v42, %v858_v27  ;;  %v1268_v27 = vpack.c.bf16 %v1204_v61, %v1204_v61  ;;  %v1271_v10 = vpack.c.bf16 %v1207_v43, %v1207_v43  ;;  %v1274_v14 = vpack.c.bf16 %v1210_v41, %v1210_v41 }
 0x18b   : > { %2851 = vrot.lane.b32.xlu1 %v7943_v39, %s7442_s11  ;;  %2559 = vst.msk [vmem:[#allocation4 + $0xa0] sm:$0xff] %vm2538_vm10, %v2483_v29  ;;  %v849_v57 = vrot.slane %v848_v32, 1  ;;  %v836_v39 = vadd.f32 %v835_v6, %v834_v18  ;;  %v843_v7 = vadd.f32 %v842_v16, %v841_v35  ;;  %v1273_v24 = vpack.c.bf16 %v1209_v22, %v1209_v22 }
 0x18c   : > { %3022 = vrot.lane.b32.xlu0 %v2958_v49, %s7443_s14  ;;  %v861_v13 = vrot.slane %v860_v47, 2  ;;  %v1275_v18 = vpack.c.bf16 %v1211_v12, %v1211_v12  ;;  %v1394_v52 = vunpack.c.l.b16 %v1265_v11  ;;  %v1396_v6 = vunpack.c.l.b16 %v1267_v60 }
 0x18d   : > { %v2481_v36 = vpop.permute.xlu1 %2480  ;;  %v850_v19 = vadd.f32 %v849_v57, %v848_v32  ;;  %v1212_v58 = vmul.f32 0.25, %v836_v39  ;;  %v1213_v46 = vmul.f32 0.25, %v843_v7  ;;  %v1397_v16 = vunpack.c.l.b16 %v1268_v27  ;;  %v2962_v7 = vld [vmem:[#allocation2 + $0x61] sm:$0xff] }
 0x18e   : > { %2558 = vst.msk [vmem:[#allocation4 + $0x98] sm:$0xff] %vm2538_vm10, %v2481_v36  ;;  %v2487_v23 = vpop.permute.xlu0 %2486  ;;  %v862_v9 = vadd.f32 %v861_v13, %v860_v47  ;;  %v1398_v56 = vunpack.c.l.b16 %v1269_v26  ;;  %v1399_v57 = vunpack.c.l.b16 %v1270_v34  ;;  %v3152_v47 = vld [vmem:[#allocation2 + $0x3a] sm:$0xff]  ;;  %v1400_v48 = vunpack.c.l.b16 %v1271_v10 }
 0x18f   : > { %2855 = vrot.lane.b32.xlu1 %v7947_v45, %s7442_s11  ;;  %2561 = vst.msk [vmem:[#allocation4 + $0xb0] sm:$0xff] %vm2538_vm10, %v2487_v23  ;;  %v857_v45 = vadd.f32 %v856_v8, %v855_v21  ;;  %v1214_v31 = vmul.f32 0.25, %v850_v19  ;;  %v1276_v35 = vpack.c.bf16 %v1212_v58, %v1212_v58  ;;  %v1277_v28 = vpack.c.bf16 %v1213_v46, %v1213_v46  ;;  %v10795_v58 = vld [vmem:[#allocation20_spill] sm:$0xff] }
 0x190   : > { %3026 = vrot.lane.b32.xlu0 %v2960_v62, %s7443_s14  ;;  %v863_v38 = vrot.slane %v862_v9, 1  ;;  %v1401_v36 = vunpack.c.l.b16 %v1272_v17  ;;  %v1402_v62 = vunpack.c.l.b16 %v1273_v24  ;;  %v1403_v21 = vunpack.c.l.b16 %v1274_v14 }
 0x191   : > { %v2485_v53 = vpop.permute.xlu1 %2484  ;;  %v1215_v1 = vmul.f32 0.25, %v857_v45  ;;  %v1278_v29 = vpack.c.bf16 %v1214_v31, %v1214_v31  ;;  %v1404_v61 = vunpack.c.l.b16 %v1275_v18  ;;  %v1405_v23 = vunpack.c.l.b16 %v1276_v35 }
 0x192   : > { %2560 = vst.msk [vmem:[#allocation4 + $0xa8] sm:$0xff] %vm2538_vm10, %v2485_v53  ;;  %v2491_v4 = vpop.permute.xlu0 %2490  ;;  %v864_v54 = vadd.f32 %v863_v38, %v862_v9  ;;  %v1406_v19 = vunpack.c.l.b16 %v1277_v28  ;;  %v1459_v43 = vsel %vm1458_vm13, %v1395_v37, %v1394_v52  ;;  %v2964_v9 = vld [vmem:[#allocation2 + $0x79] sm:$0xff]  ;;  %v1472_v12 = vsel %vm1458_vm13, %v1403_v21, %v1402_v62  ;;  %v2965_v52 = vld [vmem:[#allocation2 + $0x81] sm:$0xff] }
 0x193   : > { %3024 = vrot.lane.b32.xlu1 %v2959_v33, %s7443_s14  ;;  %2563 = vst.msk [vmem:[#allocation4 + $0xc0] sm:$0xff] %vm2538_vm10, %v2491_v4  ;;  %v1279_v42 = vpack.c.bf16 %v1215_v1, %v1215_v1  ;;  %v1407_v59 = vunpack.c.l.b16 %v1278_v29  ;;  %v1461_v22 = vsel %vm1460_vm14, %v1396_v6, %v1459_v43  ;;  %v369_v53 = vsel %vm197_vm0, %v10795_v58, 0.0  ;;  %v10796_v4 = vld [vmem:[#allocation22_spill] sm:$0xff] }
 0x194   : > { %3215 = vrot.lane.b32.xlu0 %v3151_v15, %s7444_s23  ;;  %v1216_v32 = vmul.f32 0.25, %v864_v54  ;;  %v1463_v41 = vsel %vm1462_vm15, %v1397_v16, %v1461_v22  ;;  %v373_v15 = vadd.f32 %v8523_v5, %v8494_v20  ;;  %v1473_v31 = vsel %vm1460_vm14, %v1404_v61, %v1472_v12  ;;  %v10797_v5 = vld [vmem:[#allocation24_spill] sm:$0xff]  ;;  %v2963_v1 = vld [vmem:[#allocation2 + $0x69] sm:$0xff] }
 0x195   : > { %v2489_v49 = vpop.permute.xlu1 %2488  ;;  %v1408_v50 = vunpack.c.l.b16 %v1279_v42  ;;  %v1465_v46 = vsel %vm1464_vm1, %v1398_v56, %v1463_v41  ;;  %v370_v11 = vadd.f32 %v369_v53, %v8538_v0  ;;  %v374_v38 = vsel %vm197_vm0, %v10796_v4, 0.0  ;;  %v3155_v54 = vld [vmem:[#allocation2 + $0x62] sm:$0xff] }
 0x196   : > { %2562 = vst.msk [vmem:[#allocation4 + $0xb8] sm:$0xff] %vm2538_vm10, %v2489_v49  ;;  %v2495_v63 = vpop.permute.xlu0 %2494  ;;  %v1280_v3 = vpack.c.bf16 %v1216_v32, %v1216_v32  ;;  %v1467_v55 = vsel %vm1466_vm3, %v1399_v57, %v1465_v46  ;;  %v1474_v20 = vsel %vm1462_vm15, %v1405_v23, %v1473_v31  ;;  %v375_v60 = vsel %vm197_vm0, %v10797_v5, 0.0  ;;  %v3157_v57 = vld [vmem:[#allocation2 + $0x7a] sm:$0xff]  ;;  %v3158_v5 = vld [vmem:[#allocation2 + $0x82] sm:$0xff] }
 0x197   : > { %3028 = vrot.lane.b32.xlu1 %v2961_v44, %s7443_s14  ;;  %2565 = vst.msk [vmem:[#allocation4 + $0xd0] sm:$0xff] %vm2538_vm10, %v2495_v63  ;;  %v485_v27 = vcombine.high %v8519_v30, %v8519_v30  ;;  %v1469_v0 = vsel %vm1468_vm4, %v1400_v48, %v1467_v55  ;;  %v1475_v26 = vsel %vm1464_vm1, %v1406_v19, %v1474_v20 }
 0x198   : > { %3219 = vrot.lane.b32.xlu0 %v3153_v2, %s7444_s23  ;;  %v1409_v8 = vunpack.c.l.b16 %v1280_v3  ;;  %v376_v34 = vadd.f32 %v375_v60, %v374_v38  ;;  %v492_v10 = vrot.slane %v8519_v30, %v8485_v40  ;;  %v1471_v17 = vsel %vm1470_vm5, %v1401_v36, %v1469_v0 }
 0x199   : > { %v2493_v39 = vpop.permute.xlu1 %2492  ;;  %v1476_v24 = vsel %vm1466_vm3, %v1407_v59, %v1475_v26  ;;  %v499_v14 = vrot.slane %v485_v27, %v8485_v40  ;;  %v502_v49 = vcombine.high %v370_v11, %v370_v11  ;;  %v509_v28 = vrot.slane %v370_v11, %v8485_v40 }
 0x19a   : > { %2564 = vst.msk [vmem:[#allocation4 + $0xc8] sm:$0xff] %vm2538_vm10, %v2493_v39  ;;  %v2499_v13 = vpop.permute.xlu0 %2498  ;;  %v1477_v18 = vsel %vm1468_vm4, %v1408_v50, %v1476_v24  ;;  %v500_v35 = vcombine.high %v492_v10, %v492_v10  ;;  %v519_v29 = vcombine.high %v373_v15, %v373_v15  ;;  %v8722_v42 = vrot.slane %v373_v15, %v8485_v40  ;;  %v3156_v50 = vld [vmem:[#allocation2 + $0x6a] sm:$0xff] }
 0x19b   : > { %3217 = vrot.lane.b32.xlu1 %v3152_v47, %s7444_s23  ;;  %2567 = vst.msk [vmem:[#allocation4 + $0xe0] sm:$0xff] %vm2538_vm10, %v2499_v13  ;;  %v1478_v30 = vsel %vm1470_vm5, %v1409_v8, %v1477_v18  ;;  %v501_v63 = vcombine.high %v499_v14, %v499_v14  ;;  %v516_v32 = vrot.slane %v502_v49, %v8485_v40  ;;  %v865_v36 = vsel %vm200_vm2, %v492_v10, 0.0 }
 0x19c   : > { %3030 = vrot.lane.b32.xlu0 %v2962_v7, %s7443_s14  ;;  %v1521_v37 = vpack.c.b16 %v1478_v30, %v1471_v17  ;;  %v8726_v6 = vrot.slane %v519_v29, %v8485_v40  ;;  %v536_v16 = vcombine.high %v376_v34, %v376_v34  ;;  %v517_v47 = vcombine.high %v509_v28, %v509_v28 }
 0x19d   : > { %v2497_v33 = vpop.permute.xlu1 %2496  ;;  %v518_v3 = vcombine.high %v516_v32, %v516_v32  ;;  %v8729_v48 = vrot.slane %v376_v34, %v8485_v40  ;;  %v534_v39 = vcombine.high %v8722_v42, %v8722_v42  ;;  %v866_v21 = vrot.slane %v865_v36, 4  ;;  %v2968_v34 = vld [vmem:[#allocation2 + $0xa9] sm:$0xff] }
 0x19e   : > { %2566 = vst.msk [vmem:[#allocation4 + $0xd8] sm:$0xff] %vm2538_vm10, %v2497_v33  ;;  %v2503_v45 = vpop.permute.xlu0 %2502  ;;  %7217 = vmatprep.mubr.msk.bf16.mxu1 %vm197_vm0, %v1521_v37  ;;  %v535_v7 = vcombine.high %v8726_v6, %v8726_v6  ;;  %v872_v61 = vsel %vm200_vm2, %v500_v35, 0.0  ;;  %v8742_v23 = vrot.slane %v536_v16, %v8485_v40  ;;  %v879_v13 = vsel %vm200_vm2, %v499_v14, 0.0 }
 0x19f   : > { %3221 = vrot.lane.b32.xlu1 %v3154_v25, %s7444_s23  ;;  %2569 = vst.msk [vmem:[#allocation4 + $0xf0] sm:$0xff] %vm2538_vm10, %v2503_v45  ;;  %v873_v19 = vrot.slane %v872_v61, 4  ;;  %v886_v59 = vsel %vm200_vm2, %v501_v63, 0.0  ;;  %v551_v8 = vcombine.high %v8729_v48, %v8729_v48  ;;  %v867_v43 = vadd.f32 %v866_v21, %v865_v36  ;;  %v2967_v63 = vld [vmem:[#allocation2 + $0x99] sm:$0xff] }
 0x1a0   : > { %3034 = vrot.lane.b32.xlu0 %v2964_v9, %s7443_s14  ;;  %v880_v25 = vrot.slane %v879_v13, 4  ;;  %v887_v22 = vrot.slane %v886_v59, 4  ;;  %v2966_v9 = vld [vmem:[#allocation2 + $0x91] sm:$0xff]  ;;  %v893_v12 = vsel %vm200_vm2, %v509_v28, 0.0  ;;  %v900_v58 = vsel %vm200_vm2, %v517_v47, 0.0 }
 0x1a1   : > { %v2501_v44 = vpop.permute.xlu1 %2500  ;;  %v874_v41 = vadd.f32 %v873_v19, %v872_v61  ;;  %v907_v53 = vsel %vm200_vm2, %v516_v32, 0.0  ;;  %v868_v45 = vrot.slane %v867_v43, 2  ;;  %v894_v11 = vrot.slane %v893_v12, 4 }
 0x1a2   : > { %2568 = vst.msk [vmem:[#allocation4 + $0xe8] sm:$0xff] %vm2538_vm10, %v2501_v44  ;;  %v2636_v2 = vpop.permute.xlu0 %2635  ;;  %v881_v46 = vadd.f32 %v880_v25, %v879_v13  ;;  %v888_v31 = vadd.f32 %v887_v22, %v886_v59  ;;  %v901_v38 = vrot.slane %v900_v58, 4  ;;  %v908_v55 = vrot.slane %v907_v53, 4 }
 0x1a3   : > { %3032 = vrot.lane.b32.xlu1 %v2963_v1, %s7443_s14  ;;  %2732 = vst.msk [vmem:[#allocation4] sm:$0xff] %vm2731_vm12, %v2636_v2  ;;  %v875_v4 = vrot.slane %v874_v41, 2  ;;  %v914_v20 = vsel %vm200_vm2, %v518_v3, 0.0  ;;  %v869_v60 = vadd.f32 %v868_v45, %v867_v43  ;;  %v895_v0 = vadd.f32 %v894_v11, %v893_v12 }
 0x1a4   : > { %3223 = vrot.lane.b32.xlu0 %v3155_v54, %s7444_s23  ;;  %v882_v27 = vrot.slane %v881_v46, 2  ;;  %v889_v1 = vrot.slane %v888_v31, 2  ;;  %v902_v44 = vadd.f32 %v901_v38, %v900_v58  ;;  %v909_v54 = vadd.f32 %v908_v55, %v907_v53 }
 0x1a5   : > { %v2505_v56 = vpop.permute.xlu1 %2504  ;;  %v876_v10 = vadd.f32 %v875_v4, %v874_v41  ;;  %v915_v17 = vrot.slane %v914_v20, 4  ;;  %v870_v14 = vrot.slane %v869_v60, 1  ;;  %v896_v18 = vrot.slane %v895_v0, 2 }
 0x1a6   : > { %2570 = vst.msk [vmem:[#allocation4 + $0xf8] sm:$0xff] %vm2538_vm10, %v2505_v56  ;;  %v2640_v62 = vpop.permute.xlu0 %2639  ;;  %v883_v49 = vadd.f32 %v882_v27, %v881_v46  ;;  %v890_v2 = vadd.f32 %v889_v1, %v888_v31  ;;  %v903_v28 = vrot.slane %v902_v44, 2  ;;  %v910_v29 = vrot.slane %v909_v54, 2 }
 0x1a7   : > { %3036 = vrot.lane.b32.xlu1 %v2965_v52, %s7443_s14  ;;  %2734 = vst.msk [vmem:[#allocation4 + $0x10] sm:$0xff] %vm2731_vm12, %v2640_v62  ;;  %v877_v35 = vrot.slane %v876_v10, 1  ;;  %v916_v30 = vadd.f32 %v915_v17, %v914_v20  ;;  %v552_v32 = vcombine.high %v8742_v23, %v8742_v23  ;;  %v897_v16 = vadd.f32 %v896_v18, %v895_v0 }
 0x1a8   : > { %3227 = vrot.lane.b32.xlu0 %v3157_v57, %s7444_s23  ;;  %v884_v52 = vrot.slane %v883_v49, 1  ;;  %v891_v37 = vrot.slane %v890_v2, 1  ;;  %v3159_v57 = vld [vmem:[#allocation2 + $0x92] sm:$0xff]  ;;  %v8763_v47 = vadd.f32 %v870_v14, %v869_v60  ;;  %v904_v3 = vadd.f32 %v903_v28, %v902_v44  ;;  %v3160_v60 = vld [vmem:[#allocation2 + $0x9a] sm:$0xff] }
 0x1a9   : > { %v2638_v33 = vpop.permute.xlu1 %2637  ;;  %v911_v36 = vadd.f32 %v910_v29, %v909_v54  ;;  %v917_v62 = vrot.slane %v916_v30, 2  ;;  %v8766_v61 = vadd.f32 %v877_v35, %v876_v10  ;;  %v898_v13 = vrot.slane %v897_v16, 1  ;;  %v2779_v10 = vld [vmem:[#allocation2 + $0xd8] sm:$0xff] }
 0x1aa   : > { %2733 = vst.msk [vmem:[#allocation4 + $0x8] sm:$0xff] %vm2731_vm12, %v2638_v33  ;;  %v2644_v15 = vpop.permute.xlu0 %2643  ;;  %v8768_v19 = vadd.f32 %v884_v52, %v883_v49  ;;  %v921_v59 = vsel %vm200_vm2, %v8722_v42, 0.0  ;;  %v2969_v33 = vld [vmem:[#allocation2 + $0xb1] sm:$0xff]  ;;  %v928_v41 = vsel %vm200_vm2, %v534_v39, 0.0  ;;  %v935_v12 = vsel %vm200_vm2, %v8726_v6, 0.0 }
 0x1ab   : > { %3225 = vrot.lane.b32.xlu1 %v3156_v50, %s7444_s23  ;;  %2736 = vst.msk [vmem:[#allocation4 + $0x20] sm:$0xff] %vm2731_vm12, %v2644_v15  ;;  %v905_v50 = vrot.slane %v904_v3, 1  ;;  %v912_v43 = vrot.slane %v911_v36, 1  ;;  %v918_v25 = vadd.f32 %v917_v62, %v916_v30  ;;  %v922_v22 = vrot.slane %v921_v59, 4  ;;  %v3161_v15 = vld [vmem:[#allocation2 + $0xaa] sm:$0xff]  ;;  %v3162_v30 = vld [vmem:[#allocation2 + $0xb2] sm:$0xff] }
 0x1ac   : > { %3038 = vrot.lane.b32.xlu0 %v2966_v9, %s7443_s14  ;;  %v8775_v9 = vadd.f32 %v891_v37, %v890_v2  ;;  %v942_v58 = vsel %vm200_vm2, %v535_v7, 0.0  ;;  %v8787_v45 = vadd.f32 %v898_v13, %v897_v16  ;;  %v929_v39 = vrot.slane %v928_v41, 4  ;;  %v2970_v16 = vld [vmem:[#allocation2 + $0xc1] sm:$0xff] }
 0x1ad   : > { %v2642_v26 = vpop.permute.xlu1 %2641  ;;  %v8789_v46 = vadd.f32 %v905_v50, %v904_v3  ;;  %v8791_v31 = vadd.f32 %v912_v43, %v911_v36  ;;  %v923_v11 = vadd.f32 %v922_v22, %v921_v59  ;;  %v936_v4 = vrot.slane %v935_v12, 4 }
 0x1ae   : > { %2735 = vst.msk [vmem:[#allocation4 + $0x18] sm:$0xff] %vm2731_vm12, %v2642_v26  ;;  %v2648_v24 = vpop.permute.xlu0 %2647  ;;  %v943_v38 = vrot.slane %v942_v58, 4  ;;  %v949_v6 = vsel %vm200_vm2, %v8729_v48, 0.0  ;;  %v919_v7 = vrot.slane %v918_v25, 1  ;;  %v930_v27 = vadd.f32 %v929_v39, %v928_v41 }
 0x1af   : > { %3229 = vrot.lane.b32.xlu1 %v3158_v5, %s7444_s23  ;;  %2738 = vst.msk [vmem:[#allocation4 + $0x30] sm:$0xff] %vm2731_vm12, %v2648_v24  ;;  %v924_v55 = vrot.slane %v923_v11, 2  ;;  %v950_v20 = vrot.slane %v949_v6, 4  ;;  %v956_v5 = vsel %vm200_vm2, %v551_v8, 0.0  ;;  %v937_v1 = vadd.f32 %v936_v4, %v935_v12  ;;  %v2780_v12 = vld [vmem:[#allocation2 + $0xe0] sm:$0xff] }
 0x1b0   : > { %3042 = vrot.lane.b32.xlu0 %v2968_v34, %s7443_s14  ;;  %v944_v0 = vadd.f32 %v943_v38, %v942_v58  ;;  %v957_v26 = vrot.slane %v956_v5, 4  ;;  %v963_v17 = vsel %vm200_vm2, %v8742_v23, 0.0  ;;  %v970_v24 = vsel %vm200_vm2, %v552_v32, 0.0 }
 0x1b1   : > { %v2646_v56 = vpop.permute.xlu1 %2645  ;;  %v925_v44 = vadd.f32 %v924_v55, %v923_v11  ;;  %v951_v54 = vadd.f32 %v950_v20, %v949_v6  ;;  %v931_v8 = vrot.slane %v930_v27, 2  ;;  %v938_v14 = vrot.slane %v937_v1, 2 }
 0x1b2   : > { %2737 = vst.msk [vmem:[#allocation4 + $0x28] sm:$0xff] %vm2731_vm12, %v2646_v56  ;;  %v2652_v21 = vpop.permute.xlu0 %2651  ;;  %v945_v49 = vrot.slane %v944_v0, 2  ;;  %v958_v2 = vadd.f32 %v957_v26, %v956_v5  ;;  %v964_v28 = vrot.slane %v963_v17, 4  ;;  %v971_v29 = vrot.slane %v970_v24, 4  ;;  %v2971_v26 = vld [vmem:[#allocation2 + $0xc9] sm:$0xff] }
 0x1b3   : > { %3040 = vrot.lane.b32.xlu1 %v2967_v63, %s7443_s14  ;;  %2740 = vst.msk [vmem:[#allocation4 + $0x40] sm:$0xff] %vm2731_vm12, %v2652_v21  ;;  %v926_v18 = vrot.slane %v925_v44, 1  ;;  %v952_v35 = vrot.slane %v951_v54, 2  ;;  %v932_v23 = vadd.f32 %v931_v8, %v930_v27  ;;  %v939_v63 = vadd.f32 %v938_v14, %v937_v1 }
 0x1b4   : > { %3231 = vrot.lane.b32.xlu0 %v3159_v57, %s7444_s23  ;;  %v946_v32 = vadd.f32 %v945_v49, %v944_v0  ;;  %v959_v52 = vrot.slane %v958_v2, 2  ;;  %v920_v56 = vadd.f32 %v919_v7, %v918_v25  ;;  %v965_v3 = vadd.f32 %v964_v28, %v963_v17  ;;  %v2973_v28 = vld [vmem:[#allocation2 + $0xe1] sm:$0xff] }
 0x1b5   : > { %v2650_v53 = vpop.permute.xlu1 %2649  ;;  %v953_v57 = vadd.f32 %v952_v35, %v951_v54  ;;  %v972_v36 = vadd.f32 %v971_v29, %v970_v24  ;;  %v933_v21 = vrot.slane %v932_v23, 1  ;;  %v940_v13 = vrot.slane %v939_v63, 1 }
 0x1b6   : > { %2739 = vst.msk [vmem:[#allocation4 + $0x38] sm:$0xff] %vm2731_vm12, %v2650_v53  ;;  %v2656_v42 = vpop.permute.xlu0 %2655  ;;  %v947_v59 = vrot.slane %v946_v32, 1  ;;  %v960_v50 = vadd.f32 %v959_v52, %v958_v2  ;;  %v927_v43 = vadd.f32 %v926_v18, %v925_v44  ;;  %v1218_v20 = vmul.f32 0.25, %v8766_v61  ;;  %v3165_v52 = vld [vmem:[#allocation2 + $0xda] sm:$0xff] }
 0x1b7   : > { %3044 = vrot.lane.b32.xlu1 %v2969_v33, %s7443_s14  ;;  %2742 = vst.msk [vmem:[#allocation4 + $0x50] sm:$0xff] %vm2731_vm12, %v2656_v42  ;;  %v954_v22 = vrot.slane %v953_v57, 1  ;;  %v966_v33 = vrot.slane %v965_v3, 2  ;;  %v973_v41 = vrot.slane %v972_v36, 2  ;;  %v934_v25 = vadd.f32 %v933_v21, %v932_v23  ;;  %v2972_v42 = vld [vmem:[#allocation2 + $0xd9] sm:$0xff] }
 0x1b8   : > { %3235 = vrot.lane.b32.xlu0 %v3161_v15, %s7444_s23  ;;  %v941_v58 = vadd.f32 %v940_v13, %v939_v63  ;;  %v961_v53 = vrot.slane %v960_v50, 1  ;;  %v1217_v15 = vmul.f32 0.25, %v8763_v47  ;;  %v948_v39 = vadd.f32 %v947_v59, %v946_v32 }
 0x1b9   : > { %v2654_v34 = vpop.permute.xlu1 %2653  ;;  %v955_v4 = vadd.f32 %v954_v22, %v953_v57  ;;  %v967_v38 = vadd.f32 %v966_v33, %v965_v3  ;;  %v974_v6 = vadd.f32 %v973_v41, %v972_v36  ;;  %v1219_v5 = vmul.f32 0.25, %v8768_v19  ;;  %v3164_v33 = vld [vmem:[#allocation2 + $0xca] sm:$0xff] }
 0x1ba   : > { %2741 = vst.msk [vmem:[#allocation4 + $0x48] sm:$0xff] %vm2731_vm12, %v2654_v34  ;;  %v2660_v48 = vpop.permute.xlu0 %2659  ;;  %v962_v55 = vadd.f32 %v961_v53, %v960_v50  ;;  %v1221_v1 = vmul.f32 0.25, %v8787_v45  ;;  %v1222_v0 = vmul.f32 0.25, %v8789_v46  ;;  %v1223_v34 = vmul.f32 0.25, %v8791_v31 }
 0x1bb   : > { %3233 = vrot.lane.b32.xlu1 %v3160_v60, %s7444_s23  ;;  %2744 = vst.msk [vmem:[#allocation4 + $0x60] sm:$0xff] %vm2731_vm12, %v2660_v48  ;;  %v1220_v60 = vmul.f32 0.25, %v8775_v9  ;;  %v968_v47 = vrot.slane %v967_v38, 1  ;;  %v975_v27 = vrot.slane %v974_v6, 1  ;;  %v1224_v61 = vmul.f32 0.25, %v920_v56  ;;  %v3163_v9 = vld [vmem:[#allocation2 + $0xc2] sm:$0xff] }
 0x1bc   : > { %2857 = vrot.lane.b32.xlu0 %v2779_v10, %s7442_s11  ;;  %v1225_v10 = vmul.f32 0.25, %v927_v43  ;;  %v1226_v19 = vmul.f32 0.25, %v934_v25  ;;  %v1227_v24 = vmul.f32 0.25, %v941_v58  ;;  %v1228_v48 = vmul.f32 0.25, %v948_v39 }
 0x1bd   : > { %v2658_v37 = vpop.permute.xlu1 %2657  ;;  %v969_v54 = vadd.f32 %v968_v47, %v967_v38  ;;  %v976_v17 = vadd.f32 %v975_v27, %v974_v6  ;;  %v1229_v45 = vmul.f32 0.25, %v955_v4  ;;  %v1230_v14 = vmul.f32 0.25, %v962_v55  ;;  %v10798_v27 = vld [vmem:[#allocation25_spill] sm:$0xff] }
 0x1be   : > { %2743 = vst.msk [vmem:[#allocation4 + $0x58] sm:$0xff] %vm2731_vm12, %v2658_v37  ;;  %v2664_v62 = vpop.permute.xlu0 %2663  ;;  %v1281_v46 = vpack.c.bf16 %v1217_v15, %v1217_v15  ;;  %v1282_v49 = vpack.c.bf16 %v1218_v20, %v1218_v20  ;;  %v1283_v18 = vpack.c.bf16 %v1219_v5, %v1219_v5  ;;  %v1284_v35 = vpack.c.bf16 %v1220_v60, %v1220_v60  ;;  %v2781_v15 = vld [vmem:[#allocation2 + $0xf0] sm:$0xff] }
 0x1bf   : > { %3237 = vrot.lane.b32.xlu1 %v3162_v30, %s7444_s23  ;;  %2746 = vst.msk [vmem:[#allocation4 + $0x70] sm:$0xff] %vm2731_vm12, %v2664_v62  ;;  %v1231_v31 = vmul.f32 0.25, %v969_v54  ;;  %v1232_v2 = vmul.f32 0.25, %v976_v17  ;;  %v1285_v29 = vpack.c.bf16 %v1221_v1, %v1221_v1  ;;  %v1286_v30 = vpack.c.bf16 %v1222_v0, %v1222_v0  ;;  %v3166_v0 = vld [vmem:[#allocation2 + $0xe2] sm:$0xff] }
 0x1c0   : > { %3046 = vrot.lane.b32.xlu0 %v2970_v16, %s7443_s14  ;;  %v1287_v23 = vpack.c.bf16 %v1223_v34, %v1223_v34  ;;  %v1289_v63 = vpack.c.bf16 %v1225_v10, %v1225_v10  ;;  %v1288_v37 = vpack.c.bf16 %v1224_v61, %v1224_v61  ;;  %v1290_v16 = vpack.c.bf16 %v1226_v19, %v1226_v19  ;;  %v10799_v61 = vld [vmem:[#allocation27_spill] sm:$0xff]  ;;  %v10800_v19 = vld [vmem:[#allocation26_spill] sm:$0xff] }
 0x1c1   : > { %v2662_v11 = vpop.permute.xlu1 %2661  ;;  %v1291_v56 = vpack.c.bf16 %v1227_v24, %v1227_v24  ;;  %v1292_v57 = vpack.c.bf16 %v1228_v48, %v1228_v48  ;;  %v1293_v36 = vpack.c.bf16 %v1229_v45, %v1229_v45  ;;  %v1294_v62 = vpack.c.bf16 %v1230_v14, %v1230_v14  ;;  %v2783_v54 = vld [vmem:[#allocation2 + $0x108] sm:$0xff] }
 0x1c2   : > { %2745 = vst.msk [vmem:[#allocation4 + $0x68] sm:$0xff] %vm2731_vm12, %v2662_v11  ;;  %v2668_v7 = vpop.permute.xlu0 %2667  ;;  %v1295_v21 = vpack.c.bf16 %v1231_v31, %v1231_v31  ;;  %v1410_v13 = vunpack.c.l.b16 %v1281_v46  ;;  %v1296_v59 = vpack.c.bf16 %v1232_v2, %v1232_v2  ;;  %v1411_v50 = vunpack.c.l.b16 %v1282_v49  ;;  %v10802_v2 = vld [vmem:[#allocation29_spill] sm:$0xff] }
 0x1c3   : > { %2859 = vrot.lane.b32.xlu1 %v2780_v12, %s7442_s11  ;;  %2748 = vst.msk [vmem:[#allocation4 + $0x80] sm:$0xff] %vm2731_vm12, %v2668_v7  ;;  %v1412_v43 = vunpack.c.l.b16 %v1283_v18  ;;  %v1413_v22 = vunpack.c.l.b16 %v1284_v35  ;;  %v1414_v41 = vunpack.c.l.b16 %v1285_v29  ;;  %v1415_v12 = vunpack.c.l.b16 %v1286_v30  ;;  %v10803_v29 = vld [vmem:[#allocation31_spill] sm:$0xff] }
 0x1c4   : > { %3050 = vrot.lane.b32.xlu0 %v2972_v42, %s7443_s14  ;;  %v1416_v25 = vunpack.c.l.b16 %v1287_v23  ;;  %v1418_v58 = vunpack.c.l.b16 %v1289_v63  ;;  %v1417_v11 = vunpack.c.l.b16 %v1288_v37  ;;  %v1419_v42 = vunpack.c.l.b16 %v1290_v16  ;;  %v10804_v23 = vld [vmem:[#allocation30_spill] sm:$0xff] }
 0x1c5   : > { %v2666_v44 = vpop.permute.xlu1 %2665  ;;  %v1420_v39 = vunpack.c.l.b16 %v1291_v56  ;;  %v1421_v4 = vunpack.c.l.b16 %v1292_v57  ;;  %v1422_v6 = vunpack.c.l.b16 %v1293_v36  ;;  %v1423_v7 = vunpack.c.l.b16 %v1294_v62  ;;  %v10805_v56 = vld [vmem:[#allocation32_spill] sm:$0xff] }
 0x1c6   : > { %2747 = vst.msk [vmem:[#allocation4 + $0x78] sm:$0xff] %vm2731_vm12, %v2666_v44  ;;  %v2672_v8 = vpop.permute.xlu0 %2671  ;;  %v1424_v55 = vunpack.c.l.b16 %v1295_v21  ;;  %v1479_v20 = vsel %vm1458_vm13, %v1411_v50, %v1410_v13  ;;  %v1425_v5 = vunpack.c.l.b16 %v1296_v59  ;;  %v1486_v47 = vsel %vm1458_vm13, %v1419_v42, %v1418_v58  ;;  %v2974_v36 = vld [vmem:[#allocation2 + $0xf1] sm:$0xff] }
 0x1c7   : > { %3048 = vrot.lane.b32.xlu1 %v2971_v26, %s7443_s14  ;;  %2750 = vst.msk [vmem:[#allocation4 + $0x90] sm:$0xff] %vm2731_vm12, %v2672_v8  ;;  %v1480_v60 = vsel %vm1460_vm14, %v1412_v43, %v1479_v20  ;;  %v377_v1 = vsel %vm197_vm0, %v10798_v27, 0.0  ;;  %v1487_v34 = vsel %vm1460_vm14, %v1420_v39, %v1486_v47  ;;  %v378_v10 = vsel %vm197_vm0, %v10799_v61, 0.0  ;;  %v10801_v8 = vld [vmem:[#allocation28_spill] sm:$0xff] }
 0x1c8   : > { %3239 = vrot.lane.b32.xlu0 %v3163_v9, %s7444_s23  ;;  %v1481_v26 = vsel %vm1462_vm15, %v1413_v22, %v1480_v60  ;;  %v380_v44 = vsel %vm197_vm0, %v10800_v19, 0.0  ;;  %v1488_v24 = vsel %vm1462_vm15, %v1421_v4, %v1487_v34  ;;  %v379_v48 = vadd.f32 %v378_v10, %v377_v1 }
 0x1c9   : > { %v2670_v32 = vpop.permute.xlu1 %2669  ;;  %v1482_v17 = vsel %vm1464_vm1, %v1414_v41, %v1481_v26  ;;  %v381_v45 = vsel %vm197_vm0, %v10801_v8, 0.0  ;;  %v1489_v49 = vsel %vm1464_vm1, %v1422_v6, %v1488_v24  ;;  %v383_v18 = vsel %vm197_vm0, %v10802_v2, 0.0  ;;  %v7364_v26 = vld [vmem:[%s10618_s1 + $0x10] ss:$0 sps:$4 sm:$0x33]   ;;  %v3167_v8 = vld [vmem:[#allocation2 + $0xf2] sm:$0xff] }
 0x1ca   : > { %2749 = vst.msk [vmem:[#allocation4 + $0x88] sm:$0xff] %vm2731_vm12, %v2670_v32  ;;  %v2676_v3 = vpop.permute.xlu0 %2675  ;;  %v1483_v46 = vsel %vm1466_vm3, %v1415_v12, %v1482_v17  ;;  %v382_v31 = vadd.f32 %v381_v45, %v380_v44  ;;  %v384_v30 = vsel %vm197_vm0, %v10803_v29, 0.0  ;;  %v386_v63 = vsel %vm197_vm0, %v10804_v23, 0.0  ;;  %v2782_v32 = vld [vmem:[#allocation2 + $0xf8] sm:$0xff]  ;;  %v7363_v12 = vld [vmem:[%s10618_s1 + $0x8] sm:$0xff]  }
 0x1cb   : > { %3052 = vrot.lane.b32.xlu1 %v2973_v28, %s7443_s14  ;;  %2752 = vst.msk [vmem:[#allocation4 + $0xa0] sm:$0xff] %vm2731_vm12, %v2676_v3  ;;  %v1484_v35 = vsel %vm1468_vm4, %v1416_v25, %v1483_v46  ;;  %v1490_v28 = vsel %vm1466_vm3, %v1423_v7, %v1489_v49  ;;  %v385_v16 = vadd.f32 %v384_v30, %v383_v18  ;;  %v387_v57 = vsel %vm197_vm0, %v10805_v56, 0.0  ;;  %v2976_v7 = vld [vmem:[#allocation2 + $0x109] sm:$0xff]  ;;  %v2975_v44 = vld [vmem:[#allocation2 + $0xf9] sm:$0xff] }
 0x1cc   : > { %3243 = vrot.lane.b32.xlu0 %v3165_v52, %s7444_s23  ;;  %v1485_v52 = vsel %vm1470_vm5, %v1417_v11, %v1484_v35  ;;  %v1491_v37 = vsel %vm1468_vm4, %v1424_v55, %v1490_v28  ;;  %v388_v21 = vadd.f32 %v387_v57, %v386_v63  ;;  %v553_v13 = vcombine.high %v379_v48, %v379_v48  ;;  %v2784_v11 = vld [vmem:[#allocation2 + $0x110] sm:$0xff] }
 0x1cd   : > { %v2674_v53 = vpop.permute.xlu1 %2673  ;;  %v1492_v62 = vsel %vm1470_vm5, %v1425_v5, %v1491_v37  ;;  %v560_v59 = vrot.slane %v379_v48, %v8485_v40  ;;  %v570_v22 = vcombine.high %v382_v31, %v382_v31  ;;  %v587_v41 = vcombine.high %v385_v16, %v385_v16 }
 0x1ce   : > { %2751 = vst.msk [vmem:[#allocation4 + $0x98] sm:$0xff] %vm2731_vm12, %v2674_v53  ;;  %v2680_v38 = vpop.permute.xlu0 %2679  ;;  %v1522_v43 = vpack.c.b16 %v1492_v62, %v1485_v52  ;;  %v567_v25 = vrot.slane %v553_v13, %v8485_v40  ;;  %v8881_v53 = vrot.slane %v385_v16, %v8485_v40  ;;  %v8894_v5 = vrot.slane %v388_v21, %v8485_v40 }
 0x1cf   : > { %3241 = vrot.lane.b32.xlu1 %v3164_v33, %s7444_s23  ;;  %2754 = vst.msk [vmem:[#allocation4 + $0xb0] sm:$0xff] %vm2731_vm12, %v2680_v38  ;;  %v577_v33 = vrot.slane %v382_v31, %v8485_v40  ;;  %v568_v58 = vcombine.high %v560_v59, %v560_v59  ;;  %v584_v42 = vrot.slane %v570_v22, %v8485_v40  ;;  %v977_v38 = vsel %vm200_vm2, %v560_v59, 0.0 }
 0x1d0   : > { %2861 = vrot.lane.b32.xlu0 %v2781_v15, %s7442_s11  ;;  %v604_v15 = vcombine.high %v388_v21, %v388_v21  ;;  %7218 = vmatmul.mubr.msk.bf16.vlgmr.msra.gmra.mrb[0].mxu1 %vm197_vm0, %v1522_v43  ;;  %v8887_v4 = vrot.slane %v587_v41, %v8485_v40  ;;  %v569_v55 = vcombine.high %v567_v25, %v567_v25  ;;  %v991_v19 = vsel %vm200_vm2, %v567_v25, 0.0 }
 0x1d1   : > { %v2678_v9 = vpop.permute.xlu1 %2677  ;;  %v585_v39 = vcombine.high %v577_v33, %v577_v33  ;;  %7226 = vmatpush3.bf16.msra.mxu1 %v8657_v51  ;;  %v602_v20 = vcombine.high %v8881_v53, %v8881_v53  ;;  %v586_v27 = vcombine.high %v584_v42, %v584_v42  ;;  %v984_v51 = vsel %vm200_vm2, %v568_v58, 0.0 }
 0x1d2   : > { %2753 = vst.msk [vmem:[#allocation4 + $0xa8] sm:$0xff] %vm2731_vm12, %v2678_v9  ;;  %v2684_v14 = vpop.permute.xlu0 %2683  ;;  %v8897_v60 = vrot.slane %v604_v15, %v8485_v40  ;;  %v603_v1 = vcombine.high %v8887_v4, %v8887_v4  ;;  %7227 = vmatprep.subr.bf16.mxu1 %v7363_v12  ;;  %v619_v34 = vcombine.high %v8894_v5, %v8894_v5  ;;  %v985_v10 = vrot.slane %v984_v51, 4  ;;  %v3168_v15 = vld [vmem:[#allocation2 + $0xfa] sm:$0xff] }
 0x1d3   : > { %3245 = vrot.lane.b32.xlu1 %v3166_v0, %s7444_s23  ;;  %2756 = vst.msk [vmem:[#allocation4 + $0xc0] sm:$0xff] %vm2731_vm12, %v2684_v14  ;;  %v978_v0 = vrot.slane %v977_v38, 4  ;;  %v998_v17 = vsel %vm200_vm2, %v569_v55, 0.0  ;;  %v1005_v24 = vsel %vm200_vm2, %v577_v33, 0.0  ;;  %v1012_v49 = vsel %vm200_vm2, %v585_v39, 0.0 }
 0x1d4   : > { %2865 = vrot.lane.b32.xlu0 %v2783_v54, %s7442_s11  ;;  %v620_v61 = vcombine.high %v8897_v60, %v8897_v60  ;;  %v992_v54 = vrot.slane %v991_v19, 4  ;;  %v986_v45 = vadd.f32 %v985_v10, %v984_v51  ;;  %v999_v14 = vrot.slane %v998_v17, 4 }
 0x1d5   : > { %v2682_v3 = vpop.permute.xlu1 %2681  ;;  %v979_v9 = vadd.f32 %v978_v0, %v977_v38  ;;  %v1006_v46 = vrot.slane %v1005_v24, 4  ;;  %7228 = vmatpush3.bf16.msra.mxu1 %v7363_v12  ;;  %v1013_v35 = vrot.slane %v1012_v49, 4  ;;  %v1019_v28 = vsel %vm200_vm2, %v584_v42, 0.0 }
 0x1d6   : > { %2755 = vst.msk [vmem:[#allocation4 + $0xb8] sm:$0xff] %vm2731_vm12, %v2682_v3  ;;  %v2688_v50 = vpop.permute.xlu0 %2687  ;;  %v993_v18 = vadd.f32 %v992_v54, %v991_v19  ;;  %7306 = vmatprep.subr.msk.bf16.mxu1 %vm1537_vm11, %v7364_v26  ;;  %v987_v29 = vrot.slane %v986_v45, 2  ;;  %v1000_v30 = vadd.f32 %v999_v14, %v998_v17  ;;  %v1020_v63 = vrot.slane %v1019_v28, 4  ;;  %v3169_v3 = vld [vmem:[#allocation2 + $0x10a] sm:$0xff] }
 0x1d7   : > { %2863 = vrot.lane.b32.xlu1 %v2782_v32, %s7442_s11  ;;  %2758 = vst.msk [vmem:[#allocation4 + $0xd0] sm:$0xff] %vm2731_vm12, %v2688_v50  ;;  %v980_v2 = vrot.slane %v979_v9, 2  ;;  %v1007_v23 = vadd.f32 %v1006_v46, %v1005_v24  ;;  %v2977_v32 = vld [vmem:[#allocation2 + $0x111] sm:$0xff]  ;;  %v1014_v16 = vadd.f32 %v1013_v35, %v1012_v49  ;;  %v1026_v56 = vsel %vm200_vm2, %v586_v27, 0.0 }
 0x1d8   : > { %3054 = vrot.lane.b32.xlu0 %v2974_v36, %s7443_s14  ;;  %v994_v37 = vrot.slane %v993_v18, 2  ;;  %v988_v36 = vadd.f32 %v987_v29, %v986_v45  ;;  %v1001_v62 = vrot.slane %v1000_v30, 2  ;;  %v1021_v13 = vadd.f32 %v1020_v63, %v1019_v28 }
 0x1d9   : > { %v2686_v6 = vpop.permute.xlu1 %2685  ;;  %v981_v52 = vadd.f32 %v980_v2, %v979_v9  ;;  %v1008_v21 = vrot.slane %v1007_v23, 2  ;;  %v1015_v22 = vrot.slane %v1014_v16, 2  ;;  %v1027_v33 = vrot.slane %v1026_v56, 4 }
 0x1da   : > { %2757 = vst.msk [vmem:[#allocation4 + $0xc8] sm:$0xff] %vm2731_vm12, %v2686_v6  ;;  %v2692_v47 = vpop.permute.xlu0 %2691  ;;  %v995_v43 = vadd.f32 %v994_v37, %v993_v18  ;;  %v989_v41 = vrot.slane %v988_v36, 1  ;;  %v1002_v12 = vadd.f32 %v1001_v62, %v1000_v30  ;;  %v1022_v58 = vrot.slane %v1021_v13, 2 }
 0x1db   : > { %2867 = vrot.lane.b32.xlu1 %v2784_v11, %s7442_s11  ;;  %2760 = vst.msk [vmem:[#allocation4 + $0xe0] sm:$0xff] %vm2731_vm12, %v2692_v47  ;;  %v982_v50 = vrot.slane %v981_v52, 1  ;;  %v1009_v25 = vadd.f32 %v1008_v21, %v1007_v23  ;;  %v1016_v39 = vadd.f32 %v1015_v22, %v1014_v16  ;;  %v1028_v38 = vadd.f32 %v1027_v33, %v1026_v56  ;;  %v2786_v16 = vld [vmem:[#allocation2 + $0x128] sm:$0xff] }
 0x1dc   : > { %3058 = vrot.lane.b32.xlu0 %v2976_v7, %s7443_s14  ;;  %v996_v42 = vrot.slane %v995_v43, 1  ;;  %v2785_v7 = vld [vmem:[#allocation2 + $0x120] sm:$0xff]  ;;  %v8930_v55 = vadd.f32 %v989_v41, %v988_v36  ;;  %v1003_v47 = vrot.slane %v1002_v12, 1  ;;  %v1023_v0 = vadd.f32 %v1022_v58, %v1021_v13 }
 0x1dd   : > { %v2690_v48 = vpop.permute.xlu1 %2689  ;;  %v8928_v11 = vadd.f32 %v982_v50, %v981_v52  ;;  %v1010_v27 = vrot.slane %v1009_v25, 1  ;;  %v1017_v10 = vrot.slane %v1016_v39, 1  ;;  %v1029_v19 = vrot.slane %v1028_v38, 2  ;;  %v2788_v58 = vld [vmem:[#allocation2 + $0x140] sm:$0xff] }
 0x1de   : > { %2759 = vst.msk [vmem:[#allocation4 + $0xd8] sm:$0xff] %vm2731_vm12, %v2690_v48  ;;  %v2696_v31 = vpop.permute.xlu0 %2695  ;;  %v8933_v26 = vadd.f32 %v996_v42, %v995_v43  ;;  %v8939_v9 = vadd.f32 %v1003_v47, %v1002_v12  ;;  %v1024_v17 = vrot.slane %v1023_v0, 1  ;;  %v3170_v48 = vld [vmem:[#allocation2 + $0x112] sm:$0xff]  ;;  %v1040_v14 = vsel %vm200_vm2, %v602_v20, 0.0 }
 0x1df   : > { %3056 = vrot.lane.b32.xlu1 %v2975_v44, %s7443_s14  ;;  %2762 = vst.msk [vmem:[#allocation4 + $0xf0] sm:$0xff] %vm2731_vm12, %v2696_v31  ;;  %v1033_v44 = vsel %vm200_vm2, %v8881_v53, 0.0  ;;  %v8941_v54 = vadd.f32 %v1010_v27, %v1009_v25  ;;  %v1030_v45 = vadd.f32 %v1029_v19, %v1028_v38  ;;  %v1047_v46 = vsel %vm200_vm2, %v8887_v4, 0.0  ;;  %v2787_v31 = vld [vmem:[#allocation2 + $0x138] sm:$0xff] }
 0x1e0   : > { %3247 = vrot.lane.b32.xlu0 %v3167_v8, %s7444_s23  ;;  %v1034_v24 = vrot.slane %v1033_v44, 4  ;;  %v8944_v8 = vadd.f32 %v1017_v10, %v1016_v39  ;;  %v8952_v2 = vadd.f32 %v1024_v17, %v1023_v0  ;;  %v1041_v35 = vrot.slane %v1040_v14, 4 }
 0x1e1   : > { %v2694_v57 = vpop.permute.xlu1 %2693  ;;  %v1048_v28 = vrot.slane %v1047_v46, 4  ;;  %v1031_v30 = vrot.slane %v1030_v45, 1  ;;  %v1054_v53 = vsel %vm200_vm2, %v603_v1, 0.0  ;;  %v1061_v20 = vsel %vm200_vm2, %v8894_v5, 0.0 }
 0x1e2   : > { %2761 = vst.msk [vmem:[#allocation4 + $0xe8] sm:$0xff] %vm2731_vm12, %v2694_v57  ;;  %v2830_v59 = vpop.permute.xlu0 %2829  ;;  %v1035_v18 = vadd.f32 %v1034_v24, %v1033_v44  ;;  %v1068_v23 = vsel %vm200_vm2, %v619_v34, 0.0  ;;  %v1055_v37 = vrot.slane %v1054_v53, 4  ;;  %v1062_v1 = vrot.slane %v1061_v20, 4  ;;  %v2978_v34 = vld [vmem:[#allocation2 + $0x121] sm:$0xff] }
 0x1e3   : > { %3060 = vrot.lane.b32.xlu1 %v2977_v32, %s7443_s14  ;;  %2926 = vst.msk [vmem:[#allocation4] sm:$0xff] %vm2925_vm6, %v2830_v59  ;;  %v1042_v32 = vadd.f32 %v1041_v35, %v1040_v14  ;;  %v1049_v52 = vadd.f32 %v1048_v28, %v1047_v46  ;;  %v8968_v4 = vadd.f32 %v1031_v30, %v1030_v45  ;;  %v1069_v56 = vrot.slane %v1068_v23, 4  ;;  %v2979_v14 = vld [vmem:[#allocation2 + $0x129] sm:$0xff] }
 0x1e4   : > { %3251 = vrot.lane.b32.xlu0 %v3169_v3, %s7444_s23  ;;  %v1036_v63 = vrot.slane %v1035_v18, 2  ;;  %v1075_v5 = vsel %vm200_vm2, %v8897_v60, 0.0  ;;  %v1056_v21 = vadd.f32 %v1055_v37, %v1054_v53  ;;  %v1063_v59 = vadd.f32 %v1062_v1, %v1061_v20  ;;  %v3171_v28 = vld [vmem:[#allocation2 + $0x122] sm:$0xff] }
 0x1e5   : > { %v2698_v6 = vpop.permute.xlu1 %2697  ;;  %v1043_v36 = vrot.slane %v1042_v32, 2  ;;  %v1050_v62 = vrot.slane %v1049_v52, 2  ;;  %v1070_v50 = vadd.f32 %v1069_v56, %v1068_v23  ;;  %v1076_v43 = vrot.slane %v1075_v5, 4 }
 0x1e6   : > { %2763 = vst.msk [vmem:[#allocation4 + $0xf8] sm:$0xff] %vm2731_vm12, %v2698_v6  ;;  %v2834_v51 = vpop.permute.xlu0 %2833  ;;  %v1037_v3 = vadd.f32 %v1036_v63, %v1035_v18  ;;  %v1082_v22 = vsel %vm200_vm2, %v620_v61, 0.0  ;;  %v1057_v25 = vrot.slane %v1056_v21, 2  ;;  %v8984_v45 = vmul.f32 0.25, %v8928_v11 }
 0x1e7   : > { %3249 = vrot.lane.b32.xlu1 %v3168_v15, %s7444_s23  ;;  %2928 = vst.msk [vmem:[#allocation4 + $0x10] sm:$0xff] %vm2925_vm6, %v2834_v51  ;;  %v1044_v41 = vadd.f32 %v1043_v36, %v1042_v32  ;;  %v1051_v12 = vadd.f32 %v1050_v62, %v1049_v52  ;;  %v1064_v15 = vrot.slane %v1063_v59, 2  ;;  %v1071_v42 = vrot.slane %v1070_v50, 2 }
 0x1e8   : > { %2869 = vrot.lane.b32.xlu0 %v2785_v7, %s7442_s11  ;;  %v1038_v33 = vrot.slane %v1037_v3, 1  ;;  %v1077_v39 = vadd.f32 %v1076_v43, %v1075_v5  ;;  %v1083_v38 = vrot.slane %v1082_v22, 4  ;;  %v2980_v7 = vld [vmem:[#allocation2 + $0x139] sm:$0xff]  ;;  %v1058_v27 = vadd.f32 %v1057_v25, %v1056_v21 }
 0x1e9   : > { %v2832_v49 = vpop.permute.xlu1 %2831  ;;  %v1045_v47 = vrot.slane %v1044_v41, 1  ;;  %v1052_v61 = vrot.slane %v1051_v12, 1  ;;  %v1065_v51 = vadd.f32 %v1064_v15, %v1063_v59  ;;  %v1072_v10 = vadd.f32 %v1071_v42, %v1070_v50 }
 0x1ea   : > { %2927 = vst.msk [vmem:[#allocation4 + $0x8] sm:$0xff] %vm2925_vm6, %v2832_v49  ;;  %v2838_v29 = vpop.permute.xlu0 %2837  ;;  %v1039_v60 = vadd.f32 %v1038_v33, %v1037_v3  ;;  %v1078_v19 = vrot.slane %v1077_v39, 2  ;;  %v1084_v44 = vadd.f32 %v1083_v38, %v1082_v22  ;;  %v1234_v30 = vmul.f32 0.25, %v8930_v55  ;;  %v3173_v3 = vld [vmem:[#allocation2 + $0x13a] sm:$0xff] }
 0x1eb   : > { %3253 = vrot.lane.b32.xlu1 %v3170_v48, %s7444_s23  ;;  %2930 = vst.msk [vmem:[#allocation4 + $0x20] sm:$0xff] %vm2925_vm6, %v2838_v29  ;;  %v1046_v17 = vadd.f32 %v1045_v47, %v1044_v41  ;;  %v1053_v24 = vadd.f32 %v1052_v61, %v1051_v12  ;;  %v1059_v48 = vrot.slane %v1058_v27, 1  ;;  %v1066_v46 = vrot.slane %v1065_v51, 1  ;;  %v3172_v41 = vld [vmem:[#allocation2 + $0x12a] sm:$0xff] }
 0x1ec   : > { %2873 = vrot.lane.b32.xlu0 %v2787_v31, %s7442_s11  ;;  %v1073_v49 = vrot.slane %v1072_v10, 1  ;;  %v1079_v31 = vadd.f32 %v1078_v19, %v1077_v39  ;;  %v1085_v18 = vrot.slane %v1084_v44, 2  ;;  %v1235_v53 = vmul.f32 0.25, %v8933_v26  ;;  %v2789_v39 = vld [vmem:[#allocation2 + $0x150] sm:$0xff] }
 0x1ed   : > { %v2836_v57 = vpop.permute.xlu1 %2835  ;;  %v1060_v29 = vadd.f32 %v1059_v48, %v1058_v27  ;;  %v1236_v20 = vmul.f32 0.25, %v8939_v9  ;;  %v1067_v23 = vadd.f32 %v1066_v46, %v1065_v51  ;;  %v1237_v37 = vmul.f32 0.25, %v8941_v54  ;;  %v2981_v9 = vld [vmem:[#allocation2 + $0x141] sm:$0xff] }
 0x1ee   : > { %2929 = vst.msk [vmem:[#allocation4 + $0x18] sm:$0xff] %vm2925_vm6, %v2836_v57  ;;  %v2842_v13 = vpop.permute.xlu0 %2841  ;;  %v1074_v63 = vadd.f32 %v1073_v49, %v1072_v10  ;;  %v1080_v32 = vrot.slane %v1079_v31, 1  ;;  %v1086_v52 = vadd.f32 %v1085_v18, %v1084_v44  ;;  %v1239_v55 = vmul.f32 0.25, %v8952_v2 }
 0x1ef   : > { %2871 = vrot.lane.b32.xlu1 %v2786_v16, %s7442_s11  ;;  %2932 = vst.msk [vmem:[#allocation4 + $0x30] sm:$0xff] %vm2925_vm6, %v2842_v13  ;;  %v1238_v16 = vmul.f32 0.25, %v8944_v8  ;;  %v1240_v26 = vmul.f32 0.25, %v8968_v4  ;;  %v1241_v5 = vmul.f32 0.25, %v1039_v60  ;;  %v1242_v57 = vmul.f32 0.25, %v1046_v17 }
 0x1f0   : > { %3062 = vrot.lane.b32.xlu0 %v2978_v34, %s7443_s14  ;;  %v1081_v1 = vadd.f32 %v1080_v32, %v1079_v31  ;;  %v1087_v56 = vrot.slane %v1086_v52, 1  ;;  %v1243_v36 = vmul.f32 0.25, %v1053_v24  ;;  %v1244_v62 = vmul.f32 0.25, %v1060_v29  ;;  %v3174_v24 = vld [vmem:[#allocation2 + $0x142] sm:$0xff] }
 0x1f1   : > { %v2840_v6 = vpop.permute.xlu1 %2839  ;;  %v1245_v21 = vmul.f32 0.25, %v1067_v23  ;;  %v1246_v13 = vmul.f32 0.25, %v1074_v63  ;;  %v1297_v4 = vpack.c.bf16 %v8984_v45, %v8984_v45  ;;  %v1298_v59 = vpack.c.bf16 %v1234_v30, %v1234_v30  ;;  %v2791_v31 = vld [vmem:[#allocation2 + $0x168] sm:$0xff] }
 0x1f2   : > { %2931 = vst.msk [vmem:[#allocation4 + $0x28] sm:$0xff] %vm2925_vm6, %v2840_v6  ;;  %v2846_v0 = vpop.permute.xlu0 %2845  ;;  %v1088_v8 = vadd.f32 %v1087_v56, %v1086_v52  ;;  %v1247_v2 = vmul.f32 0.25, %v1081_v1  ;;  %v1299_v50 = vpack.c.bf16 %v1235_v53, %v1235_v53  ;;  %v1300_v43 = vpack.c.bf16 %v1236_v20, %v1236_v20  ;;  %v10806_v52 = vld [vmem:[#allocation33_spill] sm:$0xff] }
 0x1f3   : > { %2875 = vrot.lane.b32.xlu1 %v2788_v58, %s7442_s11  ;;  %2934 = vst.msk [vmem:[#allocation4 + $0x40] sm:$0xff] %vm2925_vm6, %v2846_v0  ;;  %v1301_v22 = vpack.c.bf16 %v1237_v37, %v1237_v37  ;;  %v1302_v33 = vpack.c.bf16 %v1238_v16, %v1238_v16  ;;  %v1303_v25 = vpack.c.bf16 %v1239_v55, %v1239_v55  ;;  %v1426_v51 = vunpack.c.l.b16 %v1297_v4  ;;  %v10807_v16 = vld [vmem:[#allocation35_spill] sm:$0xff] }
 0x1f4   : > { %3066 = vrot.lane.b32.xlu0 %v2980_v7, %s7443_s14  ;;  %v1248_v12 = vmul.f32 0.25, %v1088_v8  ;;  %v1304_v58 = vpack.c.bf16 %v1240_v26, %v1240_v26  ;;  %v1305_v15 = vpack.c.bf16 %v1241_v5, %v1241_v5  ;;  %v1306_v38 = vpack.c.bf16 %v1242_v57, %v1242_v57  ;;  %v2790_v26 = vld [vmem:[#allocation2 + $0x158] sm:$0xff]  ;;  %v10808_v5 = vld [vmem:[#allocation34_spill] sm:$0xff] }
 0x1f5   : > { %v2844_v35 = vpop.permute.xlu1 %2843  ;;  %v1307_v6 = vpack.c.bf16 %v1243_v36, %v1243_v36  ;;  %v1308_v7 = vpack.c.bf16 %v1244_v62, %v1244_v62  ;;  %v1309_v60 = vpack.c.bf16 %v1245_v21, %v1245_v21  ;;  %v1310_v61 = vpack.c.bf16 %v1246_v13, %v1246_v13  ;;  %v10809_v21 = vld [vmem:[#allocation36_spill] sm:$0xff] }
 0x1f6   : > { %2933 = vst.msk [vmem:[#allocation4 + $0x38] sm:$0xff] %vm2925_vm6, %v2844_v35  ;;  %v2850_v11 = vpop.permute.xlu0 %2849  ;;  %v1311_v27 = vpack.c.bf16 %v1247_v2, %v1247_v2  ;;  %v1312_v0 = vpack.c.bf16 %v1248_v12, %v1248_v12  ;;  %v1427_v10 = vunpack.c.l.b16 %v1298_v59  ;;  %v1428_v19 = vunpack.c.l.b16 %v1299_v50 }
 0x1f7   : > { %3064 = vrot.lane.b32.xlu1 %v2979_v14, %s7443_s14  ;;  %2936 = vst.msk [vmem:[#allocation4 + $0x50] sm:$0xff] %vm2925_vm6, %v2850_v11  ;;  %v1429_v44 = vunpack.c.l.b16 %v1300_v43  ;;  %v1430_v17 = vunpack.c.l.b16 %v1301_v22  ;;  %v1431_v48 = vunpack.c.l.b16 %v1302_v33  ;;  %v1432_v45 = vunpack.c.l.b16 %v1303_v25  ;;  %v10811_v43 = vld [vmem:[#allocation41_spill] sm:$0xff]  ;;  %v10812_v25 = vld [vmem:[#allocation38_spill] sm:$0xff] }
 0x1f8   : > { %3255 = vrot.lane.b32.xlu0 %v3171_v28, %s7444_s23  ;;  %v1433_v14 = vunpack.c.l.b16 %v1304_v58  ;;  %v1434_v46 = vunpack.c.l.b16 %v1305_v15  ;;  %v1435_v18 = vunpack.c.l.b16 %v1306_v38  ;;  %v1436_v35 = vunpack.c.l.b16 %v1307_v6  ;;  %v2792_v15 = vld [vmem:[#allocation2 + $0x170] sm:$0xff]  ;;  %v10813_v38 = vld [vmem:[#allocation42_spill] sm:$0xff] }
 0x1f9   : > { %v2848_v34 = vpop.permute.xlu1 %2847  ;;  %v1437_v28 = vunpack.c.l.b16 %v1308_v7  ;;  %v1438_v29 = vunpack.c.l.b16 %v1309_v60  ;;  %v1439_v53 = vunpack.c.l.b16 %v1310_v61  ;;  %v1440_v20 = vunpack.c.l.b16 %v1311_v27 }
 0x1fa   : > { %2935 = vst.msk [vmem:[#allocation4 + $0x48] sm:$0xff] %vm2925_vm6, %v2848_v34  ;;  %v2854_v54 = vpop.permute.xlu0 %2853  ;;  %v1441_v11 = vunpack.c.l.b16 %v1312_v0  ;;  %v1493_v23 = vsel %vm1458_vm13, %v1427_v10, %v1426_v51  ;;  %v1500_v32 = vsel %vm1458_vm13, %v1435_v18, %v1434_v46  ;;  %v389_v37 = vsel %vm197_vm0, %v10806_v52, 0.0 }
 0x1fb   : > { %3068 = vrot.lane.b32.xlu1 %v2981_v9, %s7443_s14  ;;  %2938 = vst.msk [vmem:[#allocation4 + $0x60] sm:$0xff] %vm2925_vm6, %v2854_v54  ;;  %v1494_v63 = vsel %vm1460_vm14, %v1428_v19, %v1493_v23  ;;  %v390_v55 = vsel %vm197_vm0, %v10807_v16, 0.0  ;;  %v1501_v1 = vsel %vm1460_vm14, %v1436_v35, %v1500_v32  ;;  %v392_v57 = vsel %vm197_vm0, %v10808_v5, 0.0  ;;  %v10810_v54 = vld [vmem:[#allocation37_spill] sm:$0xff] }
 0x1fc   : > { %3259 = vrot.lane.b32.xlu0 %v3173_v3, %s7444_s23  ;;  %v1495_v9 = vsel %vm1462_vm15, %v1429_v44, %v1494_v63  ;;  %v391_v56 = vadd.f32 %v390_v55, %v389_v37  ;;  %v2982_v3 = vld [vmem:[#allocation2 + $0x151] sm:$0xff]  ;;  %v1502_v62 = vsel %vm1462_vm15, %v1437_v28, %v1501_v1  ;;  %v393_v13 = vsel %vm197_vm0, %v10809_v21, 0.0 }
 0x1fd   : > { %v2852_v42 = vpop.permute.xlu1 %2851  ;;  %v1496_v36 = vsel %vm1464_vm1, %v1430_v17, %v1495_v9  ;;  %v395_v8 = vsel %vm197_vm0, %v10810_v54, 0.0  ;;  %v1503_v59 = vsel %vm1464_vm1, %v1438_v29, %v1502_v62  ;;  %v394_v50 = vadd.f32 %v393_v13, %v392_v57  ;;  %v3177_v21 = vld [vmem:[#allocation2 + $0x16a] sm:$0xff] }
 0x1fe   : > { %2937 = vst.msk [vmem:[#allocation4 + $0x58] sm:$0xff] %vm2925_vm6, %v2852_v42  ;;  %v3023_v47 = vpop.permute.xlu0 %3022  ;;  %v1497_v4 = vsel %vm1466_vm3, %v1431_v48, %v1496_v36  ;;  %v396_v22 = vsel %vm197_vm0, %v10811_v43, 0.0  ;;  %v398_v58 = vsel %vm197_vm0, %v10812_v25, 0.0  ;;  %v399_v6 = vsel %vm197_vm0, %v10813_v38, 0.0 }
 0x1ff   : > { %3257 = vrot.lane.b32.xlu1 %v3172_v41, %s7444_s23  ;;  %3119 = vst.msk [vmem:[#allocation4] sm:$0xff] %vm3118_vm7, %v3023_v47  ;;  %v1498_v33 = vsel %vm1468_vm4, %v1432_v45, %v1497_v4  ;;  %v1504_v41 = vsel %vm1466_vm3, %v1439_v53, %v1503_v59  ;;  %v397_v12 = vadd.f32 %v396_v22, %v395_v8  ;;  %v2984_v47 = vld [vmem:[#allocation2 + $0x169] sm:$0xff]  ;;  %v3175_v53 = vld [vmem:[#allocation2 + $0x152] sm:$0xff]  ;;  %vm252_vm10 = vcmask 57344  }
 0x200   : > { %2877 = vrot.lane.b32.xlu0 %v2789_v39, %s7442_s11  ;;  %v1499_v42 = vsel %vm1470_vm5, %v1433_v14, %v1498_v33  ;;  %v1505_v39 = vsel %vm1468_vm4, %v1440_v20, %v1504_v41  ;;  %v621_v7 = vcombine.high %v391_v56, %v391_v56  ;;  %v400_v27 = vadd.f32 %v399_v6, %v398_v58  ;;  %v3176_v58 = vld [vmem:[#allocation2 + $0x15a] sm:$0xff] }
 0x201   : > { %v2856_v49 = vpop.permute.xlu1 %2855  ;;  %v1506_v61 = vsel %vm1470_vm5, %v1441_v11, %v1505_v39  ;;  %v628_v0 = vrot.slane %v391_v56, %v8485_v40  ;;  %v638_v51 = vcombine.high %v394_v50, %v394_v50  ;;  %v645_v17 = vrot.slane %v394_v50, %v8485_v40 }
 0x202   : > { %2939 = vst.msk [vmem:[#allocation4 + $0x68] sm:$0xff] %vm2925_vm6, %v2856_v49  ;;  %v3027_v30 = vpop.permute.xlu0 %3026  ;;  %v1523_v19 = vpack.c.b16 %v1506_v61, %v1499_v42  ;;  %v635_v44 = vrot.slane %v621_v7, %v8485_v40  ;;  %v9054_v14 = vrot.slane %v397_v12, %v8485_v40  ;;  %v672_v46 = vcombine.high %v400_v27, %v400_v27  ;;  %v2983_v49 = vld [vmem:[#allocation2 + $0x159] sm:$0xff] }
 0x203   : > { %3261 = vrot.lane.b32.xlu1 %v3174_v24, %s7444_s23  ;;  %3121 = vst.msk [vmem:[#allocation4 + $0x10] sm:$0xff] %vm3118_vm7, %v3027_v30  ;;  %v655_v24 = vcombine.high %v397_v12, %v397_v12  ;;  %v636_v48 = vcombine.high %v628_v0, %v628_v0  ;;  %v652_v45 = vrot.slane %v638_v51, %v8485_v40  ;;  %v1089_v35 = vsel %vm200_vm2, %v628_v0, 0.0  ;;  %v2793_v7 = vld [vmem:[#allocation2 + $0x180] sm:$0xff] }
 0x204   : > { %2881 = vrot.lane.b32.xlu0 %v2791_v31, %s7442_s11  ;;  %7221 = vmatprep.mubr.msk.bf16.mxu1 %vm197_vm0, %v1523_v19  ;;  %v637_v31 = vcombine.high %v635_v44, %v635_v44  ;;  %v653_v18 = vcombine.high %v645_v17, %v645_v17  ;;  %v670_v20 = vcombine.high %v9054_v14, %v9054_v14  ;;  %v1090_v11 = vrot.slane %v1089_v35, 4 }
 0x205   : > { %v3025_v34 = vpop.permute.xlu1 %3024  ;;  %v654_v29 = vcombine.high %v652_v45, %v652_v45  ;;  %v9060_v30 = vrot.slane %v655_v24, %v8485_v40  ;;  %v1096_v23 = vsel %vm200_vm2, %v636_v48, 0.0  ;;  %v1103_v63 = vsel %vm200_vm2, %v635_v44, 0.0 }
 0x206   : > { %3120 = vst.msk [vmem:[#allocation4 + $0x8] sm:$0xff] %vm3118_vm7, %v3025_v34  ;;  %v3216_v2 = vpop.permute.xlu0 %3215  ;;  %v9069_v52 = vrot.slane %v400_v27, %v8485_v40  ;;  %v9072_v37 = vrot.slane %v672_v46, %v8485_v40  ;;  %v1097_v16 = vrot.slane %v1096_v23, 4  ;;  %v1104_v55 = vrot.slane %v1103_v63, 4  ;;  %v3178_v46 = vld [vmem:[#allocation2 + $0x172] sm:$0xff] }
 0x207   : > { %2879 = vrot.lane.b32.xlu1 %v2790_v26, %s7442_s11  ;;  %3312 = vst.msk [vmem:[#allocation4] sm:$0xff] %vm3311_vm8, %v3216_v2  ;;  %v2985_v26 = vld [vmem:[#allocation2 + $0x171] sm:$0xff]  ;;  %v1091_v9 = vadd.f32 %v1090_v11, %v1089_v35  ;;  %v1110_v1 = vsel %vm200_vm2, %v637_v31, 0.0  ;;  %v1117_v56 = vsel %vm200_vm2, %v645_v17, 0.0  ;;  %v1124_v5 = vsel %vm200_vm2, %v653_v18, 0.0 }
 0x208   : > { %3070 = vrot.lane.b32.xlu0 %v2982_v3, %s7443_s14  ;;  %v1098_v34 = vadd.f32 %v1097_v16, %v1096_v23  ;;  %v1105_v3 = vadd.f32 %v1104_v55, %v1103_v63  ;;  %v1111_v36 = vrot.slane %v1110_v1, 4  ;;  %v1118_v62 = vrot.slane %v1117_v56, 4 }
 0x209   : > { %v3029_v60 = vpop.permute.xlu1 %3028  ;;  %v1092_v13 = vrot.slane %v1091_v9, 2  ;;  %v1125_v54 = vrot.slane %v1124_v5, 4  ;;  %v1131_v8 = vsel %vm200_vm2, %v652_v45, 0.0  ;;  %v1138_v2 = vsel %vm200_vm2, %v654_v29, 0.0  ;;  %v2795_v29 = vld [vmem:[#allocation2 + $0x198] sm:$0xff] }
 0x20a   : > { %3122 = vst.msk [vmem:[#allocation4 + $0x18] sm:$0xff] %vm3118_vm7, %v3029_v60  ;;  %v3220_v10 = vpop.permute.xlu0 %3219  ;;  %v1099_v59 = vrot.slane %v1098_v34, 2  ;;  %v1106_v50 = vrot.slane %v1105_v3, 2  ;;  %v1112_v43 = vadd.f32 %v1111_v36, %v1110_v1  ;;  %v1119_v22 = vadd.f32 %v1118_v62, %v1117_v56 }
 0x20b   : > { %2883 = vrot.lane.b32.xlu1 %v2792_v15, %s7442_s11  ;;  %3314 = vst.msk [vmem:[#allocation4 + $0x10] sm:$0xff] %vm3311_vm8, %v3220_v10  ;;  %v1093_v33 = vadd.f32 %v1092_v13, %v1091_v9  ;;  %v1126_v41 = vadd.f32 %v1125_v54, %v1124_v5  ;;  %v1132_v12 = vrot.slane %v1131_v8, 4  ;;  %v1139_v25 = vrot.slane %v1138_v2, 4 }
 0x20c   : > { %3074 = vrot.lane.b32.xlu0 %v2984_v47, %s7443_s14  ;;  %v1100_v15 = vadd.f32 %v1099_v59, %v1098_v34  ;;  %v1107_v42 = vadd.f32 %v1106_v50, %v1105_v3  ;;  %v1113_v39 = vrot.slane %v1112_v43, 2  ;;  %v1120_v38 = vrot.slane %v1119_v22, 2  ;;  %v2794_v34 = vld [vmem:[#allocation2 + $0x188] sm:$0xff] }
 0x20d   : > { %v3218_v28 = vpop.permute.xlu1 %3217  ;;  %v1094_v60 = vrot.slane %v1093_v33, 1  ;;  %v1127_v47 = vrot.slane %v1126_v41, 2  ;;  %v1133_v61 = vadd.f32 %v1132_v12, %v1131_v8  ;;  %v1140_v27 = vadd.f32 %v1139_v25, %v1138_v2  ;;  %v2796_v12 = vld [vmem:[#allocation2 + $0x1a0] sm:$0xff] }
 0x20e   : > { %3313 = vst.msk [vmem:[#allocation4 + $0x8] sm:$0xff] %vm3311_vm8, %v3218_v28  ;;  %v3031_v32 = vpop.permute.xlu0 %3030  ;;  %v1101_v51 = vrot.slane %v1100_v15, 1  ;;  %v1108_v10 = vrot.slane %v1107_v42, 1  ;;  %v1114_v19 = vadd.f32 %v1113_v39, %v1112_v43  ;;  %v1121_v44 = vadd.f32 %v1120_v38, %v1119_v22  ;;  %v2988_v38 = vld [vmem:[#allocation2 + $0x199] sm:$0xff] }
 0x20f   : > { %3072 = vrot.lane.b32.xlu1 %v2983_v49, %s7443_s14  ;;  %3123 = vst.msk [vmem:[#allocation4 + $0x20] sm:$0xff] %vm3118_vm7, %v3031_v32  ;;  %v671_v17 = vcombine.high %v9060_v30, %v9060_v30  ;;  %v9090_v24 = vadd.f32 %v1127_v47, %v1126_v41  ;;  %v1134_v48 = vrot.slane %v1133_v61, 2  ;;  %v1141_v45 = vrot.slane %v1140_v27, 2 }
 0x210   : > { %3263 = vrot.lane.b32.xlu0 %v3175_v53, %s7444_s23  ;;  %v687_v49 = vcombine.high %v9069_v52, %v9069_v52  ;;  %v688_v31 = vcombine.high %v9072_v37, %v9072_v37  ;;  %v1115_v18 = vrot.slane %v1114_v19, 1  ;;  %v1122_v35 = vrot.slane %v1121_v44, 1 }
 0x211   : > { %v3222_v57 = vpop.permute.xlu1 %3221  ;;  %v9097_v53 = vadd.f32 %v1094_v60, %v1093_v33  ;;  %v9099_v11 = vadd.f32 %v1134_v48, %v1133_v61  ;;  %v9101_v23 = vadd.f32 %v1141_v45, %v1140_v27  ;;  %v1145_v63 = vsel %vm200_vm2, %v9054_v14, 0.0  ;;  %v2987_v48 = vld [vmem:[#allocation2 + $0x189] sm:$0xff] }
 0x212   : > { %3315 = vst.msk [vmem:[#allocation4 + $0x18] sm:$0xff] %vm3311_vm8, %v3222_v57  ;;  %v3035_v4 = vpop.permute.xlu0 %3034  ;;  %v9106_v16 = vadd.f32 %v1101_v51, %v1100_v15  ;;  %v9108_v55 = vadd.f32 %v1108_v10, %v1107_v42  ;;  %v1152_v9 = vsel %vm200_vm2, %v670_v20, 0.0  ;;  %v9116_v1 = vadd.f32 %v1115_v18, %v1114_v19 }
 0x213   : > { %3076 = vrot.lane.b32.xlu1 %v2985_v26, %s7443_s14  ;;  %3125 = vst.msk [vmem:[#allocation4 + $0x30] sm:$0xff] %vm3118_vm7, %v3035_v4  ;;  %v1146_v26 = vrot.slane %v1145_v63, 4  ;;  %v9118_v56 = vadd.f32 %v1122_v35, %v1121_v44  ;;  %v1129_v5 = vrot.slane %v9090_v24, 1  ;;  %v1153_v57 = vrot.slane %v1152_v9, 4  ;;  %v3179_v35 = vld [vmem:[#allocation2 + $0x182] sm:$0xff] }
 0x214   : > { %3267 = vrot.lane.b32.xlu0 %v3177_v21, %s7444_s23  ;;  %v1159_v14 = vsel %vm200_vm2, %v9060_v30, 0.0  ;;  %v1166_v20 = vsel %vm200_vm2, %v671_v17, 0.0  ;;  %v1173_v36 = vsel %vm200_vm2, %v9069_v52, 0.0  ;;  %v2986_v21 = vld [vmem:[#allocation2 + $0x181] sm:$0xff]  ;;  %v1136_v13 = vrot.slane %v9099_v11, 1 }
 0x215   : > { %v3033_v6 = vpop.permute.xlu1 %3032  ;;  %v1147_v3 = vadd.f32 %v1146_v26, %v1145_v63  ;;  %v1143_v54 = vrot.slane %v9101_v23, 1  ;;  %v1154_v8 = vadd.f32 %v1153_v57, %v1152_v9  ;;  %v1160_v2 = vrot.slane %v1159_v14, 4 }
 0x216   : > { %3124 = vst.msk [vmem:[#allocation4 + $0x28] sm:$0xff] %vm3118_vm7, %v3033_v6  ;;  %v3224_v0 = vpop.permute.xlu0 %3223  ;;  %v1167_v50 = vrot.slane %v1166_v20, 4  ;;  %v1174_v43 = vrot.slane %v1173_v36, 4  ;;  %v1180_v30 = vsel %vm200_vm2, %v687_v49, 0.0  ;;  %v1187_v41 = vsel %vm200_vm2, %v9072_v37, 0.0 }
 0x217   : > { %3265 = vrot.lane.b32.xlu1 %v3176_v58, %s7444_s23  ;;  %3316 = vst.msk [vmem:[#allocation4 + $0x20] sm:$0xff] %vm3311_vm8, %v3224_v0  ;;  %v1148_v59 = vrot.slane %v1147_v3, 2  ;;  %v1155_v52 = vrot.slane %v1154_v8, 2  ;;  %v1161_v22 = vadd.f32 %v1160_v2, %v1159_v14  ;;  %v1181_v33 = vrot.slane %v1180_v30, 4 }
 0x218   : > { %2885 = vrot.lane.b32.xlu0 %v2793_v7, %s7442_s11  ;;  %v1168_v58 = vadd.f32 %v1167_v50, %v1166_v20  ;;  %v1175_v15 = vadd.f32 %v1174_v43, %v1173_v36  ;;  %v1188_v42 = vrot.slane %v1187_v41, 4  ;;  %v1194_v47 = vsel %vm200_vm2, %v688_v31, 0.0 }
 0x219   : > { %v3037_v28 = vpop.permute.xlu1 %3036  ;;  %v1149_v25 = vadd.f32 %v1148_v59, %v1147_v3  ;;  %v1156_v6 = vadd.f32 %v1155_v52, %v1154_v8  ;;  %v1162_v7 = vrot.slane %v1161_v22, 2  ;;  %v1182_v60 = vadd.f32 %v1181_v33, %v1180_v30 }
 0x21a   : > { %3126 = vst.msk [vmem:[#allocation4 + $0x38] sm:$0xff] %vm3118_vm7, %v3037_v28  ;;  %v3228_v32 = vpop.permute.xlu0 %3227  ;;  %v1169_v0 = vrot.slane %v1168_v58, 2  ;;  %v1176_v37 = vrot.slane %v1175_v15, 2  ;;  %v1189_v51 = vadd.f32 %v1188_v42, %v1187_v41  ;;  %v1195_v17 = vrot.slane %v1194_v47, 4 }
 0x21b   : > { %3269 = vrot.lane.b32.xlu1 %v3178_v46, %s7444_s23  ;;  %3318 = vst.msk [vmem:[#allocation4 + $0x30] sm:$0xff] %vm3311_vm8, %v3228_v32  ;;  %v1150_v27 = vrot.slane %v1149_v25, 1  ;;  %v1157_v10 = vrot.slane %v1156_v6, 1  ;;  %v1163_v19 = vadd.f32 %v1162_v7, %v1161_v22  ;;  %v1183_v44 = vrot.slane %v1182_v60, 2 }
 0x21c   : > { %2889 = vrot.lane.b32.xlu0 %v2795_v29, %s7442_s11  ;;  %v1130_v45 = vadd.f32 %v1129_v5, %v9090_v24  ;;  %v1170_v46 = vadd.f32 %v1169_v0, %v1168_v58  ;;  %v1177_v49 = vadd.f32 %v1176_v37, %v1175_v15  ;;  %v1190_v31 = vrot.slane %v1189_v51, 2 }
 0x21d   : > { %v3226_v62 = vpop.permute.xlu1 %3225  ;;  %v1137_v28 = vadd.f32 %v1136_v13, %v9099_v11  ;;  %v1164_v29 = vrot.slane %v1163_v19, 1  ;;  %v1184_v63 = vadd.f32 %v1183_v44, %v1182_v60  ;;  %v1196_v32 = vadd.f32 %v1195_v17, %v1194_v47  ;;  %v2989_v11 = vld [vmem:[#allocation2 + $0x1a1] sm:$0xff] }
 0x21e   : > { %3317 = vst.msk [vmem:[#allocation4 + $0x28] sm:$0xff] %vm3311_vm8, %v3226_v62  ;;  %v3039_v4 = vpop.permute.xlu0 %3038  ;;  %v1144_v9 = vadd.f32 %v1143_v54, %v9101_v23  ;;  %v1171_v57 = vrot.slane %v1170_v46, 1  ;;  %v1191_v3 = vadd.f32 %v1190_v31, %v1189_v51  ;;  %v1151_v24 = vadd.f32 %v1150_v27, %v1149_v25  ;;  %v3181_v23 = vld [vmem:[#allocation2 + $0x19a] sm:$0xff]  ;;  %v3180_v25 = vld [vmem:[#allocation2 + $0x18a] sm:$0xff] }
 0x21f   : > { %2887 = vrot.lane.b32.xlu1 %v2794_v34, %s7442_s11  ;;  %3127 = vst.msk [vmem:[#allocation4 + $0x40] sm:$0xff] %vm3118_vm7, %v3039_v4  ;;  %v1178_v34 = vrot.slane %v1177_v49, 1  ;;  %v1158_v5 = vadd.f32 %v1157_v10, %v1156_v6  ;;  %v1185_v14 = vrot.slane %v1184_v63, 1  ;;  %v1197_v20 = vrot.slane %v1196_v32, 2  ;;  %v3182_v10 = vld [vmem:[#allocation2 + $0x1a2] sm:$0xff] }
 0x220   : > { %3078 = vrot.lane.b32.xlu0 %v2986_v21, %s7443_s14  ;;  %v1165_v36 = vadd.f32 %v1164_v29, %v1163_v19  ;;  %v1172_v62 = vadd.f32 %v1171_v57, %v1170_v46  ;;  %v1192_v13 = vrot.slane %v1191_v3, 1  ;;  %v1249_v4 = vmul.f32 0.25, %v9097_v53 }
 0x221   : > { %v3230_v39 = vpop.permute.xlu1 %3229  ;;  %v1179_v21 = vadd.f32 %v1178_v34, %v1177_v49  ;;  %v1186_v54 = vadd.f32 %v1185_v14, %v1184_v63  ;;  %v1198_v2 = vadd.f32 %v1197_v20, %v1196_v32  ;;  %v1250_v59 = vmul.f32 0.25, %v9106_v16 }
 0x222   : > { %3319 = vst.msk [vmem:[#allocation4 + $0x38] sm:$0xff] %vm3311_vm8, %v3230_v39  ;;  %v3043_v61 = vpop.permute.xlu0 %3042  ;;  %v1193_v43 = vadd.f32 %v1192_v13, %v1191_v3  ;;  %v1251_v30 = vmul.f32 0.25, %v9108_v55  ;;  %v1252_v52 = vmul.f32 0.25, %v9116_v1  ;;  %v1253_v22 = vmul.f32 0.25, %v9118_v56 }
 0x223   : > { %2891 = vrot.lane.b32.xlu1 %v2796_v12, %s7442_s11  ;;  %3129 = vst.msk [vmem:[#allocation4 + $0x50] sm:$0xff] %vm3118_vm7, %v3043_v61  ;;  %v1199_v33 = vrot.slane %v1198_v2, 1  ;;  %v1254_v41 = vmul.f32 0.25, %v1130_v45  ;;  %v1257_v12 = vmul.f32 0.25, %v1151_v24  ;;  %v1258_v53 = vmul.f32 0.25, %v1158_v5 }
 0x224   : > { %3082 = vrot.lane.b32.xlu0 %v2988_v38, %s7443_s14  ;;  %v1255_v16 = vmul.f32 0.25, %v1137_v28  ;;  %v1259_v58 = vmul.f32 0.25, %v1165_v36  ;;  %v1260_v15 = vmul.f32 0.25, %v1172_v62  ;;  %v1261_v42 = vmul.f32 0.25, %v1179_v21 }
 0x225   : > { %v3041_v18 = vpop.permute.xlu1 %3040  ;;  %v1200_v39 = vadd.f32 %v1199_v33, %v1198_v2  ;;  %v1262_v1 = vmul.f32 0.25, %v1186_v54  ;;  %v1313_v38 = vpack.c.bf16 %v1249_v4, %v1249_v4  ;;  %v1314_v56 = vpack.c.bf16 %v1250_v59, %v1250_v59  ;;  %v3344_v33 = vld [vmem:[#allocation4] sm:$0xff] }
 0x226   : > { %3128 = vst.msk [vmem:[#allocation4 + $0x48] sm:$0xff] %vm3118_vm7, %v3041_v18  ;;  %v3232_v26 = vpop.permute.xlu0 %3231  ;;  %v1256_v7 = vmul.f32 0.25, %v1144_v9  ;;  %v1263_v60 = vmul.f32 0.25, %v1193_v43  ;;  %v1315_v47 = vpack.c.bf16 %v1251_v30, %v1251_v30  ;;  %v1316_v61 = vpack.c.bf16 %v1252_v52, %v1252_v52  ;;  %v7370_v43 = vld [vmem:[%s10618_s1 + $0x10] ss:$0 sps:$4 sm:$0x33]  }
 0x227   : > { %3080 = vrot.lane.b32.xlu1 %v2987_v48, %s7443_s14  ;;  %3320 = vst.msk [vmem:[#allocation4 + $0x40] sm:$0xff] %vm3311_vm8, %v3232_v26  ;;  %v1264_v27 = vmul.f32 0.25, %v1200_v39  ;;  %v1317_v0 = vpack.c.bf16 %v1253_v22, %v1253_v22  ;;  %v1321_v37 = vpack.c.bf16 %v1257_v12, %v1257_v12  ;;  %v1322_v51 = vpack.c.bf16 %v1258_v53, %v1258_v53 }
 0x228   : > { %3271 = vrot.lane.b32.xlu0 %v3179_v35, %s7444_s23  ;;  %v1318_v19 = vpack.c.bf16 %v1254_v41, %v1254_v41  ;;  %v1323_v44 = vpack.c.bf16 %v1259_v58, %v1259_v58  ;;  %v1324_v17 = vpack.c.bf16 %v1260_v15, %v1260_v15  ;;  %v1325_v48 = vpack.c.bf16 %v1261_v42, %v1261_v42  ;;  %v3345_v41 = vld [vmem:[#allocation4 + $0x8] sm:$0xff] }
 0x229   : > { %v3045_v8 = vpop.permute.xlu1 %3044  ;;  %v1319_v46 = vpack.c.bf16 %v1255_v16, %v1255_v16  ;;  %v1326_v49 = vpack.c.bf16 %v1262_v1, %v1262_v1  ;;  %v1442_v31 = vunpack.c.l.b16 %v1313_v38  ;;  %v1443_v18 = vunpack.c.l.b16 %v1314_v56 }
 0x22a   : > { %3130 = vst.msk [vmem:[#allocation4 + $0x58] sm:$0xff] %vm3118_vm7, %v3045_v8  ;;  %v3236_v50 = vpop.permute.xlu0 %3235  ;;  %v1320_v28 = vpack.c.bf16 %v1256_v7, %v1256_v7  ;;  %v1327_v29 = vpack.c.bf16 %v1263_v60, %v1263_v60  ;;  %v1328_v63 = vpack.c.bf16 %v1264_v27, %v1264_v27  ;;  %v1444_v32 = vunpack.c.l.b16 %v1315_v47  ;;  %v3347_v7 = vld [vmem:[#allocation4 + $0x18] sm:$0xff]  ;;  %v3348_v60 = vld [vmem:[#allocation4 + $0x20] sm:$0xff]  ;;  %v3349_v47 = vld [vmem:[#allocation4 + $0x28] sm:$0xff] }
 0x22b   : > { %3084 = vrot.lane.b32.xlu1 %v2989_v11, %s7443_s14  ;;  %3322 = vst.msk [vmem:[#allocation4 + $0x50] sm:$0xff] %vm3311_vm8, %v3236_v50  ;;  %v1445_v26 = vunpack.c.l.b16 %v1316_v61  ;;  %v1446_v9 = vunpack.c.l.b16 %v1317_v0  ;;  %v1450_v57 = vunpack.c.l.b16 %v1321_v37  ;;  %v1451_v34 = vunpack.c.l.b16 %v1322_v51 }
 0x22c   : > { %3275 = vrot.lane.b32.xlu0 %v3181_v23, %s7444_s23  ;;  %v1447_v3 = vunpack.c.l.b16 %v1318_v19  ;;  %v1452_v24 = vunpack.c.l.b16 %v1323_v44  ;;  %v1453_v5 = vunpack.c.l.b16 %v1324_v17  ;;  %v1454_v14 = vunpack.c.l.b16 %v1325_v48  ;;  %v3350_v19 = vld [vmem:[#allocation4 + $0x30] sm:$0xff]  ;;  %v3351_v44 = vld [vmem:[#allocation4 + $0x38] sm:$0xff] }
 0x22d   : > { %v3234_v55 = vpop.permute.xlu1 %3233  ;;  %v1448_v11 = vunpack.c.l.b16 %v1319_v46  ;;  %v1455_v36 = vunpack.c.l.b16 %v1326_v49  ;;  %v1507_v62 = vsel %vm1458_vm13, %v1443_v18, %v1442_v31  ;;  %v1514_v21 = vsel %vm1458_vm13, %v1451_v34, %v1450_v57 }
 0x22e   : > { %3321 = vst.msk [vmem:[#allocation4 + $0x48] sm:$0xff] %vm3311_vm8, %v3234_v55  ;;  %v2858_v6 = vpop.permute.xlu0 %2857  ;;  %v1449_v8 = vunpack.c.l.b16 %v1320_v28  ;;  %v1456_v23 = vunpack.c.l.b16 %v1327_v29  ;;  %v1508_v54 = vsel %vm1460_vm14, %v1444_v32, %v1507_v62  ;;  %v1515_v2 = vsel %vm1460_vm14, %v1452_v24, %v1514_v21  ;;  %v3352_v17 = vld [vmem:[#allocation4 + $0x40] sm:$0xff] }
 0x22f   : > { %3273 = vrot.lane.b32.xlu1 %v3180_v25, %s7444_s23  ;;  %2940 = vst.msk [vmem:[#allocation4 + $0x70] sm:$0xff] %vm2925_vm6, %v2858_v6  ;;  %v1457_v4 = vunpack.c.l.b16 %v1328_v63  ;;  %v1509_v59 = vsel %vm1462_vm15, %v1445_v26, %v1508_v54  ;;  %v1516_v50 = vsel %vm1462_vm15, %v1453_v5, %v1515_v2  ;;  %v3462_v30 = vsel %vm1537_vm11, %v7370_v43, 0  ;;  %v3346_v6 = vld [vmem:[#allocation4 + $0x10] sm:$0xff] }
 0x230   : > { %v1510_v52 = vsel %vm1464_vm1, %v1446_v9, %v1509_v59  ;;  %v1517_v22 = vsel %vm1464_vm1, %v1454_v14, %v1516_v50  ;;  %7230 = vmatpush3.bf16.msra.mxu1 %v3462_v30  ;;  %v3376_v39 = vpack.c.bf16 %v3345_v41, %v3344_v33  ;;  %vm3412_vm2 = vcmask 293888  }
 0x231   : > { %v3238_v45 = vpop.permute.xlu1 %3237  ;;  %v1511_v53 = vsel %vm1466_vm3, %v1447_v3, %v1510_v52  ;;  %v1518_v25 = vsel %vm1466_vm3, %v1455_v36, %v1517_v22  ;;  %v3377_v0 = vpack.c.bf16 %v3347_v7, %v3346_v6  ;;  %v3378_v37 = vpack.c.bf16 %v3349_v47, %v3348_v60 }
 0x232   : > { %3323 = vst.msk [vmem:[#allocation4 + $0x58] sm:$0xff] %vm3311_vm8, %v3238_v45  ;;  %v3047_v35 = vpop.permute.xlu0 %3046  ;;  %v1512_v58 = vsel %vm1468_vm4, %v1448_v11, %v1511_v53  ;;  %v1519_v15 = vsel %vm1468_vm4, %v1456_v23, %v1518_v25  ;;  %v3379_v49 = vpack.c.bf16 %v3351_v44, %v3350_v19  ;;  %v3354_v28 = vld [vmem:[#allocation4 + $0x50] sm:$0xff]  ;;  %vm3978_vm11 = vcmask 130112  }
 0x233   : > { %3277 = vrot.lane.b32.xlu1 %v3182_v10, %s7444_s23  ;;  %3131 = vst.msk [vmem:[#allocation4 + $0x60] sm:$0xff] %vm3118_vm7, %v3047_v35  ;;  %v1513_v42 = vsel %vm1470_vm5, %v1449_v8, %v1512_v58  ;;  %v1520_v55 = vsel %vm1470_vm5, %v1457_v4, %v1519_v15 }
 0x234   : > { %v1524_v1 = vpack.c.b16 %v1520_v55, %v1513_v42 }
 0x235   : > { %v2860_v20 = vpop.permute.xlu1 %2859  ;;  %v3353_v48 = vld [vmem:[#allocation4 + $0x48] sm:$0xff] }
 0x236   : > { %2941 = vst.msk [vmem:[#allocation4 + $0x78] sm:$0xff] %vm2925_vm6, %v2860_v20  ;;  %v3051_v13 = vpop.permute.xlu0 %3050  ;;  %7222 = vmatmul.mubr.msk.bf16.gmra.mrb[4].mxu1 %vm197_vm0, %v1524_v1  ;;  %v3380_v31 = vpack.c.bf16 %v3353_v48, %v3352_v17  ;;  %vm243_vm0 = vcmask 64512  }
 0x237   : > { %3133 = vst.msk [vmem:[#allocation4 + $0x70] sm:$0xff] %vm3118_vm7, %v3051_v13  ;;  %7231 = vmatprep.mubr.msk.bf16.mxu1 %vm3412_vm2, %v3376_v39 }
 0x239   : > { %v3049_v12 = vpop.permute.xlu1 %3048  ;;  %v3355_v29 = vld [vmem:[#allocation4 + $0x58] sm:$0xff] }
 0x23a   : > { %3132 = vst.msk [vmem:[#allocation4 + $0x68] sm:$0xff] %vm3118_vm7, %v3049_v12  ;;  %v3240_v16 = vpop.permute.xlu0 %3239  ;;  %v3381_v57 = vpack.c.bf16 %v3355_v29, %v3354_v28  ;;  %v10814_v28 = vmov 0.0  }
 0x23b   : > { %3324 = vst.msk [vmem:[#allocation4 + $0x60] sm:$0xff] %vm3311_vm8, %v3240_v16 }
 0x23c   : > { %244 = vst.msk [vmem:[#allocation3] sm:$0xff] %vm243_vm0, %v10814_v28  ;;  %245 = vst.msk [vmem:[#allocation3 + $0x8] sm:$0xff] %vm243_vm0, %v10814_v28 }
 0x23d   : > { %v3053_v38 = vpop.permute.xlu1 %3052  ;;  %249 = vst.msk [vmem:[#allocation3 + $0x198] sm:$0xff] %vm243_vm0, %v10814_v28  ;;  %250 = vst.msk [vmem:[#allocation3 + $0x1a0] sm:$0xff] %vm243_vm0, %v10814_v28 }
 0x23e   : > { %3134 = vst.msk [vmem:[#allocation4 + $0x78] sm:$0xff] %vm3118_vm7, %v3053_v38  ;;  %v3244_v56 = vpop.permute.xlu0 %3243  ;;  %7232 = vmatmul.mubr.msk.bf16.vlgmr.msra.gmra.mrb[8].mxu1 %vm3412_vm2, %v3377_v0 }
 0x23f   : > { %3326 = vst.msk [vmem:[#allocation4 + $0x70] sm:$0xff] %vm3311_vm8, %v3244_v56  ;;  %7235 = vmatprep.mubr.msk.bf16.mxu1 %vm3412_vm2, %v3378_v37 }
 0x240   : > { %247 = vst.msk [vmem:[#allocation3 + $0x10] sm:$0x3] %vm246_vm9, %v10814_v28  ;;  %251 = vst.msk [vmem:[#allocation3 + $0x1a8] sm:$0x3] %vm246_vm9, %v10814_v28 }
 0x241   : > { %v3242_v61 = vpop.permute.xlu1 %3241  ;;  %253 = vst.msk [vmem:[#allocation3] sm:$0x1] %vm252_vm10, %v10814_v28  ;;  %254 = vst.msk [vmem:[#allocation3 + $0x18] sm:$0x1] %vm252_vm10, %v10814_v28 }
 0x242   : > { %3325 = vst.msk [vmem:[#allocation4 + $0x68] sm:$0xff] %vm3311_vm8, %v3242_v61  ;;  %v2862_v27 = vpop.permute.xlu0 %2861  ;;  %v3356_v63 = vld [vmem:[#allocation4 + $0x60] sm:$0xff] }
 0x243   : > { %2942 = vst.msk [vmem:[#allocation4 + $0x80] sm:$0xff] %vm2925_vm6, %v2862_v27 }
 0x244   : > { %255 = vst.msk [vmem:[#allocation3 + $0x30] sm:$0x1] %vm252_vm10, %v10814_v28  ;;  %256 = vst.msk [vmem:[#allocation3 + $0x48] sm:$0x1] %vm252_vm10, %v10814_v28 }
 0x245   : > { %v3246_v51 = vpop.permute.xlu1 %3245  ;;  %257 = vst.msk [vmem:[#allocation3 + $0x60] sm:$0x1] %vm252_vm10, %v10814_v28  ;;  %258 = vst.msk [vmem:[#allocation3 + $0x78] sm:$0x1] %vm252_vm10, %v10814_v28 }
 0x246   : > { %3327 = vst.msk [vmem:[#allocation4 + $0x78] sm:$0xff] %vm3311_vm8, %v3246_v51  ;;  %v2866_v10 = vpop.permute.xlu0 %2865  ;;  %7236 = vmatmul.mubr.msk.bf16.gmra.mrb[12].mxu1 %vm3412_vm2, %v3379_v49  ;;  %v3358_v5 = vld [vmem:[#allocation4 + $0x70] sm:$0xff] }
 0x247   : > { %2944 = vst.msk [vmem:[#allocation4 + $0x90] sm:$0xff] %vm2925_vm6, %v2866_v10  ;;  %7239 = vmatprep.mubr.msk.bf16.mxu1 %vm3412_vm2, %v3380_v31 }
 0x248   : > { %259 = vst.msk [vmem:[#allocation3 + $0x90] sm:$0x1] %vm252_vm10, %v10814_v28  ;;  %260 = vst.msk [vmem:[#allocation3 + $0xa8] sm:$0x1] %vm252_vm10, %v10814_v28 }
 0x249   : > { %v2864_v45 = vpop.permute.xlu1 %2863  ;;  %v3357_v32 = vld [vmem:[#allocation4 + $0x68] sm:$0xff]  ;;  %261 = vst.msk [vmem:[#allocation3 + $0xc0] sm:$0x1] %vm252_vm10, %v10814_v28  ;;  %262 = vst.msk [vmem:[#allocation3 + $0xd8] sm:$0x1] %vm252_vm10, %v10814_v28 }
 0x24a   : > { %2943 = vst.msk [vmem:[#allocation4 + $0x88] sm:$0xff] %vm2925_vm6, %v2864_v45  ;;  %v3055_v46 = vpop.permute.xlu0 %3054  ;;  %v3382_v34 = vpack.c.bf16 %v3357_v32, %v3356_v63 }
 0x24b   : > { %3135 = vst.msk [vmem:[#allocation4 + $0x80] sm:$0xff] %vm3118_vm7, %v3055_v46 }
 0x24c   : > { %263 = vst.msk [vmem:[#allocation3 + $0xf0] sm:$0x1] %vm252_vm10, %v10814_v28  ;;  %264 = vst.msk [vmem:[#allocation3 + $0x108] sm:$0x1] %vm252_vm10, %v10814_v28 }
 0x24d   : > { %v2868_v18 = vpop.permute.xlu1 %2867  ;;  %v3359_v14 = vld [vmem:[#allocation4 + $0x78] sm:$0xff]  ;;  %265 = vst.msk [vmem:[#allocation3 + $0x120] sm:$0x1] %vm252_vm10, %v10814_v28  ;;  %266 = vst.msk [vmem:[#allocation3 + $0x138] sm:$0x1] %vm252_vm10, %v10814_v28 }
 0x24e   : > { %2945 = vst.msk [vmem:[#allocation4 + $0x98] sm:$0xff] %vm2925_vm6, %v2868_v18  ;;  %v3059_v35 = vpop.permute.xlu0 %3058  ;;  %7240 = vmatmul.mubr.msk.bf16.gmra.mrb[16].mxu1 %vm3412_vm2, %v3381_v57  ;;  %v3383_v36 = vpack.c.bf16 %v3359_v14, %v3358_v5  ;;  %v3818_v57 = vld [vmem:[#allocation3 + $0x1] sm:$0xff] }
 0x24f   : > { %3137 = vst.msk [vmem:[#allocation4 + $0x90] sm:$0xff] %vm3118_vm7, %v3059_v35  ;;  %7243 = vmatprep.mubr.msk.bf16.mxu1 %vm3412_vm2, %v3382_v34  ;;  %3882 = vrot.lane.b32.xlu0 %v3818_v57, %s7437_s7  ;;  %v3819_v34 = vld [vmem:[#allocation3 + $0x9] sm:$0xff] }
 0x250   : > { %267 = vst.msk [vmem:[#allocation3 + $0x150] sm:$0x1] %vm252_vm10, %v10814_v28  ;;  %268 = vst.msk [vmem:[#allocation3 + $0x168] sm:$0x1] %vm252_vm10, %v10814_v28  ;;  %3884 = vrot.lane.b32.xlu1 %v3819_v34, %s7437_s7 }
 0x251   : > { %v3057_v26 = vpop.permute.xlu1 %3056  ;;  %269 = vst.msk [vmem:[#allocation3 + $0x180] sm:$0x1] %vm252_vm10, %v10814_v28  ;;  %270 = vst.msk [vmem:[#allocation3 + $0x198] sm:$0x1] %vm252_vm10, %v10814_v28 }
 0x252   : > { %3136 = vst.msk [vmem:[#allocation4 + $0x88] sm:$0xff] %vm3118_vm7, %v3057_v26  ;;  %v3248_v9 = vpop.permute.xlu0 %3247 }
 0x253   : > { %3328 = vst.msk [vmem:[#allocation4 + $0x80] sm:$0xff] %vm3311_vm8, %v3248_v9 }
 0x254   : > { %271 = vst.msk [vmem:[#allocation3 + $0x11] sm:$0x1] %vm252_vm10, %v10814_v28  ;;  %272 = vst.msk [vmem:[#allocation3 + $0x29] sm:$0x1] %vm252_vm10, %v10814_v28 }
 0x255   : > { %v3061_v3 = vpop.permute.xlu1 %3060  ;;  %273 = vst.msk [vmem:[#allocation3 + $0x41] sm:$0x1] %vm252_vm10, %v10814_v28  ;;  %274 = vst.msk [vmem:[#allocation3 + $0x59] sm:$0x1] %vm252_vm10, %v10814_v28 }
 0x256   : > { %3138 = vst.msk [vmem:[#allocation4 + $0x98] sm:$0xff] %vm3118_vm7, %v3061_v3  ;;  %v3252_v24 = vpop.permute.xlu0 %3251  ;;  %7244 = vmatmul.mubr.msk.bf16.gmra.mrb[20].mxu1 %vm3412_vm2, %v3383_v36 }
 0x257   : > { %3330 = vst.msk [vmem:[#allocation4 + $0x90] sm:$0xff] %vm3311_vm8, %v3252_v24 }
 0x258   : > { %275 = vst.msk [vmem:[#allocation3 + $0x71] sm:$0x1] %vm252_vm10, %v10814_v28  ;;  %276 = vst.msk [vmem:[#allocation3 + $0x89] sm:$0x1] %vm252_vm10, %v10814_v28 }
 0x259   : > { %v3250_v20 = vpop.permute.xlu1 %3249  ;;  %277 = vst.msk [vmem:[#allocation3 + $0xa1] sm:$0x1] %vm252_vm10, %v10814_v28  ;;  %278 = vst.msk [vmem:[#allocation3 + $0xb9] sm:$0x1] %vm252_vm10, %v10814_v28 }
 0x25a   : > { %3329 = vst.msk [vmem:[#allocation4 + $0x88] sm:$0xff] %vm3311_vm8, %v3250_v20  ;;  %v2870_v11 = vpop.permute.xlu0 %2869  ;;  %v3360_v13 = vld [vmem:[#allocation4 + $0x80] sm:$0xff] }
 0x25b   : > { %2946 = vst.msk [vmem:[#allocation4 + $0xa0] sm:$0xff] %vm2925_vm6, %v2870_v11 }
 0x25c   : > { %279 = vst.msk [vmem:[#allocation3 + $0xd1] sm:$0x1] %vm252_vm10, %v10814_v28  ;;  %280 = vst.msk [vmem:[#allocation3 + $0xe9] sm:$0x1] %vm252_vm10, %v10814_v28 }
 0x25d   : > { %v3254_v62 = vpop.permute.xlu1 %3253  ;;  %281 = vst.msk [vmem:[#allocation3 + $0x101] sm:$0x1] %vm252_vm10, %v10814_v28  ;;  %282 = vst.msk [vmem:[#allocation3 + $0x119] sm:$0x1] %vm252_vm10, %v10814_v28 }
 0x25e   : > { %3331 = vst.msk [vmem:[#allocation4 + $0x98] sm:$0xff] %vm3311_vm8, %v3254_v62  ;;  %v2874_v21 = vpop.permute.xlu0 %2873  ;;  %v3362_v4 = vld [vmem:[#allocation4 + $0x90] sm:$0xff] }
 0x25f   : > { %2948 = vst.msk [vmem:[#allocation4 + $0xb0] sm:$0xff] %vm2925_vm6, %v2874_v21 }
 0x260   : > { %283 = vst.msk [vmem:[#allocation3 + $0x131] sm:$0x1] %vm252_vm10, %v10814_v28  ;;  %284 = vst.msk [vmem:[#allocation3 + $0x149] sm:$0x1] %vm252_vm10, %v10814_v28 }
 0x261   : > { %v2872_v8 = vpop.permute.xlu1 %2871  ;;  %v3361_v23 = vld [vmem:[#allocation4 + $0x88] sm:$0xff]  ;;  %285 = vst.msk [vmem:[#allocation3 + $0x161] sm:$0x1] %vm252_vm10, %v10814_v28  ;;  %286 = vst.msk [vmem:[#allocation3 + $0x179] sm:$0x1] %vm252_vm10, %v10814_v28 }
 0x262   : > { %2947 = vst.msk [vmem:[#allocation4 + $0xa8] sm:$0xff] %vm2925_vm6, %v2872_v8  ;;  %v3384_v54 = vpack.c.bf16 %v3361_v23, %v3360_v13  ;;  %v3063_v2 = vpop.permute.xlu0 %3062  ;;  %v3754_v23 = vld [vmem:[#allocation3] sm:$0xff] }
 0x263   : > { %3139 = vst.msk [vmem:[#allocation4 + $0xa0] sm:$0xff] %vm3118_vm7, %v3063_v2 }
 0x264   : > { %7247 = vmatprep.mubr.msk.bf16.mxu1 %vm3412_vm2, %v3384_v54  ;;  %287 = vst.msk [vmem:[#allocation3 + $0x191] sm:$0x1] %vm252_vm10, %v10814_v28  ;;  %288 = vst.msk [vmem:[#allocation3 + $0x1a9] sm:$0x1] %vm252_vm10, %v10814_v28  ;;  %v3755_v54 = vld [vmem:[#allocation3 + $0x8] sm:$0xff] }
 0x265   : > { %v2876_v59 = vpop.permute.xlu1 %2875  ;;  %v3363_v50 = vld [vmem:[#allocation4 + $0x98] sm:$0xff]  ;;  %3786 = vst.msk [vmem:[#allocation5] sm:$0xff] %vm243_vm0, %v3754_v23  ;;  %3787 = vst.msk [vmem:[#allocation5 + $0x8] sm:$0xff] %vm243_vm0, %v3755_v54 }
 0x266   : > { %2949 = vst.msk [vmem:[#allocation4 + $0xb8] sm:$0xff] %vm2925_vm6, %v2876_v59  ;;  %v3385_v43 = vpack.c.bf16 %v3363_v50, %v3362_v4  ;;  %v3067_v30 = vpop.permute.xlu0 %3066 }
 0x267   : > { %3141 = vst.msk [vmem:[#allocation4 + $0xb0] sm:$0xff] %vm3118_vm7, %v3067_v30 }
 0x268   : > { %7248 = vmatmul.mubr.msk.bf16.gmra.mrb[24].mxu1 %vm3412_vm2, %v3385_v43 }
 0x269   : > { %v3065_v52 = vpop.permute.xlu1 %3064 }
 0x26a   : > { %3140 = vst.msk [vmem:[#allocation4 + $0xa8] sm:$0xff] %vm3118_vm7, %v3065_v52  ;;  %v3256_v22 = vpop.permute.xlu0 %3255 }
 0x26b   : > { %3332 = vst.msk [vmem:[#allocation4 + $0xa0] sm:$0xff] %vm3311_vm8, %v3256_v22 }
 0x26d   : > { %v3069_v33 = vpop.permute.xlu1 %3068 }
 0x26e   : > { %3142 = vst.msk [vmem:[#allocation4 + $0xb8] sm:$0xff] %vm3118_vm7, %v3069_v33  ;;  %v3260_v41 = vpop.permute.xlu0 %3259 }
 0x26f   : > { %3334 = vst.msk [vmem:[#allocation4 + $0xb0] sm:$0xff] %vm3311_vm8, %v3260_v41 }
 0x271   : > { %v3258_v12 = vpop.permute.xlu1 %3257 }
 0x272   : > { %3333 = vst.msk [vmem:[#allocation4 + $0xa8] sm:$0xff] %vm3311_vm8, %v3258_v12  ;;  %v2878_v53 = vpop.permute.xlu0 %2877  ;;  %v3364_v58 = vld [vmem:[#allocation4 + $0xa0] sm:$0xff] }
 0x273   : > { %2950 = vst.msk [vmem:[#allocation4 + $0xc0] sm:$0xff] %vm2925_vm6, %v2878_v53 }
 0x275   : > { %v3262_v25 = vpop.permute.xlu1 %3261 }
 0x276   : > { %3335 = vst.msk [vmem:[#allocation4 + $0xb8] sm:$0xff] %vm3311_vm8, %v3262_v25  ;;  %v2882_v16 = vpop.permute.xlu0 %2881  ;;  %v3366_v1 = vld [vmem:[#allocation4 + $0xb0] sm:$0xff] }
 0x277   : > { %2952 = vst.msk [vmem:[#allocation4 + $0xd0] sm:$0xff] %vm2925_vm6, %v2882_v16 }
 0x279   : > { %v2880_v15 = vpop.permute.xlu1 %2879  ;;  %v3365_v42 = vld [vmem:[#allocation4 + $0xa8] sm:$0xff] }
 0x27a   : > { %2951 = vst.msk [vmem:[#allocation4 + $0xc8] sm:$0xff] %vm2925_vm6, %v2880_v15  ;;  %v3386_v55 = vpack.c.bf16 %v3365_v42, %v3364_v58  ;;  %v3071_v39 = vpop.permute.xlu0 %3070 }
 0x27b   : > { %3143 = vst.msk [vmem:[#allocation4 + $0xc0] sm:$0xff] %vm3118_vm7, %v3071_v39 }
 0x27c   : > { %7251 = vmatprep.mubr.msk.bf16.mxu1 %vm3412_vm2, %v3386_v55 }
 0x27d   : > { %v2884_v38 = vpop.permute.xlu1 %2883  ;;  %v3367_v56 = vld [vmem:[#allocation4 + $0xb8] sm:$0xff] }
 0x27e   : > { %2953 = vst.msk [vmem:[#allocation4 + $0xd8] sm:$0xff] %vm2925_vm6, %v2884_v38  ;;  %v3387_v6 = vpack.c.bf16 %v3367_v56, %v3366_v1  ;;  %v3075_v7 = vpop.permute.xlu0 %3074 }
 0x27f   : > { %3145 = vst.msk [vmem:[#allocation4 + $0xd0] sm:$0xff] %vm3118_vm7, %v3075_v7 }
 0x280   : > { %7252 = vmatmul.mubr.msk.bf16.gmra.mrb[28].mxu1 %vm3412_vm2, %v3387_v6 }
 0x281   : > { %v3073_v60 = vpop.permute.xlu1 %3072 }
 0x282   : > { %3144 = vst.msk [vmem:[#allocation4 + $0xc8] sm:$0xff] %vm3118_vm7, %v3073_v60  ;;  %v3264_v47 = vpop.permute.xlu0 %3263 }
 0x283   : > { %3336 = vst.msk [vmem:[#allocation4 + $0xc0] sm:$0xff] %vm3311_vm8, %v3264_v47 }
 0x285   : > { %v3077_v61 = vpop.permute.xlu1 %3076 }
 0x286   : > { %3146 = vst.msk [vmem:[#allocation4 + $0xd8] sm:$0xff] %vm3118_vm7, %v3077_v61  ;;  %v3268_v27 = vpop.permute.xlu0 %3267 }
 0x287   : > { %3338 = vst.msk [vmem:[#allocation4 + $0xd0] sm:$0xff] %vm3311_vm8, %v3268_v27 }
 0x289   : > { %v3266_v0 = vpop.permute.xlu1 %3265 }
 0x28a   : > { %3337 = vst.msk [vmem:[#allocation4 + $0xc8] sm:$0xff] %vm3311_vm8, %v3266_v0  ;;  %v2886_v37 = vpop.permute.xlu0 %2885  ;;  %v3368_v19 = vld [vmem:[#allocation4 + $0xc0] sm:$0xff] }
 0x28b   : > { %2954 = vst.msk [vmem:[#allocation4 + $0xe0] sm:$0xff] %vm2925_vm6, %v2886_v37 }
 0x28d   : > { %v3270_v51 = vpop.permute.xlu1 %3269 }
 0x28e   : > { %3339 = vst.msk [vmem:[#allocation4 + $0xd8] sm:$0xff] %vm3311_vm8, %v3270_v51  ;;  %v2890_v10 = vpop.permute.xlu0 %2889  ;;  %v3370_v46 = vld [vmem:[#allocation4 + $0xd0] sm:$0xff] }
 0x28f   : > { %2956 = vst.msk [vmem:[#allocation4 + $0xf0] sm:$0xff] %vm2925_vm6, %v2890_v10 }
 0x291   : > { %v2888_v44 = vpop.permute.xlu1 %2887  ;;  %v3369_v17 = vld [vmem:[#allocation4 + $0xc8] sm:$0xff] }
 0x292   : > { %2955 = vst.msk [vmem:[#allocation4 + $0xe8] sm:$0xff] %vm2925_vm6, %v2888_v44  ;;  %v3388_v48 = vpack.c.bf16 %v3369_v17, %v3368_v19  ;;  %v3079_v45 = vpop.permute.xlu0 %3078 }
 0x293   : > { %3147 = vst.msk [vmem:[#allocation4 + $0xe0] sm:$0xff] %vm3118_vm7, %v3079_v45 }
 0x294   : > { %7255 = vmatprep.mubr.msk.bf16.mxu1 %vm3412_vm2, %v3388_v48 }
 0x295   : > { %v2892_v49 = vpop.permute.xlu1 %2891  ;;  %v3371_v31 = vld [vmem:[#allocation4 + $0xd8] sm:$0xff] }
 0x296   : > { %2957 = vst.msk [vmem:[#allocation4 + $0xf8] sm:$0xff] %vm2925_vm6, %v2892_v49  ;;  %v3389_v18 = vpack.c.bf16 %v3371_v31, %v3370_v46  ;;  %v3083_v35 = vpop.permute.xlu0 %3082 }
 0x297   : > { %3149 = vst.msk [vmem:[#allocation4 + $0xf0] sm:$0xff] %vm3118_vm7, %v3083_v35 }
 0x298   : > { %7256 = vmatmul.mubr.msk.bf16.gmra.mrb[32].mxu1 %vm3412_vm2, %v3389_v18 }
 0x299   : > { %v3081_v29 = vpop.permute.xlu1 %3080 }
 0x29a   : > { %3148 = vst.msk [vmem:[#allocation4 + $0xe8] sm:$0xff] %vm3118_vm7, %v3081_v29  ;;  %v3272_v63 = vpop.permute.xlu0 %3271 }
 0x29b   : > { %3340 = vst.msk [vmem:[#allocation4 + $0xe0] sm:$0xff] %vm3311_vm8, %v3272_v63 }
 0x29d   : > { %v3085_v32 = vpop.permute.xlu1 %3084 }
 0x29e   : > { %3150 = vst.msk [vmem:[#allocation4 + $0xf8] sm:$0xff] %vm3118_vm7, %v3085_v32  ;;  %v3276_v26 = vpop.permute.xlu0 %3275 }
 0x29f   : > { %3342 = vst.msk [vmem:[#allocation4 + $0xf0] sm:$0xff] %vm3311_vm8, %v3276_v26 }
 0x2a1   : > { %v3274_v9 = vpop.permute.xlu1 %3273 }
 0x2a2   : > { %3341 = vst.msk [vmem:[#allocation4 + $0xe8] sm:$0xff] %vm3311_vm8, %v3274_v9  ;;  %v3372_v24 = vld [vmem:[#allocation4 + $0xe0] sm:$0xff] }
 0x2a3   : > { %v9338_v11 = vpop.f32.mrb[0].mxu1 }
 0x2a4   : > { %v9341_v36 = vpop.f32.mrb[1].mxu1 }
 0x2a5   : > { %v3278_v3 = vpop.permute.xlu1 %3277  ;;  %v9343_v21 = vpop.f32.mrb[2].mxu1 }
 0x2a6   : > { %3343 = vst.msk [vmem:[#allocation4 + $0xf8] sm:$0xff] %vm3311_vm8, %v3278_v3  ;;  %v3374_v20 = vld [vmem:[#allocation4 + $0xf0] sm:$0xff]  ;;  %10815 = vst [vmem:[#allocation39_spill] sm:$0xff] %v9343_v21  ;;  %v9345_v8 = vpop.f32.mrb[3].mxu1 }
 0x2a9   : > { %v3373_v5 = vld [vmem:[#allocation4 + $0xe8] sm:$0xff] }
 0x2aa   : > { %v3390_v14 = vpack.c.bf16 %v3373_v5, %v3372_v24 }
 0x2ac   : > { %7259 = vmatprep.mubr.msk.bf16.mxu1 %vm3412_vm2, %v3390_v14 }
 0x2ad   : > { %v3375_v62 = vld [vmem:[#allocation4 + $0xf8] sm:$0xff] }
 0x2ae   : > { %v3391_v13 = vpack.c.bf16 %v3375_v62, %v3374_v20 }
 0x2b0   : > { %7260 = vmatmul.mubr.msk.bf16.gmra.mrb[36].mxu1 %vm3412_vm2, %v3391_v13 }
 0x2c1   : > { %v3883_v50 = vpop.permute.xlu0 %3882 }
 0x2c2   : > { %3979 = vst.msk [vmem:[#allocation5] sm:$0xff] %vm3978_vm11, %v3883_v50  ;;  %v3885_v30 = vpop.permute.xlu1 %3884 }
 0x2c3   : > { %3980 = vst.msk [vmem:[#allocation5 + $0x8] sm:$0xff] %vm3978_vm11, %v3885_v30 }
 0x309   : > { %v9350_v2 = vpop.f32.mrb[4].mxu1 }
 0x30a   : > { %10816 = vst [vmem:[#allocation40_spill] sm:$0xff] %v9350_v2  ;;  %v9352_v4 = vpop.f32.mrb[5].mxu1 }
 0x30b   : > { %10817 = vst [vmem:[#allocation43_spill] sm:$0xff] %v9352_v4  ;;  %v9354_v59 = vpop.f32.mrb[6].mxu1 }
 0x30c   : > { %10818 = vst [vmem:[#allocation44_spill] sm:$0xff] %v9354_v59  ;;  %v9356_v43 = vpop.f32.mrb[7].mxu1 }
 0x30d   : > { %10819 = vst [vmem:[#allocation45_spill] sm:$0xff] %v9356_v43 }
 0x311   : > { %v7233_v52 = vpop.f32.mrb[8].mxu1 }
 0x312   : > { %vm3627_vm12 = vcmp.ge.f32.partialorder %v7233_v52, 0.0  ;;  %v3659_v22 = vmul.f32 0.2, %v7233_v52  ;;  %v3498_v33 = vpop.f32.mrb[9].mxu1 }
 0x313   : > { %vm3625_vm6 = vcmp.ge.f32.partialorder %v3498_v33, 0.0  ;;  %v3657_v41 = vmul.f32 0.2, %v3498_v33  ;;  %v7234_v12 = vpop.f32.mrb[10].mxu1 }
 0x314   : > { %v3691_v53 = vsel %vm3627_vm12, %v7233_v52, %v3659_v22  ;;  %vm3628_vm7 = vcmp.ge.f32.partialorder %v7234_v12, 0.0  ;;  %v3660_v25 = vmul.f32 0.2, %v7234_v12  ;;  %v3501_v16 = vpop.f32.mrb[11].mxu1 }
 0x315   : > { %3724 = vst.msk [vmem:[#allocation3 + $0x31] sm:$0xff] %vm243_vm0, %v3691_v53  ;;  %v3689_v58 = vsel %vm3625_vm6, %v3498_v33, %v3657_v41  ;;  %vm3626_vm8 = vcmp.ge.f32.partialorder %v3501_v16, 0.0  ;;  %v3658_v15 = vmul.f32 0.2, %v3501_v16 }
 0x316   : > { %3722 = vst.msk [vmem:[#allocation3 + $0x19] sm:$0xff] %vm243_vm0, %v3689_v58  ;;  %v3692_v42 = vsel %vm3628_vm7, %v7234_v12, %v3660_v25 }
 0x317   : > { %3725 = vst.msk [vmem:[#allocation3 + $0x39] sm:$0xff] %vm243_vm0, %v3692_v42  ;;  %v3690_v55 = vsel %vm3626_vm8, %v3501_v16, %v3658_v15 }
 0x318   : > { %3723 = vst.msk [vmem:[#allocation3 + $0x21] sm:$0xff] %vm243_vm0, %v3690_v55 }
 0x319   : > { %v7237_v39 = vpop.f32.mrb[12].mxu1 }
 0x31a   : > { %vm3631_vm2 = vcmp.ge.f32.partialorder %v7237_v39, 0.0  ;;  %v3663_v1 = vmul.f32 0.2, %v7237_v39  ;;  %v3514_v38 = vpop.f32.mrb[13].mxu1 }
 0x31b   : > { %vm3629_vm10 = vcmp.ge.f32.partialorder %v3514_v38, 0.0  ;;  %v3661_v56 = vmul.f32 0.2, %v3514_v38  ;;  %v7238_v6 = vpop.f32.mrb[14].mxu1 }
 0x31c   : > { %v3695_v7 = vsel %vm3631_vm2, %v7237_v39, %v3663_v1  ;;  %vm3632_vm12 = vcmp.ge.f32.partialorder %v7238_v6, 0.0  ;;  %v3664_v60 = vmul.f32 0.2, %v7238_v6  ;;  %v3517_v47 = vpop.f32.mrb[15].mxu1  ;;  %v9364_v61 = vld [vmem:[#allocation3 + $0x30] sm:$0xff] }
 0x31d   : > { %v9366_v27 = vld [vmem:[#allocation3 + $0x19] sm:$0xff]  ;;  %3728 = vst.msk [vmem:[#allocation3 + $0x61] sm:$0xff] %vm243_vm0, %v3695_v7  ;;  %v3693_v0 = vsel %vm3629_vm10, %v3514_v38, %v3661_v56  ;;  %vm3630_vm6 = vcmp.ge.f32.partialorder %v3517_v47, 0.0  ;;  %v3662_v37 = vmul.f32 0.2, %v3517_v47  ;;  %3790 = vst.msk [vmem:[#allocation5 + $0x20] sm:$0xff] %vm243_vm0, %v9364_v61 }
 0x31e   : > { %v9369_v51 = vld [vmem:[#allocation3 + $0x18] sm:$0xff]  ;;  %3886 = vrot.lane.b32.xlu0 %v9366_v27, %s7437_s7  ;;  %3726 = vst.msk [vmem:[#allocation3 + $0x49] sm:$0xff] %vm243_vm0, %v3693_v0  ;;  %v3696_v10 = vsel %vm3632_vm12, %v7238_v6, %v3664_v60 }
 0x31f   : > { %3788 = vst.msk [vmem:[#allocation5 + $0x10] sm:$0xff] %vm243_vm0, %v9369_v51  ;;  %v9378_v19 = vld [vmem:[#allocation3 + $0x38] sm:$0xff]  ;;  %v9380_v44 = vld [vmem:[#allocation3 + $0x21] sm:$0xff]  ;;  %3729 = vst.msk [vmem:[#allocation3 + $0x69] sm:$0xff] %vm243_vm0, %v3696_v10  ;;  %v3694_v17 = vsel %vm3630_vm6, %v3517_v47, %v3662_v37 }
 0x320   : > { %v9383_v48 = vld [vmem:[#allocation3 + $0x20] sm:$0xff]  ;;  %3791 = vst.msk [vmem:[#allocation5 + $0x28] sm:$0xff] %vm243_vm0, %v9378_v19  ;;  %3888 = vrot.lane.b32.xlu1 %v9380_v44, %s7437_s7  ;;  %3727 = vst.msk [vmem:[#allocation3 + $0x51] sm:$0xff] %vm243_vm0, %v3694_v17  ;;  %v9392_v45 = vld [vmem:[#allocation3 + $0x31] sm:$0xff] }
 0x321   : > { %3789 = vst.msk [vmem:[#allocation5 + $0x18] sm:$0xff] %vm243_vm0, %v9383_v48  ;;  %v7241_v46 = vpop.f32.mrb[16].mxu1  ;;  %v9396_v18 = vld [vmem:[#allocation3 + $0x39] sm:$0xff] }
 0x322   : > { %3890 = vrot.lane.b32.xlu0 %v9392_v45, %s7437_s7  ;;  %vm3635_vm7 = vcmp.ge.f32.partialorder %v7241_v46, 0.0  ;;  %v3667_v49 = vmul.f32 0.2, %v7241_v46  ;;  %v3530_v31 = vpop.f32.mrb[17].mxu1 }
 0x323   : > { %vm3633_vm8 = vcmp.ge.f32.partialorder %v3530_v31, 0.0  ;;  %v3665_v35 = vmul.f32 0.2, %v3530_v31  ;;  %v7242_v28 = vpop.f32.mrb[18].mxu1 }
 0x324   : > { %3892 = vrot.lane.b32.xlu1 %v9396_v18, %s7437_s7  ;;  %v3699_v29 = vsel %vm3635_vm7, %v7241_v46, %v3667_v49  ;;  %vm3636_vm2 = vcmp.ge.f32.partialorder %v7242_v28, 0.0  ;;  %v3668_v63 = vmul.f32 0.2, %v7242_v28  ;;  %v3533_v32 = vpop.f32.mrb[19].mxu1  ;;  %v9400_v26 = vld [vmem:[#allocation3 + $0x60] sm:$0xff] }
 0x325   : > { %v9402_v9 = vld [vmem:[#allocation3 + $0x49] sm:$0xff]  ;;  %3732 = vst.msk [vmem:[#allocation3 + $0x91] sm:$0xff] %vm243_vm0, %v3699_v29  ;;  %v3697_v57 = vsel %vm3633_vm8, %v3530_v31, %v3665_v35  ;;  %vm3634_vm10 = vcmp.ge.f32.partialorder %v3533_v32, 0.0  ;;  %v3666_v34 = vmul.f32 0.2, %v3533_v32  ;;  %3794 = vst.msk [vmem:[#allocation5 + $0x40] sm:$0xff] %vm243_vm0, %v9400_v26 }
 0x326   : > { %v9405_v3 = vld [vmem:[#allocation3 + $0x48] sm:$0xff]  ;;  %3894 = vrot.lane.b32.xlu0 %v9402_v9, %s7437_s7  ;;  %3730 = vst.msk [vmem:[#allocation3 + $0x79] sm:$0xff] %vm243_vm0, %v3697_v57  ;;  %v3700_v24 = vsel %vm3636_vm2, %v7242_v28, %v3668_v63 }
 0x327   : > { %3792 = vst.msk [vmem:[#allocation5 + $0x30] sm:$0xff] %vm243_vm0, %v9405_v3  ;;  %v9414_v5 = vld [vmem:[#allocation3 + $0x68] sm:$0xff]  ;;  %v9416_v14 = vld [vmem:[#allocation3 + $0x51] sm:$0xff]  ;;  %3733 = vst.msk [vmem:[#allocation3 + $0x99] sm:$0xff] %vm243_vm0, %v3700_v24  ;;  %v3698_v20 = vsel %vm3634_vm10, %v3533_v32, %v3666_v34 }
 0x328   : > { %v9419_v62 = vld [vmem:[#allocation3 + $0x50] sm:$0xff]  ;;  %3795 = vst.msk [vmem:[#allocation5 + $0x48] sm:$0xff] %vm243_vm0, %v9414_v5  ;;  %3896 = vrot.lane.b32.xlu1 %v9416_v14, %s7437_s7  ;;  %3731 = vst.msk [vmem:[#allocation3 + $0x81] sm:$0xff] %vm243_vm0, %v3698_v20  ;;  %v9428_v13 = vld [vmem:[#allocation3 + $0x61] sm:$0xff] }
 0x329   : > { %3793 = vst.msk [vmem:[#allocation5 + $0x38] sm:$0xff] %vm243_vm0, %v9419_v62  ;;  %v7245_v23 = vpop.f32.mrb[20].mxu1  ;;  %v9432_v30 = vld [vmem:[#allocation3 + $0x69] sm:$0xff] }
 0x32a   : > { %3898 = vrot.lane.b32.xlu0 %v9428_v13, %s7437_s7  ;;  %vm3639_vm12 = vcmp.ge.f32.partialorder %v7245_v23, 0.0  ;;  %v3671_v54 = vmul.f32 0.2, %v7245_v23  ;;  %v3546_v50 = vpop.f32.mrb[21].mxu1 }
 0x32b   : > { %vm3637_vm6 = vcmp.ge.f32.partialorder %v3546_v50, 0.0  ;;  %v3669_v52 = vmul.f32 0.2, %v3546_v50  ;;  %v7246_v22 = vpop.f32.mrb[22].mxu1 }
 0x32c   : > { %3900 = vrot.lane.b32.xlu1 %v9432_v30, %s7437_s7  ;;  %v3703_v33 = vsel %vm3639_vm12, %v7245_v23, %v3671_v54  ;;  %vm3640_vm7 = vcmp.ge.f32.partialorder %v7246_v22, 0.0  ;;  %v3672_v41 = vmul.f32 0.2, %v7246_v22  ;;  %v3549_v12 = vpop.f32.mrb[23].mxu1  ;;  %v9436_v53 = vld [vmem:[#allocation3 + $0x90] sm:$0xff] }
 0x32d   : > { %v9438_v25 = vld [vmem:[#allocation3 + $0x79] sm:$0xff]  ;;  %3736 = vst.msk [vmem:[#allocation3 + $0xc1] sm:$0xff] %vm243_vm0, %v3703_v33  ;;  %v3701_v16 = vsel %vm3637_vm6, %v3546_v50, %v3669_v52  ;;  %vm3638_vm8 = vcmp.ge.f32.partialorder %v3549_v12, 0.0  ;;  %v3670_v58 = vmul.f32 0.2, %v3549_v12  ;;  %3798 = vst.msk [vmem:[#allocation5 + $0x60] sm:$0xff] %vm243_vm0, %v9436_v53 }
 0x32e   : > { %v9441_v15 = vld [vmem:[#allocation3 + $0x78] sm:$0xff]  ;;  %3902 = vrot.lane.b32.xlu0 %v9438_v25, %s7437_s7  ;;  %3734 = vst.msk [vmem:[#allocation3 + $0xa9] sm:$0xff] %vm243_vm0, %v3701_v16  ;;  %v3704_v42 = vsel %vm3640_vm7, %v7246_v22, %v3672_v41 }
 0x32f   : > { %3796 = vst.msk [vmem:[#allocation5 + $0x50] sm:$0xff] %vm243_vm0, %v9441_v15  ;;  %v9450_v55 = vld [vmem:[#allocation3 + $0x98] sm:$0xff]  ;;  %v9452_v39 = vld [vmem:[#allocation3 + $0x81] sm:$0xff]  ;;  %3737 = vst.msk [vmem:[#allocation3 + $0xc9] sm:$0xff] %vm243_vm0, %v3704_v42  ;;  %v3702_v1 = vsel %vm3638_vm8, %v3549_v12, %v3670_v58 }
 0x330   : > { %v9455_v38 = vld [vmem:[#allocation3 + $0x80] sm:$0xff]  ;;  %3799 = vst.msk [vmem:[#allocation5 + $0x68] sm:$0xff] %vm243_vm0, %v9450_v55  ;;  %3904 = vrot.lane.b32.xlu1 %v9452_v39, %s7437_s7  ;;  %3735 = vst.msk [vmem:[#allocation3 + $0xb1] sm:$0xff] %vm243_vm0, %v3702_v1  ;;  %v3830_v56 = vld [vmem:[#allocation3 + $0x91] sm:$0xff] }
 0x331   : > { %3797 = vst.msk [vmem:[#allocation5 + $0x58] sm:$0xff] %vm243_vm0, %v9455_v38  ;;  %v3831_v7 = vld [vmem:[#allocation3 + $0x99] sm:$0xff] }
 0x332   : > { %3906 = vrot.lane.b32.xlu0 %v3830_v56, %s7437_s7 }
 0x334   : > { %3908 = vrot.lane.b32.xlu1 %v3831_v7, %s7437_s7  ;;  %v9466_v10 = vld [vmem:[#allocation3 + $0xc0] sm:$0xff] }
 0x335   : > { %v3832_v17 = vld [vmem:[#allocation3 + $0xa9] sm:$0xff]  ;;  %3802 = vst.msk [vmem:[#allocation5 + $0x80] sm:$0xff] %vm243_vm0, %v9466_v10  ;;  %v3834_v20 = vld [vmem:[#allocation3 + $0xc1] sm:$0xff] }
 0x336   : > { %v9468_v35 = vld [vmem:[#allocation3 + $0xa8] sm:$0xff]  ;;  %3910 = vrot.lane.b32.xlu0 %v3832_v17, %s7437_s7 }
 0x337   : > { %3800 = vst.msk [vmem:[#allocation5 + $0x70] sm:$0xff] %vm243_vm0, %v9468_v35  ;;  %v9476_v63 = vld [vmem:[#allocation3 + $0xc8] sm:$0xff]  ;;  %v3833_v32 = vld [vmem:[#allocation3 + $0xb1] sm:$0xff] }
 0x338   : > { %v9479_v34 = vld [vmem:[#allocation3 + $0xb0] sm:$0xff]  ;;  %3803 = vst.msk [vmem:[#allocation5 + $0x88] sm:$0xff] %vm243_vm0, %v9476_v63  ;;  %3912 = vrot.lane.b32.xlu1 %v3833_v32, %s7437_s7 }
 0x339   : > { %3801 = vst.msk [vmem:[#allocation5 + $0x78] sm:$0xff] %vm243_vm0, %v9479_v34  ;;  %v3835_v23 = vld [vmem:[#allocation3 + $0xc9] sm:$0xff] }
 0x33a   : > { %3914 = vrot.lane.b32.xlu0 %v3834_v20, %s7437_s7 }
 0x33b   : > { %v7249_v6 = vpop.f32.mrb[24].mxu1 }
 0x33c   : > { %vm3643_vm2 = vcmp.ge.f32.partialorder %v7249_v6, 0.0  ;;  %v3675_v60 = vmul.f32 0.2, %v7249_v6  ;;  %v3562_v47 = vpop.f32.mrb[25].mxu1  ;;  %3916 = vrot.lane.b32.xlu1 %v3835_v23, %s7437_s7 }
 0x33d   : > { %vm3641_vm10 = vcmp.ge.f32.partialorder %v3562_v47, 0.0  ;;  %v3673_v0 = vmul.f32 0.2, %v3562_v47  ;;  %v7250_v37 = vpop.f32.mrb[26].mxu1 }
 0x33e   : > { %v3707_v46 = vsel %vm3643_vm2, %v7249_v6, %v3675_v60  ;;  %vm3644_vm12 = vcmp.ge.f32.partialorder %v7250_v37, 0.0  ;;  %v3676_v49 = vmul.f32 0.2, %v7250_v37  ;;  %v3565_v31 = vpop.f32.mrb[27].mxu1 }
 0x33f   : > { %3740 = vst.msk [vmem:[#allocation3 + $0xf1] sm:$0xff] %vm243_vm0, %v3707_v46  ;;  %v3705_v28 = vsel %vm3641_vm10, %v3562_v47, %v3673_v0  ;;  %vm3642_vm6 = vcmp.ge.f32.partialorder %v3565_v31, 0.0  ;;  %v3674_v29 = vmul.f32 0.2, %v3565_v31 }
 0x340   : > { %3738 = vst.msk [vmem:[#allocation3 + $0xd9] sm:$0xff] %vm243_vm0, %v3705_v28  ;;  %v3708_v57 = vsel %vm3644_vm12, %v7250_v37, %v3676_v49 }
 0x341   : > { %3741 = vst.msk [vmem:[#allocation3 + $0xf9] sm:$0xff] %vm243_vm0, %v3708_v57  ;;  %v3706_v24 = vsel %vm3642_vm6, %v3565_v31, %v3674_v29 }
 0x342   : > { %3739 = vst.msk [vmem:[#allocation3 + $0xe1] sm:$0xff] %vm243_vm0, %v3706_v24 }
 0x346   : > { %v9490_v54 = vld [vmem:[#allocation3 + $0xf0] sm:$0xff] }
 0x347   : > { %v3836_v50 = vld [vmem:[#allocation3 + $0xd9] sm:$0xff]  ;;  %3806 = vst.msk [vmem:[#allocation5 + $0xa0] sm:$0xff] %vm243_vm0, %v9490_v54  ;;  %v3838_v12 = vld [vmem:[#allocation3 + $0xf1] sm:$0xff] }
 0x348   : > { %v9492_v52 = vld [vmem:[#allocation3 + $0xd8] sm:$0xff]  ;;  %3918 = vrot.lane.b32.xlu0 %v3836_v50, %s7437_s7 }
 0x349   : > { %3804 = vst.msk [vmem:[#allocation5 + $0x90] sm:$0xff] %vm243_vm0, %v9492_v52  ;;  %v3837_v22 = vld [vmem:[#allocation3 + $0xe1] sm:$0xff]  ;;  %v9502_v41 = vld [vmem:[#allocation3 + $0xf8] sm:$0xff] }
 0x34a   : > { %3920 = vrot.lane.b32.xlu1 %v3837_v22, %s7437_s7  ;;  %v9500_v33 = vld [vmem:[#allocation3 + $0xe0] sm:$0xff]  ;;  %3807 = vst.msk [vmem:[#allocation5 + $0xa8] sm:$0xff] %vm243_vm0, %v9502_v41 }
 0x34b   : > { %3805 = vst.msk [vmem:[#allocation5 + $0x98] sm:$0xff] %vm243_vm0, %v9500_v33  ;;  %v3839_v16 = vld [vmem:[#allocation3 + $0xf9] sm:$0xff] }
 0x34c   : > { %3922 = vrot.lane.b32.xlu0 %v3838_v12, %s7437_s7 }
 0x34e   : > { %3924 = vrot.lane.b32.xlu1 %v3839_v16, %s7437_s7 }
 0x353   : > { %v7253_v58 = vpop.f32.mrb[28].mxu1 }
 0x354   : > { %vm3647_vm7 = vcmp.ge.f32.partialorder %v7253_v58, 0.0  ;;  %v3679_v42 = vmul.f32 0.2, %v7253_v58  ;;  %v3578_v1 = vpop.f32.mrb[29].mxu1 }
 0x355   : > { %vm3645_vm8 = vcmp.ge.f32.partialorder %v3578_v1, 0.0  ;;  %v3677_v56 = vmul.f32 0.2, %v3578_v1  ;;  %v7254_v6 = vpop.f32.mrb[30].mxu1 }
 0x356   : > { %v3711_v7 = vsel %vm3647_vm7, %v7253_v58, %v3679_v42  ;;  %vm3648_vm2 = vcmp.ge.f32.partialorder %v7254_v6, 0.0  ;;  %v3680_v60 = vmul.f32 0.2, %v7254_v6  ;;  %v3581_v47 = vpop.f32.mrb[31].mxu1 }
 0x357   : > { %3744 = vst.msk [vmem:[#allocation3 + $0x121] sm:$0xff] %vm243_vm0, %v3711_v7  ;;  %v3709_v0 = vsel %vm3645_vm8, %v3578_v1, %v3677_v56  ;;  %vm3646_vm10 = vcmp.ge.f32.partialorder %v3581_v47, 0.0  ;;  %v3678_v37 = vmul.f32 0.2, %v3581_v47 }
 0x358   : > { %3742 = vst.msk [vmem:[#allocation3 + $0x109] sm:$0xff] %vm243_vm0, %v3709_v0  ;;  %v3712_v17 = vsel %vm3648_vm2, %v7254_v6, %v3680_v60 }
 0x359   : > { %3745 = vst.msk [vmem:[#allocation3 + $0x129] sm:$0xff] %vm243_vm0, %v3712_v17  ;;  %v3710_v46 = vsel %vm3646_vm10, %v3581_v47, %v3678_v37 }
 0x35a   : > { %3743 = vst.msk [vmem:[#allocation3 + $0x111] sm:$0xff] %vm243_vm0, %v3710_v46 }
 0x35e   : > { %v3778_v49 = vld [vmem:[#allocation3 + $0x120] sm:$0xff] }
 0x35f   : > { %v3840_v31 = vld [vmem:[#allocation3 + $0x109] sm:$0xff]  ;;  %3810 = vst.msk [vmem:[#allocation5 + $0xc0] sm:$0xff] %vm243_vm0, %v3778_v49  ;;  %v3842_v24 = vld [vmem:[#allocation3 + $0x121] sm:$0xff] }
 0x360   : > { %v9514_v28 = vld [vmem:[#allocation3 + $0x108] sm:$0xff]  ;;  %3926 = vrot.lane.b32.xlu0 %v3840_v31, %s7437_s7 }
 0x361   : > { %3808 = vst.msk [vmem:[#allocation5 + $0xb0] sm:$0xff] %vm243_vm0, %v9514_v28  ;;  %v3841_v29 = vld [vmem:[#allocation3 + $0x111] sm:$0xff]  ;;  %v3779_v57 = vld [vmem:[#allocation3 + $0x128] sm:$0xff] }
 0x362   : > { %3928 = vrot.lane.b32.xlu1 %v3841_v29, %s7437_s7  ;;  %v9521_v32 = vld [vmem:[#allocation3 + $0x110] sm:$0xff]  ;;  %3811 = vst.msk [vmem:[#allocation5 + $0xc8] sm:$0xff] %vm243_vm0, %v3779_v57  ;;  %v4035_v43 = vld [vmem:[#allocation3 + $0x122] sm:$0xff] }
 0x363   : > { %3809 = vst.msk [vmem:[#allocation5 + $0xb8] sm:$0xff] %vm243_vm0, %v9521_v32  ;;  %v3843_v20 = vld [vmem:[#allocation3 + $0x129] sm:$0xff] }
 0x364   : > { %3930 = vrot.lane.b32.xlu0 %v3842_v24, %s7437_s7  ;;  %v4033_v59 = vld [vmem:[#allocation3 + $0x10a] sm:$0xff] }
 0x366   : > { %3932 = vrot.lane.b32.xlu1 %v3843_v20, %s7437_s7 }
 0x36b   : > { %v7257_v23 = vpop.f32.mrb[32].mxu1 }
 0x36c   : > { %vm3651_vm12 = vcmp.ge.f32.partialorder %v7257_v23, 0.0  ;;  %v3683_v50 = vmul.f32 0.2, %v7257_v23  ;;  %v3594_v22 = vpop.f32.mrb[33].mxu1 }
 0x36d   : > { %vm3649_vm6 = vcmp.ge.f32.partialorder %v3594_v22, 0.0  ;;  %v3681_v12 = vmul.f32 0.2, %v3594_v22  ;;  %v7258_v16 = vpop.f32.mrb[34].mxu1 }
 0x36e   : > { %v3715_v58 = vsel %vm3651_vm12, %v7257_v23, %v3683_v50  ;;  %vm3652_vm7 = vcmp.ge.f32.partialorder %v7258_v16, 0.0  ;;  %v3684_v42 = vmul.f32 0.2, %v7258_v16  ;;  %v3597_v1 = vpop.f32.mrb[35].mxu1 }
 0x36f   : > { %3748 = vst.msk [vmem:[#allocation3 + $0x151] sm:$0xff] %vm243_vm0, %v3715_v58  ;;  %v3713_v56 = vsel %vm3649_vm6, %v3594_v22, %v3681_v12  ;;  %vm3650_vm8 = vcmp.ge.f32.partialorder %v3597_v1, 0.0  ;;  %v3682_v6 = vmul.f32 0.2, %v3597_v1 }
 0x370   : > { %3746 = vst.msk [vmem:[#allocation3 + $0x139] sm:$0xff] %vm243_vm0, %v3713_v56  ;;  %v3716_v7 = vsel %vm3652_vm7, %v7258_v16, %v3684_v42  ;;  %vm5496_vm7 = vcmask 1043456  }
 0x371   : > { %3749 = vst.msk [vmem:[#allocation3 + $0x159] sm:$0xff] %vm243_vm0, %v3716_v7  ;;  %v3714_v60 = vsel %vm3650_vm8, %v3597_v1, %v3682_v6  ;;  %vm4171_vm8 = vcmask 195712  }
 0x372   : > { %3747 = vst.msk [vmem:[#allocation3 + $0x141] sm:$0xff] %vm243_vm0, %v3714_v60 }
 0x376   : > { %v3782_v47 = vld [vmem:[#allocation3 + $0x150] sm:$0xff] }
 0x377   : > { %v3844_v0 = vld [vmem:[#allocation3 + $0x139] sm:$0xff]  ;;  %3814 = vst.msk [vmem:[#allocation5 + $0xe0] sm:$0xff] %vm243_vm0, %v3782_v47  ;;  %v3846_v31 = vld [vmem:[#allocation3 + $0x151] sm:$0xff]  ;;  %v4011_v47 = vld [vmem:[#allocation3 + $0x2] sm:$0xff] }
 0x378   : > { %v3780_v37 = vld [vmem:[#allocation3 + $0x138] sm:$0xff]  ;;  %3934 = vrot.lane.b32.xlu0 %v3844_v0, %s7437_s7 }
 0x379   : > { %3812 = vst.msk [vmem:[#allocation5 + $0xd0] sm:$0xff] %vm243_vm0, %v3780_v37  ;;  %v3845_v17 = vld [vmem:[#allocation3 + $0x141] sm:$0xff]  ;;  %v3783_v49 = vld [vmem:[#allocation3 + $0x158] sm:$0xff]  ;;  %v4012_v37 = vld [vmem:[#allocation3 + $0xa] sm:$0xff] }
 0x37a   : > { %3936 = vrot.lane.b32.xlu1 %v3845_v17, %s7437_s7  ;;  %v3781_v46 = vld [vmem:[#allocation3 + $0x140] sm:$0xff]  ;;  %3815 = vst.msk [vmem:[#allocation5 + $0xe8] sm:$0xff] %vm243_vm0, %v3783_v49 }
 0x37b   : > { %3813 = vst.msk [vmem:[#allocation5 + $0xd8] sm:$0xff] %vm243_vm0, %v3781_v46  ;;  %v3847_v29 = vld [vmem:[#allocation3 + $0x159] sm:$0xff]  ;;  %v9554_v49 = vld [vmem:[#allocation3 + $0x22] sm:$0xff] }
 0x37c   : > { %3938 = vrot.lane.b32.xlu0 %v3846_v31, %s7437_s7  ;;  %v9550_v17 = vld [vmem:[#allocation3 + $0x1a] sm:$0xff]  ;;  %v4038_v21 = vld [vmem:[#allocation3 + $0x142] sm:$0xff] }
 0x37d   : > { %v4037_v4 = vld [vmem:[#allocation3 + $0x13a] sm:$0xff] }
 0x37e   : > { %3940 = vrot.lane.b32.xlu1 %v3847_v29, %s7437_s7  ;;  %v9559_v29 = vld [vmem:[#allocation3 + $0x32] sm:$0xff] }
 0x383   : > { %v7261_v57 = vpop.f32.mrb[36].mxu1 }
 0x384   : > { %vm3655_vm2 = vcmp.ge.f32.partialorder %v7261_v57, 0.0  ;;  %v3687_v24 = vmul.f32 0.2, %v7261_v57  ;;  %v3610_v20 = vpop.f32.mrb[37].mxu1 }
 0x385   : > { %vm3653_vm10 = vcmp.ge.f32.partialorder %v3610_v20, 0.0  ;;  %v3685_v23 = vmul.f32 0.2, %v3610_v20  ;;  %v7262_v50 = vpop.f32.mrb[38].mxu1 }
 0x386   : > { %v3719_v22 = vsel %vm3655_vm2, %v7261_v57, %v3687_v24  ;;  %vm3656_vm12 = vcmp.ge.f32.partialorder %v7262_v50, 0.0  ;;  %v3688_v12 = vmul.f32 0.2, %v7262_v50  ;;  %v3613_v16 = vpop.f32.mrb[39].mxu1  ;;  %v9564_v24 = vld [vmem:[#allocation3 + $0x3a] sm:$0xff]  ;;  %vm4557_vm2 = vcmask 326912  }
 0x387   : > { %3752 = vst.msk [vmem:[#allocation3 + $0x181] sm:$0xff] %vm243_vm0, %v3719_v22  ;;  %v3717_v58 = vsel %vm3653_vm10, %v3610_v20, %v3685_v23  ;;  %vm3654_vm6 = vcmp.ge.f32.partialorder %v3613_v16, 0.0  ;;  %v3686_v42 = vmul.f32 0.2, %v3613_v16  ;;  %v9569_v23 = vld [vmem:[#allocation3 + $0x4a] sm:$0xff]  ;;  %v9574_v22 = vld [vmem:[#allocation3 + $0x52] sm:$0xff] }
 0x388   : > { %3750 = vst.msk [vmem:[#allocation3 + $0x169] sm:$0xff] %vm243_vm0, %v3717_v58  ;;  %v3720_v1 = vsel %vm3656_vm12, %v7262_v50, %v3688_v12  ;;  %vm4750_vm10 = vcmask 392512   ;;  %vm4944_vm12 = vcmask 458112  }
 0x389   : > { %3753 = vst.msk [vmem:[#allocation3 + $0x189] sm:$0xff] %vm243_vm0, %v3720_v1  ;;  %v3718_v56 = vsel %vm3654_vm6, %v3613_v16, %v3686_v42  ;;  %v9579_v16 = vld [vmem:[#allocation3 + $0x62] sm:$0xff]  ;;  %v9584_v42 = vld [vmem:[#allocation3 + $0x6a] sm:$0xff]  ;;  %vm5137_vm6 = vcmask 523712  }
 0x38a   : > { %3751 = vst.msk [vmem:[#allocation3 + $0x171] sm:$0xff] %vm243_vm0, %v3718_v56  ;;  %v9589_v56 = vld [vmem:[#allocation3 + $0x7a] sm:$0xff] }
 0x38f   : > { %v3848_v6 = vld [vmem:[#allocation3 + $0x169] sm:$0xff] }
 0x390   : > { %v3784_v7 = vld [vmem:[#allocation3 + $0x168] sm:$0xff]  ;;  %3942 = vrot.lane.b32.xlu0 %v3848_v6, %s7437_s7  ;;  %v3887_v46 = vpop.permute.xlu0 %3886 }
 0x391   : > { %3816 = vst.msk [vmem:[#allocation5 + $0xf0] sm:$0xff] %vm243_vm0, %v3784_v7  ;;  %v3849_v60 = vld [vmem:[#allocation3 + $0x171] sm:$0xff]  ;;  %v9594_v7 = vld [vmem:[#allocation3 + $0x82] sm:$0xff] }
 0x392   : > { %3944 = vrot.lane.b32.xlu1 %v3849_v60, %s7437_s7  ;;  %v3785_v0 = vld [vmem:[#allocation3 + $0x170] sm:$0xff]  ;;  %3981 = vst.msk [vmem:[#allocation5 + $0x10] sm:$0xff] %vm3978_vm11, %v3887_v46  ;;  %v3889_v31 = vpop.permute.xlu1 %3888 }
 0x393   : > { %3817 = vst.msk [vmem:[#allocation5 + $0xf8] sm:$0xff] %vm243_vm0, %v3785_v0 }
 0x394   : > { %4075 = vrot.lane.b32.xlu0 %v4011_v47, %s7439_s9  ;;  %3982 = vst.msk [vmem:[#allocation5 + $0x18] sm:$0xff] %vm3978_vm11, %v3889_v31  ;;  %v3891_v57 = vpop.permute.xlu0 %3890  ;;  %v9599_v47 = vld [vmem:[#allocation3 + $0x92] sm:$0xff]  ;;  %v9609_v31 = vld [vmem:[#allocation3 + $0xaa] sm:$0xff] }
 0x395   : > { %3983 = vst.msk [vmem:[#allocation5 + $0x20] sm:$0xff] %vm3978_vm11, %v3891_v57 }
 0x396   : > { %4077 = vrot.lane.b32.xlu1 %v4012_v37, %s7439_s9  ;;  %v3893_v20 = vpop.permute.xlu1 %3892  ;;  %v9604_v37 = vld [vmem:[#allocation3 + $0x9a] sm:$0xff] }
 0x397   : > { %3984 = vst.msk [vmem:[#allocation5 + $0x28] sm:$0xff] %vm3978_vm11, %v3893_v20  ;;  %v9614_v20 = vld [vmem:[#allocation3 + $0xb2] sm:$0xff] }
 0x398   : > { %4079 = vrot.lane.b32.xlu0 %v9550_v17, %s7439_s9  ;;  %v3895_v50 = vpop.permute.xlu0 %3894 }
 0x399   : > { %3985 = vst.msk [vmem:[#allocation5 + $0x30] sm:$0xff] %vm3978_vm11, %v3895_v50 }
 0x39a   : > { %4081 = vrot.lane.b32.xlu1 %v9554_v49, %s7439_s9  ;;  %v3897_v12 = vpop.permute.xlu1 %3896 }
 0x39b   : > { %3986 = vst.msk [vmem:[#allocation5 + $0x38] sm:$0xff] %vm3978_vm11, %v3897_v12  ;;  %v9619_v12 = vld [vmem:[#allocation3 + $0xc2] sm:$0xff] }
 0x39c   : > { %4083 = vrot.lane.b32.xlu0 %v9559_v29, %s7439_s9  ;;  %v3899_v58 = vpop.permute.xlu0 %3898 }
 0x39d   : > { %3987 = vst.msk [vmem:[#allocation5 + $0x40] sm:$0xff] %vm3978_vm11, %v3899_v58 }
 0x39e   : > { %4085 = vrot.lane.b32.xlu1 %v9564_v24, %s7439_s9  ;;  %v3901_v1 = vpop.permute.xlu1 %3900 }
 0x39f   : > { %3988 = vst.msk [vmem:[#allocation5 + $0x48] sm:$0xff] %vm3978_vm11, %v3901_v1  ;;  %v9624_v1 = vld [vmem:[#allocation3 + $0xca] sm:$0xff] }
 0x3a0   : > { %4087 = vrot.lane.b32.xlu0 %v9569_v23, %s7439_s9  ;;  %v3903_v6 = vpop.permute.xlu0 %3902 }
 0x3a1   : > { %3989 = vst.msk [vmem:[#allocation5 + $0x50] sm:$0xff] %vm3978_vm11, %v3903_v6 }
 0x3a2   : > { %4089 = vrot.lane.b32.xlu1 %v9574_v22, %s7439_s9  ;;  %v3905_v60 = vpop.permute.xlu1 %3904 }
 0x3a3   : > { %3990 = vst.msk [vmem:[#allocation5 + $0x58] sm:$0xff] %vm3978_vm11, %v3905_v60  ;;  %v9629_v60 = vld [vmem:[#allocation3 + $0xda] sm:$0xff] }
 0x3a4   : > { %4091 = vrot.lane.b32.xlu0 %v9579_v16, %s7439_s9  ;;  %v3907_v0 = vpop.permute.xlu0 %3906 }
 0x3a5   : > { %3991 = vst.msk [vmem:[#allocation5 + $0x60] sm:$0xff] %vm3978_vm11, %v3907_v0  ;;  %v9634_v0 = vld [vmem:[#allocation3 + $0xe2] sm:$0xff] }
 0x3a6   : > { %4093 = vrot.lane.b32.xlu1 %v9584_v42, %s7439_s9  ;;  %v3909_v46 = vpop.permute.xlu1 %3908 }
 0x3a7   : > { %3992 = vst.msk [vmem:[#allocation5 + $0x68] sm:$0xff] %vm3978_vm11, %v3909_v46 }
 0x3a8   : > { %4095 = vrot.lane.b32.xlu0 %v9589_v56, %s7439_s9  ;;  %v3911_v57 = vpop.permute.xlu0 %3910 }
 0x3a9   : > { %3993 = vst.msk [vmem:[#allocation5 + $0x70] sm:$0xff] %vm3978_vm11, %v3911_v57  ;;  %v9639_v57 = vld [vmem:[#allocation3 + $0xf2] sm:$0xff] }
 0x3aa   : > { %4097 = vrot.lane.b32.xlu1 %v9594_v7, %s7439_s9  ;;  %v3913_v50 = vpop.permute.xlu1 %3912 }
 0x3ab   : > { %3994 = vst.msk [vmem:[#allocation5 + $0x78] sm:$0xff] %vm3978_vm11, %v3913_v50 }
 0x3ac   : > { %4099 = vrot.lane.b32.xlu0 %v9599_v47, %s7439_s9  ;;  %v3915_v58 = vpop.permute.xlu0 %3914 }
 0x3ad   : > { %3995 = vst.msk [vmem:[#allocation5 + $0x80] sm:$0xff] %vm3978_vm11, %v3915_v58  ;;  %v9644_v58 = vld [vmem:[#allocation3 + $0xfa] sm:$0xff] }
 0x3ae   : > { %4101 = vrot.lane.b32.xlu1 %v9604_v37, %s7439_s9  ;;  %v3917_v6 = vpop.permute.xlu1 %3916 }
 0x3af   : > { %3996 = vst.msk [vmem:[#allocation5 + $0x88] sm:$0xff] %vm3978_vm11, %v3917_v6 }
 0x3b0   : > { %4103 = vrot.lane.b32.xlu0 %v9609_v31, %s7439_s9 }
 0x3b2   : > { %4105 = vrot.lane.b32.xlu1 %v9614_v20, %s7439_s9 }
 0x3b4   : > { %4107 = vrot.lane.b32.xlu0 %v9619_v12, %s7439_s9 }
 0x3b6   : > { %4109 = vrot.lane.b32.xlu1 %v9624_v1, %s7439_s9 }
 0x3b8   : > { %4111 = vrot.lane.b32.xlu0 %v9629_v60, %s7439_s9 }
 0x3ba   : > { %v3919_v46 = vpop.permute.xlu0 %3918  ;;  %4113 = vrot.lane.b32.xlu1 %v9634_v0, %s7439_s9 }
 0x3bb   : > { %3997 = vst.msk [vmem:[#allocation5 + $0x90] sm:$0xff] %vm3978_vm11, %v3919_v46  ;;  %v4034_v46 = vld [vmem:[#allocation3 + $0x112] sm:$0xff] }
 0x3bc   : > { %v3921_v50 = vpop.permute.xlu1 %3920  ;;  %4115 = vrot.lane.b32.xlu0 %v9639_v57, %s7439_s9 }
 0x3bd   : > { %3998 = vst.msk [vmem:[#allocation5 + $0x98] sm:$0xff] %vm3978_vm11, %v3921_v50  ;;  %v4036_v50 = vld [vmem:[#allocation3 + $0x12a] sm:$0xff] }
 0x3be   : > { %v3923_v6 = vpop.permute.xlu0 %3922  ;;  %4117 = vrot.lane.b32.xlu1 %v9644_v58, %s7439_s9 }
 0x3bf   : > { %3999 = vst.msk [vmem:[#allocation5 + $0xa0] sm:$0xff] %vm3978_vm11, %v3923_v6  ;;  %v4039_v6 = vld [vmem:[#allocation3 + $0x152] sm:$0xff] }
 0x3c0   : > { %v3925_v2 = vpop.permute.xlu1 %3924  ;;  %4119 = vrot.lane.b32.xlu0 %v4033_v59, %s7439_s9  ;;  %v4040_v59 = vld [vmem:[#allocation3 + $0x15a] sm:$0xff] }
 0x3c1   : > { %4000 = vst.msk [vmem:[#allocation5 + $0xa8] sm:$0xff] %vm3978_vm11, %v3925_v2  ;;  %v4041_v2 = vld [vmem:[#allocation3 + $0x16a] sm:$0xff] }
 0x3c2   : > { %4121 = vrot.lane.b32.xlu1 %v4034_v46, %s7439_s9  ;;  %v4042_v46 = vld [vmem:[#allocation3 + $0x172] sm:$0xff] }
 0x3c4   : > { %4123 = vrot.lane.b32.xlu0 %v4035_v43, %s7439_s9 }
 0x3c6   : > { %4125 = vrot.lane.b32.xlu1 %v4036_v50, %s7439_s9 }
 0x3c8   : > { %4127 = vrot.lane.b32.xlu0 %v4037_v4, %s7439_s9 }
 0x3ca   : > { %4129 = vrot.lane.b32.xlu1 %v4038_v21, %s7439_s9 }
 0x3cc   : > { %4131 = vrot.lane.b32.xlu0 %v4039_v6, %s7439_s9 }
 0x3ce   : > { %4133 = vrot.lane.b32.xlu1 %v4040_v59, %s7439_s9 }
 0x3d0   : > { %4135 = vrot.lane.b32.xlu0 %v4041_v2, %s7439_s9 }
 0x3d2   : > { %v3927_v43 = vpop.permute.xlu0 %3926  ;;  %4137 = vrot.lane.b32.xlu1 %v4042_v46, %s7439_s9  ;;  %s7090_s9 = sshll.u32 %s7497_s19, 10 }
 0x3d3   : > { %4001 = vst.msk [vmem:[#allocation5 + $0xb0] sm:$0xff] %vm3978_vm11, %v3927_v43  ;;  %s10565_s14 = scalar_lea.hbm %s10621_s4, %s7090_s9 }
 0x3d4   : > { %v3929_v50 = vpop.permute.xlu1 %3928  ;;  %4268 = vrot.lane.b32.xlu0 %v9369_v51, %s7442_s11  ;;  %v7365_v51 = vld [vmem:[%s10619_s2] sm:$0xff]  }
 0x3d5   : > { %4002 = vst.msk [vmem:[#allocation5 + $0xb8] sm:$0xff] %vm3978_vm11, %v3929_v50  ;;  %7263 = vmatprep.subr.bf16.mxu0 %v7365_v51 }
 0x3d6   : > { %v3931_v21 = vpop.permute.xlu0 %3930  ;;  %4270 = vrot.lane.b32.xlu1 %v9383_v48, %s7442_s11  ;;  %7264 = vmatpush3.bf16.msra.mxu0 %v7365_v51 }
 0x3d7   : > { %4003 = vst.msk [vmem:[#allocation5 + $0xc0] sm:$0xff] %vm3978_vm11, %v3931_v21 }
 0x3d8   : > { %v3933_v4 = vpop.permute.xlu1 %3932  ;;  %4272 = vrot.lane.b32.xlu0 %v9364_v61, %s7442_s11 }
 0x3d9   : > { %4004 = vst.msk [vmem:[#allocation5 + $0xc8] sm:$0xff] %vm3978_vm11, %v3933_v4 }
 0x3da   : > { %4274 = vrot.lane.b32.xlu1 %v9378_v19, %s7442_s11 }
 0x3dc   : > { %4461 = vrot.lane.b32.xlu0 %v9366_v27, %s7444_s23 }
 0x3de   : > { %4463 = vrot.lane.b32.xlu1 %v9380_v44, %s7444_s23 }
 0x3e0   : > { %4465 = vrot.lane.b32.xlu0 %v9392_v45, %s7444_s23 }
 0x3e2   : > { %4467 = vrot.lane.b32.xlu1 %v9396_v18, %s7444_s23 }
 0x3e4   : > { %4654 = vrot.lane.b32.xlu0 %v9550_v17, %s7445_s8  ;;  %v7366_v17 = vld [vmem:[%s10619_s2 + $0x8] sm:$0xff]  }
 0x3e5   : > { %7265 = vmatprep.subr.bf16.mxu0 %v7366_v17 }
 0x3e6   : > { %4656 = vrot.lane.b32.xlu1 %v9554_v49, %s7445_s8  ;;  %7266 = vmatpush3.bf16.msra.mxu0 %v7366_v17 }
 0x3e8   : > { %4658 = vrot.lane.b32.xlu0 %v9559_v29, %s7445_s8 }
 0x3ea   : > { %v3935_v27 = vpop.permute.xlu0 %3934  ;;  %4660 = vrot.lane.b32.xlu1 %v9564_v24, %s7445_s8 }
 0x3eb   : > { %4005 = vst.msk [vmem:[#allocation5 + $0xd0] sm:$0xff] %vm3978_vm11, %v3935_v27 }
 0x3ec   : > { %v3937_v44 = vpop.permute.xlu1 %3936  ;;  %4848 = vrot.lane.b32.xlu0 %v9364_v61, %s7446_s12  ;;  %v7367_v61 = vld [vmem:[%s10619_s2 + $0x10] sm:$0xff]  }
 0x3ed   : > { %4006 = vst.msk [vmem:[#allocation5 + $0xd8] sm:$0xff] %vm3978_vm11, %v3937_v44  ;;  %7267 = vmatprep.subr.bf16.mxu0 %v7367_v61 }
 0x3ee   : > { %v3939_v48 = vpop.permute.xlu0 %3938  ;;  %4850 = vrot.lane.b32.xlu1 %v9378_v19, %s7446_s12  ;;  %7268 = vmatpush3.bf16.msra.mxu0 %v7367_v61  ;;  %v7368_v19 = vld [vmem:[%s10619_s2 + $0x18] sm:$0xff]  }
 0x3ef   : > { %4007 = vst.msk [vmem:[#allocation5 + $0xe0] sm:$0xff] %vm3978_vm11, %v3939_v48  ;;  %7269 = vmatprep.subr.bf16.mxu0 %v7368_v19 }
 0x3f0   : > { %v3941_v49 = vpop.permute.xlu1 %3940  ;;  %4852 = vrot.lane.b32.xlu0 %v9405_v3, %s7446_s12 }
 0x3f1   : > { %4008 = vst.msk [vmem:[#allocation5 + $0xe8] sm:$0xff] %vm3978_vm11, %v3941_v49 }
 0x3f2   : > { %4854 = vrot.lane.b32.xlu1 %v9419_v62, %s7446_s12  ;;  %7270 = vmatpush3.bf16.msra.mxu0 %v7368_v19  ;;  %v4407_v19 = vld [vmem:[#allocation3 + $0x91] sm:$0xff] }
 0x3f4   : > { %5041 = vrot.lane.b32.xlu0 %v9392_v45, %s7447_s27  ;;  %v7369_v45 = vld [vmem:[%s10619_s2 + $0x20] ss:$0 sps:$4 sm:$0xff]  }
 0x3f5   : > { %7307 = vmatprep.subr.msk.bf16.mxu0 %vm5496_vm7, %v7369_v45 }
 0x3f6   : > { %5043 = vrot.lane.b32.xlu1 %v9396_v18, %s7447_s27  ;;  %v5498_v18 = vsel %vm5496_vm7, %v7369_v45, 0  ;;  %vm5330_vm7 = vcmask 589312  }
 0x3f7   : > { %7272 = vmatpush3.bf16.msra.mxu0 %v5498_v18  ;;  %v4408_v18 = vld [vmem:[#allocation3 + $0x99] sm:$0xff] }
 0x3f8   : > { %5045 = vrot.lane.b32.xlu0 %v9402_v9, %s7447_s27 }
 0x3fa   : > { %5047 = vrot.lane.b32.xlu1 %v9416_v14, %s7447_s27 }
 0x3fc   : > { %5234 = vrot.lane.b32.xlu0 %v9559_v29, %s7448_s6 }
 0x3fe   : > { %5236 = vrot.lane.b32.xlu1 %v9564_v24, %s7448_s6 }
 0x400   : > { %5238 = vrot.lane.b32.xlu0 %v9569_v23, %s7448_s6 }
 0x402   : > { %v3943_v6 = vpop.permute.xlu0 %3942  ;;  %5240 = vrot.lane.b32.xlu1 %v9574_v22, %s7448_s6 }
 0x403   : > { %4009 = vst.msk [vmem:[#allocation5 + $0xf0] sm:$0xff] %vm3978_vm11, %v3943_v6 }
 0x404   : > { %4276 = vrot.lane.b32.xlu0 %v9405_v3, %s7442_s11  ;;  %v3945_v59 = vpop.permute.xlu1 %3944 }
 0x405   : > { %4010 = vst.msk [vmem:[#allocation5 + $0xf8] sm:$0xff] %vm3978_vm11, %v3945_v59  ;;  %vm4364_vm11 = vcmask 261312  }
 0x406   : > { %v4076_v29 = vpop.permute.xlu0 %4075  ;;  %4278 = vrot.lane.b32.xlu1 %v9419_v62, %s7442_s11 }
 0x407   : > { %4172 = vst.msk [vmem:[#allocation5] sm:$0xff] %vm4171_vm8, %v4076_v29 }
 0x408   : > { %4280 = vrot.lane.b32.xlu0 %v9400_v26, %s7442_s11  ;;  %v4078_v24 = vpop.permute.xlu1 %4077 }
 0x409   : > { %4173 = vst.msk [vmem:[#allocation5 + $0x8] sm:$0xff] %vm4171_vm8, %v4078_v24 }
 0x40a   : > { %v4080_v2 = vpop.permute.xlu0 %4079  ;;  %4282 = vrot.lane.b32.xlu1 %v9414_v5, %s7442_s11 }
 0x40b   : > { %4174 = vst.msk [vmem:[#allocation5 + $0x10] sm:$0xff] %vm4171_vm8, %v4080_v2 }
 0x40c   : > { %4469 = vrot.lane.b32.xlu0 %v9402_v9, %s7444_s23  ;;  %v4082_v3 = vpop.permute.xlu1 %4081 }
 0x40d   : > { %4175 = vst.msk [vmem:[#allocation5 + $0x18] sm:$0xff] %vm4171_vm8, %v4082_v3 }
 0x40e   : > { %v4084_v62 = vpop.permute.xlu0 %4083  ;;  %4471 = vrot.lane.b32.xlu1 %v9416_v14, %s7444_s23 }
 0x40f   : > { %4176 = vst.msk [vmem:[#allocation5 + $0x20] sm:$0xff] %vm4171_vm8, %v4084_v62 }
 0x410   : > { %4473 = vrot.lane.b32.xlu0 %v9428_v13, %s7444_s23  ;;  %v4086_v46 = vpop.permute.xlu1 %4085 }
 0x411   : > { %4177 = vst.msk [vmem:[#allocation5 + $0x28] sm:$0xff] %vm4171_vm8, %v4086_v46  ;;  %v4987_v46 = vld [vmem:[#allocation3 + $0xa9] sm:$0xff] }
 0x412   : > { %v4088_v43 = vpop.permute.xlu0 %4087  ;;  %4475 = vrot.lane.b32.xlu1 %v9432_v30, %s7444_s23 }
 0x413   : > { %4178 = vst.msk [vmem:[#allocation5 + $0x30] sm:$0xff] %vm4171_vm8, %v4088_v43 }
 0x414   : > { %4662 = vrot.lane.b32.xlu0 %v9569_v23, %s7445_s8  ;;  %v4090_v9 = vpop.permute.xlu1 %4089 }
 0x415   : > { %4179 = vst.msk [vmem:[#allocation5 + $0x38] sm:$0xff] %vm4171_vm8, %v4090_v9  ;;  %v4988_v9 = vld [vmem:[#allocation3 + $0xb1] sm:$0xff] }
 0x416   : > { %v4092_v14 = vpop.permute.xlu0 %4091  ;;  %4664 = vrot.lane.b32.xlu1 %v9574_v22, %s7445_s8 }
 0x417   : > { %4180 = vst.msk [vmem:[#allocation5 + $0x40] sm:$0xff] %vm4171_vm8, %v4092_v14 }
 0x418   : > { %4666 = vrot.lane.b32.xlu0 %v9579_v16, %s7445_s8  ;;  %v4094_v50 = vpop.permute.xlu1 %4093 }
 0x419   : > { %4181 = vst.msk [vmem:[#allocation5 + $0x48] sm:$0xff] %vm4171_vm8, %v4094_v50 }
 0x41a   : > { %v4096_v21 = vpop.permute.xlu0 %4095  ;;  %4668 = vrot.lane.b32.xlu1 %v9584_v42, %s7445_s8 }
 0x41b   : > { %4182 = vst.msk [vmem:[#allocation5 + $0x50] sm:$0xff] %vm4171_vm8, %v4096_v21 }
 0x41c   : > { %4856 = vrot.lane.b32.xlu0 %v9400_v26, %s7446_s12  ;;  %v4098_v23 = vpop.permute.xlu1 %4097 }
 0x41d   : > { %4183 = vst.msk [vmem:[#allocation5 + $0x58] sm:$0xff] %vm4171_vm8, %v4098_v23 }
 0x41e   : > { %v4100_v22 = vpop.permute.xlu0 %4099  ;;  %4858 = vrot.lane.b32.xlu1 %v9414_v5, %s7446_s12 }
 0x41f   : > { %4184 = vst.msk [vmem:[#allocation5 + $0x60] sm:$0xff] %vm4171_vm8, %v4100_v22 }
 0x420   : > { %4860 = vrot.lane.b32.xlu0 %v9441_v15, %s7446_s12  ;;  %v4102_v4 = vpop.permute.xlu1 %4101 }
 0x421   : > { %4185 = vst.msk [vmem:[#allocation5 + $0x68] sm:$0xff] %vm4171_vm8, %v4102_v4 }
 0x422   : > { %v4104_v27 = vpop.permute.xlu0 %4103  ;;  %4862 = vrot.lane.b32.xlu1 %v9455_v38, %s7446_s12 }
 0x423   : > { %4186 = vst.msk [vmem:[#allocation5 + $0x70] sm:$0xff] %vm4171_vm8, %v4104_v27 }
 0x424   : > { %5049 = vrot.lane.b32.xlu0 %v9428_v13, %s7447_s27  ;;  %v4106_v26 = vpop.permute.xlu1 %4105 }
 0x425   : > { %4187 = vst.msk [vmem:[#allocation5 + $0x78] sm:$0xff] %vm4171_vm8, %v4106_v26  ;;  %v4411_v26 = vld [vmem:[#allocation3 + $0xc1] sm:$0xff] }
 0x426   : > { %v4108_v5 = vpop.permute.xlu0 %4107  ;;  %5051 = vrot.lane.b32.xlu1 %v9432_v30, %s7447_s27 }
 0x427   : > { %4188 = vst.msk [vmem:[#allocation5 + $0x80] sm:$0xff] %vm4171_vm8, %v4108_v5 }
 0x428   : > { %5053 = vrot.lane.b32.xlu0 %v9438_v25, %s7447_s27  ;;  %v4110_v51 = vpop.permute.xlu1 %4109 }
 0x429   : > { %4189 = vst.msk [vmem:[#allocation5 + $0x88] sm:$0xff] %vm4171_vm8, %v4110_v51  ;;  %v4412_v51 = vld [vmem:[#allocation3 + $0xc9] sm:$0xff] }
 0x42a   : > { %v4112_v44 = vpop.permute.xlu0 %4111  ;;  %5055 = vrot.lane.b32.xlu1 %v9452_v39, %s7447_s27 }
 0x42b   : > { %4190 = vst.msk [vmem:[#allocation5 + $0x90] sm:$0xff] %vm4171_vm8, %v4112_v44 }
 0x42c   : > { %5242 = vrot.lane.b32.xlu0 %v9579_v16, %s7448_s6  ;;  %v4114_v13 = vpop.permute.xlu1 %4113 }
 0x42d   : > { %4191 = vst.msk [vmem:[#allocation5 + $0x98] sm:$0xff] %vm4171_vm8, %v4114_v13 }
 0x42e   : > { %v4116_v30 = vpop.permute.xlu0 %4115  ;;  %5244 = vrot.lane.b32.xlu1 %v9584_v42, %s7448_s6 }
 0x42f   : > { %4192 = vst.msk [vmem:[#allocation5 + $0xa0] sm:$0xff] %vm4171_vm8, %v4116_v30 }
 0x430   : > { %5246 = vrot.lane.b32.xlu0 %v9589_v56, %s7448_s6  ;;  %v4118_v25 = vpop.permute.xlu1 %4117 }
 0x431   : > { %4193 = vst.msk [vmem:[#allocation5 + $0xa8] sm:$0xff] %vm4171_vm8, %v4118_v25 }
 0x432   : > { %v4120_v39 = vpop.permute.xlu0 %4119  ;;  %5248 = vrot.lane.b32.xlu1 %v9594_v7, %s7448_s6 }
 0x433   : > { %4194 = vst.msk [vmem:[#allocation5 + $0xb0] sm:$0xff] %vm4171_vm8, %v4120_v39 }
 0x434   : > { %4284 = vrot.lane.b32.xlu0 %v9441_v15, %s7442_s11  ;;  %v4122_v16 = vpop.permute.xlu1 %4121  ;;  %v4405_v15 = vld [vmem:[#allocation3 + $0x79] sm:$0xff] }
 0x435   : > { %4195 = vst.msk [vmem:[#allocation5 + $0xb8] sm:$0xff] %vm4171_vm8, %v4122_v16 }
 0x436   : > { %v4124_v42 = vpop.permute.xlu0 %4123  ;;  %4286 = vrot.lane.b32.xlu1 %v9455_v38, %s7442_s11  ;;  %v4406_v38 = vld [vmem:[#allocation3 + $0x81] sm:$0xff] }
 0x437   : > { %4196 = vst.msk [vmem:[#allocation5 + $0xc0] sm:$0xff] %vm4171_vm8, %v4124_v42 }
 0x438   : > { %4288 = vrot.lane.b32.xlu0 %v9436_v53, %s7442_s11  ;;  %v4126_v48 = vpop.permute.xlu1 %4125 }
 0x439   : > { %4197 = vst.msk [vmem:[#allocation5 + $0xc8] sm:$0xff] %vm4171_vm8, %v4126_v48 }
 0x43a   : > { %v4128_v17 = vpop.permute.xlu0 %4127  ;;  %4290 = vrot.lane.b32.xlu1 %v9450_v55, %s7442_s11 }
 0x43b   : > { %4198 = vst.msk [vmem:[#allocation5 + $0xd0] sm:$0xff] %vm4171_vm8, %v4128_v17 }
 0x43c   : > { %4477 = vrot.lane.b32.xlu0 %v4405_v15, %s7444_s23  ;;  %v4130_v49 = vpop.permute.xlu1 %4129 }
 0x43d   : > { %4199 = vst.msk [vmem:[#allocation5 + $0xd8] sm:$0xff] %vm4171_vm8, %v4130_v49 }
 0x43e   : > { %v4132_v61 = vpop.permute.xlu0 %4131  ;;  %4479 = vrot.lane.b32.xlu1 %v4406_v38, %s7444_s23 }
 0x43f   : > { %4200 = vst.msk [vmem:[#allocation5 + $0xe0] sm:$0xff] %vm4171_vm8, %v4132_v61 }
 0x440   : > { %4481 = vrot.lane.b32.xlu0 %v4407_v19, %s7444_s23  ;;  %v4134_v45 = vpop.permute.xlu1 %4133 }
 0x441   : > { %4201 = vst.msk [vmem:[#allocation5 + $0xe8] sm:$0xff] %vm4171_vm8, %v4134_v45 }
 0x442   : > { %v4136_v6 = vpop.permute.xlu0 %4135  ;;  %4483 = vrot.lane.b32.xlu1 %v4408_v18, %s7444_s23 }
 0x443   : > { %4202 = vst.msk [vmem:[#allocation5 + $0xf0] sm:$0xff] %vm4171_vm8, %v4136_v6 }
 0x444   : > { %4670 = vrot.lane.b32.xlu0 %v9589_v56, %s7445_s8  ;;  %v4138_v59 = vpop.permute.xlu1 %4137 }
 0x445   : > { %4203 = vst.msk [vmem:[#allocation5 + $0xf8] sm:$0xff] %vm4171_vm8, %v4138_v59  ;;  %vm5447_vm8 = vcmask 588800  }
 0x446   : > { %v4269_v29 = vpop.permute.xlu0 %4268  ;;  %4672 = vrot.lane.b32.xlu1 %v9594_v7, %s7445_s8 }
 0x447   : > { %4365 = vst.msk [vmem:[#allocation5] sm:$0xff] %vm4364_vm11, %v4269_v29 }
 0x448   : > { %4674 = vrot.lane.b32.xlu0 %v9599_v47, %s7445_s8  ;;  %v4271_v24 = vpop.permute.xlu1 %4270 }
 0x449   : > { %4366 = vst.msk [vmem:[#allocation5 + $0x8] sm:$0xff] %vm4364_vm11, %v4271_v24 }
 0x44a   : > { %v4273_v2 = vpop.permute.xlu0 %4272  ;;  %4676 = vrot.lane.b32.xlu1 %v9604_v37, %s7445_s8 }
 0x44b   : > { %4367 = vst.msk [vmem:[#allocation5 + $0x10] sm:$0xff] %vm4364_vm11, %v4273_v2 }
 0x44c   : > { %4864 = vrot.lane.b32.xlu0 %v9436_v53, %s7446_s12  ;;  %v4275_v56 = vpop.permute.xlu1 %4274 }
 0x44d   : > { %4368 = vst.msk [vmem:[#allocation5 + $0x18] sm:$0xff] %vm4364_vm11, %v4275_v56 }
 0x44e   : > { %v4462_v7 = vpop.permute.xlu0 %4461  ;;  %4866 = vrot.lane.b32.xlu1 %v9450_v55, %s7446_s12 }
 0x44f   : > { %4558 = vst.msk [vmem:[#allocation5] sm:$0xff] %vm4557_vm2, %v4462_v7 }
 0x450   : > { %4868 = vrot.lane.b32.xlu0 %v9468_v35, %s7446_s12  ;;  %v4464_v3 = vpop.permute.xlu1 %4463 }
 0x451   : > { %4559 = vst.msk [vmem:[#allocation5 + $0x8] sm:$0xff] %vm4557_vm2, %v4464_v3  ;;  %v4415_v3 = vld [vmem:[#allocation3 + $0xf1] sm:$0xff] }
 0x452   : > { %v4466_v62 = vpop.permute.xlu0 %4465  ;;  %4870 = vrot.lane.b32.xlu1 %v9479_v34, %s7446_s12 }
 0x453   : > { %4560 = vst.msk [vmem:[#allocation5 + $0x10] sm:$0xff] %vm4557_vm2, %v4466_v62 }
 0x454   : > { %5057 = vrot.lane.b32.xlu0 %v4407_v19, %s7447_s27  ;;  %v4468_v53 = vpop.permute.xlu1 %4467  ;;  %v4991_v19 = vld [vmem:[#allocation3 + $0xd9] sm:$0xff] }
 0x455   : > { %4561 = vst.msk [vmem:[#allocation5 + $0x18] sm:$0xff] %vm4557_vm2, %v4468_v53  ;;  %v4416_v53 = vld [vmem:[#allocation3 + $0xf9] sm:$0xff] }
 0x456   : > { %v4655_v55 = vpop.permute.xlu0 %4654  ;;  %5059 = vrot.lane.b32.xlu1 %v4408_v18, %s7447_s27  ;;  %v4992_v18 = vld [vmem:[#allocation3 + $0xe1] sm:$0xff] }
 0x457   : > { %4751 = vst.msk [vmem:[#allocation5] sm:$0xff] %vm4750_vm10, %v4655_v55 }
 0x458   : > { %5061 = vrot.lane.b32.xlu0 %v4987_v46, %s7447_s27  ;;  %v4657_v43 = vpop.permute.xlu1 %4656 }
 0x459   : > { %4752 = vst.msk [vmem:[#allocation5 + $0x8] sm:$0xff] %vm4750_vm10, %v4657_v43 }
 0x45a   : > { %v4659_v14 = vpop.permute.xlu0 %4658  ;;  %5063 = vrot.lane.b32.xlu1 %v4988_v9, %s7447_s27 }
 0x45b   : > { %4753 = vst.msk [vmem:[#allocation5 + $0x10] sm:$0xff] %vm4750_vm10, %v4659_v14 }
 0x45c   : > { %5250 = vrot.lane.b32.xlu0 %v9599_v47, %s7448_s6  ;;  %v4661_v50 = vpop.permute.xlu1 %4660 }
 0x45d   : > { %4754 = vst.msk [vmem:[#allocation5 + $0x18] sm:$0xff] %vm4750_vm10, %v4661_v50 }
 0x45e   : > { %v4849_v21 = vpop.permute.xlu0 %4848  ;;  %5252 = vrot.lane.b32.xlu1 %v9604_v37, %s7448_s6 }
 0x45f   : > { %4945 = vst.msk [vmem:[#allocation5] sm:$0xff] %vm4944_vm12, %v4849_v21 }
 0x460   : > { %5254 = vrot.lane.b32.xlu0 %v9609_v31, %s7448_s6  ;;  %v4851_v23 = vpop.permute.xlu1 %4850 }
 0x461   : > { %4946 = vst.msk [vmem:[#allocation5 + $0x8] sm:$0xff] %vm4944_vm12, %v4851_v23 }
 0x462   : > { %v4853_v22 = vpop.permute.xlu0 %4852  ;;  %5256 = vrot.lane.b32.xlu1 %v9614_v20, %s7448_s6 }
 0x463   : > { %4947 = vst.msk [vmem:[#allocation5 + $0x10] sm:$0xff] %vm4944_vm12, %v4853_v22 }
 0x464   : > { %4292 = vrot.lane.b32.xlu0 %v9468_v35, %s7442_s11  ;;  %v4855_v47 = vpop.permute.xlu1 %4854 }
 0x465   : > { %4948 = vst.msk [vmem:[#allocation5 + $0x18] sm:$0xff] %vm4944_vm12, %v4855_v47 }
 0x466   : > { %v5042_v37 = vpop.permute.xlu0 %5041  ;;  %4294 = vrot.lane.b32.xlu1 %v9479_v34, %s7442_s11 }
 0x467   : > { %5138 = vst.msk [vmem:[#allocation5] sm:$0xff] %vm5137_vm6, %v5042_v37 }
 0x468   : > { %4296 = vrot.lane.b32.xlu0 %v9466_v10, %s7442_s11  ;;  %v5044_v4 = vpop.permute.xlu1 %5043 }
 0x469   : > { %5139 = vst.msk [vmem:[#allocation5 + $0x8] sm:$0xff] %vm5137_vm6, %v5044_v4 }
 0x46a   : > { %v5046_v27 = vpop.permute.xlu0 %5045  ;;  %4298 = vrot.lane.b32.xlu1 %v9476_v63, %s7442_s11 }
 0x46b   : > { %5140 = vst.msk [vmem:[#allocation5 + $0x10] sm:$0xff] %vm5137_vm6, %v5046_v27  ;;  %v4996_v27 = vld [vmem:[#allocation3 + $0x111] sm:$0xff] }
 0x46c   : > { %4485 = vrot.lane.b32.xlu0 %v4987_v46, %s7444_s23  ;;  %v5048_v35 = vpop.permute.xlu1 %5047 }
 0x46d   : > { %5141 = vst.msk [vmem:[#allocation5 + $0x18] sm:$0xff] %vm5137_vm6, %v5048_v35  ;;  %v5186_v35 = vld [vmem:[#allocation3 + $0xf2] sm:$0xff] }
 0x46e   : > { %v5235_v34 = vpop.permute.xlu0 %5234  ;;  %4487 = vrot.lane.b32.xlu1 %v4988_v9, %s7444_s23 }
 0x46f   : > { %5331 = vst.msk [vmem:[#allocation5] sm:$0xff] %vm5330_vm7, %v5235_v34 }
 0x470   : > { %4489 = vrot.lane.b32.xlu0 %v4411_v26, %s7444_s23  ;;  %v5237_v5 = vpop.permute.xlu1 %5236 }
 0x471   : > { %5332 = vst.msk [vmem:[#allocation5 + $0x8] sm:$0xff] %vm5330_vm7, %v5237_v5 }
 0x472   : > { %v5239_v44 = vpop.permute.xlu0 %5238  ;;  %4491 = vrot.lane.b32.xlu1 %v4412_v51, %s7444_s23 }
 0x473   : > { %5333 = vst.msk [vmem:[#allocation5 + $0x10] sm:$0xff] %vm5330_vm7, %v5239_v44 }
 0x474   : > { %4678 = vrot.lane.b32.xlu0 %v9609_v31, %s7445_s8  ;;  %v5241_v13 = vpop.permute.xlu1 %5240 }
 0x475   : > { %5334 = vst.msk [vmem:[#allocation5 + $0x18] sm:$0xff] %vm5330_vm7, %v5241_v13  ;;  %v5189_v13 = vld [vmem:[#allocation3 + $0x112] sm:$0xff] }
 0x476   : > { %v4277_v30 = vpop.permute.xlu0 %4276  ;;  %4680 = vrot.lane.b32.xlu1 %v9614_v20, %s7445_s8  ;;  %v5363_v39 = vld [vmem:[#allocation5] sm:$0xff] }
 0x477   : > { %4369 = vst.msk [vmem:[#allocation5 + $0x20] sm:$0xff] %vm4364_vm11, %v4277_v30 }
 0x478   : > { %4682 = vrot.lane.b32.xlu0 %v9619_v12, %s7445_s8  ;;  %v4279_v25 = vpop.permute.xlu1 %4278  ;;  %v5364_v16 = vld [vmem:[#allocation5 + $0x8] sm:$0xff] }
 0x479   : > { %4370 = vst.msk [vmem:[#allocation5 + $0x28] sm:$0xff] %vm4364_vm11, %v4279_v25  ;;  %v5395_v42 = vpack.c.bf16 %v5364_v16, %v5363_v39  ;;  %v4224_v25 = vld [vmem:[#allocation3 + $0x108] sm:$0xff]  ;;  %v4225_v16 = vld [vmem:[#allocation3 + $0x110] sm:$0xff] }
 0x47a   : > { %v4281_v31 = vpop.permute.xlu0 %4280  ;;  %4684 = vrot.lane.b32.xlu1 %v9624_v1, %s7445_s8  ;;  %v5365_v48 = vld [vmem:[#allocation5 + $0x10] sm:$0xff] }
 0x47b   : > { %4371 = vst.msk [vmem:[#allocation5 + $0x30] sm:$0xff] %vm4364_vm11, %v4281_v31  ;;  %7273 = vmatprep.mubr.msk.bf16.mxu0 %vm5447_vm8, %v5395_v42  ;;  %v4226_v31 = vld [vmem:[#allocation3 + $0x120] sm:$0xff] }
 0x47c   : > { %4872 = vrot.lane.b32.xlu0 %v9466_v10, %s7446_s12  ;;  %v4283_v20 = vpop.permute.xlu1 %4282  ;;  %v5366_v17 = vld [vmem:[#allocation5 + $0x18] sm:$0xff] }
 0x47d   : > { %4372 = vst.msk [vmem:[#allocation5 + $0x38] sm:$0xff] %vm4364_vm11, %v4283_v20  ;;  %v5396_v15 = vpack.c.bf16 %v5366_v17, %v5365_v48  ;;  %v4227_v48 = vld [vmem:[#allocation3 + $0x128] sm:$0xff] }
 0x47e   : > { %v4470_v49 = vpop.permute.xlu0 %4469  ;;  %4874 = vrot.lane.b32.xlu1 %v9476_v63, %s7446_s12 }
 0x47f   : > { %4562 = vst.msk [vmem:[#allocation5 + $0x20] sm:$0xff] %vm4557_vm2, %v4470_v49  ;;  %7274 = vmatmul.mubr.msk.bf16.vlgmr.msra.gmra.mrb[0].mxu0 %vm5447_vm8, %v5396_v15 }
 0x480   : > { %4876 = vrot.lane.b32.xlu0 %v9492_v52, %s7446_s12  ;;  %v4472_v38 = vpop.permute.xlu1 %4471 }
 0x481   : > { %4563 = vst.msk [vmem:[#allocation5 + $0x28] sm:$0xff] %vm4557_vm2, %v4472_v38  ;;  %v4419_v38 = vld [vmem:[#allocation3 + $0x121] sm:$0xff] }
 0x482   : > { %v4474_v10 = vpop.permute.xlu0 %4473  ;;  %4878 = vrot.lane.b32.xlu1 %v9500_v33, %s7446_s12 }
 0x483   : > { %4564 = vst.msk [vmem:[#allocation5 + $0x30] sm:$0xff] %vm4557_vm2, %v4474_v10 }
 0x484   : > { %5065 = vrot.lane.b32.xlu0 %v4411_v26, %s7447_s27  ;;  %v4476_v61 = vpop.permute.xlu1 %4475  ;;  %v5187_v26 = vld [vmem:[#allocation3 + $0xfa] sm:$0xff] }
 0x485   : > { %4565 = vst.msk [vmem:[#allocation5 + $0x38] sm:$0xff] %vm4557_vm2, %v4476_v61  ;;  %v4420_v61 = vld [vmem:[#allocation3 + $0x129] sm:$0xff] }
 0x486   : > { %v4663_v63 = vpop.permute.xlu0 %4662  ;;  %5067 = vrot.lane.b32.xlu1 %v4412_v51, %s7447_s27  ;;  %v5188_v51 = vld [vmem:[#allocation3 + $0x10a] sm:$0xff] }
 0x487   : > { %4755 = vst.msk [vmem:[#allocation5 + $0x20] sm:$0xff] %vm4750_vm10, %v4663_v63 }
 0x488   : > { %5069 = vrot.lane.b32.xlu0 %v4991_v19, %s7447_s27  ;;  %v4665_v45 = vpop.permute.xlu1 %4664 }
 0x489   : > { %4756 = vst.msk [vmem:[#allocation5 + $0x28] sm:$0xff] %vm4750_vm10, %v4665_v45 }
 0x48a   : > { %v4667_v6 = vpop.permute.xlu0 %4666  ;;  %5071 = vrot.lane.b32.xlu1 %v4992_v18, %s7447_s27 }
 0x48b   : > { %4757 = vst.msk [vmem:[#allocation5 + $0x30] sm:$0xff] %vm4750_vm10, %v4667_v6 }
 0x48c   : > { %5258 = vrot.lane.b32.xlu0 %v9619_v12, %s7448_s6  ;;  %v4669_v59 = vpop.permute.xlu1 %4668 }
 0x48d   : > { %4758 = vst.msk [vmem:[#allocation5 + $0x38] sm:$0xff] %vm4750_vm10, %v4669_v59 }
 0x48e   : > { %v4857_v29 = vpop.permute.xlu0 %4856  ;;  %5260 = vrot.lane.b32.xlu1 %v9624_v1, %s7448_s6 }
 0x48f   : > { %4949 = vst.msk [vmem:[#allocation5 + $0x20] sm:$0xff] %vm4944_vm12, %v4857_v29 }
 0x490   : > { %5262 = vrot.lane.b32.xlu0 %v9629_v60, %s7448_s6  ;;  %v4859_v24 = vpop.permute.xlu1 %4858 }
 0x491   : > { %4950 = vst.msk [vmem:[#allocation5 + $0x28] sm:$0xff] %vm4944_vm12, %v4859_v24  ;;  %v4613_v24 = vld [vmem:[#allocation3 + $0x12a] sm:$0xff] }
 0x492   : > { %v4861_v2 = vpop.permute.xlu0 %4860  ;;  %5264 = vrot.lane.b32.xlu1 %v9634_v0, %s7448_s6 }
 0x493   : > { %4951 = vst.msk [vmem:[#allocation5 + $0x30] sm:$0xff] %vm4944_vm12, %v4861_v2 }
 0x494   : > { %4300 = vrot.lane.b32.xlu0 %v9492_v52, %s7442_s11  ;;  %v4863_v12 = vpop.permute.xlu1 %4862 }
 0x495   : > { %4952 = vst.msk [vmem:[#allocation5 + $0x38] sm:$0xff] %vm4944_vm12, %v4863_v12 }
 0x496   : > { %v5050_v1 = vpop.permute.xlu0 %5049  ;;  %4302 = vrot.lane.b32.xlu1 %v9500_v33, %s7442_s11 }
 0x497   : > { %5142 = vst.msk [vmem:[#allocation5 + $0x20] sm:$0xff] %vm5137_vm6, %v5050_v1 }
 0x498   : > { %4304 = vrot.lane.b32.xlu0 %v9490_v54, %s7442_s11  ;;  %v5052_v56 = vpop.permute.xlu1 %5051 }
 0x499   : > { %5143 = vst.msk [vmem:[#allocation5 + $0x28] sm:$0xff] %vm5137_vm6, %v5052_v56 }
 0x49a   : > { %v5054_v7 = vpop.permute.xlu0 %5053  ;;  %4306 = vrot.lane.b32.xlu1 %v9502_v41, %s7442_s11 }
 0x49b   : > { %5144 = vst.msk [vmem:[#allocation5 + $0x30] sm:$0xff] %vm5137_vm6, %v5054_v7 }
 0x49c   : > { %4493 = vrot.lane.b32.xlu0 %v4991_v19, %s7444_s23  ;;  %v5056_v52 = vpop.permute.xlu1 %5055 }
 0x49d   : > { %5145 = vst.msk [vmem:[#allocation5 + $0x38] sm:$0xff] %vm5137_vm6, %v5056_v52 }
 0x49e   : > { %v5243_v33 = vpop.permute.xlu0 %5242  ;;  %4495 = vrot.lane.b32.xlu1 %v4992_v18, %s7444_s23  ;;  %v4612_v18 = vld [vmem:[#allocation3 + $0x122] sm:$0xff] }
 0x49f   : > { %5335 = vst.msk [vmem:[#allocation5 + $0x20] sm:$0xff] %vm5330_vm7, %v5243_v33 }
 0x4a0   : > { %4497 = vrot.lane.b32.xlu0 %v4415_v3, %s7444_s23  ;;  %v5245_v62 = vpop.permute.xlu1 %5244 }
 0x4a1   : > { %5336 = vst.msk [vmem:[#allocation5 + $0x28] sm:$0xff] %vm5330_vm7, %v5245_v62 }
 0x4a2   : > { %v5247_v55 = vpop.permute.xlu0 %5246  ;;  %4499 = vrot.lane.b32.xlu1 %v4416_v53, %s7444_s23 }
 0x4a3   : > { %5337 = vst.msk [vmem:[#allocation5 + $0x30] sm:$0xff] %vm5330_vm7, %v5247_v55 }
 0x4a4   : > { %4686 = vrot.lane.b32.xlu0 %v9629_v60, %s7445_s8  ;;  %v5249_v46 = vpop.permute.xlu1 %5248 }
 0x4a5   : > { %5338 = vst.msk [vmem:[#allocation5 + $0x38] sm:$0xff] %vm5330_vm7, %v5249_v46 }
 0x4a6   : > { %v4285_v43 = vpop.permute.xlu0 %4284  ;;  %4688 = vrot.lane.b32.xlu1 %v9634_v0, %s7445_s8  ;;  %v5367_v14 = vld [vmem:[#allocation5 + $0x20] sm:$0xff] }
 0x4a7   : > { %4373 = vst.msk [vmem:[#allocation5 + $0x40] sm:$0xff] %vm4364_vm11, %v4285_v43 }
 0x4a8   : > { %4690 = vrot.lane.b32.xlu0 %v9639_v57, %s7445_s8  ;;  %v4287_v9 = vpop.permute.xlu1 %4286  ;;  %v5368_v50 = vld [vmem:[#allocation5 + $0x28] sm:$0xff] }
 0x4a9   : > { %4374 = vst.msk [vmem:[#allocation5 + $0x48] sm:$0xff] %vm4364_vm11, %v4287_v9  ;;  %v5397_v21 = vpack.c.bf16 %v5368_v50, %v5367_v14  ;;  %v4999_v9 = vld [vmem:[#allocation3 + $0x139] sm:$0xff]  ;;  %v5000_v50 = vld [vmem:[#allocation3 + $0x141] sm:$0xff] }
 0x4aa   : > { %v4289_v23 = vpop.permute.xlu0 %4288  ;;  %4692 = vrot.lane.b32.xlu1 %v9644_v58, %s7445_s8  ;;  %v5369_v0 = vld [vmem:[#allocation5 + $0x30] sm:$0xff] }
 0x4ab   : > { %4375 = vst.msk [vmem:[#allocation5 + $0x50] sm:$0xff] %vm4364_vm11, %v4289_v23  ;;  %7277 = vmatprep.mubr.msk.bf16.mxu0 %vm5447_vm8, %v5397_v21 }
 0x4ac   : > { %4880 = vrot.lane.b32.xlu0 %v9490_v54, %s7446_s12  ;;  %v4291_v60 = vpop.permute.xlu1 %4290  ;;  %v5370_v57 = vld [vmem:[#allocation5 + $0x38] sm:$0xff] }
 0x4ad   : > { %4376 = vst.msk [vmem:[#allocation5 + $0x58] sm:$0xff] %vm4364_vm11, %v4291_v60  ;;  %v5398_v22 = vpack.c.bf16 %v5370_v57, %v5369_v0  ;;  %v5192_v0 = vld [vmem:[#allocation3 + $0x13a] sm:$0xff] }
 0x4ae   : > { %v4478_v47 = vpop.permute.xlu0 %4477  ;;  %4882 = vrot.lane.b32.xlu1 %v9502_v41, %s7446_s12 }
 0x4af   : > { %4566 = vst.msk [vmem:[#allocation5 + $0x40] sm:$0xff] %vm4557_vm2, %v4478_v47  ;;  %7278 = vmatmul.mubr.msk.bf16.gmra.mrb[4].mxu0 %vm5447_vm8, %v5398_v22  ;;  %v5193_v22 = vld [vmem:[#allocation3 + $0x142] sm:$0xff] }
 0x4b0   : > { %4884 = vrot.lane.b32.xlu0 %v9514_v28, %s7446_s12  ;;  %v4480_v58 = vpop.permute.xlu1 %4479  ;;  %v4995_v28 = vld [vmem:[#allocation3 + $0x109] sm:$0xff] }
 0x4b1   : > { %4567 = vst.msk [vmem:[#allocation5 + $0x48] sm:$0xff] %vm4557_vm2, %v4480_v58 }
 0x4b2   : > { %v4482_v54 = vpop.permute.xlu0 %4481  ;;  %4886 = vrot.lane.b32.xlu1 %v9521_v32, %s7446_s12 }
 0x4b3   : > { %4568 = vst.msk [vmem:[#allocation5 + $0x50] sm:$0xff] %vm4557_vm2, %v4482_v54 }
 0x4b4   : > { %5073 = vrot.lane.b32.xlu0 %v4415_v3, %s7447_s27  ;;  %v4484_v37 = vpop.permute.xlu1 %4483  ;;  %v4806_v3 = vld [vmem:[#allocation3 + $0x138] sm:$0xff] }
 0x4b5   : > { %4569 = vst.msk [vmem:[#allocation5 + $0x58] sm:$0xff] %vm4557_vm2, %v4484_v37  ;;  %v4230_v37 = vld [vmem:[#allocation3 + $0x150] sm:$0xff] }
 0x4b6   : > { %v4671_v41 = vpop.permute.xlu0 %4670  ;;  %5075 = vrot.lane.b32.xlu1 %v4416_v53, %s7447_s27  ;;  %v4807_v53 = vld [vmem:[#allocation3 + $0x140] sm:$0xff] }
 0x4b7   : > { %4759 = vst.msk [vmem:[#allocation5 + $0x40] sm:$0xff] %vm4750_vm10, %v4671_v41 }
 0x4b8   : > { %5077 = vrot.lane.b32.xlu0 %v4995_v28, %s7447_s27  ;;  %v4673_v4 = vpop.permute.xlu1 %4672 }
 0x4b9   : > { %4760 = vst.msk [vmem:[#allocation5 + $0x48] sm:$0xff] %vm4750_vm10, %v4673_v4 }
 0x4ba   : > { %v4675_v32 = vpop.permute.xlu0 %4674  ;;  %5079 = vrot.lane.b32.xlu1 %v4996_v27, %s7447_s27 }
 0x4bb   : > { %4761 = vst.msk [vmem:[#allocation5 + $0x50] sm:$0xff] %vm4750_vm10, %v4675_v32 }
 0x4bc   : > { %5266 = vrot.lane.b32.xlu0 %v5186_v35, %s7448_s6  ;;  %v4677_v34 = vpop.permute.xlu1 %4676  ;;  %v4423_v35 = vld [vmem:[#allocation3 + $0x151] sm:$0xff] }
 0x4bd   : > { %4762 = vst.msk [vmem:[#allocation5 + $0x58] sm:$0xff] %vm4750_vm10, %v4677_v34 }
 0x4be   : > { %v4865_v5 = vpop.permute.xlu0 %4864  ;;  %5268 = vrot.lane.b32.xlu1 %v5187_v26, %s7448_s6  ;;  %v4424_v26 = vld [vmem:[#allocation3 + $0x159] sm:$0xff] }
 0x4bf   : > { %4953 = vst.msk [vmem:[#allocation5 + $0x40] sm:$0xff] %vm4944_vm12, %v4865_v5 }
 0x4c0   : > { %5270 = vrot.lane.b32.xlu0 %v5188_v51, %s7448_s6  ;;  %v4867_v44 = vpop.permute.xlu1 %4866 }
 0x4c1   : > { %4954 = vst.msk [vmem:[#allocation5 + $0x48] sm:$0xff] %vm4944_vm12, %v4867_v44 }
 0x4c2   : > { %v4869_v30 = vpop.permute.xlu0 %4868  ;;  %5272 = vrot.lane.b32.xlu1 %v5189_v13, %s7448_s6 }
 0x4c3   : > { %4955 = vst.msk [vmem:[#allocation5 + $0x50] sm:$0xff] %vm4944_vm12, %v4869_v30 }
 0x4c4   : > { %4308 = vrot.lane.b32.xlu0 %v4224_v25, %s7442_s11  ;;  %v4871_v39 = vpop.permute.xlu1 %4870 }
 0x4c5   : > { %4956 = vst.msk [vmem:[#allocation5 + $0x58] sm:$0xff] %vm4944_vm12, %v4871_v39 }
 0x4c6   : > { %v5058_v42 = vpop.permute.xlu0 %5057  ;;  %4310 = vrot.lane.b32.xlu1 %v4225_v16, %s7442_s11  ;;  %v4617_v16 = vld [vmem:[#allocation3 + $0x15a] sm:$0xff] }
 0x4c7   : > { %5146 = vst.msk [vmem:[#allocation5 + $0x40] sm:$0xff] %vm5137_vm6, %v5058_v42 }
 0x4c8   : > { %4312 = vrot.lane.b32.xlu0 %v4226_v31, %s7442_s11  ;;  %v5060_v20 = vpop.permute.xlu1 %5059 }
 0x4c9   : > { %5147 = vst.msk [vmem:[#allocation5 + $0x48] sm:$0xff] %vm5137_vm6, %v5060_v20 }
 0x4ca   : > { %v5062_v17 = vpop.permute.xlu0 %5061  ;;  %4314 = vrot.lane.b32.xlu1 %v4227_v48, %s7442_s11 }
 0x4cb   : > { %5148 = vst.msk [vmem:[#allocation5 + $0x50] sm:$0xff] %vm5137_vm6, %v5062_v17 }
 0x4cc   : > { %4501 = vrot.lane.b32.xlu0 %v4995_v28, %s7444_s23  ;;  %v5064_v15 = vpop.permute.xlu1 %5063  ;;  %v4231_v28 = vld [vmem:[#allocation3 + $0x158] sm:$0xff] }
 0x4cd   : > { %5149 = vst.msk [vmem:[#allocation5 + $0x58] sm:$0xff] %vm5137_vm6, %v5064_v15 }
 0x4ce   : > { %v5251_v49 = vpop.permute.xlu0 %5250  ;;  %4503 = vrot.lane.b32.xlu1 %v4996_v27, %s7444_s23 }
 0x4cf   : > { %5339 = vst.msk [vmem:[#allocation5 + $0x40] sm:$0xff] %vm5330_vm7, %v5251_v49 }
 0x4d0   : > { %4505 = vrot.lane.b32.xlu0 %v4419_v38, %s7444_s23  ;;  %v5253_v10 = vpop.permute.xlu1 %5252 }
 0x4d1   : > { %5340 = vst.msk [vmem:[#allocation5 + $0x48] sm:$0xff] %vm5330_vm7, %v5253_v10 }
 0x4d2   : > { %v5255_v63 = vpop.permute.xlu0 %5254  ;;  %4507 = vrot.lane.b32.xlu1 %v4420_v61, %s7444_s23 }
 0x4d3   : > { %5341 = vst.msk [vmem:[#allocation5 + $0x50] sm:$0xff] %vm5330_vm7, %v5255_v63 }
 0x4d4   : > { %4694 = vrot.lane.b32.xlu0 %v5188_v51, %s7445_s8  ;;  %v5257_v19 = vpop.permute.xlu1 %5256 }
 0x4d5   : > { %5342 = vst.msk [vmem:[#allocation5 + $0x58] sm:$0xff] %vm5330_vm7, %v5257_v19 }
 0x4d6   : > { %v4293_v45 = vpop.permute.xlu0 %4292  ;;  %4696 = vrot.lane.b32.xlu1 %v5189_v13, %s7445_s8  ;;  %v5371_v59 = vld [vmem:[#allocation5 + $0x40] sm:$0xff] }
 0x4d7   : > { %4377 = vst.msk [vmem:[#allocation5 + $0x60] sm:$0xff] %vm4364_vm11, %v4293_v45  ;;  %v4616_v13 = vld [vmem:[#allocation3 + $0x152] sm:$0xff] }
 0x4d8   : > { %4698 = vrot.lane.b32.xlu0 %v4612_v18, %s7445_s8  ;;  %v4295_v6 = vpop.permute.xlu1 %4294  ;;  %v5372_v29 = vld [vmem:[#allocation5 + $0x48] sm:$0xff] }
 0x4d9   : > { %4378 = vst.msk [vmem:[#allocation5 + $0x68] sm:$0xff] %vm4364_vm11, %v4295_v6  ;;  %v5399_v2 = vpack.c.bf16 %v5372_v29, %v5371_v59  ;;  %v5004_v59 = vld [vmem:[#allocation3 + $0x171] sm:$0xff] }
 0x4da   : > { %v4297_v12 = vpop.permute.xlu0 %4296  ;;  %4700 = vrot.lane.b32.xlu1 %v4613_v24, %s7445_s8  ;;  %v5373_v56 = vld [vmem:[#allocation5 + $0x50] sm:$0xff] }
 0x4db   : > { %4379 = vst.msk [vmem:[#allocation5 + $0x70] sm:$0xff] %vm4364_vm11, %v4297_v12  ;;  %7281 = vmatprep.mubr.msk.bf16.mxu0 %vm5447_vm8, %v5399_v2  ;;  %v5196_v12 = vld [vmem:[#allocation3 + $0x16a] sm:$0xff] }
 0x4dc   : > { %4888 = vrot.lane.b32.xlu0 %v4226_v31, %s7446_s12  ;;  %v4299_v1 = vpop.permute.xlu1 %4298  ;;  %v5374_v7 = vld [vmem:[#allocation5 + $0x58] sm:$0xff] }
 0x4dd   : > { %4380 = vst.msk [vmem:[#allocation5 + $0x78] sm:$0xff] %vm4364_vm11, %v4299_v1  ;;  %v5400_v52 = vpack.c.bf16 %v5374_v7, %v5373_v56  ;;  %v5197_v56 = vld [vmem:[#allocation3 + $0x172] sm:$0xff] }
 0x4de   : > { %v4486_v33 = vpop.permute.xlu0 %4485  ;;  %4890 = vrot.lane.b32.xlu1 %v4227_v48, %s7446_s12 }
 0x4df   : > { %4570 = vst.msk [vmem:[#allocation5 + $0x60] sm:$0xff] %vm4557_vm2, %v4486_v33  ;;  %7282 = vmatmul.mubr.msk.bf16.gmra.mrb[8].mxu0 %vm5447_vm8, %v5400_v52 }
 0x4e0   : > { %4892 = vrot.lane.b32.xlu0 %v4806_v3, %s7446_s12  ;;  %v4488_v62 = vpop.permute.xlu1 %4487 }
 0x4e1   : > { %4571 = vst.msk [vmem:[#allocation5 + $0x68] sm:$0xff] %vm4557_vm2, %v4488_v62 }
 0x4e2   : > { %v4490_v55 = vpop.permute.xlu0 %4489  ;;  %4894 = vrot.lane.b32.xlu1 %v4807_v53, %s7446_s12 }
 0x4e3   : > { %4572 = vst.msk [vmem:[#allocation5 + $0x70] sm:$0xff] %vm4557_vm2, %v4490_v55 }
 0x4e4   : > { %5081 = vrot.lane.b32.xlu0 %v4419_v38, %s7447_s27  ;;  %v4492_v46 = vpop.permute.xlu1 %4491  ;;  %v4810_v38 = vld [vmem:[#allocation3 + $0x168] sm:$0xff] }
 0x4e5   : > { %4573 = vst.msk [vmem:[#allocation5 + $0x78] sm:$0xff] %vm4557_vm2, %v4492_v46 }
 0x4e6   : > { %v4679_v43 = vpop.permute.xlu0 %4678  ;;  %5083 = vrot.lane.b32.xlu1 %v4420_v61, %s7447_s27  ;;  %v4811_v61 = vld [vmem:[#allocation3 + $0x170] sm:$0xff] }
 0x4e7   : > { %4763 = vst.msk [vmem:[#allocation5 + $0x60] sm:$0xff] %vm4750_vm10, %v4679_v43 }
 0x4e8   : > { %5085 = vrot.lane.b32.xlu0 %v4999_v9, %s7447_s27  ;;  %v4681_v14 = vpop.permute.xlu1 %4680 }
 0x4e9   : > { %4764 = vst.msk [vmem:[#allocation5 + $0x68] sm:$0xff] %vm4750_vm10, %v4681_v14 }
 0x4ea   : > { %v4683_v21 = vpop.permute.xlu0 %4682  ;;  %5087 = vrot.lane.b32.xlu1 %v5000_v50, %s7447_s27 }
 0x4eb   : > { %4765 = vst.msk [vmem:[#allocation5 + $0x70] sm:$0xff] %vm4750_vm10, %v4683_v21 }
 0x4ec   : > { %5274 = vrot.lane.b32.xlu0 %v4612_v18, %s7448_s6  ;;  %v4685_v23 = vpop.permute.xlu1 %4684  ;;  %v5003_v18 = vld [vmem:[#allocation3 + $0x169] sm:$0xff] }
 0x4ed   : > { %4766 = vst.msk [vmem:[#allocation5 + $0x78] sm:$0xff] %vm4750_vm10, %v4685_v23 }
 0x4ee   : > { %v4873_v60 = vpop.permute.xlu0 %4872  ;;  %5276 = vrot.lane.b32.xlu1 %v4613_v24, %s7448_s6 }
 0x4ef   : > { %4957 = vst.msk [vmem:[#allocation5 + $0x60] sm:$0xff] %vm4944_vm12, %v4873_v60 }
 0x4f0   : > { %5278 = vrot.lane.b32.xlu0 %v5192_v0, %s7448_s6  ;;  %v4875_v57 = vpop.permute.xlu1 %4874 }
 0x4f1   : > { %4958 = vst.msk [vmem:[#allocation5 + $0x68] sm:$0xff] %vm4944_vm12, %v4875_v57 }
 0x4f2   : > { %v4877_v47 = vpop.permute.xlu0 %4876  ;;  %5280 = vrot.lane.b32.xlu1 %v5193_v22, %s7448_s6 }
 0x4f3   : > { %4959 = vst.msk [vmem:[#allocation5 + $0x70] sm:$0xff] %vm4944_vm12, %v4877_v47 }
 0x4f4   : > { %4316 = vrot.lane.b32.xlu0 %v4806_v3, %s7442_s11  ;;  %v4879_v58 = vpop.permute.xlu1 %4878  ;;  %v4234_v3 = vld [vmem:[#allocation3 + $0x180] sm:$0xff] }
 0x4f5   : > { %4960 = vst.msk [vmem:[#allocation5 + $0x78] sm:$0xff] %vm4944_vm12, %v4879_v58  ;;  %v4621_v58 = vld [vmem:[#allocation3 + $0x18a] sm:$0xff] }
 0x4f6   : > { %v5066_v54 = vpop.permute.xlu0 %5065  ;;  %4318 = vrot.lane.b32.xlu1 %v4807_v53, %s7442_s11  ;;  %v4235_v53 = vld [vmem:[#allocation3 + $0x188] sm:$0xff] }
 0x4f7   : > { %5150 = vst.msk [vmem:[#allocation5 + $0x60] sm:$0xff] %vm5137_vm6, %v5066_v54 }
 0x4f8   : > { %4320 = vrot.lane.b32.xlu0 %v4230_v37, %s7442_s11  ;;  %v5068_v41 = vpop.permute.xlu1 %5067 }
 0x4f9   : > { %5151 = vst.msk [vmem:[#allocation5 + $0x68] sm:$0xff] %vm5137_vm6, %v5068_v41 }
 0x4fa   : > { %v5070_v4 = vpop.permute.xlu0 %5069  ;;  %4322 = vrot.lane.b32.xlu1 %v4231_v28, %s7442_s11 }
 0x4fb   : > { %5152 = vst.msk [vmem:[#allocation5 + $0x70] sm:$0xff] %vm5137_vm6, %v5070_v4 }
 0x4fc   : > { %4509 = vrot.lane.b32.xlu0 %v4999_v9, %s7444_s23  ;;  %v5072_v27 = vpop.permute.xlu1 %5071  ;;  %v4427_v9 = vld [vmem:[#allocation3 + $0x181] sm:$0xff] }
 0x4fd   : > { %5153 = vst.msk [vmem:[#allocation5 + $0x78] sm:$0xff] %vm5137_vm6, %v5072_v27 }
 0x4fe   : > { %v5259_v32 = vpop.permute.xlu0 %5258  ;;  %4511 = vrot.lane.b32.xlu1 %v5000_v50, %s7444_s23  ;;  %v4428_v50 = vld [vmem:[#allocation3 + $0x189] sm:$0xff] }
 0x4ff   : > { %5343 = vst.msk [vmem:[#allocation5 + $0x60] sm:$0xff] %vm5330_vm7, %v5259_v32  ;;  %v4814_v32 = vld [vmem:[#allocation3 + $0x198] sm:$0xff] }
 0x500   : > { %4513 = vrot.lane.b32.xlu0 %v4423_v35, %s7444_s23  ;;  %v5261_v34 = vpop.permute.xlu1 %5260 }
 0x501   : > { %5344 = vst.msk [vmem:[#allocation5 + $0x68] sm:$0xff] %vm5330_vm7, %v5261_v34  ;;  %v4815_v34 = vld [vmem:[#allocation3 + $0x1a0] sm:$0xff] }
 0x502   : > { %v5263_v5 = vpop.permute.xlu0 %5262  ;;  %4515 = vrot.lane.b32.xlu1 %v4424_v26, %s7444_s23 }
 0x503   : > { %5345 = vst.msk [vmem:[#allocation5 + $0x70] sm:$0xff] %vm5330_vm7, %v5263_v5 }
 0x504   : > { %4702 = vrot.lane.b32.xlu0 %v5192_v0, %s7445_s8  ;;  %v5265_v51 = vpop.permute.xlu1 %5264  ;;  %v4620_v0 = vld [vmem:[#allocation3 + $0x182] sm:$0xff] }
 0x505   : > { %5346 = vst.msk [vmem:[#allocation5 + $0x78] sm:$0xff] %vm5330_vm7, %v5265_v51 }
 0x506   : > { %v4301_v44 = vpop.permute.xlu0 %4300  ;;  %4704 = vrot.lane.b32.xlu1 %v5193_v22, %s7445_s8  ;;  %v5375_v25 = vld [vmem:[#allocation5 + $0x60] sm:$0xff] }
 0x507   : > { %4381 = vst.msk [vmem:[#allocation5 + $0x80] sm:$0xff] %vm4364_vm11, %v4301_v44  ;;  %v5007_v44 = vld [vmem:[#allocation3 + $0x199] sm:$0xff] }
 0x508   : > { %4706 = vrot.lane.b32.xlu0 %v4616_v13, %s7445_s8  ;;  %v4303_v30 = vpop.permute.xlu1 %4302  ;;  %v5376_v39 = vld [vmem:[#allocation5 + $0x68] sm:$0xff] }
 0x509   : > { %4382 = vst.msk [vmem:[#allocation5 + $0x88] sm:$0xff] %vm4364_vm11, %v4303_v30  ;;  %v5401_v42 = vpack.c.bf16 %v5376_v39, %v5375_v25  ;;  %v5008_v30 = vld [vmem:[#allocation3 + $0x1a1] sm:$0xff] }
 0x50a   : > { %v4305_v31 = vpop.permute.xlu0 %4304  ;;  %4708 = vrot.lane.b32.xlu1 %v4617_v16, %s7445_s8  ;;  %v5377_v48 = vld [vmem:[#allocation5 + $0x70] sm:$0xff] }
 0x50b   : > { %4383 = vst.msk [vmem:[#allocation5 + $0x90] sm:$0xff] %vm4364_vm11, %v4305_v31  ;;  %7285 = vmatprep.mubr.msk.bf16.mxu0 %vm5447_vm8, %v5401_v42  ;;  %v5200_v42 = vld [vmem:[#allocation3 + $0x19a] sm:$0xff] }
 0x50c   : > { %4896 = vrot.lane.b32.xlu0 %v4230_v37, %s7446_s12  ;;  %v4307_v20 = vpop.permute.xlu1 %4306  ;;  %v5378_v17 = vld [vmem:[#allocation5 + $0x78] sm:$0xff] }
 0x50d   : > { %4384 = vst.msk [vmem:[#allocation5 + $0x98] sm:$0xff] %vm4364_vm11, %v4307_v20  ;;  %v5402_v15 = vpack.c.bf16 %v5378_v17, %v5377_v48  ;;  %v5201_v20 = vld [vmem:[#allocation3 + $0x1a2] sm:$0xff] }
 0x50e   : > { %v4494_v49 = vpop.permute.xlu0 %4493  ;;  %4898 = vrot.lane.b32.xlu1 %v4231_v28, %s7446_s12 }
 0x50f   : > { %4574 = vst.msk [vmem:[#allocation5 + $0x80] sm:$0xff] %vm4557_vm2, %v4494_v49  ;;  %7286 = vmatmul.mubr.msk.bf16.gmra.mrb[12].mxu0 %vm5447_vm8, %v5402_v15 }
 0x510   : > { %4900 = vrot.lane.b32.xlu0 %v4810_v38, %s7446_s12  ;;  %v4496_v10 = vpop.permute.xlu1 %4495 }
 0x511   : > { %4575 = vst.msk [vmem:[#allocation5 + $0x88] sm:$0xff] %vm4557_vm2, %v4496_v10 }
 0x512   : > { %v4498_v63 = vpop.permute.xlu0 %4497  ;;  %4902 = vrot.lane.b32.xlu1 %v4811_v61, %s7446_s12 }
 0x513   : > { %4576 = vst.msk [vmem:[#allocation5 + $0x90] sm:$0xff] %vm4557_vm2, %v4498_v63 }
 0x514   : > { %5089 = vrot.lane.b32.xlu0 %v4423_v35, %s7447_s27  ;;  %v4500_v19 = vpop.permute.xlu1 %4499 }
 0x515   : > { %4577 = vst.msk [vmem:[#allocation5 + $0x98] sm:$0xff] %vm4557_vm2, %v4500_v19 }
 0x516   : > { %v4687_v45 = vpop.permute.xlu0 %4686  ;;  %5091 = vrot.lane.b32.xlu1 %v4424_v26, %s7447_s27 }
 0x517   : > { %4767 = vst.msk [vmem:[#allocation5 + $0x80] sm:$0xff] %vm4750_vm10, %v4687_v45 }
 0x518   : > { %5093 = vrot.lane.b32.xlu0 %v5003_v18, %s7447_s27  ;;  %v4689_v6 = vpop.permute.xlu1 %4688 }
 0x519   : > { %4768 = vst.msk [vmem:[#allocation5 + $0x88] sm:$0xff] %vm4750_vm10, %v4689_v6 }
 0x51a   : > { %v4691_v29 = vpop.permute.xlu0 %4690  ;;  %5095 = vrot.lane.b32.xlu1 %v5004_v59, %s7447_s27 }
 0x51b   : > { %4769 = vst.msk [vmem:[#allocation5 + $0x90] sm:$0xff] %vm4750_vm10, %v4691_v29 }
 0x51c   : > { %5282 = vrot.lane.b32.xlu0 %v4616_v13, %s7448_s6  ;;  %v4693_v24 = vpop.permute.xlu1 %4692 }
 0x51d   : > { %4770 = vst.msk [vmem:[#allocation5 + $0x98] sm:$0xff] %vm4750_vm10, %v4693_v24 }
 0x51e   : > { %v4881_v2 = vpop.permute.xlu0 %4880  ;;  %5284 = vrot.lane.b32.xlu1 %v4617_v16, %s7448_s6 }
 0x51f   : > { %4961 = vst.msk [vmem:[#allocation5 + $0x80] sm:$0xff] %vm4944_vm12, %v4881_v2 }
 0x520   : > { %5286 = vrot.lane.b32.xlu0 %v5196_v12, %s7448_s6  ;;  %v4883_v1 = vpop.permute.xlu1 %4882 }
 0x521   : > { %4962 = vst.msk [vmem:[#allocation5 + $0x88] sm:$0xff] %vm4944_vm12, %v4883_v1  ;;  %v6582_v1 = vrot.slane %v9341_v36, 2 }
 0x522   : > { %v4885_v7 = vpop.permute.xlu0 %4884  ;;  %5288 = vrot.lane.b32.xlu1 %v5197_v56, %s7448_s6 }
 0x523   : > { %4963 = vst.msk [vmem:[#allocation5 + $0x90] sm:$0xff] %vm4944_vm12, %v4885_v7  ;;  %v6584_v7 = vrot.slane %v9341_v36, 4 }
 0x524   : > { %4324 = vrot.lane.b32.xlu0 %v4810_v38, %s7442_s11  ;;  %v4887_v52 = vpop.permute.xlu1 %4886 }
 0x525   : > { %4964 = vst.msk [vmem:[#allocation5 + $0x98] sm:$0xff] %vm4944_vm12, %v4887_v52 }
 0x526   : > { %v5074_v33 = vpop.permute.xlu0 %5073  ;;  %4326 = vrot.lane.b32.xlu1 %v4811_v61, %s7442_s11 }
 0x527   : > { %5154 = vst.msk [vmem:[#allocation5 + $0x80] sm:$0xff] %vm5137_vm6, %v5074_v33 }
 0x528   : > { %4328 = vrot.lane.b32.xlu0 %v4234_v3, %s7442_s11  ;;  %v5076_v62 = vpop.permute.xlu1 %5075 }
 0x529   : > { %5155 = vst.msk [vmem:[#allocation5 + $0x88] sm:$0xff] %vm5137_vm6, %v5076_v62 }
 0x52a   : > { %v5078_v55 = vpop.permute.xlu0 %5077  ;;  %4330 = vrot.lane.b32.xlu1 %v4235_v53, %s7442_s11  ;;  %s188_s11 = sand.u32 1, %s7425_s16  }
 0x52b   : > { %5156 = vst.msk [vmem:[#allocation5 + $0x90] sm:$0xff] %vm5137_vm6, %v5078_v55  ;;  %s10575_s19 = scalar_lea.sflag [#allocation7], %s188_s11 }
 0x52c   : > { %4517 = vrot.lane.b32.xlu0 %v5003_v18, %s7444_s23  ;;  %v5080_v46 = vpop.permute.xlu1 %5079 }
 0x52d   : > { %5157 = vst.msk [vmem:[#allocation5 + $0x98] sm:$0xff] %vm5137_vm6, %v5080_v46 }
 0x52e   : > { %v5267_v43 = vpop.permute.xlu0 %5266  ;;  %4519 = vrot.lane.b32.xlu1 %v5004_v59, %s7444_s23 }
 0x52f   : > { %5347 = vst.msk [vmem:[#allocation5 + $0x80] sm:$0xff] %vm5330_vm7, %v5267_v43  ;;  %v6585_v43 = vrot.slane %v9341_v36, 5 }
 0x530   : > { %4521 = vrot.lane.b32.xlu0 %v4427_v9, %s7444_s23  ;;  %v5269_v14 = vpop.permute.xlu1 %5268 }
 0x531   : > { %5348 = vst.msk [vmem:[#allocation5 + $0x88] sm:$0xff] %vm5330_vm7, %v5269_v14 }
 0x532   : > { %v5271_v21 = vpop.permute.xlu0 %5270  ;;  %4523 = vrot.lane.b32.xlu1 %v4428_v50, %s7444_s23  ;;  %s7037_s23 = sshll.u32 %s188_s11, 6 }
 0x533   : > { %5349 = vst.msk [vmem:[#allocation5 + $0x90] sm:$0xff] %vm5330_vm7, %v5271_v21 }
 0x534   : > { %4710 = vrot.lane.b32.xlu0 %v5196_v12, %s7445_s8  ;;  %v5273_v23 = vpop.permute.xlu1 %5272  ;;  %v6581_v12 = vrot.slane %v9341_v36, 1 }
 0x535   : > { %5350 = vst.msk [vmem:[#allocation5 + $0x98] sm:$0xff] %vm5330_vm7, %v5273_v23 }
 0x536   : > { %v4309_v60 = vpop.permute.xlu0 %4308  ;;  %4712 = vrot.lane.b32.xlu1 %v5197_v56, %s7445_s8  ;;  %v5379_v22 = vld [vmem:[#allocation5 + $0x80] sm:$0xff]  ;;  %v6583_v56 = vrot.slane %v9341_v36, 3 }
 0x537   : > { %4385 = vst.msk [vmem:[#allocation5 + $0xa0] sm:$0xff] %vm4364_vm11, %v4309_v60 }
 0x538   : > { %4714 = vrot.lane.b32.xlu0 %v4620_v0, %s7445_s8  ;;  %v4311_v57 = vpop.permute.xlu1 %4310  ;;  %v5380_v47 = vld [vmem:[#allocation5 + $0x88] sm:$0xff] }
 0x539   : > { %4386 = vst.msk [vmem:[#allocation5 + $0xa8] sm:$0xff] %vm4364_vm11, %v4311_v57  ;;  %v5403_v54 = vpack.c.bf16 %v5380_v47, %v5379_v22 }
 0x53a   : > { %v4313_v37 = vpop.permute.xlu0 %4312  ;;  %4716 = vrot.lane.b32.xlu1 %v4621_v58, %s7445_s8  ;;  %v5381_v28 = vld [vmem:[#allocation5 + $0x90] sm:$0xff]  ;;  %s10211_s8 = scalar_lea.vmem [#allocation6], %s7037_s23 }
 0x53b   : > { %4387 = vst.msk [vmem:[#allocation5 + $0xb0] sm:$0xff] %vm4364_vm11, %v4313_v37  ;;  %7289 = vmatprep.mubr.msk.bf16.mxu0 %vm5447_vm8, %v5403_v54  ;;  %s6971_s10 = sshll.u32 %s10211_s8, 4  ;;  %s10568_s10 = int_to_ptr.vmem [resolvable:$true] %s6971_s10 }
 0x53c   : > { %4904 = vrot.lane.b32.xlu0 %v4234_v3, %s7446_s12  ;;  %v4315_v41 = vpop.permute.xlu1 %4314  ;;  %v5382_v4 = vld [vmem:[#allocation5 + $0x98] sm:$0xff]  ;;  %s7371_s20 = scalar_lea.vmem %s10568_s10, 1024 }
 0x53d   : > { %4388 = vst.msk [vmem:[#allocation5 + $0xb8] sm:$0xff] %vm4364_vm11, %v4315_v41  ;;  %v5404_v27 = vpack.c.bf16 %v5382_v4, %v5381_v28  ;;  %p7372_p11 = scmp.ne.s32.totalorder %s10568_s10, %s7371_s20 }
 0x53e   : > { %v4502_v35 = vpop.permute.xlu0 %4501  ;;  %4906 = vrot.lane.b32.xlu1 %v4235_v53, %s7446_s12 }
 0x53f   : > { %4578 = vst.msk [vmem:[#allocation5 + $0xa0] sm:$0xff] %vm4557_vm2, %v4502_v35  ;;  %7290 = vmatmul.mubr.msk.bf16.gmra.mrb[16].mxu0 %vm5447_vm8, %v5404_v27  ;;  %p7373_p12 = pnand %p7372_p11, %p7514_p5 }
 0x540   : > { %4908 = vrot.lane.b32.xlu0 %v4814_v32, %s7446_s12  ;;  %v4504_v26 = vpop.permute.xlu1 %4503 }
 0x541   : > { %4579 = vst.msk [vmem:[#allocation5 + $0xa8] sm:$0xff] %vm4557_vm2, %v4504_v26  ;;  %p7374_p13 = pneg %p7373_p12 }
 0x542   : > { %v4506_v5 = vpop.permute.xlu0 %4505  ;;  %4910 = vrot.lane.b32.xlu1 %v4815_v34, %s7446_s12 }
 0x543   : > { %4580 = vst.msk [vmem:[#allocation5 + $0xb0] sm:$0xff] %vm4557_vm2, %v4506_v5 }
 0x544   : > { %5097 = vrot.lane.b32.xlu0 %v4427_v9, %s7447_s27  ;;  %v4508_v51 = vpop.permute.xlu1 %4507  ;;  %v6586_v9 = vrot.slane %v9341_v36, 6 }
 0x545   : > { %4581 = vst.msk [vmem:[#allocation5 + $0xb8] sm:$0xff] %vm4557_vm2, %v4508_v51 }
 0x546   : > { %v4695_v13 = vpop.permute.xlu0 %4694  ;;  %5099 = vrot.lane.b32.xlu1 %v4428_v50, %s7447_s27 }
 0x547   : > { %4771 = vst.msk [vmem:[#allocation5 + $0xa0] sm:$0xff] %vm4750_vm10, %v4695_v13 }
 0x548   : > { %5101 = vrot.lane.b32.xlu0 %v5007_v44, %s7447_s27  ;;  %v4697_v25 = vpop.permute.xlu1 %4696 }
 0x549   : > { %4772 = vst.msk [vmem:[#allocation5 + $0xa8] sm:$0xff] %vm4750_vm10, %v4697_v25 }
 0x54a   : > { %v4699_v39 = vpop.permute.xlu0 %4698  ;;  %5103 = vrot.lane.b32.xlu1 %v5008_v30, %s7447_s27  ;;  %s7375_s27 = sshll.u32 %s7449_s22, 4  ;;  %s7376_s27 = int_to_ptr.vmem [resolvable:$false] %s7375_s27 }
 0x54b   : > { %4773 = vst.msk [vmem:[#allocation5 + $0xb0] sm:$0xff] %vm4750_vm10, %v4699_v39  ;;  %s7377_s28 = scalar_lea.vmem %s7376_s27, 2048  ;;  %p7378_p0 = scmp.lt.s32.totalorder %s10568_s10, %s7376_s27 }
 0x54c   : > { %5290 = vrot.lane.b32.xlu0 %v4620_v0, %s7448_s6  ;;  %v4701_v16 = vpop.permute.xlu1 %4700  ;;  %p7379_p1 = scmp.lt.s32.totalorder %s7377_s28, %s7371_s20 }
 0x54d   : > { %4774 = vst.msk [vmem:[#allocation5 + $0xb8] sm:$0xff] %vm4750_vm10, %v4701_v16 }
 0x54e   : > { %v4889_v31 = vpop.permute.xlu0 %4888  ;;  %5292 = vrot.lane.b32.xlu1 %v4621_v58, %s7448_s6  ;;  %p7380_p2 = por %p7379_p1, %p7378_p0 }
 0x54f   : > { %4965 = vst.msk [vmem:[#allocation5 + $0xa0] sm:$0xff] %vm4944_vm12, %v4889_v31 }
 0x550   : > { %v4891_v48 = vpop.permute.xlu1 %4890  ;;  %5294 = vrot.lane.b32.xlu0 %v5200_v42, %s7448_s6  ;;  %p7381_p3 = pnand %p7380_p2, %p7374_p13 }
 0x551   : > { %4966 = vst.msk [vmem:[#allocation5 + $0xa8] sm:$0xff] %vm4944_vm12, %v4891_v48 }
 0x552   : > { %v4893_v17 = vpop.permute.xlu0 %4892  ;;  %v7275_v15 = vpop.f32.mrb[0].mxu0  ;;  %5296 = vrot.lane.b32.xlu1 %v5201_v20, %s7448_s6 }
 0x553   : > { %4967 = vst.msk [vmem:[#allocation5 + $0xb0] sm:$0xff] %vm4944_vm12, %v4893_v17  ;;  %v5662_v49 = vsel %vm243_vm0, %v7275_v15, 0.0  ;;  %v5534_v38 = vpop.f32.mrb[1].mxu0 }
 0x554   : > { %v5661_v10 = vsel %vm243_vm0, %v5534_v38, 0.0  ;;  %v7276_v61 = vpop.f32.mrb[2].mxu0  ;;  %v4895_v63 = vpop.permute.xlu1 %4894 }
 0x555   : > { %v5663_v19 = vadd.f32 %v5662_v49, %v5661_v10  ;;  %v5665_v45 = vsel %vm243_vm0, %v7276_v61, 0.0  ;;  %4968 = vst.msk [vmem:[#allocation5 + $0xb8] sm:$0xff] %vm4944_vm12, %v4895_v63  ;;  %v5537_v18 = vpop.f32.mrb[3].mxu0 }
 0x556   : > { %v5664_v6 = vsel %vm243_vm0, %v5537_v18, 0.0  ;;  %v5082_v59 = vpop.permute.xlu0 %5081 }
 0x557   : > { %v5725_v29 = vcombine.high %v5663_v19, %v5663_v19  ;;  %v5732_v24 = vrot.slane %v5663_v19, %v8485_v40  ;;  %v5666_v2 = vadd.f32 %v5665_v45, %v5664_v6  ;;  %5158 = vst.msk [vmem:[#allocation5 + $0xa0] sm:$0xff] %vm5137_vm6, %v5082_v59 }
 0x558   : > { %v5084_v52 = vpop.permute.xlu1 %5083 }
 0x559   : > { %v5739_v33 = vrot.slane %v5725_v29, %v8485_v40  ;;  %v5740_v3 = vcombine.high %v5732_v24, %v5732_v24  ;;  %v6061_v62 = vsel %vm246_vm9, %v5732_v24, 0.0  ;;  %v5742_v53 = vcombine.high %v5666_v2, %v5666_v2  ;;  %5159 = vst.msk [vmem:[#allocation5 + $0xa8] sm:$0xff] %vm5137_vm6, %v5084_v52 }
 0x55a   : > { %v6062_v55 = vrot.slane %v6061_v62, 4  ;;  %v5749_v46 = vrot.slane %v5666_v2, %v8485_v40  ;;  %v5086_v14 = vpop.permute.xlu0 %5085 }
 0x55b   : > { %v5741_v50 = vcombine.high %v5739_v33, %v5739_v33  ;;  %v6068_v21 = vsel %vm246_vm9, %v5740_v3, 0.0  ;;  %v6075_v23 = vsel %vm246_vm9, %v5739_v33, 0.0  ;;  %v5756_v60 = vrot.slane %v5742_v53, %v8485_v40  ;;  %5160 = vst.msk [vmem:[#allocation5 + $0xb0] sm:$0xff] %vm5137_vm6, %v5086_v14 }
 0x55c   : > { %v6063_v0 = vadd.f32 %v6062_v55, %v6061_v62  ;;  %v6069_v57 = vrot.slane %v6068_v21, 4  ;;  %v6076_v22 = vrot.slane %v6075_v23, 4  ;;  %v5757_v47 = vcombine.high %v5749_v46, %v5749_v46  ;;  %v5088_v58 = vpop.permute.xlu1 %5087 }
 0x55d   : > { %v6082_v54 = vsel %vm246_vm9, %v5741_v50, 0.0  ;;  %v5758_v37 = vcombine.high %v5756_v60, %v5756_v60  ;;  %v6089_v41 = vsel %vm246_vm9, %v5749_v46, 0.0  ;;  %v6103_v28 = vsel %vm246_vm9, %v5756_v60, 0.0  ;;  %5161 = vst.msk [vmem:[#allocation5 + $0xb8] sm:$0xff] %vm5137_vm6, %v5088_v58 }
 0x55e   : > { %v6064_v4 = vrot.slane %v6063_v0, 2  ;;  %v6070_v27 = vadd.f32 %v6069_v57, %v6068_v21  ;;  %v6077_v32 = vadd.f32 %v6076_v22, %v6075_v23  ;;  %v6083_v35 = vrot.slane %v6082_v54, 4  ;;  %v5275_v34 = vpop.permute.xlu0 %5274 }
 0x55f   : > { %v6090_v26 = vrot.slane %v6089_v41, 4  ;;  %v6096_v5 = vsel %vm246_vm9, %v5757_v47, 0.0  ;;  %v6104_v51 = vrot.slane %v6103_v28, 4  ;;  %v6110_v44 = vsel %vm246_vm9, %v5758_v37, 0.0  ;;  %5351 = vst.msk [vmem:[#allocation5 + $0xa0] sm:$0xff] %vm5330_vm7, %v5275_v34 }
 0x560   : > { %v6065_v13 = vadd.f32 %v6064_v4, %v6063_v0  ;;  %v6071_v30 = vrot.slane %v6070_v27, 2  ;;  %v6078_v25 = vrot.slane %v6077_v32, 2  ;;  %v6084_v39 = vadd.f32 %v6083_v35, %v6082_v54  ;;  %v5277_v16 = vpop.permute.xlu1 %5276 }
 0x561   : > { %v6091_v42 = vadd.f32 %v6090_v26, %v6089_v41  ;;  %v6097_v31 = vrot.slane %v6096_v5, 4  ;;  %v6105_v20 = vadd.f32 %v6104_v51, %v6103_v28  ;;  %v6111_v48 = vrot.slane %v6110_v44, 4  ;;  %5352 = vst.msk [vmem:[#allocation5 + $0xa8] sm:$0xff] %vm5330_vm7, %v5277_v16 }
 0x562   : > { %v6066_v17 = vrot.slane %v6065_v13, 1  ;;  %v6072_v15 = vadd.f32 %v6071_v30, %v6070_v27  ;;  %v6079_v49 = vadd.f32 %v6078_v25, %v6077_v32  ;;  %v6085_v38 = vrot.slane %v6084_v39, 2  ;;  %v5279_v10 = vpop.permute.xlu0 %5278 }
 0x563   : > { %v6092_v61 = vrot.slane %v6091_v42, 2  ;;  %v6098_v63 = vadd.f32 %v6097_v31, %v6096_v5  ;;  %v6106_v19 = vrot.slane %v6105_v20, 2  ;;  %v6112_v45 = vadd.f32 %v6111_v48, %v6110_v44  ;;  %5353 = vst.msk [vmem:[#allocation5 + $0xb0] sm:$0xff] %vm5330_vm7, %v5279_v10 }
 0x564   : > { %v6067_v18 = vadd.f32 %v6066_v17, %v6065_v13  ;;  %v6073_v6 = vrot.slane %v6072_v15, 1  ;;  %v6080_v59 = vrot.slane %v6079_v49, 1  ;;  %v6086_v29 = vadd.f32 %v6085_v38, %v6084_v39  ;;  %v5281_v24 = vpop.permute.xlu1 %5280 }
 0x565   : > { %v6093_v2 = vadd.f32 %v6092_v61, %v6091_v42  ;;  %v6099_v52 = vrot.slane %v6098_v63, 2  ;;  %v6107_v33 = vadd.f32 %v6106_v19, %v6105_v20  ;;  %v6113_v3 = vrot.slane %v6112_v45, 2  ;;  %5354 = vst.msk [vmem:[#allocation5 + $0xb8] sm:$0xff] %vm5330_vm7, %v5281_v24 }
 0x566   : > { %v6074_v62 = vadd.f32 %v6073_v6, %v6072_v15  ;;  %v6081_v53 = vadd.f32 %v6080_v59, %v6079_v49  ;;  %v6087_v55 = vrot.slane %v6086_v29, 1  ;;  %v6509_v46 = vmul.f32 0.25, %v6067_v18  ;;  %v4317_v14 = vpop.permute.xlu0 %4316  ;;  %v5383_v27 = vld [vmem:[#allocation5 + $0xa0] sm:$0xff] }
 0x567   : > { %v6094_v50 = vrot.slane %v6093_v2, 1  ;;  %v6100_v21 = vadd.f32 %v6099_v52, %v6098_v63  ;;  %v6108_v23 = vrot.slane %v6107_v33, 1  ;;  %v6114_v60 = vadd.f32 %v6113_v3, %v6112_v45  ;;  %4389 = vst.msk [vmem:[#allocation5 + $0xc0] sm:$0xff] %vm4364_vm11, %v4317_v14 }
 0x568   : > { %v6088_v0 = vadd.f32 %v6087_v55, %v6086_v29  ;;  %v6510_v57 = vmul.f32 0.25, %v6074_v62  ;;  %v6511_v22 = vmul.f32 0.25, %v6081_v53  ;;  %v6701_v47 = vadd.f32 %v6509_v46, %v9341_v36  ;;  %v4319_v58 = vpop.permute.xlu1 %4318  ;;  %v5384_v54 = vld [vmem:[#allocation5 + $0xa8] sm:$0xff] }
 0x569   : > { %v6095_v37 = vadd.f32 %v6094_v50, %v6093_v2  ;;  %v6101_v41 = vrot.slane %v6100_v21, 1  ;;  %v6109_v28 = vadd.f32 %v6108_v23, %v6107_v33  ;;  %v6115_v4 = vrot.slane %v6114_v60, 1  ;;  %4390 = vst.msk [vmem:[#allocation5 + $0xc8] sm:$0xff] %vm4364_vm11, %v4319_v58 }
 0x56a   : > { %v6512_v32 = vmul.f32 0.25, %v6088_v0  ;;  %v6702_v35 = vadd.f32 %v6581_v12, %v6510_v57  ;;  %v6703_v34 = vadd.f32 %v6582_v1, %v6511_v22  ;;  %v4321_v26 = vpop.permute.xlu0 %4320  ;;  %v5405_v5 = vpack.c.bf16 %v5384_v54, %v5383_v27 }
 0x56b   : > { %v6102_v51 = vadd.f32 %v6101_v41, %v6100_v21  ;;  %v6116_v44 = vadd.f32 %v6115_v4, %v6114_v60  ;;  %v6513_v13 = vmul.f32 0.25, %v6095_v37  ;;  %v6515_v30 = vmul.f32 0.25, %v6109_v28  ;;  %4391 = vst.msk [vmem:[#allocation5 + $0xd0] sm:$0xff] %vm4364_vm11, %v4321_v26 }
 0x56c   : > { %v6704_v25 = vadd.f32 %v6583_v56, %v6512_v32  ;;  %v6829_v39 = vrot.slane %v6702_v35, 7  ;;  %v6831_v16 = vrot.slane %v6703_v34, 6  ;;  %v6587_v42 = vrot.slane %v9341_v36, 7  ;;  %7293 = vmatprep.mubr.msk.bf16.mxu0 %vm5447_vm8, %v5405_v5  ;;  %v4323_v12 = vpop.permute.xlu1 %4322  ;;  %v5386_v31 = vld [vmem:[#allocation5 + $0xb8] sm:$0xff]  ;;  %v5385_v56 = vld [vmem:[#allocation5 + $0xb0] sm:$0xff] }
 0x56d   : > { %v6514_v1 = vmul.f32 0.25, %v6102_v51  ;;  %v6516_v20 = vmul.f32 0.25, %v6116_v44  ;;  %v6705_v48 = vadd.f32 %v6584_v7, %v6513_v13  ;;  %v6707_v17 = vadd.f32 %v6586_v9, %v6515_v30  ;;  %4392 = vst.msk [vmem:[#allocation5 + $0xd8] sm:$0xff] %vm4364_vm11, %v4323_v12 }
 0x56e   : > { %v6830_v15 = vsel %vm1458_vm13, %v6829_v39, %v6701_v47  ;;  %v6833_v49 = vrot.slane %v6704_v25, 5  ;;  %v4510_v38 = vpop.permute.xlu0 %4509  ;;  %v5406_v10 = vpack.c.bf16 %v5386_v31, %v5385_v56  ;;  %v6588_v27 = vrot.slane %v9345_v8, 1 }
 0x56f   : > { %v6832_v61 = vsel %vm1460_vm14, %v6831_v16, %v6830_v15  ;;  %v6706_v63 = vadd.f32 %v6585_v43, %v6514_v1  ;;  %v6708_v19 = vadd.f32 %v6587_v42, %v6516_v20  ;;  %v6835_v45 = vrot.slane %v6705_v48, 4  ;;  %4582 = vst.msk [vmem:[#allocation5 + $0xc0] sm:$0xff] %vm4557_vm2, %v4510_v38 }
 0x570   : > { %v6834_v7 = vsel %vm1462_vm15, %v6833_v49, %v6832_v61  ;;  %7294 = vmatmul.mubr.msk.bf16.gmra.mrb[20].mxu0 %vm5447_vm8, %v5406_v10  ;;  %v4512_v9 = vpop.permute.xlu1 %4511  ;;  %v6839_v59 = vrot.slane %v6707_v17, 2  ;;  %v6589_v32 = vrot.slane %v9345_v8, 2  ;;  %v6590_v35 = vrot.slane %v9345_v8, 3 }
 0x571   : > { %v6836_v18 = vsel %vm1464_vm1, %v6835_v45, %v6834_v7  ;;  %v6837_v6 = vrot.slane %v6706_v63, 3  ;;  %4583 = vst.msk [vmem:[#allocation5 + $0xc8] sm:$0xff] %vm4557_vm2, %v4512_v9  ;;  %v6841_v43 = vrot.slane %v6708_v19, 1  ;;  %v6591_v34 = vrot.slane %v9345_v8, 4 }
 0x572   : > { %v4514_v29 = vpop.permute.xlu0 %4513  ;;  %v6592_v39 = vrot.slane %v9345_v8, 5  ;;  %v6593_v16 = vrot.slane %v9345_v8, 6 }
 0x573   : > { %v6838_v36 = vsel %vm1466_vm3, %v6837_v6, %v6836_v18  ;;  %4584 = vst.msk [vmem:[#allocation5 + $0xd0] sm:$0xff] %vm4557_vm2, %v4514_v29 }
 0x574   : > { %v6840_v24 = vsel %vm1468_vm4, %v6839_v59, %v6838_v36  ;;  %v4516_v2 = vpop.permute.xlu1 %4515 }
 0x575   : > { %v6842_v52 = vsel %vm1470_vm5, %v6841_v43, %v6840_v24  ;;  %4585 = vst.msk [vmem:[#allocation5 + $0xd8] sm:$0xff] %vm4557_vm2, %v4516_v2 }
 0x576   : > { %6949 = vst.msk [vmem:[%s10211_s8] sm:$0xff] %vm243_vm0, %v6842_v52  ;;  %v4703_v33 = vpop.permute.xlu0 %4702 }
 0x577   : > { %4775 = vst.msk [vmem:[#allocation5 + $0xc0] sm:$0xff] %vm4750_vm10, %v4703_v33 }
 0x578   : > { %v4705_v3 = vpop.permute.xlu1 %4704 }
 0x579   : > { %4776 = vst.msk [vmem:[#allocation5 + $0xc8] sm:$0xff] %vm4750_vm10, %v4705_v3 }
 0x57a   : > { %v4707_v62 = vpop.permute.xlu0 %4706 }
 0x57b   : > { %4777 = vst.msk [vmem:[#allocation5 + $0xd0] sm:$0xff] %vm4750_vm10, %v4707_v62 }
 0x57c   : > { %v4709_v53 = vpop.permute.xlu1 %4708 }
 0x57d   : > { %4778 = vst.msk [vmem:[#allocation5 + $0xd8] sm:$0xff] %vm4750_vm10, %v4709_v53 }
 0x57e   : > { %v4897_v55 = vpop.permute.xlu0 %4896 }
 0x57f   : > { %4969 = vst.msk [vmem:[#allocation5 + $0xc0] sm:$0xff] %vm4944_vm12, %v4897_v55 }
 0x580   : > { %v4899_v46 = vpop.permute.xlu1 %4898 }
 0x581   : > { %4970 = vst.msk [vmem:[#allocation5 + $0xc8] sm:$0xff] %vm4944_vm12, %v4899_v46 }
 0x582   : > { %v4901_v14 = vpop.permute.xlu0 %4900  ;;  %v7279_v50 = vpop.f32.mrb[4].mxu0 }
 0x583   : > { %4971 = vst.msk [vmem:[#allocation5 + $0xd0] sm:$0xff] %vm4944_vm12, %v4901_v14  ;;  %v5668_v21 = vsel %vm243_vm0, %v7279_v50, 0.0  ;;  %v5550_v23 = vpop.f32.mrb[5].mxu0 }
 0x584   : > { %v5667_v60 = vsel %vm243_vm0, %v5550_v23, 0.0  ;;  %v7280_v0 = vpop.f32.mrb[6].mxu0  ;;  %v4903_v57 = vpop.permute.xlu1 %4902 }
 0x585   : > { %v5669_v22 = vadd.f32 %v5668_v21, %v5667_v60  ;;  %v5671_v47 = vsel %vm243_vm0, %v7280_v0, 0.0  ;;  %4972 = vst.msk [vmem:[#allocation5 + $0xd8] sm:$0xff] %vm4944_vm12, %v4903_v57  ;;  %v5553_v58 = vpop.f32.mrb[7].mxu0 }
 0x586   : > { %v5670_v54 = vsel %vm243_vm0, %v5553_v58, 0.0  ;;  %v5090_v37 = vpop.permute.xlu0 %5089 }
 0x587   : > { %v5759_v41 = vcombine.high %v5669_v22, %v5669_v22  ;;  %v5766_v28 = vrot.slane %v5669_v22, %v8485_v40  ;;  %v5672_v4 = vadd.f32 %v5671_v47, %v5670_v54  ;;  %5162 = vst.msk [vmem:[#allocation5 + $0xc0] sm:$0xff] %vm5137_vm6, %v5090_v37 }
 0x588   : > { %v5092_v26 = vpop.permute.xlu1 %5091 }
 0x589   : > { %v5773_v5 = vrot.slane %v5759_v41, %v8485_v40  ;;  %v5774_v51 = vcombine.high %v5766_v28, %v5766_v28  ;;  %v6117_v44 = vsel %vm246_vm9, %v5766_v28, 0.0  ;;  %v5776_v13 = vcombine.high %v5672_v4, %v5672_v4  ;;  %5163 = vst.msk [vmem:[#allocation5 + $0xc8] sm:$0xff] %vm5137_vm6, %v5092_v26 }
 0x58a   : > { %v6118_v30 = vrot.slane %v6117_v44, 4  ;;  %v5783_v25 = vrot.slane %v5672_v4, %v8485_v40  ;;  %v5094_v42 = vpop.permute.xlu0 %5093 }
 0x58b   : > { %v5775_v12 = vcombine.high %v5773_v5, %v5773_v5  ;;  %v6124_v31 = vsel %vm246_vm9, %v5774_v51, 0.0  ;;  %v6131_v1 = vsel %vm246_vm9, %v5773_v5, 0.0  ;;  %v5790_v20 = vrot.slane %v5776_v13, %v8485_v40  ;;  %5164 = vst.msk [vmem:[#allocation5 + $0xd0] sm:$0xff] %vm5137_vm6, %v5094_v42 }
 0x58c   : > { %v6119_v48 = vadd.f32 %v6118_v30, %v6117_v44  ;;  %v6125_v17 = vrot.slane %v6124_v31, 4  ;;  %v6132_v56 = vrot.slane %v6131_v1, 4  ;;  %v5791_v15 = vcombine.high %v5783_v25, %v5783_v25  ;;  %v5096_v49 = vpop.permute.xlu1 %5095 }
 0x58d   : > { %v6138_v38 = vsel %vm246_vm9, %v5775_v12, 0.0  ;;  %v5792_v10 = vcombine.high %v5790_v20, %v5790_v20  ;;  %v6145_v61 = vsel %vm246_vm9, %v5783_v25, 0.0  ;;  %v6159_v63 = vsel %vm246_vm9, %v5790_v20, 0.0  ;;  %5165 = vst.msk [vmem:[#allocation5 + $0xd8] sm:$0xff] %vm5137_vm6, %v5096_v49 }
 0x58e   : > { %v6120_v19 = vrot.slane %v6119_v48, 2  ;;  %v6126_v45 = vadd.f32 %v6125_v17, %v6124_v31  ;;  %v6133_v7 = vadd.f32 %v6132_v56, %v6131_v1  ;;  %v6139_v9 = vrot.slane %v6138_v38, 4  ;;  %v5283_v18 = vpop.permute.xlu0 %5282 }
 0x58f   : > { %v6146_v6 = vrot.slane %v6145_v61, 4  ;;  %v6152_v59 = vsel %vm246_vm9, %v5791_v15, 0.0  ;;  %v6160_v29 = vrot.slane %v6159_v63, 4  ;;  %v6166_v36 = vsel %vm246_vm9, %v5792_v10, 0.0  ;;  %5355 = vst.msk [vmem:[#allocation5 + $0xc0] sm:$0xff] %vm5330_vm7, %v5283_v18 }
 0x590   : > { %v6121_v43 = vadd.f32 %v6120_v19, %v6119_v48  ;;  %v6127_v24 = vrot.slane %v6126_v45, 2  ;;  %v6134_v2 = vrot.slane %v6133_v7, 2  ;;  %v6140_v52 = vadd.f32 %v6139_v9, %v6138_v38  ;;  %v5285_v33 = vpop.permute.xlu1 %5284 }
 0x591   : > { %v6147_v3 = vadd.f32 %v6146_v6, %v6145_v61  ;;  %v6153_v62 = vrot.slane %v6152_v59, 4  ;;  %v6161_v53 = vadd.f32 %v6160_v29, %v6159_v63  ;;  %v6167_v55 = vrot.slane %v6166_v36, 4  ;;  %5356 = vst.msk [vmem:[#allocation5 + $0xc8] sm:$0xff] %vm5330_vm7, %v5285_v33 }
 0x592   : > { %v6122_v46 = vrot.slane %v6121_v43, 1  ;;  %v6128_v14 = vadd.f32 %v6127_v24, %v6126_v45  ;;  %v6135_v50 = vadd.f32 %v6134_v2, %v6133_v7  ;;  %v6141_v21 = vrot.slane %v6140_v52, 2  ;;  %v5287_v23 = vpop.permute.xlu0 %5286 }
 0x593   : > { %v6148_v60 = vrot.slane %v6147_v3, 2  ;;  %v6154_v0 = vadd.f32 %v6153_v62, %v6152_v59  ;;  %v6162_v57 = vrot.slane %v6161_v53, 2  ;;  %v6168_v22 = vadd.f32 %v6167_v55, %v6166_v36  ;;  %5357 = vst.msk [vmem:[#allocation5 + $0xd0] sm:$0xff] %vm5330_vm7, %v5287_v23 }
 0x594   : > { %v6123_v47 = vadd.f32 %v6122_v46, %v6121_v43  ;;  %v6129_v58 = vrot.slane %v6128_v14, 1  ;;  %v6136_v54 = vrot.slane %v6135_v50, 1  ;;  %v6142_v37 = vadd.f32 %v6141_v21, %v6140_v52  ;;  %v5289_v41 = vpop.permute.xlu1 %5288 }
 0x595   : > { %v6149_v28 = vadd.f32 %v6148_v60, %v6147_v3  ;;  %v6155_v4 = vrot.slane %v6154_v0, 2  ;;  %v6163_v26 = vadd.f32 %v6162_v57, %v6161_v53  ;;  %v6169_v5 = vrot.slane %v6168_v22, 2  ;;  %5358 = vst.msk [vmem:[#allocation5 + $0xd8] sm:$0xff] %vm5330_vm7, %v5289_v41 }
 0x596   : > { %v6130_v51 = vadd.f32 %v6129_v58, %v6128_v14  ;;  %v6137_v44 = vadd.f32 %v6136_v54, %v6135_v50  ;;  %v6143_v13 = vrot.slane %v6142_v37, 1  ;;  %v6517_v30 = vmul.f32 0.25, %v6123_v47  ;;  %v4325_v25 = vpop.permute.xlu0 %4324  ;;  %v5387_v19 = vld [vmem:[#allocation5 + $0xc0] sm:$0xff] }
 0x597   : > { %v6150_v42 = vrot.slane %v6149_v28, 1  ;;  %v6156_v12 = vadd.f32 %v6155_v4, %v6154_v0  ;;  %v6164_v31 = vrot.slane %v6163_v26, 1  ;;  %v6170_v1 = vadd.f32 %v6169_v5, %v6168_v22  ;;  %4393 = vst.msk [vmem:[#allocation5 + $0xe0] sm:$0xff] %vm4364_vm11, %v4325_v25 }
 0x598   : > { %v6144_v20 = vadd.f32 %v6143_v13, %v6142_v37  ;;  %v6518_v48 = vmul.f32 0.25, %v6130_v51  ;;  %v6519_v17 = vmul.f32 0.25, %v6137_v44  ;;  %v6709_v56 = vadd.f32 %v6517_v30, %v9345_v8  ;;  %v4327_v15 = vpop.permute.xlu1 %4326  ;;  %v5388_v49 = vld [vmem:[#allocation5 + $0xc8] sm:$0xff] }
 0x599   : > { %v6151_v38 = vadd.f32 %v6150_v42, %v6149_v28  ;;  %v6157_v10 = vrot.slane %v6156_v12, 1  ;;  %v6165_v61 = vadd.f32 %v6164_v31, %v6163_v26  ;;  %v6171_v63 = vrot.slane %v6170_v1, 1  ;;  %4394 = vst.msk [vmem:[#allocation5 + $0xe8] sm:$0xff] %vm4364_vm11, %v4327_v15 }
 0x59a   : > { %v6520_v45 = vmul.f32 0.25, %v6144_v20  ;;  %v6710_v7 = vadd.f32 %v6588_v27, %v6518_v48  ;;  %v6711_v9 = vadd.f32 %v6589_v32, %v6519_v17  ;;  %v4329_v18 = vpop.permute.xlu0 %4328  ;;  %v5407_v6 = vpack.c.bf16 %v5388_v49, %v5387_v19  ;;  %v5389_v46 = vld [vmem:[#allocation5 + $0xd0] sm:$0xff] }
 0x59b   : > { %v6158_v59 = vadd.f32 %v6157_v10, %v6156_v12  ;;  %v6172_v29 = vadd.f32 %v6171_v63, %v6170_v1  ;;  %v6521_v36 = vmul.f32 0.25, %v6151_v38  ;;  %v6523_v43 = vmul.f32 0.25, %v6165_v61  ;;  %4395 = vst.msk [vmem:[#allocation5 + $0xf0] sm:$0xff] %vm4364_vm11, %v4329_v18 }
 0x59c   : > { %v6712_v24 = vadd.f32 %v6590_v35, %v6520_v45  ;;  %v6843_v2 = vrot.slane %v6710_v7, 7  ;;  %v6845_v52 = vrot.slane %v6711_v9, 6  ;;  %v6594_v33 = vrot.slane %v9345_v8, 7  ;;  %7297 = vmatprep.mubr.msk.bf16.mxu0 %vm5447_vm8, %v5407_v6  ;;  %v4331_v27 = vpop.permute.xlu1 %4330  ;;  %v5390_v3 = vld [vmem:[#allocation5 + $0xd8] sm:$0xff] }
 0x59d   : > { %v6522_v32 = vmul.f32 0.25, %v6158_v59  ;;  %v6524_v62 = vmul.f32 0.25, %v6172_v29  ;;  %v6713_v53 = vadd.f32 %v6591_v34, %v6521_v36  ;;  %v6715_v55 = vadd.f32 %v6593_v16, %v6523_v43  ;;  %4396 = vst.msk [vmem:[#allocation5 + $0xf8] sm:$0xff] %vm4364_vm11, %v4331_v27 }
 0x59e   : > { %v6844_v35 = vsel %vm1458_vm13, %v6843_v2, %v6709_v56  ;;  %v6847_v14 = vrot.slane %v6712_v24, 5  ;;  %v4518_v50 = vpop.permute.xlu0 %4517  ;;  %v5408_v21 = vpack.c.bf16 %v5390_v3, %v5389_v46  ;;  %v6595_v63 = vrot.slane %v9338_v11, 1 }
 0x59f   : > { %v6846_v23 = vsel %vm1460_vm14, %v6845_v52, %v6844_v35  ;;  %v6714_v60 = vadd.f32 %v6592_v39, %v6522_v32  ;;  %v6716_v0 = vadd.f32 %v6594_v33, %v6524_v62  ;;  %v6849_v57 = vrot.slane %v6713_v53, 4  ;;  %4586 = vst.msk [vmem:[#allocation5 + $0xe0] sm:$0xff] %vm4557_vm2, %v4518_v50 }
 0x5a0   : > { %v6848_v34 = vsel %vm1462_vm15, %v6847_v14, %v6846_v23  ;;  %7298 = vmatmul.mubr.msk.bf16.gmra.mrb[24].mxu0 %vm5447_vm8, %v5408_v21  ;;  %v4520_v16 = vpop.permute.xlu1 %4519  ;;  %v6853_v58 = vrot.slane %v6715_v55, 2  ;;  %v6596_v19 = vrot.slane %v9338_v11, 2  ;;  %v6597_v45 = vrot.slane %v9338_v11, 3 }
 0x5a1   : > { %v6850_v22 = vsel %vm1464_vm1, %v6849_v57, %v6848_v34  ;;  %v6851_v47 = vrot.slane %v6714_v60, 3  ;;  %4587 = vst.msk [vmem:[#allocation5 + $0xe8] sm:$0xff] %vm4557_vm2, %v4520_v16  ;;  %v6855_v39 = vrot.slane %v6716_v0, 1  ;;  %v6598_v7 = vrot.slane %v9338_v11, 4 }
 0x5a2   : > { %v4522_v54 = vpop.permute.xlu0 %4521  ;;  %v6599_v24 = vrot.slane %v9338_v11, 5  ;;  %v6600_v2 = vrot.slane %v9338_v11, 6 }
 0x5a3   : > { %v6852_v8 = vsel %vm1466_vm3, %v6851_v47, %v6850_v22  ;;  %4588 = vst.msk [vmem:[#allocation5 + $0xf0] sm:$0xff] %vm4557_vm2, %v4522_v54 }
 0x5a4   : > { %v6854_v37 = vsel %vm1468_vm4, %v6853_v58, %v6852_v8  ;;  %v4524_v41 = vpop.permute.xlu1 %4523 }
 0x5a5   : > { %v6856_v28 = vsel %vm1470_vm5, %v6855_v39, %v6854_v37  ;;  %4589 = vst.msk [vmem:[#allocation5 + $0xf8] sm:$0xff] %vm4557_vm2, %v4524_v41 }
 0x5a6   : > { %6950 = vst.msk [vmem:[%s10211_s8 + $0x8] sm:$0xff] %vm243_vm0, %v6856_v28  ;;  %v4711_v4 = vpop.permute.xlu0 %4710 }
 0x5a7   : > { %4779 = vst.msk [vmem:[#allocation5 + $0xe0] sm:$0xff] %vm4750_vm10, %v4711_v4 }
 0x5a8   : > { %v4713_v26 = vpop.permute.xlu1 %4712 }
 0x5a9   : > { %4780 = vst.msk [vmem:[#allocation5 + $0xe8] sm:$0xff] %vm4750_vm10, %v4713_v26 }
 0x5aa   : > { %v4715_v5 = vpop.permute.xlu0 %4714 }
 0x5ab   : > { %4781 = vst.msk [vmem:[#allocation5 + $0xf0] sm:$0xff] %vm4750_vm10, %v4715_v5 }
 0x5ac   : > { %v4717_v51 = vpop.permute.xlu1 %4716 }
 0x5ad   : > { %4782 = vst.msk [vmem:[#allocation5 + $0xf8] sm:$0xff] %vm4750_vm10, %v4717_v51 }
 0x5ae   : > { %v4905_v44 = vpop.permute.xlu0 %4904 }
 0x5af   : > { %4973 = vst.msk [vmem:[#allocation5 + $0xe0] sm:$0xff] %vm4944_vm12, %v4905_v44 }
 0x5b0   : > { %v4907_v13 = vpop.permute.xlu1 %4906 }
 0x5b1   : > { %4974 = vst.msk [vmem:[#allocation5 + $0xe8] sm:$0xff] %vm4944_vm12, %v4907_v13 }
 0x5b2   : > { %v4909_v30 = vpop.permute.xlu0 %4908  ;;  %v7283_v25 = vpop.f32.mrb[8].mxu0 }
 0x5b3   : > { %4975 = vst.msk [vmem:[#allocation5 + $0xf0] sm:$0xff] %vm4944_vm12, %v4909_v30  ;;  %v5674_v42 = vsel %vm243_vm0, %v7283_v25, 0.0  ;;  %v5566_v12 = vpop.f32.mrb[9].mxu0 }
 0x5b4   : > { %v5673_v31 = vsel %vm243_vm0, %v5566_v12, 0.0  ;;  %v7284_v1 = vpop.f32.mrb[10].mxu0  ;;  %v4911_v20 = vpop.permute.xlu1 %4910 }
 0x5b5   : > { %v5675_v48 = vadd.f32 %v5674_v42, %v5673_v31  ;;  %v5677_v17 = vsel %vm243_vm0, %v7284_v1, 0.0  ;;  %4976 = vst.msk [vmem:[#allocation5 + $0xf8] sm:$0xff] %vm4944_vm12, %v4911_v20  ;;  %v5569_v56 = vpop.f32.mrb[11].mxu0 }
 0x5b6   : > { %v5676_v15 = vsel %vm243_vm0, %v5569_v56, 0.0  ;;  %v5098_v49 = vpop.permute.xlu0 %5097 }
 0x5b7   : > { %v5793_v38 = vcombine.high %v5675_v48, %v5675_v48  ;;  %v5800_v10 = vrot.slane %v5675_v48, %v8485_v40  ;;  %v5678_v61 = vadd.f32 %v5677_v17, %v5676_v15  ;;  %5166 = vst.msk [vmem:[#allocation5 + $0xe0] sm:$0xff] %vm5137_vm6, %v5098_v49 }
 0x5b8   : > { %v5100_v9 = vpop.permute.xlu1 %5099 }
 0x5b9   : > { %v5807_v18 = vrot.slane %v5793_v38, %v8485_v40  ;;  %v5808_v6 = vcombine.high %v5800_v10, %v5800_v10  ;;  %v6173_v59 = vsel %vm246_vm9, %v5800_v10, 0.0  ;;  %v5810_v29 = vcombine.high %v5678_v61, %v5678_v61  ;;  %5167 = vst.msk [vmem:[#allocation5 + $0xe8] sm:$0xff] %vm5137_vm6, %v5100_v9 }
 0x5ba   : > { %v6174_v36 = vrot.slane %v6173_v59, 4  ;;  %v5817_v43 = vrot.slane %v5678_v61, %v8485_v40  ;;  %v5102_v52 = vpop.permute.xlu0 %5101 }
 0x5bb   : > { %v5809_v33 = vcombine.high %v5807_v18, %v5807_v18  ;;  %v6180_v27 = vsel %vm246_vm9, %v5808_v6, 0.0  ;;  %v6187_v3 = vsel %vm246_vm9, %v5807_v18, 0.0  ;;  %v5824_v32 = vrot.slane %v5810_v29, %v8485_v40  ;;  %5168 = vst.msk [vmem:[#allocation5 + $0xf0] sm:$0xff] %vm5137_vm6, %v5102_v52 }
 0x5bc   : > { %v6175_v62 = vadd.f32 %v6174_v36, %v6173_v59  ;;  %v6181_v53 = vrot.slane %v6180_v27, 4  ;;  %v6188_v55 = vrot.slane %v6187_v3, 4  ;;  %v5825_v46 = vcombine.high %v5817_v43, %v5817_v43  ;;  %v5104_v35 = vpop.permute.xlu1 %5103 }
 0x5bd   : > { %v6194_v14 = vsel %vm246_vm9, %v5809_v33, 0.0  ;;  %v5826_v50 = vcombine.high %v5824_v32, %v5824_v32  ;;  %v6201_v21 = vsel %vm246_vm9, %v5817_v43, 0.0  ;;  %v6215_v23 = vsel %vm246_vm9, %v5824_v32, 0.0  ;;  %5169 = vst.msk [vmem:[#allocation5 + $0xf8] sm:$0xff] %vm5137_vm6, %v5104_v35 }
 0x5be   : > { %v6176_v60 = vrot.slane %v6175_v62, 2  ;;  %v6182_v0 = vadd.f32 %v6181_v53, %v6180_v27  ;;  %v6189_v57 = vadd.f32 %v6188_v55, %v6187_v3  ;;  %v6195_v34 = vrot.slane %v6194_v14, 4  ;;  %v5291_v16 = vpop.permute.xlu0 %5290 }
 0x5bf   : > { %v6202_v22 = vrot.slane %v6201_v21, 4  ;;  %v6208_v47 = vsel %vm246_vm9, %v5825_v46, 0.0  ;;  %v6216_v58 = vrot.slane %v6215_v23, 4  ;;  %v6222_v54 = vsel %vm246_vm9, %v5826_v50, 0.0  ;;  %5359 = vst.msk [vmem:[#allocation5 + $0xe0] sm:$0xff] %vm5330_vm7, %v5291_v16 }
 0x5c0   : > { %v6177_v8 = vadd.f32 %v6176_v60, %v6175_v62  ;;  %v6183_v39 = vrot.slane %v6182_v0, 2  ;;  %v6190_v37 = vrot.slane %v6189_v57, 2  ;;  %v6196_v41 = vadd.f32 %v6195_v34, %v6194_v14  ;;  %v5293_v28 = vpop.permute.xlu1 %5292 }
 0x5c1   : > { %v6203_v4 = vadd.f32 %v6202_v22, %v6201_v21  ;;  %v6209_v26 = vrot.slane %v6208_v47, 4  ;;  %v6217_v5 = vadd.f32 %v6216_v58, %v6215_v23  ;;  %v6223_v51 = vrot.slane %v6222_v54, 4  ;;  %5360 = vst.msk [vmem:[#allocation5 + $0xe8] sm:$0xff] %vm5330_vm7, %v5293_v28 }
 0x5c2   : > { %v6178_v44 = vrot.slane %v6177_v8, 1  ;;  %v6184_v13 = vadd.f32 %v6183_v39, %v6182_v0  ;;  %v6191_v30 = vadd.f32 %v6190_v37, %v6189_v57  ;;  %v6197_v25 = vrot.slane %v6196_v41, 2  ;;  %v5295_v42 = vpop.permute.xlu0 %5294 }
 0x5c3   : > { %v6204_v12 = vrot.slane %v6203_v4, 2  ;;  %v6210_v31 = vadd.f32 %v6209_v26, %v6208_v47  ;;  %v6218_v1 = vrot.slane %v6217_v5, 2  ;;  %v6224_v20 = vadd.f32 %v6223_v51, %v6222_v54  ;;  %5361 = vst.msk [vmem:[#allocation5 + $0xf0] sm:$0xff] %vm5330_vm7, %v5295_v42 }
 0x5c4   : > { %v6179_v48 = vadd.f32 %v6178_v44, %v6177_v8  ;;  %v6185_v17 = vrot.slane %v6184_v13, 1  ;;  %v6192_v56 = vrot.slane %v6191_v30, 1  ;;  %v6198_v15 = vadd.f32 %v6197_v25, %v6196_v41  ;;  %v5297_v49 = vpop.permute.xlu1 %5296 }
 0x5c5   : > { %v6205_v38 = vadd.f32 %v6204_v12, %v6203_v4  ;;  %v6211_v10 = vrot.slane %v6210_v31, 2  ;;  %v6219_v61 = vadd.f32 %v6218_v1, %v6217_v5  ;;  %v6225_v9 = vrot.slane %v6224_v20, 2  ;;  %5362 = vst.msk [vmem:[#allocation5 + $0xf8] sm:$0xff] %vm5330_vm7, %v5297_v49 }
 0x5c6   : > { %v6186_v18 = vadd.f32 %v6185_v17, %v6184_v13  ;;  %v6193_v6 = vadd.f32 %v6192_v56, %v6191_v30  ;;  %v6199_v59 = vrot.slane %v6198_v15, 1  ;;  %v6525_v29 = vmul.f32 0.25, %v6179_v48  ;;  %v5391_v50 = vld [vmem:[#allocation5 + $0xe0] sm:$0xff] }
 0x5c7   : > { %v6206_v36 = vrot.slane %v6205_v38, 1  ;;  %v6212_v43 = vadd.f32 %v6211_v10, %v6210_v31  ;;  %v6220_v52 = vrot.slane %v6219_v61, 1  ;;  %v6226_v33 = vadd.f32 %v6225_v9, %v6224_v20 }
 0x5c8   : > { %v6200_v27 = vadd.f32 %v6199_v59, %v6198_v15  ;;  %v6526_v3 = vmul.f32 0.25, %v6186_v18  ;;  %v6527_v32 = vmul.f32 0.25, %v6193_v6  ;;  %v6717_v62 = vadd.f32 %v9338_v11, %v6525_v29  ;;  %v5392_v53 = vld [vmem:[#allocation5 + $0xe8] sm:$0xff]  ;;  %v10820_v18 = vld [vmem:[#allocation39_spill] sm:$0xff] }
 0x5c9   : > { %v6207_v55 = vadd.f32 %v6206_v36, %v6205_v38  ;;  %v6213_v46 = vrot.slane %v6212_v43, 1  ;;  %v6221_v35 = vadd.f32 %v6220_v52, %v6219_v61  ;;  %v6227_v14 = vrot.slane %v6226_v33, 1 }
 0x5ca   : > { %v6528_v21 = vmul.f32 0.25, %v6200_v27  ;;  %v6718_v23 = vadd.f32 %v6595_v63, %v6526_v3  ;;  %v6719_v60 = vadd.f32 %v6596_v19, %v6527_v32  ;;  %v5409_v0 = vpack.c.bf16 %v5392_v53, %v5391_v50  ;;  %v5393_v47 = vld [vmem:[#allocation5 + $0xf0] sm:$0xff] }
 0x5cb   : > { %v6214_v57 = vadd.f32 %v6213_v46, %v6212_v43  ;;  %v6228_v34 = vadd.f32 %v6227_v14, %v6226_v33  ;;  %v6529_v16 = vmul.f32 0.25, %v6207_v55  ;;  %v6531_v22 = vmul.f32 0.25, %v6221_v35 }
 0x5cc   : > { %v6720_v58 = vadd.f32 %v6597_v45, %v6528_v21  ;;  %v6857_v54 = vrot.slane %v6718_v23, 7  ;;  %v6859_v8 = vrot.slane %v6719_v60, 6  ;;  %v6601_v39 = vrot.slane %v9338_v11, 7  ;;  %7301 = vmatprep.mubr.msk.bf16.mxu0 %vm5447_vm8, %v5409_v0  ;;  %v5394_v37 = vld [vmem:[#allocation5 + $0xf8] sm:$0xff] }
 0x5cd   : > { %v6530_v63 = vmul.f32 0.25, %v6214_v57  ;;  %v6532_v41 = vmul.f32 0.25, %v6228_v34  ;;  %v6721_v19 = vadd.f32 %v6598_v7, %v6529_v16  ;;  %v6723_v28 = vadd.f32 %v6600_v2, %v6531_v22 }
 0x5ce   : > { %v6858_v4 = vsel %vm1458_vm13, %v6857_v54, %v6717_v62  ;;  %v6861_v26 = vrot.slane %v6720_v58, 5  ;;  %v5410_v45 = vpack.c.bf16 %v5394_v37, %v5393_v47  ;;  %v6602_v6 = vrot.slane %v10820_v18, 1 }
 0x5cf   : > { %v6860_v5 = vsel %vm1460_vm14, %v6859_v8, %v6858_v4  ;;  %v6722_v51 = vadd.f32 %v6599_v24, %v6530_v63  ;;  %v6724_v44 = vadd.f32 %v6601_v39, %v6532_v41  ;;  %v6863_v13 = vrot.slane %v6721_v19, 4 }
 0x5d0   : > { %v6862_v30 = vsel %vm1462_vm15, %v6861_v26, %v6860_v5  ;;  %7302 = vmatmul.mubr.msk.bf16.gmra.mrb[28].mxu0 %vm5447_vm8, %v5410_v45  ;;  %v6867_v2 = vrot.slane %v6723_v28, 2  ;;  %v6603_v59 = vrot.slane %v10820_v18, 2  ;;  %v6604_v29 = vrot.slane %v10820_v18, 3 }
 0x5d1   : > { %v6864_v7 = vsel %vm1464_vm1, %v6863_v13, %v6862_v30  ;;  %v6865_v25 = vrot.slane %v6722_v51, 3  ;;  %v6869_v12 = vrot.slane %v6724_v44, 1  ;;  %v6605_v32 = vrot.slane %v10820_v18, 4 }
 0x5d2   : > { %v6606_v62 = vrot.slane %v10820_v18, 5 }
 0x5d3   : > { %v6866_v42 = vsel %vm1466_vm3, %v6865_v25, %v6864_v7 }
 0x5d4   : > { %v6868_v31 = vsel %vm1468_vm4, %v6867_v2, %v6866_v42 }
 0x5d5   : > { %v6870_v1 = vsel %vm1470_vm5, %v6869_v12, %v6868_v31 }
 0x5d6   : > { %6951 = vst.msk [vmem:[%s10211_s8 + $0x10] sm:$0xff] %vm243_vm0, %v6870_v1 }
 0x5e2   : > { %v7287_v11 = vpop.f32.mrb[12].mxu0 }
 0x5e3   : > { %v5680_v24 = vsel %vm243_vm0, %v7287_v11, 0.0  ;;  %v5582_v20 = vpop.f32.mrb[13].mxu0 }
 0x5e4   : > { %v5679_v48 = vsel %vm243_vm0, %v5582_v20, 0.0  ;;  %v7288_v17 = vpop.f32.mrb[14].mxu0 }
 0x5e5   : > { %v5681_v56 = vadd.f32 %v5680_v24, %v5679_v48  ;;  %v5683_v15 = vsel %vm243_vm0, %v7288_v17, 0.0  ;;  %v5585_v49 = vpop.f32.mrb[15].mxu0 }
 0x5e6   : > { %v5682_v38 = vsel %vm243_vm0, %v5585_v49, 0.0 }
 0x5e7   : > { %v5827_v10 = vcombine.high %v5681_v56, %v5681_v56  ;;  %v5834_v61 = vrot.slane %v5681_v56, %v8485_v40  ;;  %v5684_v9 = vadd.f32 %v5683_v15, %v5682_v38 }
 0x5e9   : > { %v5841_v36 = vrot.slane %v5827_v10, %v8485_v40  ;;  %v5842_v43 = vcombine.high %v5834_v61, %v5834_v61  ;;  %v6229_v52 = vsel %vm246_vm9, %v5834_v61, 0.0  ;;  %v5844_v33 = vcombine.high %v5684_v9, %v5684_v9 }
 0x5ea   : > { %v6230_v27 = vrot.slane %v6229_v52, 4  ;;  %v5851_v3 = vrot.slane %v5684_v9, %v8485_v40 }
 0x5eb   : > { %v5843_v53 = vcombine.high %v5841_v36, %v5841_v36  ;;  %v6236_v55 = vsel %vm246_vm9, %v5842_v43, 0.0  ;;  %v6243_v46 = vsel %vm246_vm9, %v5841_v36, 0.0  ;;  %v5858_v35 = vrot.slane %v5844_v33, %v8485_v40 }
 0x5ec   : > { %v6231_v14 = vadd.f32 %v6230_v27, %v6229_v52  ;;  %v6237_v50 = vrot.slane %v6236_v55, 4  ;;  %v6244_v21 = vrot.slane %v6243_v46, 4  ;;  %v5859_v23 = vcombine.high %v5851_v3, %v5851_v3 }
 0x5ed   : > { %v6250_v60 = vsel %vm246_vm9, %v5843_v53, 0.0  ;;  %v5860_v0 = vcombine.high %v5858_v35, %v5858_v35  ;;  %v6257_v57 = vsel %vm246_vm9, %v5851_v3, 0.0  ;;  %v6271_v34 = vsel %vm246_vm9, %v5858_v35, 0.0 }
 0x5ee   : > { %v6232_v16 = vrot.slane %v6231_v14, 2  ;;  %v6238_v22 = vadd.f32 %v6237_v50, %v6236_v55  ;;  %v6245_v47 = vadd.f32 %v6244_v21, %v6243_v46  ;;  %v6251_v58 = vrot.slane %v6250_v60, 4 }
 0x5ef   : > { %v6258_v54 = vrot.slane %v6257_v57, 4  ;;  %v6264_v8 = vsel %vm246_vm9, %v5859_v23, 0.0  ;;  %v6272_v39 = vrot.slane %v6271_v34, 4  ;;  %v6278_v37 = vsel %vm246_vm9, %v5860_v0, 0.0 }
 0x5f0   : > { %v6233_v63 = vadd.f32 %v6232_v16, %v6231_v14  ;;  %v6239_v41 = vrot.slane %v6238_v22, 2  ;;  %v6246_v19 = vrot.slane %v6245_v47, 2  ;;  %v6252_v28 = vadd.f32 %v6251_v58, %v6250_v60 }
 0x5f1   : > { %v6259_v4 = vadd.f32 %v6258_v54, %v6257_v57  ;;  %v6265_v26 = vrot.slane %v6264_v8, 4  ;;  %v6273_v45 = vadd.f32 %v6272_v39, %v6271_v34  ;;  %v6279_v5 = vrot.slane %v6278_v37, 4 }
 0x5f2   : > { %v6234_v51 = vrot.slane %v6233_v63, 1  ;;  %v6240_v44 = vadd.f32 %v6239_v41, %v6238_v22  ;;  %v6247_v13 = vadd.f32 %v6246_v19, %v6245_v47  ;;  %v6253_v30 = vrot.slane %v6252_v28, 2 }
 0x5f3   : > { %v6260_v7 = vrot.slane %v6259_v4, 2  ;;  %v6266_v25 = vadd.f32 %v6265_v26, %v6264_v8  ;;  %v6274_v2 = vrot.slane %v6273_v45, 2  ;;  %v6280_v42 = vadd.f32 %v6279_v5, %v6278_v37 }
 0x5f4   : > { %v6235_v12 = vadd.f32 %v6234_v51, %v6233_v63  ;;  %v6241_v31 = vrot.slane %v6240_v44, 1  ;;  %v6248_v1 = vrot.slane %v6247_v13, 1  ;;  %v6254_v11 = vadd.f32 %v6253_v30, %v6252_v28 }
 0x5f5   : > { %v6261_v24 = vadd.f32 %v6260_v7, %v6259_v4  ;;  %v6267_v20 = vrot.slane %v6266_v25, 2  ;;  %v6275_v48 = vadd.f32 %v6274_v2, %v6273_v45  ;;  %v6281_v17 = vrot.slane %v6280_v42, 2 }
 0x5f6   : > { %v6242_v56 = vadd.f32 %v6241_v31, %v6240_v44  ;;  %v6249_v15 = vadd.f32 %v6248_v1, %v6247_v13  ;;  %v6255_v49 = vrot.slane %v6254_v11, 1  ;;  %v6533_v38 = vmul.f32 0.25, %v6235_v12 }
 0x5f7   : > { %v6262_v10 = vrot.slane %v6261_v24, 1  ;;  %v6268_v61 = vadd.f32 %v6267_v20, %v6266_v25  ;;  %v6276_v9 = vrot.slane %v6275_v48, 1  ;;  %v6282_v36 = vadd.f32 %v6281_v17, %v6280_v42 }
 0x5f8   : > { %v6256_v43 = vadd.f32 %v6255_v49, %v6254_v11  ;;  %v6534_v52 = vmul.f32 0.25, %v6242_v56  ;;  %v6535_v33 = vmul.f32 0.25, %v6249_v15  ;;  %v6725_v27 = vadd.f32 %v10820_v18, %v6533_v38  ;;  %v10821_v11 = vld [vmem:[#allocation43_spill] sm:$0xff] }
 0x5f9   : > { %v6263_v3 = vadd.f32 %v6262_v10, %v6261_v24  ;;  %v6269_v53 = vrot.slane %v6268_v61, 1  ;;  %v6277_v55 = vadd.f32 %v6276_v9, %v6275_v48  ;;  %v6283_v46 = vrot.slane %v6282_v36, 1 }
 0x5fa   : > { %v6536_v35 = vmul.f32 0.25, %v6256_v43  ;;  %v6726_v14 = vadd.f32 %v6602_v6, %v6534_v52  ;;  %v6727_v50 = vadd.f32 %v6603_v59, %v6535_v33  ;;  %v6607_v21 = vrot.slane %v10820_v18, 6 }
 0x5fb   : > { %v6270_v23 = vadd.f32 %v6269_v53, %v6268_v61  ;;  %v6284_v60 = vadd.f32 %v6283_v46, %v6282_v36  ;;  %v6537_v0 = vmul.f32 0.25, %v6263_v3  ;;  %v6539_v57 = vmul.f32 0.25, %v6277_v55 }
 0x5fc   : > { %v6728_v34 = vadd.f32 %v6604_v29, %v6536_v35  ;;  %v6871_v16 = vrot.slane %v6726_v14, 7  ;;  %v6873_v22 = vrot.slane %v6727_v50, 6  ;;  %v6608_v47 = vrot.slane %v10820_v18, 7 }
 0x5fd   : > { %v6538_v58 = vmul.f32 0.25, %v6270_v23  ;;  %v6540_v54 = vmul.f32 0.25, %v6284_v60  ;;  %v6729_v6 = vadd.f32 %v6605_v32, %v6537_v0  ;;  %v6731_v59 = vadd.f32 %v6607_v21, %v6539_v57 }
 0x5fe   : > { %v6872_v8 = vsel %vm1458_vm13, %v6871_v16, %v6725_v27  ;;  %v6875_v39 = vrot.slane %v6728_v34, 5  ;;  %v6609_v24 = vrot.slane %v10821_v11, 1  ;;  %v6610_v20 = vrot.slane %v10821_v11, 2 }
 0x5ff   : > { %v6874_v37 = vsel %vm1460_vm14, %v6873_v22, %v6872_v8  ;;  %v6730_v63 = vadd.f32 %v6606_v62, %v6538_v58  ;;  %v6732_v29 = vadd.f32 %v6608_v47, %v6540_v54  ;;  %v6877_v41 = vrot.slane %v6729_v6, 4 }
 0x600   : > { %v6876_v19 = vsel %vm1462_vm15, %v6875_v39, %v6874_v37  ;;  %v6881_v26 = vrot.slane %v6731_v59, 2  ;;  %v6611_v48 = vrot.slane %v10821_v11, 3  ;;  %v6612_v61 = vrot.slane %v10821_v11, 4 }
 0x601   : > { %v6878_v28 = vsel %vm1464_vm1, %v6877_v41, %v6876_v19  ;;  %v6879_v4 = vrot.slane %v6730_v63, 3  ;;  %v6883_v45 = vrot.slane %v6732_v29, 1  ;;  %v6613_v9 = vrot.slane %v10821_v11, 5 }
 0x603   : > { %v6880_v32 = vsel %vm1466_vm3, %v6879_v4, %v6878_v28 }
 0x604   : > { %v6882_v5 = vsel %vm1468_vm4, %v6881_v26, %v6880_v32 }
 0x605   : > { %v6884_v51 = vsel %vm1470_vm5, %v6883_v45, %v6882_v5 }
 0x606   : > { %6952 = vst.msk [vmem:[%s10211_s8 + $0x18] sm:$0xff] %vm243_vm0, %v6884_v51 }
 0x612   : > { %v7291_v44 = vpop.f32.mrb[16].mxu0 }
 0x613   : > { %v5686_v18 = vsel %vm243_vm0, %v7291_v44, 0.0  ;;  %v5598_v62 = vpop.f32.mrb[17].mxu0 }
 0x614   : > { %v5685_v13 = vsel %vm243_vm0, %v5598_v62, 0.0  ;;  %v7292_v30 = vpop.f32.mrb[18].mxu0 }
 0x615   : > { %v5687_v7 = vadd.f32 %v5686_v18, %v5685_v13  ;;  %v5689_v25 = vsel %vm243_vm0, %v7292_v30, 0.0  ;;  %v5601_v2 = vpop.f32.mrb[19].mxu0 }
 0x616   : > { %v5688_v42 = vsel %vm243_vm0, %v5601_v2, 0.0 }
 0x617   : > { %v5861_v12 = vcombine.high %v5687_v7, %v5687_v7  ;;  %v5868_v31 = vrot.slane %v5687_v7, %v8485_v40  ;;  %v5690_v1 = vadd.f32 %v5689_v25, %v5688_v42 }
 0x619   : > { %v5875_v17 = vrot.slane %v5861_v12, %v8485_v40  ;;  %v5876_v56 = vcombine.high %v5868_v31, %v5868_v31  ;;  %v6285_v15 = vsel %vm246_vm9, %v5868_v31, 0.0  ;;  %v5878_v49 = vcombine.high %v5690_v1, %v5690_v1 }
 0x61a   : > { %v6286_v38 = vrot.slane %v6285_v15, 4  ;;  %v5885_v10 = vrot.slane %v5690_v1, %v8485_v40 }
 0x61b   : > { %v5877_v36 = vcombine.high %v5875_v17, %v5875_v17  ;;  %v6292_v43 = vsel %vm246_vm9, %v5876_v56, 0.0  ;;  %v6299_v52 = vsel %vm246_vm9, %v5875_v17, 0.0  ;;  %v5892_v33 = vrot.slane %v5878_v49, %v8485_v40 }
 0x61c   : > { %v6287_v27 = vadd.f32 %v6286_v38, %v6285_v15  ;;  %v6293_v3 = vrot.slane %v6292_v43, 4  ;;  %v6300_v53 = vrot.slane %v6299_v52, 4  ;;  %v5893_v55 = vcombine.high %v5885_v10, %v5885_v10 }
 0x61d   : > { %v6306_v46 = vsel %vm246_vm9, %v5877_v36, 0.0  ;;  %v5894_v35 = vcombine.high %v5892_v33, %v5892_v33  ;;  %v6313_v14 = vsel %vm246_vm9, %v5885_v10, 0.0  ;;  %v6327_v50 = vsel %vm246_vm9, %v5892_v33, 0.0 }
 0x61e   : > { %v6288_v21 = vrot.slane %v6287_v27, 2  ;;  %v6294_v23 = vadd.f32 %v6293_v3, %v6292_v43  ;;  %v6301_v60 = vadd.f32 %v6300_v53, %v6299_v52  ;;  %v6307_v0 = vrot.slane %v6306_v46, 4 }
 0x61f   : > { %v6314_v57 = vrot.slane %v6313_v14, 4  ;;  %v6320_v34 = vsel %vm246_vm9, %v5893_v55, 0.0  ;;  %v6328_v16 = vrot.slane %v6327_v50, 4  ;;  %v6334_v22 = vsel %vm246_vm9, %v5894_v35, 0.0 }
 0x620   : > { %v6289_v47 = vadd.f32 %v6288_v21, %v6287_v27  ;;  %v6295_v58 = vrot.slane %v6294_v23, 2  ;;  %v6302_v54 = vrot.slane %v6301_v60, 2  ;;  %v6308_v6 = vadd.f32 %v6307_v0, %v6306_v46 }
 0x621   : > { %v6315_v59 = vadd.f32 %v6314_v57, %v6313_v14  ;;  %v6321_v8 = vrot.slane %v6320_v34, 4  ;;  %v6329_v39 = vadd.f32 %v6328_v16, %v6327_v50  ;;  %v6335_v37 = vrot.slane %v6334_v22, 4 }
 0x622   : > { %v6290_v63 = vrot.slane %v6289_v47, 1  ;;  %v6296_v29 = vadd.f32 %v6295_v58, %v6294_v23  ;;  %v6303_v41 = vadd.f32 %v6302_v54, %v6301_v60  ;;  %v6309_v19 = vrot.slane %v6308_v6, 2 }
 0x623   : > { %v6316_v28 = vrot.slane %v6315_v59, 2  ;;  %v6322_v4 = vadd.f32 %v6321_v8, %v6320_v34  ;;  %v6330_v26 = vrot.slane %v6329_v39, 2  ;;  %v6336_v32 = vadd.f32 %v6335_v37, %v6334_v22 }
 0x624   : > { %v6291_v45 = vadd.f32 %v6290_v63, %v6289_v47  ;;  %v6297_v5 = vrot.slane %v6296_v29, 1  ;;  %v6304_v51 = vrot.slane %v6303_v41, 1  ;;  %v6310_v44 = vadd.f32 %v6309_v19, %v6308_v6 }
 0x625   : > { %v6317_v18 = vadd.f32 %v6316_v28, %v6315_v59  ;;  %v6323_v62 = vrot.slane %v6322_v4, 2  ;;  %v6331_v13 = vadd.f32 %v6330_v26, %v6329_v39  ;;  %v6337_v30 = vrot.slane %v6336_v32, 2 }
 0x626   : > { %v6298_v7 = vadd.f32 %v6297_v5, %v6296_v29  ;;  %v6305_v25 = vadd.f32 %v6304_v51, %v6303_v41  ;;  %v6311_v2 = vrot.slane %v6310_v44, 1  ;;  %v6541_v42 = vmul.f32 0.25, %v6291_v45 }
 0x627   : > { %v6318_v12 = vrot.slane %v6317_v18, 1  ;;  %v6324_v31 = vadd.f32 %v6323_v62, %v6322_v4  ;;  %v6332_v1 = vrot.slane %v6331_v13, 1  ;;  %v6338_v17 = vadd.f32 %v6337_v30, %v6336_v32 }
 0x628   : > { %v6312_v56 = vadd.f32 %v6311_v2, %v6310_v44  ;;  %v6542_v15 = vmul.f32 0.25, %v6298_v7  ;;  %v6543_v49 = vmul.f32 0.25, %v6305_v25  ;;  %v6733_v38 = vadd.f32 %v6541_v42, %v10821_v11  ;;  %v10822_v44 = vld [vmem:[#allocation45_spill] sm:$0xff] }
 0x629   : > { %v6319_v10 = vadd.f32 %v6318_v12, %v6317_v18  ;;  %v6325_v36 = vrot.slane %v6324_v31, 1  ;;  %v6333_v43 = vadd.f32 %v6332_v1, %v6331_v13  ;;  %v6339_v52 = vrot.slane %v6338_v17, 1 }
 0x62a   : > { %v6544_v33 = vmul.f32 0.25, %v6312_v56  ;;  %v6734_v27 = vadd.f32 %v6609_v24, %v6542_v15  ;;  %v6735_v3 = vadd.f32 %v6610_v20, %v6543_v49  ;;  %v6614_v53 = vrot.slane %v10821_v11, 6 }
 0x62b   : > { %v6326_v55 = vadd.f32 %v6325_v36, %v6324_v31  ;;  %v6340_v46 = vadd.f32 %v6339_v52, %v6338_v17  ;;  %v6545_v35 = vmul.f32 0.25, %v6319_v10  ;;  %v6547_v14 = vmul.f32 0.25, %v6333_v43 }
 0x62c   : > { %v6736_v50 = vadd.f32 %v6611_v48, %v6544_v33  ;;  %v6885_v21 = vrot.slane %v6734_v27, 7  ;;  %v6887_v23 = vrot.slane %v6735_v3, 6  ;;  %v6615_v60 = vrot.slane %v10821_v11, 7 }
 0x62d   : > { %v6546_v0 = vmul.f32 0.25, %v6326_v55  ;;  %v6548_v57 = vmul.f32 0.25, %v6340_v46  ;;  %v6737_v24 = vadd.f32 %v6612_v61, %v6545_v35  ;;  %v6739_v20 = vadd.f32 %v6614_v53, %v6547_v14 }
 0x62e   : > { %v6886_v34 = vsel %vm1458_vm13, %v6885_v21, %v6733_v38  ;;  %v6889_v16 = vrot.slane %v6736_v50, 5  ;;  %v6616_v18 = vrot.slane %v10822_v44, 1  ;;  %v6617_v62 = vrot.slane %v10822_v44, 2 }
 0x62f   : > { %v6888_v22 = vsel %vm1460_vm14, %v6887_v23, %v6886_v34  ;;  %v6738_v47 = vadd.f32 %v6613_v9, %v6546_v0  ;;  %v6740_v48 = vadd.f32 %v6615_v60, %v6548_v57  ;;  %v6891_v58 = vrot.slane %v6737_v24, 4 }
 0x630   : > { %v6890_v54 = vsel %vm1462_vm15, %v6889_v16, %v6888_v22  ;;  %v6895_v8 = vrot.slane %v6739_v20, 2  ;;  %v6618_v13 = vrot.slane %v10822_v44, 3  ;;  %v6619_v31 = vrot.slane %v10822_v44, 4 }
 0x631   : > { %v6892_v6 = vsel %vm1464_vm1, %v6891_v58, %v6890_v54  ;;  %v6893_v59 = vrot.slane %v6738_v47, 3  ;;  %v6897_v39 = vrot.slane %v6740_v48, 1  ;;  %v6620_v1 = vrot.slane %v10822_v44, 5 }
 0x633   : > { %v6894_v61 = vsel %vm1466_vm3, %v6893_v59, %v6892_v6 }
 0x634   : > { %v6896_v37 = vsel %vm1468_vm4, %v6895_v8, %v6894_v61 }
 0x635   : > { %v6898_v63 = vsel %vm1470_vm5, %v6897_v39, %v6896_v37 }
 0x636   : > { %6953 = vst.msk [vmem:[%s10211_s8 + $0x20] sm:$0xff] %vm243_vm0, %v6898_v63 }
 0x643   : > { %v7295_v29 = vpop.f32.mrb[20].mxu0 }
 0x644   : > { %v5692_v11 = vsel %vm243_vm0, %v7295_v29, 0.0  ;;  %v5614_v9 = vpop.f32.mrb[21].mxu0 }
 0x645   : > { %v5691_v41 = vsel %vm243_vm0, %v5614_v9, 0.0  ;;  %v7296_v19 = vpop.f32.mrb[22].mxu0 }
 0x646   : > { %v5693_v28 = vadd.f32 %v5692_v11, %v5691_v41  ;;  %v5695_v4 = vsel %vm243_vm0, %v7296_v19, 0.0  ;;  %v5617_v26 = vpop.f32.mrb[23].mxu0 }
 0x647   : > { %v5694_v32 = vsel %vm243_vm0, %v5617_v26, 0.0 }
 0x648   : > { %v5895_v45 = vcombine.high %v5693_v28, %v5693_v28  ;;  %v5902_v5 = vrot.slane %v5693_v28, %v8485_v40  ;;  %v5696_v51 = vadd.f32 %v5695_v4, %v5694_v32 }
 0x64a   : > { %v5909_v30 = vrot.slane %v5895_v45, %v8485_v40  ;;  %v5910_v7 = vcombine.high %v5902_v5, %v5902_v5  ;;  %v6341_v25 = vsel %vm246_vm9, %v5902_v5, 0.0  ;;  %v5912_v2 = vcombine.high %v5696_v51, %v5696_v51 }
 0x64b   : > { %v6342_v42 = vrot.slane %v6341_v25, 4  ;;  %v5919_v12 = vrot.slane %v5696_v51, %v8485_v40 }
 0x64c   : > { %v5911_v17 = vcombine.high %v5909_v30, %v5909_v30  ;;  %v6348_v56 = vsel %vm246_vm9, %v5910_v7, 0.0  ;;  %v6355_v15 = vsel %vm246_vm9, %v5909_v30, 0.0  ;;  %v5926_v49 = vrot.slane %v5912_v2, %v8485_v40 }
 0x64d   : > { %v6343_v38 = vadd.f32 %v6342_v42, %v6341_v25  ;;  %v6349_v10 = vrot.slane %v6348_v56, 4  ;;  %v6356_v36 = vrot.slane %v6355_v15, 4  ;;  %v5927_v43 = vcombine.high %v5919_v12, %v5919_v12 }
 0x64e   : > { %v6362_v52 = vsel %vm246_vm9, %v5911_v17, 0.0  ;;  %v5928_v33 = vcombine.high %v5926_v49, %v5926_v49  ;;  %v6369_v27 = vsel %vm246_vm9, %v5919_v12, 0.0  ;;  %v6383_v3 = vsel %vm246_vm9, %v5926_v49, 0.0 }
 0x64f   : > { %v6344_v53 = vrot.slane %v6343_v38, 2  ;;  %v6350_v55 = vadd.f32 %v6349_v10, %v6348_v56  ;;  %v6357_v46 = vadd.f32 %v6356_v36, %v6355_v15  ;;  %v6363_v35 = vrot.slane %v6362_v52, 4 }
 0x650   : > { %v6370_v14 = vrot.slane %v6369_v27, 4  ;;  %v6376_v50 = vsel %vm246_vm9, %v5927_v43, 0.0  ;;  %v6384_v21 = vrot.slane %v6383_v3, 4  ;;  %v6390_v23 = vsel %vm246_vm9, %v5928_v33, 0.0 }
 0x651   : > { %v6345_v60 = vadd.f32 %v6344_v53, %v6343_v38  ;;  %v6351_v0 = vrot.slane %v6350_v55, 2  ;;  %v6358_v57 = vrot.slane %v6357_v46, 2  ;;  %v6364_v24 = vadd.f32 %v6363_v35, %v6362_v52 }
 0x652   : > { %v6371_v20 = vadd.f32 %v6370_v14, %v6369_v27  ;;  %v6377_v34 = vrot.slane %v6376_v50, 4  ;;  %v6385_v16 = vadd.f32 %v6384_v21, %v6383_v3  ;;  %v6391_v22 = vrot.slane %v6390_v23, 4 }
 0x653   : > { %v6346_v47 = vrot.slane %v6345_v60, 1  ;;  %v6352_v48 = vadd.f32 %v6351_v0, %v6350_v55  ;;  %v6359_v58 = vadd.f32 %v6358_v57, %v6357_v46  ;;  %v6365_v54 = vrot.slane %v6364_v24, 2 }
 0x654   : > { %v6372_v6 = vrot.slane %v6371_v20, 2  ;;  %v6378_v59 = vadd.f32 %v6377_v34, %v6376_v50  ;;  %v6386_v8 = vrot.slane %v6385_v16, 2  ;;  %v6392_v61 = vadd.f32 %v6391_v22, %v6390_v23 }
 0x655   : > { %v6347_v39 = vadd.f32 %v6346_v47, %v6345_v60  ;;  %v6353_v37 = vrot.slane %v6352_v48, 1  ;;  %v6360_v63 = vrot.slane %v6359_v58, 1  ;;  %v6366_v29 = vadd.f32 %v6365_v54, %v6364_v24 }
 0x656   : > { %v6373_v11 = vadd.f32 %v6372_v6, %v6371_v20  ;;  %v6379_v9 = vrot.slane %v6378_v59, 2  ;;  %v6387_v41 = vadd.f32 %v6386_v8, %v6385_v16  ;;  %v6393_v19 = vrot.slane %v6392_v61, 2 }
 0x657   : > { %v6354_v28 = vadd.f32 %v6353_v37, %v6352_v48  ;;  %v6361_v4 = vadd.f32 %v6360_v63, %v6359_v58  ;;  %v6367_v26 = vrot.slane %v6366_v29, 1  ;;  %v6549_v32 = vmul.f32 0.25, %v6347_v39 }
 0x658   : > { %v6374_v45 = vrot.slane %v6373_v11, 1  ;;  %v6380_v5 = vadd.f32 %v6379_v9, %v6378_v59  ;;  %v6388_v51 = vrot.slane %v6387_v41, 1  ;;  %v6394_v30 = vadd.f32 %v6393_v19, %v6392_v61 }
 0x659   : > { %v6368_v7 = vadd.f32 %v6367_v26, %v6366_v29  ;;  %v6550_v25 = vmul.f32 0.25, %v6354_v28  ;;  %v6551_v2 = vmul.f32 0.25, %v6361_v4  ;;  %v6741_v42 = vadd.f32 %v6549_v32, %v10822_v44  ;;  %v10823_v29 = vld [vmem:[#allocation40_spill] sm:$0xff] }
 0x65a   : > { %v6375_v12 = vadd.f32 %v6374_v45, %v6373_v11  ;;  %v6381_v17 = vrot.slane %v6380_v5, 1  ;;  %v6389_v56 = vadd.f32 %v6388_v51, %v6387_v41  ;;  %v6395_v15 = vrot.slane %v6394_v30, 1 }
 0x65b   : > { %v6552_v49 = vmul.f32 0.25, %v6368_v7  ;;  %v6742_v38 = vadd.f32 %v6616_v18, %v6550_v25  ;;  %v6743_v10 = vadd.f32 %v6617_v62, %v6551_v2  ;;  %v6621_v36 = vrot.slane %v10822_v44, 6 }
 0x65c   : > { %v6382_v43 = vadd.f32 %v6381_v17, %v6380_v5  ;;  %v6396_v52 = vadd.f32 %v6395_v15, %v6394_v30  ;;  %v6553_v33 = vmul.f32 0.25, %v6375_v12  ;;  %v6555_v27 = vmul.f32 0.25, %v6389_v56 }
 0x65d   : > { %v6744_v3 = vadd.f32 %v6618_v13, %v6552_v49  ;;  %v6899_v53 = vrot.slane %v6742_v38, 7  ;;  %v6901_v55 = vrot.slane %v6743_v10, 6  ;;  %v6622_v46 = vrot.slane %v10822_v44, 7 }
 0x65e   : > { %v6554_v35 = vmul.f32 0.25, %v6382_v43  ;;  %v6556_v14 = vmul.f32 0.25, %v6396_v52  ;;  %v6745_v18 = vadd.f32 %v6619_v31, %v6553_v33  ;;  %v6747_v62 = vadd.f32 %v6621_v36, %v6555_v27 }
 0x65f   : > { %v6900_v50 = vsel %vm1458_vm13, %v6899_v53, %v6741_v42  ;;  %v6903_v21 = vrot.slane %v6744_v3, 5  ;;  %v6623_v11 = vrot.slane %v10823_v29, 1  ;;  %v6624_v9 = vrot.slane %v10823_v29, 2 }
 0x660   : > { %v6902_v23 = vsel %vm1460_vm14, %v6901_v55, %v6900_v50  ;;  %v6746_v60 = vadd.f32 %v6620_v1, %v6554_v35  ;;  %v6748_v13 = vadd.f32 %v6622_v46, %v6556_v14  ;;  %v6905_v0 = vrot.slane %v6745_v18, 4 }
 0x661   : > { %v6904_v57 = vsel %vm1462_vm15, %v6903_v21, %v6902_v23  ;;  %v6909_v34 = vrot.slane %v6747_v62, 2  ;;  %v6625_v41 = vrot.slane %v10823_v29, 3  ;;  %v6626_v5 = vrot.slane %v10823_v29, 4 }
 0x662   : > { %v6906_v24 = vsel %vm1464_vm1, %v6905_v0, %v6904_v57  ;;  %v6907_v20 = vrot.slane %v6746_v60, 3  ;;  %v6911_v16 = vrot.slane %v6748_v13, 1  ;;  %v6627_v51 = vrot.slane %v10823_v29, 5 }
 0x664   : > { %v6908_v31 = vsel %vm1466_vm3, %v6907_v20, %v6906_v24 }
 0x665   : > { %v6910_v22 = vsel %vm1468_vm4, %v6909_v34, %v6908_v31 }
 0x666   : > { %v6912_v47 = vsel %vm1470_vm5, %v6911_v16, %v6910_v22 }
 0x667   : > { %6954 = vst.msk [vmem:[%s10211_s8 + $0x28] sm:$0xff] %vm243_vm0, %v6912_v47 }
 0x673   : > { %v7299_v48 = vpop.f32.mrb[24].mxu0 }
 0x674   : > { %v5698_v44 = vsel %vm243_vm0, %v7299_v48, 0.0  ;;  %v5630_v1 = vpop.f32.mrb[25].mxu0 }
 0x675   : > { %v5697_v58 = vsel %vm243_vm0, %v5630_v1, 0.0  ;;  %v7300_v54 = vpop.f32.mrb[26].mxu0 }
 0x676   : > { %v5699_v6 = vadd.f32 %v5698_v44, %v5697_v58  ;;  %v5701_v59 = vsel %vm243_vm0, %v7300_v54, 0.0  ;;  %v5633_v8 = vpop.f32.mrb[27].mxu0 }
 0x677   : > { %v5700_v61 = vsel %vm243_vm0, %v5633_v8, 0.0 }
 0x678   : > { %v5929_v39 = vcombine.high %v5699_v6, %v5699_v6  ;;  %v5936_v37 = vrot.slane %v5699_v6, %v8485_v40  ;;  %v5702_v63 = vadd.f32 %v5701_v59, %v5700_v61 }
 0x67a   : > { %v5943_v19 = vrot.slane %v5929_v39, %v8485_v40  ;;  %v5944_v28 = vcombine.high %v5936_v37, %v5936_v37  ;;  %v6397_v4 = vsel %vm246_vm9, %v5936_v37, 0.0  ;;  %v5946_v26 = vcombine.high %v5702_v63, %v5702_v63 }
 0x67b   : > { %v6398_v32 = vrot.slane %v6397_v4, 4  ;;  %v5953_v45 = vrot.slane %v5702_v63, %v8485_v40 }
 0x67c   : > { %v5945_v30 = vcombine.high %v5943_v19, %v5943_v19  ;;  %v6404_v7 = vsel %vm246_vm9, %v5944_v28, 0.0  ;;  %v6411_v25 = vsel %vm246_vm9, %v5943_v19, 0.0  ;;  %v5960_v2 = vrot.slane %v5946_v26, %v8485_v40 }
 0x67d   : > { %v6399_v42 = vadd.f32 %v6398_v32, %v6397_v4  ;;  %v6405_v12 = vrot.slane %v6404_v7, 4  ;;  %v6412_v17 = vrot.slane %v6411_v25, 4  ;;  %v5961_v56 = vcombine.high %v5953_v45, %v5953_v45 }
 0x67e   : > { %v6418_v15 = vsel %vm246_vm9, %v5945_v30, 0.0  ;;  %v5962_v49 = vcombine.high %v5960_v2, %v5960_v2  ;;  %v6425_v38 = vsel %vm246_vm9, %v5953_v45, 0.0  ;;  %v6439_v10 = vsel %vm246_vm9, %v5960_v2, 0.0 }
 0x67f   : > { %v6400_v36 = vrot.slane %v6399_v42, 2  ;;  %v6406_v43 = vadd.f32 %v6405_v12, %v6404_v7  ;;  %v6413_v52 = vadd.f32 %v6412_v17, %v6411_v25  ;;  %v6419_v33 = vrot.slane %v6418_v15, 4 }
 0x680   : > { %v6426_v27 = vrot.slane %v6425_v38, 4  ;;  %v6432_v3 = vsel %vm246_vm9, %v5961_v56, 0.0  ;;  %v6440_v53 = vrot.slane %v6439_v10, 4  ;;  %v6446_v55 = vsel %vm246_vm9, %v5962_v49, 0.0 }
 0x681   : > { %v6401_v46 = vadd.f32 %v6400_v36, %v6399_v42  ;;  %v6407_v35 = vrot.slane %v6406_v43, 2  ;;  %v6414_v14 = vrot.slane %v6413_v52, 2  ;;  %v6420_v18 = vadd.f32 %v6419_v33, %v6418_v15 }
 0x682   : > { %v6427_v62 = vadd.f32 %v6426_v27, %v6425_v38  ;;  %v6433_v50 = vrot.slane %v6432_v3, 4  ;;  %v6441_v21 = vadd.f32 %v6440_v53, %v6439_v10  ;;  %v6447_v23 = vrot.slane %v6446_v55, 4 }
 0x683   : > { %v6402_v60 = vrot.slane %v6401_v46, 1  ;;  %v6408_v13 = vadd.f32 %v6407_v35, %v6406_v43  ;;  %v6415_v0 = vadd.f32 %v6414_v14, %v6413_v52  ;;  %v6421_v57 = vrot.slane %v6420_v18, 2 }
 0x684   : > { %v6428_v24 = vrot.slane %v6427_v62, 2  ;;  %v6434_v20 = vadd.f32 %v6433_v50, %v6432_v3  ;;  %v6442_v34 = vrot.slane %v6441_v21, 2  ;;  %v6448_v31 = vadd.f32 %v6447_v23, %v6446_v55 }
 0x685   : > { %v6403_v16 = vadd.f32 %v6402_v60, %v6401_v46  ;;  %v6409_v22 = vrot.slane %v6408_v13, 1  ;;  %v6416_v47 = vrot.slane %v6415_v0, 1  ;;  %v6422_v48 = vadd.f32 %v6421_v57, %v6420_v18 }
 0x686   : > { %v6429_v44 = vadd.f32 %v6428_v24, %v6427_v62  ;;  %v6435_v1 = vrot.slane %v6434_v20, 2  ;;  %v6443_v58 = vadd.f32 %v6442_v34, %v6441_v21  ;;  %v6449_v54 = vrot.slane %v6448_v31, 2 }
 0x687   : > { %v6410_v6 = vadd.f32 %v6409_v22, %v6408_v13  ;;  %v6417_v59 = vadd.f32 %v6416_v47, %v6415_v0  ;;  %v6423_v8 = vrot.slane %v6422_v48, 1  ;;  %v6557_v61 = vmul.f32 0.25, %v6403_v16 }
 0x688   : > { %v6430_v39 = vrot.slane %v6429_v44, 1  ;;  %v6436_v37 = vadd.f32 %v6435_v1, %v6434_v20  ;;  %v6444_v63 = vrot.slane %v6443_v58, 1  ;;  %v6450_v19 = vadd.f32 %v6449_v54, %v6448_v31 }
 0x689   : > { %v6424_v28 = vadd.f32 %v6423_v8, %v6422_v48  ;;  %v6558_v4 = vmul.f32 0.25, %v6410_v6  ;;  %v6559_v26 = vmul.f32 0.25, %v6417_v59  ;;  %v6749_v32 = vadd.f32 %v10823_v29, %v6557_v61  ;;  %v10824_v48 = vld [vmem:[#allocation44_spill] sm:$0xff] }
 0x68a   : > { %v6431_v45 = vadd.f32 %v6430_v39, %v6429_v44  ;;  %v6437_v30 = vrot.slane %v6436_v37, 1  ;;  %v6445_v7 = vadd.f32 %v6444_v63, %v6443_v58  ;;  %v6451_v25 = vrot.slane %v6450_v19, 1 }
 0x68b   : > { %v6560_v2 = vmul.f32 0.25, %v6424_v28  ;;  %v6750_v42 = vadd.f32 %v6623_v11, %v6558_v4  ;;  %v6751_v12 = vadd.f32 %v6624_v9, %v6559_v26  ;;  %v6628_v17 = vrot.slane %v10823_v29, 6 }
 0x68c   : > { %v6438_v56 = vadd.f32 %v6437_v30, %v6436_v37  ;;  %v6452_v15 = vadd.f32 %v6451_v25, %v6450_v19  ;;  %v6561_v49 = vmul.f32 0.25, %v6431_v45  ;;  %v6563_v38 = vmul.f32 0.25, %v6445_v7 }
 0x68d   : > { %v6752_v10 = vadd.f32 %v6625_v41, %v6560_v2  ;;  %v6913_v36 = vrot.slane %v6750_v42, 7  ;;  %v6915_v43 = vrot.slane %v6751_v12, 6  ;;  %v6629_v52 = vrot.slane %v10823_v29, 7 }
 0x68e   : > { %v6562_v33 = vmul.f32 0.25, %v6438_v56  ;;  %v6564_v27 = vmul.f32 0.25, %v6452_v15  ;;  %v6753_v11 = vadd.f32 %v6626_v5, %v6561_v49  ;;  %v6755_v9 = vadd.f32 %v6628_v17, %v6563_v38 }
 0x68f   : > { %v6914_v3 = vsel %vm1458_vm13, %v6913_v36, %v6749_v32  ;;  %v6917_v53 = vrot.slane %v6752_v10, 5  ;;  %v6630_v44 = vrot.slane %v10824_v48, 1  ;;  %v6631_v1 = vrot.slane %v10824_v48, 2 }
 0x690   : > { %v6916_v55 = vsel %vm1460_vm14, %v6915_v43, %v6914_v3  ;;  %v6754_v46 = vadd.f32 %v6627_v51, %v6562_v33  ;;  %v6756_v41 = vadd.f32 %v6629_v52, %v6564_v27  ;;  %v6919_v35 = vrot.slane %v6753_v11, 4 }
 0x691   : > { %v6918_v14 = vsel %vm1462_vm15, %v6917_v53, %v6916_v55  ;;  %v6923_v50 = vrot.slane %v6755_v9, 2  ;;  %v6632_v58 = vrot.slane %v10824_v48, 3  ;;  %v6633_v37 = vrot.slane %v10824_v48, 4 }
 0x692   : > { %v6920_v18 = vsel %vm1464_vm1, %v6919_v35, %v6918_v14  ;;  %v6921_v62 = vrot.slane %v6754_v46, 3  ;;  %v6925_v21 = vrot.slane %v6756_v41, 1  ;;  %v6634_v63 = vrot.slane %v10824_v48, 5 }
 0x694   : > { %v6922_v5 = vsel %vm1466_vm3, %v6921_v62, %v6920_v18 }
 0x695   : > { %v6924_v23 = vsel %vm1468_vm4, %v6923_v50, %v6922_v5 }
 0x696   : > { %v6926_v60 = vsel %vm1470_vm5, %v6925_v21, %v6924_v23 }
 0x697   : > { %6955 = vst.msk [vmem:[%s10211_s8 + $0x30] sm:$0xff] %vm243_vm0, %v6926_v60 }
 0x6a3   : > { %v7303_v13 = vpop.f32.mrb[28].mxu0 }
 0x6a4   : > { %v5704_v29 = vsel %vm243_vm0, %v7303_v13, 0.0  ;;  %v5646_v51 = vpop.f32.mrb[29].mxu0 }
 0x6a5   : > { %v5703_v0 = vsel %vm243_vm0, %v5646_v51, 0.0  ;;  %v7304_v57 = vpop.f32.mrb[30].mxu0 }
 0x6a6   : > { %v5705_v24 = vadd.f32 %v5704_v29, %v5703_v0  ;;  %v5707_v20 = vsel %vm243_vm0, %v7304_v57, 0.0  ;;  %v5649_v34 = vpop.f32.mrb[31].mxu0 }
 0x6a7   : > { %v5706_v31 = vsel %vm243_vm0, %v5649_v34, 0.0 }
 0x6a8   : > { %v5963_v16 = vcombine.high %v5705_v24, %v5705_v24  ;;  %v5970_v22 = vrot.slane %v5705_v24, %v8485_v40  ;;  %v5708_v47 = vadd.f32 %v5707_v20, %v5706_v31 }
 0x6aa   : > { %v5977_v54 = vrot.slane %v5963_v16, %v8485_v40  ;;  %v5978_v6 = vcombine.high %v5970_v22, %v5970_v22  ;;  %v6453_v59 = vsel %vm246_vm9, %v5970_v22, 0.0  ;;  %v5980_v8 = vcombine.high %v5708_v47, %v5708_v47 }
 0x6ab   : > { %v6454_v61 = vrot.slane %v6453_v59, 4  ;;  %v5987_v39 = vrot.slane %v5708_v47, %v8485_v40 }
 0x6ac   : > { %v5979_v19 = vcombine.high %v5977_v54, %v5977_v54  ;;  %v6460_v28 = vsel %vm246_vm9, %v5978_v6, 0.0  ;;  %v6467_v4 = vsel %vm246_vm9, %v5977_v54, 0.0  ;;  %v5994_v26 = vrot.slane %v5980_v8, %v8485_v40 }
 0x6ad   : > { %v6455_v32 = vadd.f32 %v6454_v61, %v6453_v59  ;;  %v6461_v45 = vrot.slane %v6460_v28, 4  ;;  %v6468_v30 = vrot.slane %v6467_v4, 4  ;;  %v5995_v7 = vcombine.high %v5987_v39, %v5987_v39 }
 0x6ae   : > { %v6474_v25 = vsel %vm246_vm9, %v5979_v19, 0.0  ;;  %v5996_v2 = vcombine.high %v5994_v26, %v5994_v26  ;;  %v6481_v42 = vsel %vm246_vm9, %v5987_v39, 0.0  ;;  %v6495_v12 = vsel %vm246_vm9, %v5994_v26, 0.0 }
 0x6af   : > { %v6456_v17 = vrot.slane %v6455_v32, 2  ;;  %v6462_v56 = vadd.f32 %v6461_v45, %v6460_v28  ;;  %v6469_v15 = vadd.f32 %v6468_v30, %v6467_v4  ;;  %v6475_v49 = vrot.slane %v6474_v25, 4 }
 0x6b0   : > { %v6482_v38 = vrot.slane %v6481_v42, 4  ;;  %v6488_v10 = vsel %vm246_vm9, %v5995_v7, 0.0  ;;  %v6496_v36 = vrot.slane %v6495_v12, 4  ;;  %v6502_v40 = vsel %vm246_vm9, %v5996_v2, 0.0 }
 0x6b1   : > { %v6457_v43 = vadd.f32 %v6456_v17, %v6455_v32  ;;  %v6463_v52 = vrot.slane %v6462_v56, 2  ;;  %v6470_v33 = vrot.slane %v6469_v15, 2  ;;  %v6476_v27 = vadd.f32 %v6475_v49, %v6474_v25 }
 0x6b2   : > { %v6483_v11 = vadd.f32 %v6482_v38, %v6481_v42  ;;  %v6489_v9 = vrot.slane %v6488_v10, 4  ;;  %v6497_v3 = vadd.f32 %v6496_v36, %v6495_v12  ;;  %v6503_v53 = vrot.slane %v6502_v40, 4 }
 0x6b3   : > { %v6458_v55 = vrot.slane %v6457_v43, 1  ;;  %v6464_v46 = vadd.f32 %v6463_v52, %v6462_v56  ;;  %v6471_v41 = vadd.f32 %v6470_v33, %v6469_v15  ;;  %v6477_v35 = vrot.slane %v6476_v27, 2 }
 0x6b4   : > { %v6484_v14 = vrot.slane %v6483_v11, 2  ;;  %v6490_v18 = vadd.f32 %v6489_v9, %v6488_v10  ;;  %v6498_v62 = vrot.slane %v6497_v3, 2  ;;  %v6504_v50 = vadd.f32 %v6503_v53, %v6502_v40 }
 0x6b5   : > { %v6459_v5 = vadd.f32 %v6458_v55, %v6457_v43  ;;  %v6465_v21 = vrot.slane %v6464_v46, 1  ;;  %v6472_v23 = vrot.slane %v6471_v41, 1  ;;  %v6478_v60 = vadd.f32 %v6477_v35, %v6476_v27 }
 0x6b6   : > { %v6485_v13 = vadd.f32 %v6484_v14, %v6483_v11  ;;  %v6491_v29 = vrot.slane %v6490_v18, 2  ;;  %v6499_v51 = vadd.f32 %v6498_v62, %v6497_v3  ;;  %v6505_v0 = vrot.slane %v6504_v50, 2 }
 0x6b7   : > { %v6466_v57 = vadd.f32 %v6465_v21, %v6464_v46  ;;  %v6473_v24 = vadd.f32 %v6472_v23, %v6471_v41  ;;  %v6479_v20 = vrot.slane %v6478_v60, 1  ;;  %v6565_v34 = vmul.f32 0.25, %v6459_v5 }
 0x6b8   : > { %v6486_v31 = vrot.slane %v6485_v13, 1  ;;  %v6492_v16 = vadd.f32 %v6491_v29, %v6490_v18  ;;  %v6500_v22 = vrot.slane %v6499_v51, 1  ;;  %v6506_v47 = vadd.f32 %v6505_v0, %v6504_v50 }
 0x6b9   : > { %v6480_v54 = vadd.f32 %v6479_v20, %v6478_v60  ;;  %v6566_v6 = vmul.f32 0.25, %v6466_v57  ;;  %v6567_v59 = vmul.f32 0.25, %v6473_v24  ;;  %v6757_v8 = vadd.f32 %v10824_v48, %v6565_v34 }
 0x6ba   : > { %v6487_v61 = vadd.f32 %v6486_v31, %v6485_v13  ;;  %v6493_v39 = vrot.slane %v6492_v16, 1  ;;  %v6501_v19 = vadd.f32 %v6500_v22, %v6499_v51  ;;  %v6507_v28 = vrot.slane %v6506_v47, 1 }
 0x6bb   : > { %v6568_v4 = vmul.f32 0.25, %v6480_v54  ;;  %v6758_v26 = vadd.f32 %v6630_v44, %v6566_v6  ;;  %v6759_v32 = vadd.f32 %v6631_v1, %v6567_v59  ;;  %v6635_v45 = vrot.slane %v10824_v48, 6 }
 0x6bc   : > { %v6494_v30 = vadd.f32 %v6493_v39, %v6492_v16  ;;  %v6508_v7 = vadd.f32 %v6507_v28, %v6506_v47  ;;  %v6569_v25 = vmul.f32 0.25, %v6487_v61  ;;  %v6571_v2 = vmul.f32 0.25, %v6501_v19 }
 0x6bd   : > { %v6760_v42 = vadd.f32 %v6632_v58, %v6568_v4  ;;  %v6927_v12 = vrot.slane %v6758_v26, 7  ;;  %v6929_v17 = vrot.slane %v6759_v32, 6  ;;  %v6636_v56 = vrot.slane %v10824_v48, 7 }
 0x6be   : > { %v6570_v15 = vmul.f32 0.25, %v6494_v30  ;;  %v6572_v44 = vmul.f32 0.25, %v6508_v7  ;;  %v6761_v1 = vadd.f32 %v6633_v37, %v6569_v25  ;;  %v6763_v49 = vadd.f32 %v6635_v45, %v6571_v2 }
 0x6bf   : > { %v6928_v38 = vsel %vm1458_vm13, %v6927_v12, %v6757_v8  ;;  %v6931_v10 = vrot.slane %v6760_v42, 5 }
 0x6c0   : > { %v6930_v36 = vsel %vm1460_vm14, %v6929_v17, %v6928_v38  ;;  %v6762_v58 = vadd.f32 %v6634_v63, %v6570_v15  ;;  %v6764_v40 = vadd.f32 %v6636_v56, %v6572_v44  ;;  %v6933_v43 = vrot.slane %v6761_v1, 4 }
 0x6c1   : > { %v6932_v52 = vsel %vm1462_vm15, %v6931_v10, %v6930_v36  ;;  %v6937_v27 = vrot.slane %v6763_v49, 2 }
 0x6c2   : > { %v6934_v33 = vsel %vm1464_vm1, %v6933_v43, %v6932_v52  ;;  %v6935_v37 = vrot.slane %v6762_v58, 3  ;;  %v6939_v9 = vrot.slane %v6764_v40, 1 }
 0x6c4   : > { %v6936_v11 = vsel %vm1466_vm3, %v6935_v37, %v6934_v33 }
 0x6c5   : > { %v6938_v48 = vsel %vm1468_vm4, %v6937_v27, %v6936_v11 }
 0x6c6   : > { %v6940_v63 = vsel %vm1470_vm5, %v6939_v9, %v6938_v48 }
 0x6c7   : > { %6956 = vst.msk [vmem:[%s10211_s8 + $0x38] sm:$0xff] %vm243_vm0, %v6940_v63 }
 0x6c8   : > { %7384 = shalt.err (!%p7381_p3)
}
 0x6c9   : > { %s7385_s29 = scalar_lea.hbm %s10565_s14, 1024  ;;  %s7389_s6 = scalar_lea.hbm %s10621_s4, 2048 }
 0x6ca   : > { %p7386_p4 = scmp.ne.s32.totalorder %s10565_s14, %s7385_s29  ;;  %p7390_p9 = scmp.lt.u32.totalorder %s10565_s14, %s10621_s4 }
 0x6cb   : > { %p7391_p10 = scmp.lt.u32.totalorder %s7389_s6, %s7385_s29  ;;  %p7393_p12 = scmp.lt.u32.totalorder %s7385_s29, %s10565_s14 }
 0x6cc   : > { %p7387_p7 = pnand %p7386_p4, %p7514_p5 }
 0x6cd   : > { %p7392_p11 = por %p7391_p10, %p7390_p9 }
 0x6ce   : > { %p7388_p8 = pneg %p7387_p7 }
 0x6cf   : > { %p7394_p13 = por %p7393_p12, %p7392_p11 }
 0x6d1   : > { %p7395_p0 = pnand %p7394_p13, %p7388_p8 }
 0x6d3   : > { %7398 = shalt.err (!%p7395_p0)
}
 0x6d4   : > { %s7450_s8 = smov 128  }
 0x6d5   : > { %7308 = dma.vmem_to_hbm [thread:$0]  (%p7514_p5), %s10568_s10, 1024, %s10565_s14, %s10575_s19, %s7450_s8, %s7450_s8, %s7437_s7  }
 0x6d6 PF: > { %p7314_p1 = scmp.ge.s32.totalorder %s7433_s18, 2  ;;  %s6986_s9 = sand.u32 1, %s7421_s15  }
 0x6d7   : > { %s6987_s12 = scalar_lea.sflag [#allocation7], %s6986_s9 }
 0x6d8   : > { %p7311_p2 = pnand %p7314_p1, %p7518_p6 }
 0x6da   : > { %7416 = dma.done.wait (!%p7311_p2), %s6987_s12, 1024  }
 0x6db   : > { %7418 = vsyncadd (!%p7311_p2), %s6987_s12, 4294966272  ;;  %p14_p3 = scmp.ge.s32.totalorder %s7501_s21, 4   ;;  %s10825_s15 = smov %s7425_s16 }
 0x6dc   : > { %s10826_s16 = smov %s7429_s17  ;;  %s10827_s17 = smov %s7512_s24 }
 0x6dd   : > { %s10828_s18 = smov %s7501_s21  ;;  %16 = sbr.rel (!%p14_p3) target bundleno = 3 (0x3), region = 77 }
 0x6e4   :  { %6992 = vsyncpa [#allocation7], 1 }
 0x6e5   :  { %6994 = vsyncpa [#allocation7 + $0x1], 1 }

</bundles_post_ra>
